<compile_context>
chip_gen: v7x
topology: tpu7x:2x2x1
jax: 0.10.0
libtpu: 0.0.40
codegen_flags: <defaults>
</compile_context>

<pallas_src>
import functools
import math

import jax
import jax.numpy as jnp
from jax.experimental import pallas as pl
from jax.experimental.pallas import tpu as pltpu

VOCAB = 512
D_MODEL = 128
N_HEADS = 4
HEAD_DIM = D_MODEL // N_HEADS
D_FF = 256
N_ENC = 2
N_DEC = 2
PAD_ID = 0
DECODER_START_ID = 0
IGNORE_INDEX = -100
NEG_INF = -1e9
ATTN_SCALE = 1.0 / math.sqrt(HEAD_DIM)
SEQ_MULT = 16                      # bf16 minimum sublane tile


# ----------------------------------------------------------------------------
# In-kernel helpers (operate on loaded f32/bf16 values)
# ----------------------------------------------------------------------------

def _ln(x, g, b):
    """LayerNorm in f32.  x: (T, D) f32, g/b: (1, D) f32."""
    mean = jnp.mean(x, axis=-1, keepdims=True)
    xc = x - mean
    var = jnp.mean(xc * xc, axis=-1, keepdims=True)
    return xc * jax.lax.rsqrt(var + 1e-5) * g + b


def _project(x, w, b):
    """x: (T, Din) f32.  bf16 matmul against bf16 weights, f32 accumulate + bias."""
    return jnp.dot(x.astype(jnp.bfloat16), w,
                   preferred_element_type=jnp.float32) + b


def _mha(q, k, v, bias, out_sc):
    """Multi-head softmax attention entirely in-VMEM.

    q: (Tq, D) f32, k/v: (Tk, D) f32, bias broadcastable to (Tq, Tk) f32.
    Each head's output is stored directly into the (Tq, D) f32 VMEM scratch at its
    lane offset (no jnp.concatenate relayout chain)."""
    for h in range(N_HEADS):
        sl = slice(h * HEAD_DIM, (h + 1) * HEAD_DIM)
        qh = q[:, sl] * ATTN_SCALE
        kh = k[:, sl]
        vh = v[:, sl]
        s = jax.lax.dot_general(qh, kh, (((1,), (1,)), ((), ())),
                                preferred_element_type=jnp.float32) + bias
        m = jnp.max(s, axis=-1, keepdims=True)
        p = jnp.exp(s - m)
        l = jnp.sum(p, axis=-1, keepdims=True)
        o = jnp.dot(p, vh, preferred_element_type=jnp.float32)
        # approx reciprocal goes to the EUP slot (nearly free); ~1e-3 rel. error vs
        # PyTorch's exact divide -- switch approx=False if validating bit-parity.
        out_sc[:, sl] = o * pl.reciprocal(l, approx=True)
    return out_sc[...]


def _ffn(x, fc1_w, fc1_b, fc2_w, fc2_b):
    h = _project(x, fc1_w, fc1_b)
    # TODO(synk): PyTorch/HF Pegasus uses exact (erf) GELU; tanh-approx keeps the
    # lowering simple and differs only by a tiny numerical epsilon.
    h = jax.nn.gelu(h, approximate=True)
    return _project(h, fc2_w, fc2_b)


# ----------------------------------------------------------------------------
# Fused whole-stack kernels
# ----------------------------------------------------------------------------

def _encoder_stack_kernel(h_ref, kb_ref,
                          ln1_g, ln1_b, qkv_w, qkv_b, o_w, o_b,
                          ln2_g, ln2_b, fc1_w, fc1_b, fc2_w, fc2_b,
                          lnf_g, lnf_b,
                          out_ref, attn_sc):
    h = h_ref[0].astype(jnp.float32)            # (Ts, D)
    kb = kb_ref[0]                              # (1, Ts) additive key-mask bias

    for i in range(N_ENC):                      # static unroll; weights VMEM-resident
        # pre-LN self-attention (fused (D,3D) QKV slab)
        x = _ln(h, ln1_g[i], ln1_b[i])
        qkv = _project(x, qkv_w[i], qkv_b[i])   # (Ts, 3D)
        q = qkv[:, :D_MODEL]
        k = qkv[:, D_MODEL:2 * D_MODEL]
        v = qkv[:, 2 * D_MODEL:]
        h = h + _project(_mha(q, k, v, kb, attn_sc), o_w[i], o_b[i])

        # pre-LN feed-forward
        x = _ln(h, ln2_g[i], ln2_b[i])
        h = h + _ffn(x, fc1_w[i], fc1_b[i], fc2_w[i], fc2_b[i])

    h = _ln(h, lnf_g[...], lnf_b[...])          # final encoder LayerNorm, fused
    out_ref[0] = h.astype(out_ref.dtype)


def _decoder_stack_loss_kernel(h_ref, enc_ref, kb_ref, labels_ref,
                               ln1_g, ln1_b, sa_qkv_w, sa_qkv_b, sa_o_w, sa_o_b,
                               ln2_g, ln2_b, ca_q_w, ca_q_b, ca_kv_w, ca_kv_b,
                               ca_o_w, ca_o_b,
                               ln3_g, ln3_b, fc1_w, fc1_b, fc2_w, fc2_b,
                               lnf_g, lnf_b, emb_t, flb,
                               loss_ref, valid_ref, attn_sc):
    h = h_ref[0].astype(jnp.float32)            # (Td, D)
    enc = enc_ref[0]                            # (Ts, D) bf16, loaded once per batch row
    kb = kb_ref[0]                              # (1, Ts) cross key-mask bias
    td = h.shape[0]

    # causal mask built in-kernel (also keeps padded tail rows out of real rows)
    row = jax.lax.broadcasted_iota(jnp.int32, (td, td), 0)
    col = jax.lax.broadcasted_iota(jnp.int32, (td, td), 1)
    causal = jnp.where(col <= row, 0.0, NEG_INF)

    for i in range(N_DEC):                      # static unroll; weights VMEM-resident
        # causal self-attention
        x = _ln(h, ln1_g[i], ln1_b[i])
        qkv = _project(x, sa_qkv_w[i], sa_qkv_b[i])   # (Td, 3D)
        q = qkv[:, :D_MODEL]
        k = qkv[:, D_MODEL:2 * D_MODEL]
        v = qkv[:, 2 * D_MODEL:]
        h = h + _project(_mha(q, k, v, causal, attn_sc), sa_o_w[i], sa_o_b[i])

        # cross-attention (K/V projected in-kernel from a fused (D,2D) slab)
        x = _ln(h, ln2_g[i], ln2_b[i])
        q = _project(x, ca_q_w[i], ca_q_b[i])
        kv = jnp.dot(enc, ca_kv_w[i], preferred_element_type=jnp.float32) + ca_kv_b[i]
        k = kv[:, :D_MODEL]
        v = kv[:, D_MODEL:]
        h = h + _project(_mha(q, k, v, kb, attn_sc), ca_o_w[i], ca_o_b[i])

        # feed-forward
        x = _ln(h, ln3_g[i], ln3_b[i])
        h = h + _ffn(x, fc1_w[i], fc1_b[i], fc2_w[i], fc2_b[i])

    # final decoder LN + tied LM head (pre-transposed (D,V) -> no in-kernel transpose)
    # + final_logits_bias + masked softmax cross-entropy, all fused.
    x = _ln(h, lnf_g[...], lnf_b[...])                          # (Td, D)
    logits = jnp.dot(x.astype(jnp.bfloat16), emb_t[...],
                     preferred_element_type=jnp.float32) + flb[...]   # (Td, V)
    labels = labels_ref[0]                                      # (Td, 1) int32

    # TODO(synk): at a real Pegasus vocab (~96k) grid over the vocab axis ("arbitrary")
    # with an online max/LSE accumulator so the logits/emb slabs fit v7x's 64 MiB VMEM;
    # at V=512 a single block is optimal.
    m = jnp.max(logits, axis=-1, keepdims=True)
    lse = jnp.log(jnp.sum(jnp.exp(logits - m), axis=-1, keepdims=True)) + m
    colv = jax.lax.broadcasted_iota(jnp.int32, logits.shape, 1)
    picked = jnp.sum(jnp.where(colv == labels, logits, 0.0), axis=-1, keepdims=True)
    valid = (labels != IGNORE_INDEX).astype(jnp.float32)        # torch ignore_index
    per = (lse - picked) * valid                                # (Td, 1)
    loss_ref[0] = jnp.sum(per, keepdims=True)                   # (1, 1) scalars
    valid_ref[0] = jnp.sum(valid, keepdims=True)


# ----------------------------------------------------------------------------
# pallas_call wrappers
# ----------------------------------------------------------------------------

def _wspec(shape):
    """Constant-index weight BlockSpec: DMA'd once, stays VMEM resident."""
    # NOTE: at real Pegasus dims, mark these pipeline_mode=pl.Buffered(1) (or manual
    # DMA) so v7x's 64 MiB VMEM isn't halved by default double-buffering; at D=128
    # the footprint is <2 MiB so the default is harmless.
    return pl.BlockSpec(shape, lambda b: (0,) * len(shape))


def encoder_stack(h, key_bias, enc_w, ln_f):
    B, Ts, D = h.shape
    L = N_ENC
    return pl.pallas_call(
        _encoder_stack_kernel,
        out_shape=jax.ShapeDtypeStruct((B, Ts, D), jnp.bfloat16),
        grid=(B,),
        in_specs=[
            pl.BlockSpec((1, Ts, D), lambda b: (b, 0, 0)),
            pl.BlockSpec((1, 1, Ts), lambda b: (b, 0, 0)),
            _wspec((L, 1, D)), _wspec((L, 1, D)),
            _wspec((L, D, 3 * D)), _wspec((L, 1, 3 * D)),
            _wspec((L, D, D)), _wspec((L, 1, D)),
            _wspec((L, 1, D)), _wspec((L, 1, D)),
            _wspec((L, D, D_FF)), _wspec((L, 1, D_FF)),
            _wspec((L, D_FF, D)), _wspec((L, 1, D)),
            _wspec((1, D)), _wspec((1, D)),
        ],
        out_specs=pl.BlockSpec((1, Ts, D), lambda b: (b, 0, 0)),
        scratch_shapes=[pltpu.VMEM((Ts, D), jnp.float32)],
        compiler_params=pltpu.CompilerParams(dimension_semantics=("parallel",)),
    )(h, key_bias,
      enc_w["ln_sa_g"], enc_w["ln_sa_b"], enc_w["qkv_w"], enc_w["qkv_b"],
      enc_w["o_w"], enc_w["o_b"],
      enc_w["ln_ff_g"], enc_w["ln_ff_b"], enc_w["fc1_w"], enc_w["fc1_b"],
      enc_w["fc2_w"], enc_w["fc2_b"],
      ln_f["g"], ln_f["b"])


def decoder_stack_and_loss(h, enc_out, key_bias, labels, dec_w, ln_f, emb_t, flb):
    B, Td, D = h.shape
    Ts = enc_out.shape[1]
    V = emb_t.shape[1]
    L = N_DEC
    labels3 = labels.reshape(B, Td, 1).astype(jnp.int32)
    return pl.pallas_call(
        _decoder_stack_loss_kernel,
        out_shape=(jax.ShapeDtypeStruct((B, 1, 1), jnp.float32),
                   jax.ShapeDtypeStruct((B, 1, 1), jnp.float32)),
        grid=(B,),
        in_specs=[
            pl.BlockSpec((1, Td, D), lambda b: (b, 0, 0)),
            pl.BlockSpec((1, Ts, D), lambda b: (b, 0, 0)),
            pl.BlockSpec((1, 1, Ts), lambda b: (b, 0, 0)),
            pl.BlockSpec((1, Td, 1), lambda b: (b, 0, 0)),
            _wspec((L, 1, D)), _wspec((L, 1, D)),
            _wspec((L, D, 3 * D)), _wspec((L, 1, 3 * D)),
            _wspec((L, D, D)), _wspec((L, 1, D)),
            _wspec((L, 1, D)), _wspec((L, 1, D)),
            _wspec((L, D, D)), _wspec((L, 1, D)),
            _wspec((L, D, 2 * D)), _wspec((L, 1, 2 * D)),
            _wspec((L, D, D)), _wspec((L, 1, D)),
            _wspec((L, 1, D)), _wspec((L, 1, D)),
            _wspec((L, D, D_FF)), _wspec((L, 1, D_FF)),
            _wspec((L, D_FF, D)), _wspec((L, 1, D)),
            _wspec((1, D)), _wspec((1, D)),
            _wspec((D, V)), _wspec((1, V)),
        ],
        out_specs=(pl.BlockSpec((1, 1, 1), lambda b: (b, 0, 0)),
                   pl.BlockSpec((1, 1, 1), lambda b: (b, 0, 0))),
        scratch_shapes=[pltpu.VMEM((Td, D), jnp.float32)],
        compiler_params=pltpu.CompilerParams(dimension_semantics=("parallel",)),
    )(h, enc_out, key_bias, labels3,
      dec_w["ln_sa_g"], dec_w["ln_sa_b"], dec_w["sa_qkv_w"], dec_w["sa_qkv_b"],
      dec_w["sa_o_w"], dec_w["sa_o_b"],
      dec_w["ln_ca_g"], dec_w["ln_ca_b"], dec_w["ca_q_w"], dec_w["ca_q_b"],
      dec_w["ca_kv_w"], dec_w["ca_kv_b"], dec_w["ca_o_w"], dec_w["ca_o_b"],
      dec_w["ln_ff_g"], dec_w["ln_ff_b"], dec_w["fc1_w"], dec_w["fc1_b"],
      dec_w["fc2_w"], dec_w["fc2_b"],
      ln_f["g"], ln_f["b"], emb_t, flb)


# ----------------------------------------------------------------------------
# Pegasus-style model glue (plain JAX: gathers, shifting, padding)
# ----------------------------------------------------------------------------

def sinusoidal_pos_emb(T, D):
    pos = jnp.arange(T, dtype=jnp.float32)[:, None]
    dim = jnp.arange(D // 2, dtype=jnp.float32)[None, :]
    angle = pos / jnp.power(10000.0, 2.0 * dim / D)
    return jnp.concatenate([jnp.sin(angle), jnp.cos(angle)], axis=-1)


def embed(ids, emb_table):
    T = ids.shape[1]
    h = jnp.take(emb_table, ids, axis=0).astype(jnp.float32) * math.sqrt(D_MODEL)
    h = h + sinusoidal_pos_emb(T, D_MODEL)[None, :, :]
    return h.astype(jnp.bfloat16)


def shift_tokens_right(labels):
    dec = jnp.roll(labels, 1, axis=-1)
    dec = dec.at[:, 0].set(DECODER_START_ID)
    return jnp.where(dec == IGNORE_INDEX, PAD_ID, dec)


def _pad_to_multiple(x, mult, axis, pad_value):
    t = x.shape[axis]
    pad = (-t) % mult
    if pad == 0:
        return x
    widths = [(0, 0)] * x.ndim
    widths[axis] = (0, pad)
    return jnp.pad(x, widths, constant_values=pad_value)


@functools.partial(jax.jit, static_argnames=("is_training",))
def bagualu_summary_forward(params, input_ids, attention_mask, labels,
                            is_training=True):
    """Mirrors BagualuSummaryModel.forward (training path)."""
    # pad to full bf16 (16,128) tiles: pad src keys are attention-masked, pad tgt
    # rows carry label=-100 and are causally isolated -> loss is unchanged.
    input_ids = _pad_to_multiple(input_ids, SEQ_MULT, 1, PAD_ID)
    attention_mask = _pad_to_multiple(attention_mask, SEQ_MULT, 1, 0)
    labels = _pad_to_multiple(labels, SEQ_MULT, 1, IGNORE_INDEX)

    B, Ts = input_ids.shape
    key_bias = ((1.0 - attention_mask.astype(jnp.float32)) * NEG_INF
                ).reshape(B, 1, Ts)

    # encoder: one fused pallas_call for the whole stack (+ final encoder LN)
    enc_in = embed(input_ids, params["emb"])
    enc_out = encoder_stack(enc_in, key_bias, params["enc"], params["ln_enc"])

    # decoder + tied LM head + CrossEntropy: one fused pallas_call
    dec_ids = shift_tokens_right(labels)
    dec_in = embed(dec_ids, params["emb"])
    emb_t = jnp.transpose(params["emb"])        # (D, V): transpose once in HBM, not in-kernel
    loss_sums, valid_counts = decoder_stack_and_loss(
        dec_in, enc_out, key_bias, labels, params["dec"], params["ln_dec"],
        emb_t, params["final_logits_bias"])

    masked_lm_loss = jnp.sum(loss_sums) / jnp.maximum(jnp.sum(valid_counts), 1.0)
    kl_loss = 0.0
    loss_total = masked_lm_loss + kl_loss

    generated_ids = None
    # TODO(synk): beam-search generation (num_beams=8, max_length=max_dec_length)
    # for the is_training=False path has no clean Pallas equivalent here.
    return {"loss_total": loss_total, "generated_ids": generated_ids}


# ----------------------------------------------------------------------------
# Deterministic parameter init (bf16 weights, f32 biases / LayerNorm params,
# per-layer weights stacked along a leading layer axis)
# ----------------------------------------------------------------------------

def init_params(key):
    keys = iter(jax.random.split(key, 64))

    def w(*shape):
        return (jax.random.normal(next(keys), shape, jnp.float32) * 0.02
                ).astype(jnp.bfloat16)

    def zeros(*shape):
        return jnp.zeros(shape, jnp.float32)

    def ones(*shape):
        return jnp.ones(shape, jnp.float32)

    Le, Ld, D, F = N_ENC, N_DEC, D_MODEL, D_FF

    enc = {
        "ln_sa_g": ones(Le, 1, D), "ln_sa_b": zeros(Le, 1, D),
        "qkv_w": w(Le, D, 3 * D), "qkv_b": zeros(Le, 1, 3 * D),
        "o_w": w(Le, D, D), "o_b": zeros(Le, 1, D),
        "ln_ff_g": ones(Le, 1, D), "ln_ff_b": zeros(Le, 1, D),
        "fc1_w": w(Le, D, F), "fc1_b": zeros(Le, 1, F),
        "fc2_w": w(Le, F, D), "fc2_b": zeros(Le, 1, D),
    }
    dec = {
        "ln_sa_g": ones(Ld, 1, D), "ln_sa_b": zeros(Ld, 1, D),
        "sa_qkv_w": w(Ld, D, 3 * D), "sa_qkv_b": zeros(Ld, 1, 3 * D),
        "sa_o_w": w(Ld, D, D), "sa_o_b": zeros(Ld, 1, D),
        "ln_ca_g": ones(Ld, 1, D), "ln_ca_b": zeros(Ld, 1, D),
        "ca_q_w": w(Ld, D, D), "ca_q_b": zeros(Ld, 1, D),
        "ca_kv_w": w(Ld, D, 2 * D), "ca_kv_b": zeros(Ld, 1, 2 * D),
        "ca_o_w": w(Ld, D, D), "ca_o_b": zeros(Ld, 1, D),
        "ln_ff_g": ones(Ld, 1, D), "ln_ff_b": zeros(Ld, 1, D),
        "fc1_w": w(Ld, D, F), "fc1_b": zeros(Ld, 1, F),
        "fc2_w": w(Ld, F, D), "fc2_b": zeros(Ld, 1, D),
    }
    return {
        "emb": (jax.random.normal(next(keys), (VOCAB, D), jnp.float32)
                * 0.02).astype(jnp.bfloat16),
        "final_logits_bias": jnp.zeros((1, VOCAB), jnp.float32),
        "enc": enc,
        "dec": dec,
        "ln_enc": {"g": ones(1, D), "b": zeros(1, D)},
        "ln_dec": {"g": ones(1, D), "b": zeros(1, D)},
    }


if __name__ == "__main__":
    key = jax.random.PRNGKey(0)
    k_param, k_src, k_tgt = jax.random.split(key, 3)

    B, T_SRC, T_TGT = 2, 16, 8
    params = init_params(k_param)

    input_ids = jax.random.randint(k_src, (B, T_SRC), 1, VOCAB, dtype=jnp.int32)
    attention_mask = jnp.ones((B, T_SRC), jnp.int32).at[1, 12:].set(0)
    labels = jax.random.randint(k_tgt, (B, T_TGT), 1, VOCAB, dtype=jnp.int32)

    out = bagualu_summary_forward(params, input_ids, attention_mask, labels,
                                  is_training=True)
    loss = jax.block_until_ready(out["loss_total"])
    assert jnp.isfinite(loss)
    print("KERNEL_OK")
</pallas_src>

<mosaic_0001>
module attributes {stable_mosaic.version = 11 : i64} {
  func.func @_decoder_stack_loss_kernel(%arg0: i32, %arg1: memref<1x16x128xbf16, #tpu.memory_space<vmem>>, %arg2: memref<1x16x128xbf16, #tpu.memory_space<vmem>>, %arg3: memref<1x1x16xf32, #tpu.memory_space<vmem>>, %arg4: memref<1x16x1xi32, #tpu.memory_space<vmem>>, %arg5: memref<2x1x128xf32, #tpu.memory_space<vmem>>, %arg6: memref<2x1x128xf32, #tpu.memory_space<vmem>>, %arg7: memref<2x128x384xbf16, #tpu.memory_space<vmem>>, %arg8: memref<2x1x384xf32, #tpu.memory_space<vmem>>, %arg9: memref<2x128x128xbf16, #tpu.memory_space<vmem>>, %arg10: memref<2x1x128xf32, #tpu.memory_space<vmem>>, %arg11: memref<2x1x128xf32, #tpu.memory_space<vmem>>, %arg12: memref<2x1x128xf32, #tpu.memory_space<vmem>>, %arg13: memref<2x128x128xbf16, #tpu.memory_space<vmem>>, %arg14: memref<2x1x128xf32, #tpu.memory_space<vmem>>, %arg15: memref<2x128x256xbf16, #tpu.memory_space<vmem>>, %arg16: memref<2x1x256xf32, #tpu.memory_space<vmem>>, %arg17: memref<2x128x128xbf16, #tpu.memory_space<vmem>>, %arg18: memref<2x1x128xf32, #tpu.memory_space<vmem>>, %arg19: memref<2x1x128xf32, #tpu.memory_space<vmem>>, %arg20: memref<2x1x128xf32, #tpu.memory_space<vmem>>, %arg21: memref<2x128x256xbf16, #tpu.memory_space<vmem>>, %arg22: memref<2x1x256xf32, #tpu.memory_space<vmem>>, %arg23: memref<2x256x128xbf16, #tpu.memory_space<vmem>>, %arg24: memref<2x1x128xf32, #tpu.memory_space<vmem>>, %arg25: memref<1x128xf32, #tpu.memory_space<vmem>>, %arg26: memref<1x128xf32, #tpu.memory_space<vmem>>, %arg27: memref<128x512xbf16, #tpu.memory_space<vmem>>, %arg28: memref<1x512xf32, #tpu.memory_space<vmem>>, %arg29: memref<1x1x1xf32, #tpu.memory_space<vmem>>, %arg30: memref<1x1x1xf32, #tpu.memory_space<vmem>>, %arg31: memref<16x128xf32, #tpu.memory_space<vmem>>) attributes {dimension_semantics = [#tpu.dimension_semantics<parallel>], iteration_bounds = array<i64: 2>, scalar_prefetch = 0 : i64, scratch_operands = 1 : i64, tpu.core_type = #tpu.core_type<tc>, window_params = [{transform_indices = @transform_0, window_bounds = array<i64: 1, 16, 128>}, {transform_indices = @transform_1, window_bounds = array<i64: 1, 16, 128>}, {transform_indices = @transform_2, window_bounds = array<i64: 1, 1, 16>}, {transform_indices = @transform_3, window_bounds = array<i64: 1, 16, 1>}, {pipeline_mode = #tpu.pipeline_mode<synchronous>, transform_indices = @transform_4, window_bounds = array<i64: 2, 1, 128>}, {pipeline_mode = #tpu.pipeline_mode<synchronous>, transform_indices = @transform_5, window_bounds = array<i64: 2, 1, 128>}, {pipeline_mode = #tpu.pipeline_mode<synchronous>, transform_indices = @transform_6, window_bounds = array<i64: 2, 128, 384>}, {pipeline_mode = #tpu.pipeline_mode<synchronous>, transform_indices = @transform_7, window_bounds = array<i64: 2, 1, 384>}, {pipeline_mode = #tpu.pipeline_mode<synchronous>, transform_indices = @transform_8, window_bounds = array<i64: 2, 128, 128>}, {pipeline_mode = #tpu.pipeline_mode<synchronous>, transform_indices = @transform_9, window_bounds = array<i64: 2, 1, 128>}, {pipeline_mode = #tpu.pipeline_mode<synchronous>, transform_indices = @transform_10, window_bounds = array<i64: 2, 1, 128>}, {pipeline_mode = #tpu.pipeline_mode<synchronous>, transform_indices = @transform_11, window_bounds = array<i64: 2, 1, 128>}, {pipeline_mode = #tpu.pipeline_mode<synchronous>, transform_indices = @transform_12, window_bounds = array<i64: 2, 128, 128>}, {pipeline_mode = #tpu.pipeline_mode<synchronous>, transform_indices = @transform_13, window_bounds = array<i64: 2, 1, 128>}, {pipeline_mode = #tpu.pipeline_mode<synchronous>, transform_indices = @transform_14, window_bounds = array<i64: 2, 128, 256>}, {pipeline_mode = #tpu.pipeline_mode<synchronous>, transform_indices = @transform_15, window_bounds = array<i64: 2, 1, 256>}, {pipeline_mode = #tpu.pipeline_mode<synchronous>, transform_indices = @transform_16, window_bounds = array<i64: 2, 128, 128>}, {pipeline_mode = #tpu.pipeline_mode<synchronous>, transform_indices = @transform_17, window_bounds = array<i64: 2, 1, 128>}, {pipeline_mode = #tpu.pipeline_mode<synchronous>, transform_indices = @transform_18, window_bounds = array<i64: 2, 1, 128>}, {pipeline_mode = #tpu.pipeline_mode<synchronous>, transform_indices = @transform_19, window_bounds = array<i64: 2, 1, 128>}, {pipeline_mode = #tpu.pipeline_mode<synchronous>, transform_indices = @transform_20, window_bounds = array<i64: 2, 128, 256>}, {pipeline_mode = #tpu.pipeline_mode<synchronous>, transform_indices = @transform_21, window_bounds = array<i64: 2, 1, 256>}, {pipeline_mode = #tpu.pipeline_mode<synchronous>, transform_indices = @transform_22, window_bounds = array<i64: 2, 256, 128>}, {pipeline_mode = #tpu.pipeline_mode<synchronous>, transform_indices = @transform_23, window_bounds = array<i64: 2, 1, 128>}, {pipeline_mode = #tpu.pipeline_mode<synchronous>, transform_indices = @transform_24, window_bounds = array<i64: 1, 128>}, {pipeline_mode = #tpu.pipeline_mode<synchronous>, transform_indices = @transform_25, window_bounds = array<i64: 1, 128>}, {pipeline_mode = #tpu.pipeline_mode<synchronous>, transform_indices = @transform_26, window_bounds = array<i64: 128, 512>}, {pipeline_mode = #tpu.pipeline_mode<synchronous>, transform_indices = @transform_27, window_bounds = array<i64: 1, 512>}, {transform_indices = @transform_28, window_bounds = array<i64: 1, 1, 1>}, {transform_indices = @transform_29, window_bounds = array<i64: 1, 1, 1>}]} {
    %c0 = arith.constant 0 : index
    %c0_0 = arith.constant 0 : index
    %c0_1 = arith.constant 0 : index
    %0 = vector.load %arg1[%c0, %c0_0, %c0_1] : memref<1x16x128xbf16, #tpu.memory_space<vmem>>, vector<1x16x128xbf16>
    %1 = vector.shape_cast %0 : vector<1x16x128xbf16> to vector<16x128xbf16>
    %2 = arith.extf %1 : vector<16x128xbf16> to vector<16x128xf32>
    %c0_2 = arith.constant 0 : index
    %c0_3 = arith.constant 0 : index
    %c0_4 = arith.constant 0 : index
    %3 = vector.load %arg2[%c0_2, %c0_3, %c0_4] : memref<1x16x128xbf16, #tpu.memory_space<vmem>>, vector<1x16x128xbf16>
    %4 = vector.shape_cast %3 : vector<1x16x128xbf16> to vector<16x128xbf16>
    %c0_5 = arith.constant 0 : index
    %c0_6 = arith.constant 0 : index
    %c0_7 = arith.constant 0 : index
    %5 = vector.load %arg3[%c0_5, %c0_6, %c0_7] : memref<1x1x16xf32, #tpu.memory_space<vmem>>, vector<1x1x16xf32>
    %6 = vector.shape_cast %5 : vector<1x1x16xf32> to vector<1x16xf32>
    %7 = tpu.iota {dimensions = array<i32: 0>} : vector<16x16xi32>
    %8 = tpu.iota {dimensions = array<i32: 1>} : vector<16x16xi32>
    %9 = arith.cmpi sle, %8, %7 : vector<16x16xi32>
    %cst = arith.constant 0.000000e+00 : f32
    %cst_8 = arith.constant -1.000000e+09 : f32
    %10 = vector.broadcast %cst : f32 to vector<16x16xf32>
    %11 = vector.broadcast %cst_8 : f32 to vector<16x16xf32>
    %12 = arith.select %9, %10, %11 : vector<16x16xi1>, vector<16x16xf32>
    %c0_9 = arith.constant 0 : index
    %c0_10 = arith.constant 0 : index
    %c0_11 = arith.constant 0 : index
    %13 = vector.load %arg5[%c0_9, %c0_10, %c0_11] : memref<2x1x128xf32, #tpu.memory_space<vmem>>, vector<1x1x128xf32>
    %14 = vector.shape_cast %13 : vector<1x1x128xf32> to vector<1x128xf32>
    %c0_12 = arith.constant 0 : index
    %c0_13 = arith.constant 0 : index
    %c0_14 = arith.constant 0 : index
    %15 = vector.load %arg6[%c0_12, %c0_13, %c0_14] : memref<2x1x128xf32, #tpu.memory_space<vmem>>, vector<1x1x128xf32>
    %16 = vector.shape_cast %15 : vector<1x1x128xf32> to vector<1x128xf32>
    %cst_15 = arith.constant dense<0.000000e+00> : vector<16xf32>
    %17 = vector.multi_reduction <add>, %2, %cst_15 [1] : vector<16x128xf32> to vector<16xf32>
    %18 = vector.shape_cast %17 : vector<16xf32> to vector<16x1xf32>
    %cst_16 = arith.constant 1.280000e+02 : f32
    %19 = vector.broadcast %cst_16 : f32 to vector<16x1xf32>
    %20 = arith.divf %18, %19 : vector<16x1xf32>
    %21 = vector.broadcast %20 : vector<16x1xf32> to vector<16x128xf32>
    %22 = arith.subf %2, %21 : vector<16x128xf32>
    %23 = arith.mulf %22, %22 : vector<16x128xf32>
    %cst_17 = arith.constant dense<0.000000e+00> : vector<16xf32>
    %24 = vector.multi_reduction <add>, %23, %cst_17 [1] : vector<16x128xf32> to vector<16xf32>
    %25 = vector.shape_cast %24 : vector<16xf32> to vector<16x1xf32>
    %cst_18 = arith.constant 1.280000e+02 : f32
    %26 = vector.broadcast %cst_18 : f32 to vector<16x1xf32>
    %27 = arith.divf %25, %26 : vector<16x1xf32>
    %cst_19 = arith.constant 9.99999974E-6 : f32
    %28 = vector.broadcast %cst_19 : f32 to vector<16x1xf32>
    %29 = arith.addf %27, %28 : vector<16x1xf32>
    %30 = math.rsqrt %29 : vector<16x1xf32>
    %31 = vector.broadcast %30 : vector<16x1xf32> to vector<16x128xf32>
    %32 = arith.mulf %22, %31 : vector<16x128xf32>
    %33 = vector.broadcast %14 : vector<1x128xf32> to vector<16x128xf32>
    %34 = arith.mulf %32, %33 : vector<16x128xf32>
    %35 = vector.broadcast %16 : vector<1x128xf32> to vector<16x128xf32>
    %36 = arith.addf %34, %35 : vector<16x128xf32>
    %c0_20 = arith.constant 0 : index
    %c0_21 = arith.constant 0 : index
    %c0_22 = arith.constant 0 : index
    %37 = vector.load %arg7[%c0_20, %c0_21, %c0_22] : memref<2x128x384xbf16, #tpu.memory_space<vmem>>, vector<1x128x384xbf16>
    %38 = vector.shape_cast %37 : vector<1x128x384xbf16> to vector<128x384xbf16>
    %c0_23 = arith.constant 0 : index
    %c0_24 = arith.constant 0 : index
    %c0_25 = arith.constant 0 : index
    %39 = vector.load %arg8[%c0_23, %c0_24, %c0_25] : memref<2x1x384xf32, #tpu.memory_space<vmem>>, vector<1x1x384xf32>
    %40 = vector.shape_cast %39 : vector<1x1x384xf32> to vector<1x384xf32>
    %41 = arith.truncf %36 : vector<16x128xf32> to vector<16x128xbf16>
    %cst_26 = arith.constant dense<0.000000e+00> : vector<16x384xf32>
    %42 = tpu.matmul %41, %38, %cst_26 {dimension_numbers = #tpu.dot_dimension_numbers<[1], [0], [0], [1], [0, 0, 1, 1], [], []>} : vector<16x128xbf16>, vector<128x384xbf16>, vector<16x384xf32> -> vector<16x384xf32>
    %43 = vector.broadcast %40 : vector<1x384xf32> to vector<16x384xf32>
    %44 = arith.addf %42, %43 : vector<16x384xf32>
    %45 = vector.extract_strided_slice %44 {offsets = [0, 0], sizes = [16, 128], strides = [1, 1]} : vector<16x384xf32> to vector<16x128xf32>
    %46 = vector.extract_strided_slice %44 {offsets = [0, 128], sizes = [16, 128], strides = [1, 1]} : vector<16x384xf32> to vector<16x128xf32>
    %47 = vector.extract_strided_slice %44 {offsets = [0, 256], sizes = [16, 128], strides = [1, 1]} : vector<16x384xf32> to vector<16x128xf32>
    %48 = vector.extract_strided_slice %45 {offsets = [0, 0], sizes = [16, 32], strides = [1, 1]} : vector<16x128xf32> to vector<16x32xf32>
    %cst_27 = arith.constant 0.176776692 : f32
    %49 = vector.broadcast %cst_27 : f32 to vector<16x32xf32>
    %50 = arith.mulf %48, %49 : vector<16x32xf32>
    %51 = vector.extract_strided_slice %46 {offsets = [0, 0], sizes = [16, 32], strides = [1, 1]} : vector<16x128xf32> to vector<16x32xf32>
    %52 = vector.extract_strided_slice %47 {offsets = [0, 0], sizes = [16, 32], strides = [1, 1]} : vector<16x128xf32> to vector<16x32xf32>
    %cst_28 = arith.constant dense<0.000000e+00> : vector<16x16xf32>
    %53 = tpu.matmul %50, %51, %cst_28 {dimension_numbers = #tpu.dot_dimension_numbers<[1], [1], [0], [0], [0, 0, 1, 0], [], []>} : vector<16x32xf32>, vector<16x32xf32>, vector<16x16xf32> -> vector<16x16xf32>
    %54 = arith.addf %53, %12 : vector<16x16xf32>
    %cst_29 = arith.constant dense<0xFF800000> : vector<16xf32>
    %55 = vector.multi_reduction <maximumf>, %54, %cst_29 [1] : vector<16x16xf32> to vector<16xf32>
    %56 = vector.shape_cast %55 : vector<16xf32> to vector<16x1xf32>
    %57 = vector.broadcast %56 : vector<16x1xf32> to vector<16x16xf32>
    %58 = arith.subf %54, %57 : vector<16x16xf32>
    %59 = math.exp %58 : vector<16x16xf32>
    %cst_30 = arith.constant dense<0.000000e+00> : vector<16xf32>
    %60 = vector.multi_reduction <add>, %59, %cst_30 [1] : vector<16x16xf32> to vector<16xf32>
    %61 = vector.shape_cast %60 : vector<16xf32> to vector<16x1xf32>
    %cst_31 = arith.constant dense<0.000000e+00> : vector<16x32xf32>
    %62 = tpu.matmul %59, %52, %cst_31 {dimension_numbers = #tpu.dot_dimension_numbers<[1], [0], [0], [1], [0, 0, 1, 1], [], []>} : vector<16x16xf32>, vector<16x32xf32>, vector<16x32xf32> -> vector<16x32xf32>
    %63 = tpu.reciprocal %61 {approx = true} : vector<16x1xf32> -> vector<16x1xf32>
    %64 = vector.broadcast %63 : vector<16x1xf32> to vector<16x32xf32>
    %65 = arith.mulf %62, %64 : vector<16x32xf32>
    %c0_32 = arith.constant 0 : index
    %c0_33 = arith.constant 0 : index
    %66 = vector.load %arg31[%c0_32, %c0_33] : memref<16x128xf32, #tpu.memory_space<vmem>>, vector<16x32xf32>
    tpu.vector_store %arg31[%c0_32, %c0_33], %65 {strides = array<i32>} : memref<16x128xf32, #tpu.memory_space<vmem>>, vector<16x32xf32>,
    %67 = vector.extract_strided_slice %45 {offsets = [0, 32], sizes = [16, 32], strides = [1, 1]} : vector<16x128xf32> to vector<16x32xf32>
    %cst_34 = arith.constant 0.176776692 : f32
    %68 = vector.broadcast %cst_34 : f32 to vector<16x32xf32>
    %69 = arith.mulf %67, %68 : vector<16x32xf32>
    %70 = vector.extract_strided_slice %46 {offsets = [0, 32], sizes = [16, 32], strides = [1, 1]} : vector<16x128xf32> to vector<16x32xf32>
    %71 = vector.extract_strided_slice %47 {offsets = [0, 32], sizes = [16, 32], strides = [1, 1]} : vector<16x128xf32> to vector<16x32xf32>
    %cst_35 = arith.constant dense<0.000000e+00> : vector<16x16xf32>
    %72 = tpu.matmul %69, %70, %cst_35 {dimension_numbers = #tpu.dot_dimension_numbers<[1], [1], [0], [0], [0, 0, 1, 0], [], []>} : vector<16x32xf32>, vector<16x32xf32>, vector<16x16xf32> -> vector<16x16xf32>
    %73 = arith.addf %72, %12 : vector<16x16xf32>
    %cst_36 = arith.constant dense<0xFF800000> : vector<16xf32>
    %74 = vector.multi_reduction <maximumf>, %73, %cst_36 [1] : vector<16x16xf32> to vector<16xf32>
    %75 = vector.shape_cast %74 : vector<16xf32> to vector<16x1xf32>
    %76 = vector.broadcast %75 : vector<16x1xf32> to vector<16x16xf32>
    %77 = arith.subf %73, %76 : vector<16x16xf32>
    %78 = math.exp %77 : vector<16x16xf32>
    %cst_37 = arith.constant dense<0.000000e+00> : vector<16xf32>
    %79 = vector.multi_reduction <add>, %78, %cst_37 [1] : vector<16x16xf32> to vector<16xf32>
    %80 = vector.shape_cast %79 : vector<16xf32> to vector<16x1xf32>
    %cst_38 = arith.constant dense<0.000000e+00> : vector<16x32xf32>
    %81 = tpu.matmul %78, %71, %cst_38 {dimension_numbers = #tpu.dot_dimension_numbers<[1], [0], [0], [1], [0, 0, 1, 1], [], []>} : vector<16x16xf32>, vector<16x32xf32>, vector<16x32xf32> -> vector<16x32xf32>
    %82 = tpu.reciprocal %80 {approx = true} : vector<16x1xf32> -> vector<16x1xf32>
    %83 = vector.broadcast %82 : vector<16x1xf32> to vector<16x32xf32>
    %84 = arith.mulf %81, %83 : vector<16x32xf32>
    %c0_39 = arith.constant 0 : index
    %c32 = arith.constant 32 : index
    %85 = vector.load %arg31[%c0_39, %c32] : memref<16x128xf32, #tpu.memory_space<vmem>>, vector<16x32xf32>
    tpu.vector_store %arg31[%c0_39, %c32], %84 {strides = array<i32>} : memref<16x128xf32, #tpu.memory_space<vmem>>, vector<16x32xf32>,
    %86 = vector.extract_strided_slice %45 {offsets = [0, 64], sizes = [16, 32], strides = [1, 1]} : vector<16x128xf32> to vector<16x32xf32>
    %cst_40 = arith.constant 0.176776692 : f32
    %87 = vector.broadcast %cst_40 : f32 to vector<16x32xf32>
    %88 = arith.mulf %86, %87 : vector<16x32xf32>
    %89 = vector.extract_strided_slice %46 {offsets = [0, 64], sizes = [16, 32], strides = [1, 1]} : vector<16x128xf32> to vector<16x32xf32>
    %90 = vector.extract_strided_slice %47 {offsets = [0, 64], sizes = [16, 32], strides = [1, 1]} : vector<16x128xf32> to vector<16x32xf32>
    %cst_41 = arith.constant dense<0.000000e+00> : vector<16x16xf32>
    %91 = tpu.matmul %88, %89, %cst_41 {dimension_numbers = #tpu.dot_dimension_numbers<[1], [1], [0], [0], [0, 0, 1, 0], [], []>} : vector<16x32xf32>, vector<16x32xf32>, vector<16x16xf32> -> vector<16x16xf32>
    %92 = arith.addf %91, %12 : vector<16x16xf32>
    %cst_42 = arith.constant dense<0xFF800000> : vector<16xf32>
    %93 = vector.multi_reduction <maximumf>, %92, %cst_42 [1] : vector<16x16xf32> to vector<16xf32>
    %94 = vector.shape_cast %93 : vector<16xf32> to vector<16x1xf32>
    %95 = vector.broadcast %94 : vector<16x1xf32> to vector<16x16xf32>
    %96 = arith.subf %92, %95 : vector<16x16xf32>
    %97 = math.exp %96 : vector<16x16xf32>
    %cst_43 = arith.constant dense<0.000000e+00> : vector<16xf32>
    %98 = vector.multi_reduction <add>, %97, %cst_43 [1] : vector<16x16xf32> to vector<16xf32>
    %99 = vector.shape_cast %98 : vector<16xf32> to vector<16x1xf32>
    %cst_44 = arith.constant dense<0.000000e+00> : vector<16x32xf32>
    %100 = tpu.matmul %97, %90, %cst_44 {dimension_numbers = #tpu.dot_dimension_numbers<[1], [0], [0], [1], [0, 0, 1, 1], [], []>} : vector<16x16xf32>, vector<16x32xf32>, vector<16x32xf32> -> vector<16x32xf32>
    %101 = tpu.reciprocal %99 {approx = true} : vector<16x1xf32> -> vector<16x1xf32>
    %102 = vector.broadcast %101 : vector<16x1xf32> to vector<16x32xf32>
    %103 = arith.mulf %100, %102 : vector<16x32xf32>
    %c0_45 = arith.constant 0 : index
    %c64 = arith.constant 64 : index
    %104 = vector.load %arg31[%c0_45, %c64] : memref<16x128xf32, #tpu.memory_space<vmem>>, vector<16x32xf32>
    tpu.vector_store %arg31[%c0_45, %c64], %103 {strides = array<i32>} : memref<16x128xf32, #tpu.memory_space<vmem>>, vector<16x32xf32>,
    %105 = vector.extract_strided_slice %45 {offsets = [0, 96], sizes = [16, 32], strides = [1, 1]} : vector<16x128xf32> to vector<16x32xf32>
    %cst_46 = arith.constant 0.176776692 : f32
    %106 = vector.broadcast %cst_46 : f32 to vector<16x32xf32>
    %107 = arith.mulf %105, %106 : vector<16x32xf32>
    %108 = vector.extract_strided_slice %46 {offsets = [0, 96], sizes = [16, 32], strides = [1, 1]} : vector<16x128xf32> to vector<16x32xf32>
    %109 = vector.extract_strided_slice %47 {offsets = [0, 96], sizes = [16, 32], strides = [1, 1]} : vector<16x128xf32> to vector<16x32xf32>
    %cst_47 = arith.constant dense<0.000000e+00> : vector<16x16xf32>
    %110 = tpu.matmul %107, %108, %cst_47 {dimension_numbers = #tpu.dot_dimension_numbers<[1], [1], [0], [0], [0, 0, 1, 0], [], []>} : vector<16x32xf32>, vector<16x32xf32>, vector<16x16xf32> -> vector<16x16xf32>
    %111 = arith.addf %110, %12 : vector<16x16xf32>
    %cst_48 = arith.constant dense<0xFF800000> : vector<16xf32>
    %112 = vector.multi_reduction <maximumf>, %111, %cst_48 [1] : vector<16x16xf32> to vector<16xf32>
    %113 = vector.shape_cast %112 : vector<16xf32> to vector<16x1xf32>
    %114 = vector.broadcast %113 : vector<16x1xf32> to vector<16x16xf32>
    %115 = arith.subf %111, %114 : vector<16x16xf32>
    %116 = math.exp %115 : vector<16x16xf32>
    %cst_49 = arith.constant dense<0.000000e+00> : vector<16xf32>
    %117 = vector.multi_reduction <add>, %116, %cst_49 [1] : vector<16x16xf32> to vector<16xf32>
    %118 = vector.shape_cast %117 : vector<16xf32> to vector<16x1xf32>
    %cst_50 = arith.constant dense<0.000000e+00> : vector<16x32xf32>
    %119 = tpu.matmul %116, %109, %cst_50 {dimension_numbers = #tpu.dot_dimension_numbers<[1], [0], [0], [1], [0, 0, 1, 1], [], []>} : vector<16x16xf32>, vector<16x32xf32>, vector<16x32xf32> -> vector<16x32xf32>
    %120 = tpu.reciprocal %118 {approx = true} : vector<16x1xf32> -> vector<16x1xf32>
    %121 = vector.broadcast %120 : vector<16x1xf32> to vector<16x32xf32>
    %122 = arith.mulf %119, %121 : vector<16x32xf32>
    %c0_51 = arith.constant 0 : index
    %c96 = arith.constant 96 : index
    %123 = vector.load %arg31[%c0_51, %c96] : memref<16x128xf32, #tpu.memory_space<vmem>>, vector<16x32xf32>
    tpu.vector_store %arg31[%c0_51, %c96], %122 {strides = array<i32>} : memref<16x128xf32, #tpu.memory_space<vmem>>, vector<16x32xf32>,
    %c0_52 = arith.constant 0 : index
    %c0_53 = arith.constant 0 : index
    %124 = vector.load %arg31[%c0_52, %c0_53] : memref<16x128xf32, #tpu.memory_space<vmem>>, vector<16x128xf32>
    %c0_54 = arith.constant 0 : index
    %c0_55 = arith.constant 0 : index
    %c0_56 = arith.constant 0 : index
    %125 = vector.load %arg9[%c0_54, %c0_55, %c0_56] : memref<2x128x128xbf16, #tpu.memory_space<vmem>>, vector<1x128x128xbf16>
    %126 = vector.shape_cast %125 : vector<1x128x128xbf16> to vector<128x128xbf16>
    %c0_57 = arith.constant 0 : index
    %c0_58 = arith.constant 0 : index
    %c0_59 = arith.constant 0 : index
    %127 = vector.load %arg10[%c0_57, %c0_58, %c0_59] : memref<2x1x128xf32, #tpu.memory_space<vmem>>, vector<1x1x128xf32>
    %128 = vector.shape_cast %127 : vector<1x1x128xf32> to vector<1x128xf32>
    %129 = arith.truncf %124 : vector<16x128xf32> to vector<16x128xbf16>
    %cst_60 = arith.constant dense<0.000000e+00> : vector<16x128xf32>
    %130 = tpu.matmul %129, %126, %cst_60 {dimension_numbers = #tpu.dot_dimension_numbers<[1], [0], [0], [1], [0, 0, 1, 1], [], []>} : vector<16x128xbf16>, vector<128x128xbf16>, vector<16x128xf32> -> vector<16x128xf32>
    %131 = vector.broadcast %128 : vector<1x128xf32> to vector<16x128xf32>
    %132 = arith.addf %130, %131 : vector<16x128xf32>
    %133 = arith.addf %2, %132 : vector<16x128xf32>
    %c0_61 = arith.constant 0 : index
    %c0_62 = arith.constant 0 : index
    %c0_63 = arith.constant 0 : index
    %134 = vector.load %arg11[%c0_61, %c0_62, %c0_63] : memref<2x1x128xf32, #tpu.memory_space<vmem>>, vector<1x1x128xf32>
    %135 = vector.shape_cast %134 : vector<1x1x128xf32> to vector<1x128xf32>
    %c0_64 = arith.constant 0 : index
    %c0_65 = arith.constant 0 : index
    %c0_66 = arith.constant 0 : index
    %136 = vector.load %arg12[%c0_64, %c0_65, %c0_66] : memref<2x1x128xf32, #tpu.memory_space<vmem>>, vector<1x1x128xf32>
    %137 = vector.shape_cast %136 : vector<1x1x128xf32> to vector<1x128xf32>
    %cst_67 = arith.constant dense<0.000000e+00> : vector<16xf32>
    %138 = vector.multi_reduction <add>, %133, %cst_67 [1] : vector<16x128xf32> to vector<16xf32>
    %139 = vector.shape_cast %138 : vector<16xf32> to vector<16x1xf32>
    %cst_68 = arith.constant 1.280000e+02 : f32
    %140 = vector.broadcast %cst_68 : f32 to vector<16x1xf32>
    %141 = arith.divf %139, %140 : vector<16x1xf32>
    %142 = vector.broadcast %141 : vector<16x1xf32> to vector<16x128xf32>
    %143 = arith.subf %133, %142 : vector<16x128xf32>
    %144 = arith.mulf %143, %143 : vector<16x128xf32>
    %cst_69 = arith.constant dense<0.000000e+00> : vector<16xf32>
    %145 = vector.multi_reduction <add>, %144, %cst_69 [1] : vector<16x128xf32> to vector<16xf32>
    %146 = vector.shape_cast %145 : vector<16xf32> to vector<16x1xf32>
    %cst_70 = arith.constant 1.280000e+02 : f32
    %147 = vector.broadcast %cst_70 : f32 to vector<16x1xf32>
    %148 = arith.divf %146, %147 : vector<16x1xf32>
    %cst_71 = arith.constant 9.99999974E-6 : f32
    %149 = vector.broadcast %cst_71 : f32 to vector<16x1xf32>
    %150 = arith.addf %148, %149 : vector<16x1xf32>
    %151 = math.rsqrt %150 : vector<16x1xf32>
    %152 = vector.broadcast %151 : vector<16x1xf32> to vector<16x128xf32>
    %153 = arith.mulf %143, %152 : vector<16x128xf32>
    %154 = vector.broadcast %135 : vector<1x128xf32> to vector<16x128xf32>
    %155 = arith.mulf %153, %154 : vector<16x128xf32>
    %156 = vector.broadcast %137 : vector<1x128xf32> to vector<16x128xf32>
    %157 = arith.addf %155, %156 : vector<16x128xf32>
    %c0_72 = arith.constant 0 : index
    %c0_73 = arith.constant 0 : index
    %c0_74 = arith.constant 0 : index
    %158 = vector.load %arg13[%c0_72, %c0_73, %c0_74] : memref<2x128x128xbf16, #tpu.memory_space<vmem>>, vector<1x128x128xbf16>
    %159 = vector.shape_cast %158 : vector<1x128x128xbf16> to vector<128x128xbf16>
    %c0_75 = arith.constant 0 : index
    %c0_76 = arith.constant 0 : index
    %c0_77 = arith.constant 0 : index
    %160 = vector.load %arg14[%c0_75, %c0_76, %c0_77] : memref<2x1x128xf32, #tpu.memory_space<vmem>>, vector<1x1x128xf32>
    %161 = vector.shape_cast %160 : vector<1x1x128xf32> to vector<1x128xf32>
    %162 = arith.truncf %157 : vector<16x128xf32> to vector<16x128xbf16>
    %cst_78 = arith.constant dense<0.000000e+00> : vector<16x128xf32>
    %163 = tpu.matmul %162, %159, %cst_78 {dimension_numbers = #tpu.dot_dimension_numbers<[1], [0], [0], [1], [0, 0, 1, 1], [], []>} : vector<16x128xbf16>, vector<128x128xbf16>, vector<16x128xf32> -> vector<16x128xf32>
    %164 = vector.broadcast %161 : vector<1x128xf32> to vector<16x128xf32>
    %165 = arith.addf %163, %164 : vector<16x128xf32>
    %c0_79 = arith.constant 0 : index
    %c0_80 = arith.constant 0 : index
    %c0_81 = arith.constant 0 : index
    %166 = vector.load %arg15[%c0_79, %c0_80, %c0_81] : memref<2x128x256xbf16, #tpu.memory_space<vmem>>, vector<1x128x256xbf16>
    %167 = vector.shape_cast %166 : vector<1x128x256xbf16> to vector<128x256xbf16>
    %cst_82 = arith.constant dense<0.000000e+00> : vector<16x256xf32>
    %168 = tpu.matmul %4, %167, %cst_82 {dimension_numbers = #tpu.dot_dimension_numbers<[1], [0], [0], [1], [0, 0, 1, 1], [], []>} : vector<16x128xbf16>, vector<128x256xbf16>, vector<16x256xf32> -> vector<16x256xf32>
    %c0_83 = arith.constant 0 : index
    %c0_84 = arith.constant 0 : index
    %c0_85 = arith.constant 0 : index
    %169 = vector.load %arg16[%c0_83, %c0_84, %c0_85] : memref<2x1x256xf32, #tpu.memory_space<vmem>>, vector<1x1x256xf32>
    %170 = vector.shape_cast %169 : vector<1x1x256xf32> to vector<1x256xf32>
    %171 = vector.broadcast %170 : vector<1x256xf32> to vector<16x256xf32>
    %172 = arith.addf %168, %171 : vector<16x256xf32>
    %173 = vector.extract_strided_slice %172 {offsets = [0, 0], sizes = [16, 128], strides = [1, 1]} : vector<16x256xf32> to vector<16x128xf32>
    %174 = vector.extract_strided_slice %172 {offsets = [0, 128], sizes = [16, 128], strides = [1, 1]} : vector<16x256xf32> to vector<16x128xf32>
    %175 = vector.extract_strided_slice %165 {offsets = [0, 0], sizes = [16, 32], strides = [1, 1]} : vector<16x128xf32> to vector<16x32xf32>
    %cst_86 = arith.constant 0.176776692 : f32
    %176 = vector.broadcast %cst_86 : f32 to vector<16x32xf32>
    %177 = arith.mulf %175, %176 : vector<16x32xf32>
    %178 = vector.extract_strided_slice %173 {offsets = [0, 0], sizes = [16, 32], strides = [1, 1]} : vector<16x128xf32> to vector<16x32xf32>
    %179 = vector.extract_strided_slice %174 {offsets = [0, 0], sizes = [16, 32], strides = [1, 1]} : vector<16x128xf32> to vector<16x32xf32>
    %cst_87 = arith.constant dense<0.000000e+00> : vector<16x16xf32>
    %180 = tpu.matmul %177, %178, %cst_87 {dimension_numbers = #tpu.dot_dimension_numbers<[1], [1], [0], [0], [0, 0, 1, 0], [], []>} : vector<16x32xf32>, vector<16x32xf32>, vector<16x16xf32> -> vector<16x16xf32>
    %181 = vector.broadcast %6 : vector<1x16xf32> to vector<16x16xf32>
    %182 = arith.addf %180, %181 : vector<16x16xf32>
    %cst_88 = arith.constant dense<0xFF800000> : vector<16xf32>
    %183 = vector.multi_reduction <maximumf>, %182, %cst_88 [1] : vector<16x16xf32> to vector<16xf32>
    %184 = vector.shape_cast %183 : vector<16xf32> to vector<16x1xf32>
    %185 = vector.broadcast %184 : vector<16x1xf32> to vector<16x16xf32>
    %186 = arith.subf %182, %185 : vector<16x16xf32>
    %187 = math.exp %186 : vector<16x16xf32>
    %cst_89 = arith.constant dense<0.000000e+00> : vector<16xf32>
    %188 = vector.multi_reduction <add>, %187, %cst_89 [1] : vector<16x16xf32> to vector<16xf32>
    %189 = vector.shape_cast %188 : vector<16xf32> to vector<16x1xf32>
    %cst_90 = arith.constant dense<0.000000e+00> : vector<16x32xf32>
    %190 = tpu.matmul %187, %179, %cst_90 {dimension_numbers = #tpu.dot_dimension_numbers<[1], [0], [0], [1], [0, 0, 1, 1], [], []>} : vector<16x16xf32>, vector<16x32xf32>, vector<16x32xf32> -> vector<16x32xf32>
    %191 = tpu.reciprocal %189 {approx = true} : vector<16x1xf32> -> vector<16x1xf32>
    %192 = vector.broadcast %191 : vector<16x1xf32> to vector<16x32xf32>
    %193 = arith.mulf %190, %192 : vector<16x32xf32>
    %c0_91 = arith.constant 0 : index
    %c0_92 = arith.constant 0 : index
    %194 = vector.load %arg31[%c0_91, %c0_92] : memref<16x128xf32, #tpu.memory_space<vmem>>, vector<16x32xf32>
    tpu.vector_store %arg31[%c0_91, %c0_92], %193 {strides = array<i32>} : memref<16x128xf32, #tpu.memory_space<vmem>>, vector<16x32xf32>,
    %195 = vector.extract_strided_slice %165 {offsets = [0, 32], sizes = [16, 32], strides = [1, 1]} : vector<16x128xf32> to vector<16x32xf32>
    %cst_93 = arith.constant 0.176776692 : f32
    %196 = vector.broadcast %cst_93 : f32 to vector<16x32xf32>
    %197 = arith.mulf %195, %196 : vector<16x32xf32>
    %198 = vector.extract_strided_slice %173 {offsets = [0, 32], sizes = [16, 32], strides = [1, 1]} : vector<16x128xf32> to vector<16x32xf32>
    %199 = vector.extract_strided_slice %174 {offsets = [0, 32], sizes = [16, 32], strides = [1, 1]} : vector<16x128xf32> to vector<16x32xf32>
    %cst_94 = arith.constant dense<0.000000e+00> : vector<16x16xf32>
    %200 = tpu.matmul %197, %198, %cst_94 {dimension_numbers = #tpu.dot_dimension_numbers<[1], [1], [0], [0], [0, 0, 1, 0], [], []>} : vector<16x32xf32>, vector<16x32xf32>, vector<16x16xf32> -> vector<16x16xf32>
    %201 = vector.broadcast %6 : vector<1x16xf32> to vector<16x16xf32>
    %202 = arith.addf %200, %201 : vector<16x16xf32>
    %cst_95 = arith.constant dense<0xFF800000> : vector<16xf32>
    %203 = vector.multi_reduction <maximumf>, %202, %cst_95 [1] : vector<16x16xf32> to vector<16xf32>
    %204 = vector.shape_cast %203 : vector<16xf32> to vector<16x1xf32>
    %205 = vector.broadcast %204 : vector<16x1xf32> to vector<16x16xf32>
    %206 = arith.subf %202, %205 : vector<16x16xf32>
    %207 = math.exp %206 : vector<16x16xf32>
    %cst_96 = arith.constant dense<0.000000e+00> : vector<16xf32>
    %208 = vector.multi_reduction <add>, %207, %cst_96 [1] : vector<16x16xf32> to vector<16xf32>
    %209 = vector.shape_cast %208 : vector<16xf32> to vector<16x1xf32>
    %cst_97 = arith.constant dense<0.000000e+00> : vector<16x32xf32>
    %210 = tpu.matmul %207, %199, %cst_97 {dimension_numbers = #tpu.dot_dimension_numbers<[1], [0], [0], [1], [0, 0, 1, 1], [], []>} : vector<16x16xf32>, vector<16x32xf32>, vector<16x32xf32> -> vector<16x32xf32>
    %211 = tpu.reciprocal %209 {approx = true} : vector<16x1xf32> -> vector<16x1xf32>
    %212 = vector.broadcast %211 : vector<16x1xf32> to vector<16x32xf32>
    %213 = arith.mulf %210, %212 : vector<16x32xf32>
    %c0_98 = arith.constant 0 : index
    %c32_99 = arith.constant 32 : index
    %214 = vector.load %arg31[%c0_98, %c32_99] : memref<16x128xf32, #tpu.memory_space<vmem>>, vector<16x32xf32>
    tpu.vector_store %arg31[%c0_98, %c32_99], %213 {strides = array<i32>} : memref<16x128xf32, #tpu.memory_space<vmem>>, vector<16x32xf32>,
    %215 = vector.extract_strided_slice %165 {offsets = [0, 64], sizes = [16, 32], strides = [1, 1]} : vector<16x128xf32> to vector<16x32xf32>
    %cst_100 = arith.constant 0.176776692 : f32
    %216 = vector.broadcast %cst_100 : f32 to vector<16x32xf32>
    %217 = arith.mulf %215, %216 : vector<16x32xf32>
    %218 = vector.extract_strided_slice %173 {offsets = [0, 64], sizes = [16, 32], strides = [1, 1]} : vector<16x128xf32> to vector<16x32xf32>
    %219 = vector.extract_strided_slice %174 {offsets = [0, 64], sizes = [16, 32], strides = [1, 1]} : vector<16x128xf32> to vector<16x32xf32>
    %cst_101 = arith.constant dense<0.000000e+00> : vector<16x16xf32>
    %220 = tpu.matmul %217, %218, %cst_101 {dimension_numbers = #tpu.dot_dimension_numbers<[1], [1], [0], [0], [0, 0, 1, 0], [], []>} : vector<16x32xf32>, vector<16x32xf32>, vector<16x16xf32> -> vector<16x16xf32>
    %221 = vector.broadcast %6 : vector<1x16xf32> to vector<16x16xf32>
    %222 = arith.addf %220, %221 : vector<16x16xf32>
    %cst_102 = arith.constant dense<0xFF800000> : vector<16xf32>
    %223 = vector.multi_reduction <maximumf>, %222, %cst_102 [1] : vector<16x16xf32> to vector<16xf32>
    %224 = vector.shape_cast %223 : vector<16xf32> to vector<16x1xf32>
    %225 = vector.broadcast %224 : vector<16x1xf32> to vector<16x16xf32>
    %226 = arith.subf %222, %225 : vector<16x16xf32>
    %227 = math.exp %226 : vector<16x16xf32>
    %cst_103 = arith.constant dense<0.000000e+00> : vector<16xf32>
    %228 = vector.multi_reduction <add>, %227, %cst_103 [1] : vector<16x16xf32> to vector<16xf32>
    %229 = vector.shape_cast %228 : vector<16xf32> to vector<16x1xf32>
    %cst_104 = arith.constant dense<0.000000e+00> : vector<16x32xf32>
    %230 = tpu.matmul %227, %219, %cst_104 {dimension_numbers = #tpu.dot_dimension_numbers<[1], [0], [0], [1], [0, 0, 1, 1], [], []>} : vector<16x16xf32>, vector<16x32xf32>, vector<16x32xf32> -> vector<16x32xf32>
    %231 = tpu.reciprocal %229 {approx = true} : vector<16x1xf32> -> vector<16x1xf32>
    %232 = vector.broadcast %231 : vector<16x1xf32> to vector<16x32xf32>
    %233 = arith.mulf %230, %232 : vector<16x32xf32>
    %c0_105 = arith.constant 0 : index
    %c64_106 = arith.constant 64 : index
    %234 = vector.load %arg31[%c0_105, %c64_106] : memref<16x128xf32, #tpu.memory_space<vmem>>, vector<16x32xf32>
    tpu.vector_store %arg31[%c0_105, %c64_106], %233 {strides = array<i32>} : memref<16x128xf32, #tpu.memory_space<vmem>>, vector<16x32xf32>,
    %235 = vector.extract_strided_slice %165 {offsets = [0, 96], sizes = [16, 32], strides = [1, 1]} : vector<16x128xf32> to vector<16x32xf32>
    %cst_107 = arith.constant 0.176776692 : f32
    %236 = vector.broadcast %cst_107 : f32 to vector<16x32xf32>
    %237 = arith.mulf %235, %236 : vector<16x32xf32>
    %238 = vector.extract_strided_slice %173 {offsets = [0, 96], sizes = [16, 32], strides = [1, 1]} : vector<16x128xf32> to vector<16x32xf32>
    %239 = vector.extract_strided_slice %174 {offsets = [0, 96], sizes = [16, 32], strides = [1, 1]} : vector<16x128xf32> to vector<16x32xf32>
    %cst_108 = arith.constant dense<0.000000e+00> : vector<16x16xf32>
    %240 = tpu.matmul %237, %238, %cst_108 {dimension_numbers = #tpu.dot_dimension_numbers<[1], [1], [0], [0], [0, 0, 1, 0], [], []>} : vector<16x32xf32>, vector<16x32xf32>, vector<16x16xf32> -> vector<16x16xf32>
    %241 = vector.broadcast %6 : vector<1x16xf32> to vector<16x16xf32>
    %242 = arith.addf %240, %241 : vector<16x16xf32>
    %cst_109 = arith.constant dense<0xFF800000> : vector<16xf32>
    %243 = vector.multi_reduction <maximumf>, %242, %cst_109 [1] : vector<16x16xf32> to vector<16xf32>
    %244 = vector.shape_cast %243 : vector<16xf32> to vector<16x1xf32>
    %245 = vector.broadcast %244 : vector<16x1xf32> to vector<16x16xf32>
    %246 = arith.subf %242, %245 : vector<16x16xf32>
    %247 = math.exp %246 : vector<16x16xf32>
    %cst_110 = arith.constant dense<0.000000e+00> : vector<16xf32>
    %248 = vector.multi_reduction <add>, %247, %cst_110 [1] : vector<16x16xf32> to vector<16xf32>
    %249 = vector.shape_cast %248 : vector<16xf32> to vector<16x1xf32>
    %cst_111 = arith.constant dense<0.000000e+00> : vector<16x32xf32>
    %250 = tpu.matmul %247, %239, %cst_111 {dimension_numbers = #tpu.dot_dimension_numbers<[1], [0], [0], [1], [0, 0, 1, 1], [], []>} : vector<16x16xf32>, vector<16x32xf32>, vector<16x32xf32> -> vector<16x32xf32>
    %251 = tpu.reciprocal %249 {approx = true} : vector<16x1xf32> -> vector<16x1xf32>
    %252 = vector.broadcast %251 : vector<16x1xf32> to vector<16x32xf32>
    %253 = arith.mulf %250, %252 : vector<16x32xf32>
    %c0_112 = arith.constant 0 : index
    %c96_113 = arith.constant 96 : index
    %254 = vector.load %arg31[%c0_112, %c96_113] : memref<16x128xf32, #tpu.memory_space<vmem>>, vector<16x32xf32>
    tpu.vector_store %arg31[%c0_112, %c96_113], %253 {strides = array<i32>} : memref<16x128xf32, #tpu.memory_space<vmem>>, vector<16x32xf32>,
    %c0_114 = arith.constant 0 : index
    %c0_115 = arith.constant 0 : index
    %255 = vector.load %arg31[%c0_114, %c0_115] : memref<16x128xf32, #tpu.memory_space<vmem>>, vector<16x128xf32>
    %c0_116 = arith.constant 0 : index
    %c0_117 = arith.constant 0 : index
    %c0_118 = arith.constant 0 : index
    %256 = vector.load %arg17[%c0_116, %c0_117, %c0_118] : memref<2x128x128xbf16, #tpu.memory_space<vmem>>, vector<1x128x128xbf16>
    %257 = vector.shape_cast %256 : vector<1x128x128xbf16> to vector<128x128xbf16>
    %c0_119 = arith.constant 0 : index
    %c0_120 = arith.constant 0 : index
    %c0_121 = arith.constant 0 : index
    %258 = vector.load %arg18[%c0_119, %c0_120, %c0_121] : memref<2x1x128xf32, #tpu.memory_space<vmem>>, vector<1x1x128xf32>
    %259 = vector.shape_cast %258 : vector<1x1x128xf32> to vector<1x128xf32>
    %260 = arith.truncf %255 : vector<16x128xf32> to vector<16x128xbf16>
    %cst_122 = arith.constant dense<0.000000e+00> : vector<16x128xf32>
    %261 = tpu.matmul %260, %257, %cst_122 {dimension_numbers = #tpu.dot_dimension_numbers<[1], [0], [0], [1], [0, 0, 1, 1], [], []>} : vector<16x128xbf16>, vector<128x128xbf16>, vector<16x128xf32> -> vector<16x128xf32>
    %262 = vector.broadcast %259 : vector<1x128xf32> to vector<16x128xf32>
    %263 = arith.addf %261, %262 : vector<16x128xf32>
    %264 = arith.addf %133, %263 : vector<16x128xf32>
    %c0_123 = arith.constant 0 : index
    %c0_124 = arith.constant 0 : index
    %c0_125 = arith.constant 0 : index
    %265 = vector.load %arg19[%c0_123, %c0_124, %c0_125] : memref<2x1x128xf32, #tpu.memory_space<vmem>>, vector<1x1x128xf32>
    %266 = vector.shape_cast %265 : vector<1x1x128xf32> to vector<1x128xf32>
    %c0_126 = arith.constant 0 : index
    %c0_127 = arith.constant 0 : index
    %c0_128 = arith.constant 0 : index
    %267 = vector.load %arg20[%c0_126, %c0_127, %c0_128] : memref<2x1x128xf32, #tpu.memory_space<vmem>>, vector<1x1x128xf32>
    %268 = vector.shape_cast %267 : vector<1x1x128xf32> to vector<1x128xf32>
    %cst_129 = arith.constant dense<0.000000e+00> : vector<16xf32>
    %269 = vector.multi_reduction <add>, %264, %cst_129 [1] : vector<16x128xf32> to vector<16xf32>
    %270 = vector.shape_cast %269 : vector<16xf32> to vector<16x1xf32>
    %cst_130 = arith.constant 1.280000e+02 : f32
    %271 = vector.broadcast %cst_130 : f32 to vector<16x1xf32>
    %272 = arith.divf %270, %271 : vector<16x1xf32>
    %273 = vector.broadcast %272 : vector<16x1xf32> to vector<16x128xf32>
    %274 = arith.subf %264, %273 : vector<16x128xf32>
    %275 = arith.mulf %274, %274 : vector<16x128xf32>
    %cst_131 = arith.constant dense<0.000000e+00> : vector<16xf32>
    %276 = vector.multi_reduction <add>, %275, %cst_131 [1] : vector<16x128xf32> to vector<16xf32>
    %277 = vector.shape_cast %276 : vector<16xf32> to vector<16x1xf32>
    %cst_132 = arith.constant 1.280000e+02 : f32
    %278 = vector.broadcast %cst_132 : f32 to vector<16x1xf32>
    %279 = arith.divf %277, %278 : vector<16x1xf32>
    %cst_133 = arith.constant 9.99999974E-6 : f32
    %280 = vector.broadcast %cst_133 : f32 to vector<16x1xf32>
    %281 = arith.addf %279, %280 : vector<16x1xf32>
    %282 = math.rsqrt %281 : vector<16x1xf32>
    %283 = vector.broadcast %282 : vector<16x1xf32> to vector<16x128xf32>
    %284 = arith.mulf %274, %283 : vector<16x128xf32>
    %285 = vector.broadcast %266 : vector<1x128xf32> to vector<16x128xf32>
    %286 = arith.mulf %284, %285 : vector<16x128xf32>
    %287 = vector.broadcast %268 : vector<1x128xf32> to vector<16x128xf32>
    %288 = arith.addf %286, %287 : vector<16x128xf32>
    %c0_134 = arith.constant 0 : index
    %c0_135 = arith.constant 0 : index
    %c0_136 = arith.constant 0 : index
    %289 = vector.load %arg21[%c0_134, %c0_135, %c0_136] : memref<2x128x256xbf16, #tpu.memory_space<vmem>>, vector<1x128x256xbf16>
    %290 = vector.shape_cast %289 : vector<1x128x256xbf16> to vector<128x256xbf16>
    %c0_137 = arith.constant 0 : index
    %c0_138 = arith.constant 0 : index
    %c0_139 = arith.constant 0 : index
    %291 = vector.load %arg22[%c0_137, %c0_138, %c0_139] : memref<2x1x256xf32, #tpu.memory_space<vmem>>, vector<1x1x256xf32>
    %292 = vector.shape_cast %291 : vector<1x1x256xf32> to vector<1x256xf32>
    %c0_140 = arith.constant 0 : index
    %c0_141 = arith.constant 0 : index
    %c0_142 = arith.constant 0 : index
    %293 = vector.load %arg23[%c0_140, %c0_141, %c0_142] : memref<2x256x128xbf16, #tpu.memory_space<vmem>>, vector<1x256x128xbf16>
    %294 = vector.shape_cast %293 : vector<1x256x128xbf16> to vector<256x128xbf16>
    %c0_143 = arith.constant 0 : index
    %c0_144 = arith.constant 0 : index
    %c0_145 = arith.constant 0 : index
    %295 = vector.load %arg24[%c0_143, %c0_144, %c0_145] : memref<2x1x128xf32, #tpu.memory_space<vmem>>, vector<1x1x128xf32>
    %296 = vector.shape_cast %295 : vector<1x1x128xf32> to vector<1x128xf32>
    %297 = arith.truncf %288 : vector<16x128xf32> to vector<16x128xbf16>
    %cst_146 = arith.constant dense<0.000000e+00> : vector<16x256xf32>
    %298 = tpu.matmul %297, %290, %cst_146 {dimension_numbers = #tpu.dot_dimension_numbers<[1], [0], [0], [1], [0, 0, 1, 1], [], []>} : vector<16x128xbf16>, vector<128x256xbf16>, vector<16x256xf32> -> vector<16x256xf32>
    %299 = vector.broadcast %292 : vector<1x256xf32> to vector<16x256xf32>
    %300 = arith.addf %298, %299 : vector<16x256xf32>
    %301 = arith.mulf %300, %300 : vector<16x256xf32>
    %302 = arith.mulf %300, %301 : vector<16x256xf32>
    %cst_147 = arith.constant 4.471500e-02 : f32
    %303 = vector.broadcast %cst_147 : f32 to vector<16x256xf32>
    %304 = arith.mulf %303, %302 : vector<16x256xf32>
    %305 = arith.addf %300, %304 : vector<16x256xf32>
    %cst_148 = arith.constant 0.797884583 : f32
    %306 = vector.broadcast %cst_148 : f32 to vector<16x256xf32>
    %307 = arith.mulf %306, %305 : vector<16x256xf32>
    %308 = math.tanh %307 : vector<16x256xf32>
    %cst_149 = arith.constant 1.000000e+00 : f32
    %309 = vector.broadcast %cst_149 : f32 to vector<16x256xf32>
    %310 = arith.addf %309, %308 : vector<16x256xf32>
    %cst_150 = arith.constant 5.000000e-01 : f32
    %311 = vector.broadcast %cst_150 : f32 to vector<16x256xf32>
    %312 = arith.mulf %311, %310 : vector<16x256xf32>
    %313 = arith.mulf %300, %312 : vector<16x256xf32>
    %314 = arith.truncf %313 : vector<16x256xf32> to vector<16x256xbf16>
    %cst_151 = arith.constant dense<0.000000e+00> : vector<16x128xf32>
    %315 = tpu.matmul %314, %294, %cst_151 {dimension_numbers = #tpu.dot_dimension_numbers<[1], [0], [0], [1], [0, 0, 1, 1], [], []>} : vector<16x256xbf16>, vector<256x128xbf16>, vector<16x128xf32> -> vector<16x128xf32>
    %316 = vector.broadcast %296 : vector<1x128xf32> to vector<16x128xf32>
    %317 = arith.addf %315, %316 : vector<16x128xf32>
    %318 = arith.addf %264, %317 : vector<16x128xf32>
    %c1 = arith.constant 1 : index
    %c0_152 = arith.constant 0 : index
    %c0_153 = arith.constant 0 : index
    %319 = vector.load %arg5[%c1, %c0_152, %c0_153] : memref<2x1x128xf32, #tpu.memory_space<vmem>>, vector<1x1x128xf32>
    %320 = vector.shape_cast %319 : vector<1x1x128xf32> to vector<1x128xf32>
    %c1_154 = arith.constant 1 : index
    %c0_155 = arith.constant 0 : index
    %c0_156 = arith.constant 0 : index
    %321 = vector.load %arg6[%c1_154, %c0_155, %c0_156] : memref<2x1x128xf32, #tpu.memory_space<vmem>>, vector<1x1x128xf32>
    %322 = vector.shape_cast %321 : vector<1x1x128xf32> to vector<1x128xf32>
    %cst_157 = arith.constant dense<0.000000e+00> : vector<16xf32>
    %323 = vector.multi_reduction <add>, %318, %cst_157 [1] : vector<16x128xf32> to vector<16xf32>
    %324 = vector.shape_cast %323 : vector<16xf32> to vector<16x1xf32>
    %cst_158 = arith.constant 1.280000e+02 : f32
    %325 = vector.broadcast %cst_158 : f32 to vector<16x1xf32>
    %326 = arith.divf %324, %325 : vector<16x1xf32>
    %327 = vector.broadcast %326 : vector<16x1xf32> to vector<16x128xf32>
    %328 = arith.subf %318, %327 : vector<16x128xf32>
    %329 = arith.mulf %328, %328 : vector<16x128xf32>
    %cst_159 = arith.constant dense<0.000000e+00> : vector<16xf32>
    %330 = vector.multi_reduction <add>, %329, %cst_159 [1] : vector<16x128xf32> to vector<16xf32>
    %331 = vector.shape_cast %330 : vector<16xf32> to vector<16x1xf32>
    %cst_160 = arith.constant 1.280000e+02 : f32
    %332 = vector.broadcast %cst_160 : f32 to vector<16x1xf32>
    %333 = arith.divf %331, %332 : vector<16x1xf32>
    %cst_161 = arith.constant 9.99999974E-6 : f32
    %334 = vector.broadcast %cst_161 : f32 to vector<16x1xf32>
    %335 = arith.addf %333, %334 : vector<16x1xf32>
    %336 = math.rsqrt %335 : vector<16x1xf32>
    %337 = vector.broadcast %336 : vector<16x1xf32> to vector<16x128xf32>
    %338 = arith.mulf %328, %337 : vector<16x128xf32>
    %339 = vector.broadcast %320 : vector<1x128xf32> to vector<16x128xf32>
    %340 = arith.mulf %338, %339 : vector<16x128xf32>
    %341 = vector.broadcast %322 : vector<1x128xf32> to vector<16x128xf32>
    %342 = arith.addf %340, %341 : vector<16x128xf32>
    %c1_162 = arith.constant 1 : index
    %c0_163 = arith.constant 0 : index
    %c0_164 = arith.constant 0 : index
    %343 = vector.load %arg7[%c1_162, %c0_163, %c0_164] : memref<2x128x384xbf16, #tpu.memory_space<vmem>>, vector<1x128x384xbf16>
    %344 = vector.shape_cast %343 : vector<1x128x384xbf16> to vector<128x384xbf16>
    %c1_165 = arith.constant 1 : index
    %c0_166 = arith.constant 0 : index
    %c0_167 = arith.constant 0 : index
    %345 = vector.load %arg8[%c1_165, %c0_166, %c0_167] : memref<2x1x384xf32, #tpu.memory_space<vmem>>, vector<1x1x384xf32>
    %346 = vector.shape_cast %345 : vector<1x1x384xf32> to vector<1x384xf32>
    %347 = arith.truncf %342 : vector<16x128xf32> to vector<16x128xbf16>
    %cst_168 = arith.constant dense<0.000000e+00> : vector<16x384xf32>
    %348 = tpu.matmul %347, %344, %cst_168 {dimension_numbers = #tpu.dot_dimension_numbers<[1], [0], [0], [1], [0, 0, 1, 1], [], []>} : vector<16x128xbf16>, vector<128x384xbf16>, vector<16x384xf32> -> vector<16x384xf32>
    %349 = vector.broadcast %346 : vector<1x384xf32> to vector<16x384xf32>
    %350 = arith.addf %348, %349 : vector<16x384xf32>
    %351 = vector.extract_strided_slice %350 {offsets = [0, 0], sizes = [16, 128], strides = [1, 1]} : vector<16x384xf32> to vector<16x128xf32>
    %352 = vector.extract_strided_slice %350 {offsets = [0, 128], sizes = [16, 128], strides = [1, 1]} : vector<16x384xf32> to vector<16x128xf32>
    %353 = vector.extract_strided_slice %350 {offsets = [0, 256], sizes = [16, 128], strides = [1, 1]} : vector<16x384xf32> to vector<16x128xf32>
    %354 = vector.extract_strided_slice %351 {offsets = [0, 0], sizes = [16, 32], strides = [1, 1]} : vector<16x128xf32> to vector<16x32xf32>
    %cst_169 = arith.constant 0.176776692 : f32
    %355 = vector.broadcast %cst_169 : f32 to vector<16x32xf32>
    %356 = arith.mulf %354, %355 : vector<16x32xf32>
    %357 = vector.extract_strided_slice %352 {offsets = [0, 0], sizes = [16, 32], strides = [1, 1]} : vector<16x128xf32> to vector<16x32xf32>
    %358 = vector.extract_strided_slice %353 {offsets = [0, 0], sizes = [16, 32], strides = [1, 1]} : vector<16x128xf32> to vector<16x32xf32>
    %cst_170 = arith.constant dense<0.000000e+00> : vector<16x16xf32>
    %359 = tpu.matmul %356, %357, %cst_170 {dimension_numbers = #tpu.dot_dimension_numbers<[1], [1], [0], [0], [0, 0, 1, 0], [], []>} : vector<16x32xf32>, vector<16x32xf32>, vector<16x16xf32> -> vector<16x16xf32>
    %360 = arith.addf %359, %12 : vector<16x16xf32>
    %cst_171 = arith.constant dense<0xFF800000> : vector<16xf32>
    %361 = vector.multi_reduction <maximumf>, %360, %cst_171 [1] : vector<16x16xf32> to vector<16xf32>
    %362 = vector.shape_cast %361 : vector<16xf32> to vector<16x1xf32>
    %363 = vector.broadcast %362 : vector<16x1xf32> to vector<16x16xf32>
    %364 = arith.subf %360, %363 : vector<16x16xf32>
    %365 = math.exp %364 : vector<16x16xf32>
    %cst_172 = arith.constant dense<0.000000e+00> : vector<16xf32>
    %366 = vector.multi_reduction <add>, %365, %cst_172 [1] : vector<16x16xf32> to vector<16xf32>
    %367 = vector.shape_cast %366 : vector<16xf32> to vector<16x1xf32>
    %cst_173 = arith.constant dense<0.000000e+00> : vector<16x32xf32>
    %368 = tpu.matmul %365, %358, %cst_173 {dimension_numbers = #tpu.dot_dimension_numbers<[1], [0], [0], [1], [0, 0, 1, 1], [], []>} : vector<16x16xf32>, vector<16x32xf32>, vector<16x32xf32> -> vector<16x32xf32>
    %369 = tpu.reciprocal %367 {approx = true} : vector<16x1xf32> -> vector<16x1xf32>
    %370 = vector.broadcast %369 : vector<16x1xf32> to vector<16x32xf32>
    %371 = arith.mulf %368, %370 : vector<16x32xf32>
    %c0_174 = arith.constant 0 : index
    %c0_175 = arith.constant 0 : index
    %372 = vector.load %arg31[%c0_174, %c0_175] : memref<16x128xf32, #tpu.memory_space<vmem>>, vector<16x32xf32>
    tpu.vector_store %arg31[%c0_174, %c0_175], %371 {strides = array<i32>} : memref<16x128xf32, #tpu.memory_space<vmem>>, vector<16x32xf32>,
    %373 = vector.extract_strided_slice %351 {offsets = [0, 32], sizes = [16, 32], strides = [1, 1]} : vector<16x128xf32> to vector<16x32xf32>
    %cst_176 = arith.constant 0.176776692 : f32
    %374 = vector.broadcast %cst_176 : f32 to vector<16x32xf32>
    %375 = arith.mulf %373, %374 : vector<16x32xf32>
    %376 = vector.extract_strided_slice %352 {offsets = [0, 32], sizes = [16, 32], strides = [1, 1]} : vector<16x128xf32> to vector<16x32xf32>
    %377 = vector.extract_strided_slice %353 {offsets = [0, 32], sizes = [16, 32], strides = [1, 1]} : vector<16x128xf32> to vector<16x32xf32>
    %cst_177 = arith.constant dense<0.000000e+00> : vector<16x16xf32>
    %378 = tpu.matmul %375, %376, %cst_177 {dimension_numbers = #tpu.dot_dimension_numbers<[1], [1], [0], [0], [0, 0, 1, 0], [], []>} : vector<16x32xf32>, vector<16x32xf32>, vector<16x16xf32> -> vector<16x16xf32>
    %379 = arith.addf %378, %12 : vector<16x16xf32>
    %cst_178 = arith.constant dense<0xFF800000> : vector<16xf32>
    %380 = vector.multi_reduction <maximumf>, %379, %cst_178 [1] : vector<16x16xf32> to vector<16xf32>
    %381 = vector.shape_cast %380 : vector<16xf32> to vector<16x1xf32>
    %382 = vector.broadcast %381 : vector<16x1xf32> to vector<16x16xf32>
    %383 = arith.subf %379, %382 : vector<16x16xf32>
    %384 = math.exp %383 : vector<16x16xf32>
    %cst_179 = arith.constant dense<0.000000e+00> : vector<16xf32>
    %385 = vector.multi_reduction <add>, %384, %cst_179 [1] : vector<16x16xf32> to vector<16xf32>
    %386 = vector.shape_cast %385 : vector<16xf32> to vector<16x1xf32>
    %cst_180 = arith.constant dense<0.000000e+00> : vector<16x32xf32>
    %387 = tpu.matmul %384, %377, %cst_180 {dimension_numbers = #tpu.dot_dimension_numbers<[1], [0], [0], [1], [0, 0, 1, 1], [], []>} : vector<16x16xf32>, vector<16x32xf32>, vector<16x32xf32> -> vector<16x32xf32>
    %388 = tpu.reciprocal %386 {approx = true} : vector<16x1xf32> -> vector<16x1xf32>
    %389 = vector.broadcast %388 : vector<16x1xf32> to vector<16x32xf32>
    %390 = arith.mulf %387, %389 : vector<16x32xf32>
    %c0_181 = arith.constant 0 : index
    %c32_182 = arith.constant 32 : index
    %391 = vector.load %arg31[%c0_181, %c32_182] : memref<16x128xf32, #tpu.memory_space<vmem>>, vector<16x32xf32>
    tpu.vector_store %arg31[%c0_181, %c32_182], %390 {strides = array<i32>} : memref<16x128xf32, #tpu.memory_space<vmem>>, vector<16x32xf32>,
    %392 = vector.extract_strided_slice %351 {offsets = [0, 64], sizes = [16, 32], strides = [1, 1]} : vector<16x128xf32> to vector<16x32xf32>
    %cst_183 = arith.constant 0.176776692 : f32
    %393 = vector.broadcast %cst_183 : f32 to vector<16x32xf32>
    %394 = arith.mulf %392, %393 : vector<16x32xf32>
    %395 = vector.extract_strided_slice %352 {offsets = [0, 64], sizes = [16, 32], strides = [1, 1]} : vector<16x128xf32> to vector<16x32xf32>
    %396 = vector.extract_strided_slice %353 {offsets = [0, 64], sizes = [16, 32], strides = [1, 1]} : vector<16x128xf32> to vector<16x32xf32>
    %cst_184 = arith.constant dense<0.000000e+00> : vector<16x16xf32>
    %397 = tpu.matmul %394, %395, %cst_184 {dimension_numbers = #tpu.dot_dimension_numbers<[1], [1], [0], [0], [0, 0, 1, 0], [], []>} : vector<16x32xf32>, vector<16x32xf32>, vector<16x16xf32> -> vector<16x16xf32>
    %398 = arith.addf %397, %12 : vector<16x16xf32>
    %cst_185 = arith.constant dense<0xFF800000> : vector<16xf32>
    %399 = vector.multi_reduction <maximumf>, %398, %cst_185 [1] : vector<16x16xf32> to vector<16xf32>
    %400 = vector.shape_cast %399 : vector<16xf32> to vector<16x1xf32>
    %401 = vector.broadcast %400 : vector<16x1xf32> to vector<16x16xf32>
    %402 = arith.subf %398, %401 : vector<16x16xf32>
    %403 = math.exp %402 : vector<16x16xf32>
    %cst_186 = arith.constant dense<0.000000e+00> : vector<16xf32>
    %404 = vector.multi_reduction <add>, %403, %cst_186 [1] : vector<16x16xf32> to vector<16xf32>
    %405 = vector.shape_cast %404 : vector<16xf32> to vector<16x1xf32>
    %cst_187 = arith.constant dense<0.000000e+00> : vector<16x32xf32>
    %406 = tpu.matmul %403, %396, %cst_187 {dimension_numbers = #tpu.dot_dimension_numbers<[1], [0], [0], [1], [0, 0, 1, 1], [], []>} : vector<16x16xf32>, vector<16x32xf32>, vector<16x32xf32> -> vector<16x32xf32>
    %407 = tpu.reciprocal %405 {approx = true} : vector<16x1xf32> -> vector<16x1xf32>
    %408 = vector.broadcast %407 : vector<16x1xf32> to vector<16x32xf32>
    %409 = arith.mulf %406, %408 : vector<16x32xf32>
    %c0_188 = arith.constant 0 : index
    %c64_189 = arith.constant 64 : index
    %410 = vector.load %arg31[%c0_188, %c64_189] : memref<16x128xf32, #tpu.memory_space<vmem>>, vector<16x32xf32>
    tpu.vector_store %arg31[%c0_188, %c64_189], %409 {strides = array<i32>} : memref<16x128xf32, #tpu.memory_space<vmem>>, vector<16x32xf32>,
    %411 = vector.extract_strided_slice %351 {offsets = [0, 96], sizes = [16, 32], strides = [1, 1]} : vector<16x128xf32> to vector<16x32xf32>
    %cst_190 = arith.constant 0.176776692 : f32
    %412 = vector.broadcast %cst_190 : f32 to vector<16x32xf32>
    %413 = arith.mulf %411, %412 : vector<16x32xf32>
    %414 = vector.extract_strided_slice %352 {offsets = [0, 96], sizes = [16, 32], strides = [1, 1]} : vector<16x128xf32> to vector<16x32xf32>
    %415 = vector.extract_strided_slice %353 {offsets = [0, 96], sizes = [16, 32], strides = [1, 1]} : vector<16x128xf32> to vector<16x32xf32>
    %cst_191 = arith.constant dense<0.000000e+00> : vector<16x16xf32>
    %416 = tpu.matmul %413, %414, %cst_191 {dimension_numbers = #tpu.dot_dimension_numbers<[1], [1], [0], [0], [0, 0, 1, 0], [], []>} : vector<16x32xf32>, vector<16x32xf32>, vector<16x16xf32> -> vector<16x16xf32>
    %417 = arith.addf %416, %12 : vector<16x16xf32>
    %cst_192 = arith.constant dense<0xFF800000> : vector<16xf32>
    %418 = vector.multi_reduction <maximumf>, %417, %cst_192 [1] : vector<16x16xf32> to vector<16xf32>
    %419 = vector.shape_cast %418 : vector<16xf32> to vector<16x1xf32>
    %420 = vector.broadcast %419 : vector<16x1xf32> to vector<16x16xf32>
    %421 = arith.subf %417, %420 : vector<16x16xf32>
    %422 = math.exp %421 : vector<16x16xf32>
    %cst_193 = arith.constant dense<0.000000e+00> : vector<16xf32>
    %423 = vector.multi_reduction <add>, %422, %cst_193 [1] : vector<16x16xf32> to vector<16xf32>
    %424 = vector.shape_cast %423 : vector<16xf32> to vector<16x1xf32>
    %cst_194 = arith.constant dense<0.000000e+00> : vector<16x32xf32>
    %425 = tpu.matmul %422, %415, %cst_194 {dimension_numbers = #tpu.dot_dimension_numbers<[1], [0], [0], [1], [0, 0, 1, 1], [], []>} : vector<16x16xf32>, vector<16x32xf32>, vector<16x32xf32> -> vector<16x32xf32>
    %426 = tpu.reciprocal %424 {approx = true} : vector<16x1xf32> -> vector<16x1xf32>
    %427 = vector.broadcast %426 : vector<16x1xf32> to vector<16x32xf32>
    %428 = arith.mulf %425, %427 : vector<16x32xf32>
    %c0_195 = arith.constant 0 : index
    %c96_196 = arith.constant 96 : index
    %429 = vector.load %arg31[%c0_195, %c96_196] : memref<16x128xf32, #tpu.memory_space<vmem>>, vector<16x32xf32>
    tpu.vector_store %arg31[%c0_195, %c96_196], %428 {strides = array<i32>} : memref<16x128xf32, #tpu.memory_space<vmem>>, vector<16x32xf32>,
    %c0_197 = arith.constant 0 : index
    %c0_198 = arith.constant 0 : index
    %430 = vector.load %arg31[%c0_197, %c0_198] : memref<16x128xf32, #tpu.memory_space<vmem>>, vector<16x128xf32>
    %c1_199 = arith.constant 1 : index
    %c0_200 = arith.constant 0 : index
    %c0_201 = arith.constant 0 : index
    %431 = vector.load %arg9[%c1_199, %c0_200, %c0_201] : memref<2x128x128xbf16, #tpu.memory_space<vmem>>, vector<1x128x128xbf16>
    %432 = vector.shape_cast %431 : vector<1x128x128xbf16> to vector<128x128xbf16>
    %c1_202 = arith.constant 1 : index
    %c0_203 = arith.constant 0 : index
    %c0_204 = arith.constant 0 : index
    %433 = vector.load %arg10[%c1_202, %c0_203, %c0_204] : memref<2x1x128xf32, #tpu.memory_space<vmem>>, vector<1x1x128xf32>
    %434 = vector.shape_cast %433 : vector<1x1x128xf32> to vector<1x128xf32>
    %435 = arith.truncf %430 : vector<16x128xf32> to vector<16x128xbf16>
    %cst_205 = arith.constant dense<0.000000e+00> : vector<16x128xf32>
    %436 = tpu.matmul %435, %432, %cst_205 {dimension_numbers = #tpu.dot_dimension_numbers<[1], [0], [0], [1], [0, 0, 1, 1], [], []>} : vector<16x128xbf16>, vector<128x128xbf16>, vector<16x128xf32> -> vector<16x128xf32>
    %437 = vector.broadcast %434 : vector<1x128xf32> to vector<16x128xf32>
    %438 = arith.addf %436, %437 : vector<16x128xf32>
    %439 = arith.addf %318, %438 : vector<16x128xf32>
    %c1_206 = arith.constant 1 : index
    %c0_207 = arith.constant 0 : index
    %c0_208 = arith.constant 0 : index
    %440 = vector.load %arg11[%c1_206, %c0_207, %c0_208] : memref<2x1x128xf32, #tpu.memory_space<vmem>>, vector<1x1x128xf32>
    %441 = vector.shape_cast %440 : vector<1x1x128xf32> to vector<1x128xf32>
    %c1_209 = arith.constant 1 : index
    %c0_210 = arith.constant 0 : index
    %c0_211 = arith.constant 0 : index
    %442 = vector.load %arg12[%c1_209, %c0_210, %c0_211] : memref<2x1x128xf32, #tpu.memory_space<vmem>>, vector<1x1x128xf32>
    %443 = vector.shape_cast %442 : vector<1x1x128xf32> to vector<1x128xf32>
    %cst_212 = arith.constant dense<0.000000e+00> : vector<16xf32>
    %444 = vector.multi_reduction <add>, %439, %cst_212 [1] : vector<16x128xf32> to vector<16xf32>
    %445 = vector.shape_cast %444 : vector<16xf32> to vector<16x1xf32>
    %cst_213 = arith.constant 1.280000e+02 : f32
    %446 = vector.broadcast %cst_213 : f32 to vector<16x1xf32>
    %447 = arith.divf %445, %446 : vector<16x1xf32>
    %448 = vector.broadcast %447 : vector<16x1xf32> to vector<16x128xf32>
    %449 = arith.subf %439, %448 : vector<16x128xf32>
    %450 = arith.mulf %449, %449 : vector<16x128xf32>
    %cst_214 = arith.constant dense<0.000000e+00> : vector<16xf32>
    %451 = vector.multi_reduction <add>, %450, %cst_214 [1] : vector<16x128xf32> to vector<16xf32>
    %452 = vector.shape_cast %451 : vector<16xf32> to vector<16x1xf32>
    %cst_215 = arith.constant 1.280000e+02 : f32
    %453 = vector.broadcast %cst_215 : f32 to vector<16x1xf32>
    %454 = arith.divf %452, %453 : vector<16x1xf32>
    %cst_216 = arith.constant 9.99999974E-6 : f32
    %455 = vector.broadcast %cst_216 : f32 to vector<16x1xf32>
    %456 = arith.addf %454, %455 : vector<16x1xf32>
    %457 = math.rsqrt %456 : vector<16x1xf32>
    %458 = vector.broadcast %457 : vector<16x1xf32> to vector<16x128xf32>
    %459 = arith.mulf %449, %458 : vector<16x128xf32>
    %460 = vector.broadcast %441 : vector<1x128xf32> to vector<16x128xf32>
    %461 = arith.mulf %459, %460 : vector<16x128xf32>
    %462 = vector.broadcast %443 : vector<1x128xf32> to vector<16x128xf32>
    %463 = arith.addf %461, %462 : vector<16x128xf32>
    %c1_217 = arith.constant 1 : index
    %c0_218 = arith.constant 0 : index
    %c0_219 = arith.constant 0 : index
    %464 = vector.load %arg13[%c1_217, %c0_218, %c0_219] : memref<2x128x128xbf16, #tpu.memory_space<vmem>>, vector<1x128x128xbf16>
    %465 = vector.shape_cast %464 : vector<1x128x128xbf16> to vector<128x128xbf16>
    %c1_220 = arith.constant 1 : index
    %c0_221 = arith.constant 0 : index
    %c0_222 = arith.constant 0 : index
    %466 = vector.load %arg14[%c1_220, %c0_221, %c0_222] : memref<2x1x128xf32, #tpu.memory_space<vmem>>, vector<1x1x128xf32>
    %467 = vector.shape_cast %466 : vector<1x1x128xf32> to vector<1x128xf32>
    %468 = arith.truncf %463 : vector<16x128xf32> to vector<16x128xbf16>
    %cst_223 = arith.constant dense<0.000000e+00> : vector<16x128xf32>
    %469 = tpu.matmul %468, %465, %cst_223 {dimension_numbers = #tpu.dot_dimension_numbers<[1], [0], [0], [1], [0, 0, 1, 1], [], []>} : vector<16x128xbf16>, vector<128x128xbf16>, vector<16x128xf32> -> vector<16x128xf32>
    %470 = vector.broadcast %467 : vector<1x128xf32> to vector<16x128xf32>
    %471 = arith.addf %469, %470 : vector<16x128xf32>
    %c1_224 = arith.constant 1 : index
    %c0_225 = arith.constant 0 : index
    %c0_226 = arith.constant 0 : index
    %472 = vector.load %arg15[%c1_224, %c0_225, %c0_226] : memref<2x128x256xbf16, #tpu.memory_space<vmem>>, vector<1x128x256xbf16>
    %473 = vector.shape_cast %472 : vector<1x128x256xbf16> to vector<128x256xbf16>
    %cst_227 = arith.constant dense<0.000000e+00> : vector<16x256xf32>
    %474 = tpu.matmul %4, %473, %cst_227 {dimension_numbers = #tpu.dot_dimension_numbers<[1], [0], [0], [1], [0, 0, 1, 1], [], []>} : vector<16x128xbf16>, vector<128x256xbf16>, vector<16x256xf32> -> vector<16x256xf32>
    %c1_228 = arith.constant 1 : index
    %c0_229 = arith.constant 0 : index
    %c0_230 = arith.constant 0 : index
    %475 = vector.load %arg16[%c1_228, %c0_229, %c0_230] : memref<2x1x256xf32, #tpu.memory_space<vmem>>, vector<1x1x256xf32>
    %476 = vector.shape_cast %475 : vector<1x1x256xf32> to vector<1x256xf32>
    %477 = vector.broadcast %476 : vector<1x256xf32> to vector<16x256xf32>
    %478 = arith.addf %474, %477 : vector<16x256xf32>
    %479 = vector.extract_strided_slice %478 {offsets = [0, 0], sizes = [16, 128], strides = [1, 1]} : vector<16x256xf32> to vector<16x128xf32>
    %480 = vector.extract_strided_slice %478 {offsets = [0, 128], sizes = [16, 128], strides = [1, 1]} : vector<16x256xf32> to vector<16x128xf32>
    %481 = vector.extract_strided_slice %471 {offsets = [0, 0], sizes = [16, 32], strides = [1, 1]} : vector<16x128xf32> to vector<16x32xf32>
    %cst_231 = arith.constant 0.176776692 : f32
    %482 = vector.broadcast %cst_231 : f32 to vector<16x32xf32>
    %483 = arith.mulf %481, %482 : vector<16x32xf32>
    %484 = vector.extract_strided_slice %479 {offsets = [0, 0], sizes = [16, 32], strides = [1, 1]} : vector<16x128xf32> to vector<16x32xf32>
    %485 = vector.extract_strided_slice %480 {offsets = [0, 0], sizes = [16, 32], strides = [1, 1]} : vector<16x128xf32> to vector<16x32xf32>
    %cst_232 = arith.constant dense<0.000000e+00> : vector<16x16xf32>
    %486 = tpu.matmul %483, %484, %cst_232 {dimension_numbers = #tpu.dot_dimension_numbers<[1], [1], [0], [0], [0, 0, 1, 0], [], []>} : vector<16x32xf32>, vector<16x32xf32>, vector<16x16xf32> -> vector<16x16xf32>
    %487 = vector.broadcast %6 : vector<1x16xf32> to vector<16x16xf32>
    %488 = arith.addf %486, %487 : vector<16x16xf32>
    %cst_233 = arith.constant dense<0xFF800000> : vector<16xf32>
    %489 = vector.multi_reduction <maximumf>, %488, %cst_233 [1] : vector<16x16xf32> to vector<16xf32>
    %490 = vector.shape_cast %489 : vector<16xf32> to vector<16x1xf32>
    %491 = vector.broadcast %490 : vector<16x1xf32> to vector<16x16xf32>
    %492 = arith.subf %488, %491 : vector<16x16xf32>
    %493 = math.exp %492 : vector<16x16xf32>
    %cst_234 = arith.constant dense<0.000000e+00> : vector<16xf32>
    %494 = vector.multi_reduction <add>, %493, %cst_234 [1] : vector<16x16xf32> to vector<16xf32>
    %495 = vector.shape_cast %494 : vector<16xf32> to vector<16x1xf32>
    %cst_235 = arith.constant dense<0.000000e+00> : vector<16x32xf32>
    %496 = tpu.matmul %493, %485, %cst_235 {dimension_numbers = #tpu.dot_dimension_numbers<[1], [0], [0], [1], [0, 0, 1, 1], [], []>} : vector<16x16xf32>, vector<16x32xf32>, vector<16x32xf32> -> vector<16x32xf32>
    %497 = tpu.reciprocal %495 {approx = true} : vector<16x1xf32> -> vector<16x1xf32>
    %498 = vector.broadcast %497 : vector<16x1xf32> to vector<16x32xf32>
    %499 = arith.mulf %496, %498 : vector<16x32xf32>
    %c0_236 = arith.constant 0 : index
    %c0_237 = arith.constant 0 : index
    %500 = vector.load %arg31[%c0_236, %c0_237] : memref<16x128xf32, #tpu.memory_space<vmem>>, vector<16x32xf32>
    tpu.vector_store %arg31[%c0_236, %c0_237], %499 {strides = array<i32>} : memref<16x128xf32, #tpu.memory_space<vmem>>, vector<16x32xf32>,
    %501 = vector.extract_strided_slice %471 {offsets = [0, 32], sizes = [16, 32], strides = [1, 1]} : vector<16x128xf32> to vector<16x32xf32>
    %cst_238 = arith.constant 0.176776692 : f32
    %502 = vector.broadcast %cst_238 : f32 to vector<16x32xf32>
    %503 = arith.mulf %501, %502 : vector<16x32xf32>
    %504 = vector.extract_strided_slice %479 {offsets = [0, 32], sizes = [16, 32], strides = [1, 1]} : vector<16x128xf32> to vector<16x32xf32>
    %505 = vector.extract_strided_slice %480 {offsets = [0, 32], sizes = [16, 32], strides = [1, 1]} : vector<16x128xf32> to vector<16x32xf32>
    %cst_239 = arith.constant dense<0.000000e+00> : vector<16x16xf32>
    %506 = tpu.matmul %503, %504, %cst_239 {dimension_numbers = #tpu.dot_dimension_numbers<[1], [1], [0], [0], [0, 0, 1, 0], [], []>} : vector<16x32xf32>, vector<16x32xf32>, vector<16x16xf32> -> vector<16x16xf32>
    %507 = vector.broadcast %6 : vector<1x16xf32> to vector<16x16xf32>
    %508 = arith.addf %506, %507 : vector<16x16xf32>
    %cst_240 = arith.constant dense<0xFF800000> : vector<16xf32>
    %509 = vector.multi_reduction <maximumf>, %508, %cst_240 [1] : vector<16x16xf32> to vector<16xf32>
    %510 = vector.shape_cast %509 : vector<16xf32> to vector<16x1xf32>
    %511 = vector.broadcast %510 : vector<16x1xf32> to vector<16x16xf32>
    %512 = arith.subf %508, %511 : vector<16x16xf32>
    %513 = math.exp %512 : vector<16x16xf32>
    %cst_241 = arith.constant dense<0.000000e+00> : vector<16xf32>
    %514 = vector.multi_reduction <add>, %513, %cst_241 [1] : vector<16x16xf32> to vector<16xf32>
    %515 = vector.shape_cast %514 : vector<16xf32> to vector<16x1xf32>
    %cst_242 = arith.constant dense<0.000000e+00> : vector<16x32xf32>
    %516 = tpu.matmul %513, %505, %cst_242 {dimension_numbers = #tpu.dot_dimension_numbers<[1], [0], [0], [1], [0, 0, 1, 1], [], []>} : vector<16x16xf32>, vector<16x32xf32>, vector<16x32xf32> -> vector<16x32xf32>
    %517 = tpu.reciprocal %515 {approx = true} : vector<16x1xf32> -> vector<16x1xf32>
    %518 = vector.broadcast %517 : vector<16x1xf32> to vector<16x32xf32>
    %519 = arith.mulf %516, %518 : vector<16x32xf32>
    %c0_243 = arith.constant 0 : index
    %c32_244 = arith.constant 32 : index
    %520 = vector.load %arg31[%c0_243, %c32_244] : memref<16x128xf32, #tpu.memory_space<vmem>>, vector<16x32xf32>
    tpu.vector_store %arg31[%c0_243, %c32_244], %519 {strides = array<i32>} : memref<16x128xf32, #tpu.memory_space<vmem>>, vector<16x32xf32>,
    %521 = vector.extract_strided_slice %471 {offsets = [0, 64], sizes = [16, 32], strides = [1, 1]} : vector<16x128xf32> to vector<16x32xf32>
    %cst_245 = arith.constant 0.176776692 : f32
    %522 = vector.broadcast %cst_245 : f32 to vector<16x32xf32>
    %523 = arith.mulf %521, %522 : vector<16x32xf32>
    %524 = vector.extract_strided_slice %479 {offsets = [0, 64], sizes = [16, 32], strides = [1, 1]} : vector<16x128xf32> to vector<16x32xf32>
    %525 = vector.extract_strided_slice %480 {offsets = [0, 64], sizes = [16, 32], strides = [1, 1]} : vector<16x128xf32> to vector<16x32xf32>
    %cst_246 = arith.constant dense<0.000000e+00> : vector<16x16xf32>
    %526 = tpu.matmul %523, %524, %cst_246 {dimension_numbers = #tpu.dot_dimension_numbers<[1], [1], [0], [0], [0, 0, 1, 0], [], []>} : vector<16x32xf32>, vector<16x32xf32>, vector<16x16xf32> -> vector<16x16xf32>
    %527 = vector.broadcast %6 : vector<1x16xf32> to vector<16x16xf32>
    %528 = arith.addf %526, %527 : vector<16x16xf32>
    %cst_247 = arith.constant dense<0xFF800000> : vector<16xf32>
    %529 = vector.multi_reduction <maximumf>, %528, %cst_247 [1] : vector<16x16xf32> to vector<16xf32>
    %530 = vector.shape_cast %529 : vector<16xf32> to vector<16x1xf32>
    %531 = vector.broadcast %530 : vector<16x1xf32> to vector<16x16xf32>
    %532 = arith.subf %528, %531 : vector<16x16xf32>
    %533 = math.exp %532 : vector<16x16xf32>
    %cst_248 = arith.constant dense<0.000000e+00> : vector<16xf32>
    %534 = vector.multi_reduction <add>, %533, %cst_248 [1] : vector<16x16xf32> to vector<16xf32>
    %535 = vector.shape_cast %534 : vector<16xf32> to vector<16x1xf32>
    %cst_249 = arith.constant dense<0.000000e+00> : vector<16x32xf32>
    %536 = tpu.matmul %533, %525, %cst_249 {dimension_numbers = #tpu.dot_dimension_numbers<[1], [0], [0], [1], [0, 0, 1, 1], [], []>} : vector<16x16xf32>, vector<16x32xf32>, vector<16x32xf32> -> vector<16x32xf32>
    %537 = tpu.reciprocal %535 {approx = true} : vector<16x1xf32> -> vector<16x1xf32>
    %538 = vector.broadcast %537 : vector<16x1xf32> to vector<16x32xf32>
    %539 = arith.mulf %536, %538 : vector<16x32xf32>
    %c0_250 = arith.constant 0 : index
    %c64_251 = arith.constant 64 : index
    %540 = vector.load %arg31[%c0_250, %c64_251] : memref<16x128xf32, #tpu.memory_space<vmem>>, vector<16x32xf32>
    tpu.vector_store %arg31[%c0_250, %c64_251], %539 {strides = array<i32>} : memref<16x128xf32, #tpu.memory_space<vmem>>, vector<16x32xf32>,
    %541 = vector.extract_strided_slice %471 {offsets = [0, 96], sizes = [16, 32], strides = [1, 1]} : vector<16x128xf32> to vector<16x32xf32>
    %cst_252 = arith.constant 0.176776692 : f32
    %542 = vector.broadcast %cst_252 : f32 to vector<16x32xf32>
    %543 = arith.mulf %541, %542 : vector<16x32xf32>
    %544 = vector.extract_strided_slice %479 {offsets = [0, 96], sizes = [16, 32], strides = [1, 1]} : vector<16x128xf32> to vector<16x32xf32>
    %545 = vector.extract_strided_slice %480 {offsets = [0, 96], sizes = [16, 32], strides = [1, 1]} : vector<16x128xf32> to vector<16x32xf32>
    %cst_253 = arith.constant dense<0.000000e+00> : vector<16x16xf32>
    %546 = tpu.matmul %543, %544, %cst_253 {dimension_numbers = #tpu.dot_dimension_numbers<[1], [1], [0], [0], [0, 0, 1, 0], [], []>} : vector<16x32xf32>, vector<16x32xf32>, vector<16x16xf32> -> vector<16x16xf32>
    %547 = vector.broadcast %6 : vector<1x16xf32> to vector<16x16xf32>
    %548 = arith.addf %546, %547 : vector<16x16xf32>
    %cst_254 = arith.constant dense<0xFF800000> : vector<16xf32>
    %549 = vector.multi_reduction <maximumf>, %548, %cst_254 [1] : vector<16x16xf32> to vector<16xf32>
    %550 = vector.shape_cast %549 : vector<16xf32> to vector<16x1xf32>
    %551 = vector.broadcast %550 : vector<16x1xf32> to vector<16x16xf32>
    %552 = arith.subf %548, %551 : vector<16x16xf32>
    %553 = math.exp %552 : vector<16x16xf32>
    %cst_255 = arith.constant dense<0.000000e+00> : vector<16xf32>
    %554 = vector.multi_reduction <add>, %553, %cst_255 [1] : vector<16x16xf32> to vector<16xf32>
    %555 = vector.shape_cast %554 : vector<16xf32> to vector<16x1xf32>
    %cst_256 = arith.constant dense<0.000000e+00> : vector<16x32xf32>
    %556 = tpu.matmul %553, %545, %cst_256 {dimension_numbers = #tpu.dot_dimension_numbers<[1], [0], [0], [1], [0, 0, 1, 1], [], []>} : vector<16x16xf32>, vector<16x32xf32>, vector<16x32xf32> -> vector<16x32xf32>
    %557 = tpu.reciprocal %555 {approx = true} : vector<16x1xf32> -> vector<16x1xf32>
    %558 = vector.broadcast %557 : vector<16x1xf32> to vector<16x32xf32>
    %559 = arith.mulf %556, %558 : vector<16x32xf32>
    %c0_257 = arith.constant 0 : index
    %c96_258 = arith.constant 96 : index
    %560 = vector.load %arg31[%c0_257, %c96_258] : memref<16x128xf32, #tpu.memory_space<vmem>>, vector<16x32xf32>
    tpu.vector_store %arg31[%c0_257, %c96_258], %559 {strides = array<i32>} : memref<16x128xf32, #tpu.memory_space<vmem>>, vector<16x32xf32>,
    %c0_259 = arith.constant 0 : index
    %c0_260 = arith.constant 0 : index
    %561 = vector.load %arg31[%c0_259, %c0_260] : memref<16x128xf32, #tpu.memory_space<vmem>>, vector<16x128xf32>
    %c1_261 = arith.constant 1 : index
    %c0_262 = arith.constant 0 : index
    %c0_263 = arith.constant 0 : index
    %562 = vector.load %arg17[%c1_261, %c0_262, %c0_263] : memref<2x128x128xbf16, #tpu.memory_space<vmem>>, vector<1x128x128xbf16>
    %563 = vector.shape_cast %562 : vector<1x128x128xbf16> to vector<128x128xbf16>
    %c1_264 = arith.constant 1 : index
    %c0_265 = arith.constant 0 : index
    %c0_266 = arith.constant 0 : index
    %564 = vector.load %arg18[%c1_264, %c0_265, %c0_266] : memref<2x1x128xf32, #tpu.memory_space<vmem>>, vector<1x1x128xf32>
    %565 = vector.shape_cast %564 : vector<1x1x128xf32> to vector<1x128xf32>
    %566 = arith.truncf %561 : vector<16x128xf32> to vector<16x128xbf16>
    %cst_267 = arith.constant dense<0.000000e+00> : vector<16x128xf32>
    %567 = tpu.matmul %566, %563, %cst_267 {dimension_numbers = #tpu.dot_dimension_numbers<[1], [0], [0], [1], [0, 0, 1, 1], [], []>} : vector<16x128xbf16>, vector<128x128xbf16>, vector<16x128xf32> -> vector<16x128xf32>
    %568 = vector.broadcast %565 : vector<1x128xf32> to vector<16x128xf32>
    %569 = arith.addf %567, %568 : vector<16x128xf32>
    %570 = arith.addf %439, %569 : vector<16x128xf32>
    %c1_268 = arith.constant 1 : index
    %c0_269 = arith.constant 0 : index
    %c0_270 = arith.constant 0 : index
    %571 = vector.load %arg19[%c1_268, %c0_269, %c0_270] : memref<2x1x128xf32, #tpu.memory_space<vmem>>, vector<1x1x128xf32>
    %572 = vector.shape_cast %571 : vector<1x1x128xf32> to vector<1x128xf32>
    %c1_271 = arith.constant 1 : index
    %c0_272 = arith.constant 0 : index
    %c0_273 = arith.constant 0 : index
    %573 = vector.load %arg20[%c1_271, %c0_272, %c0_273] : memref<2x1x128xf32, #tpu.memory_space<vmem>>, vector<1x1x128xf32>
    %574 = vector.shape_cast %573 : vector<1x1x128xf32> to vector<1x128xf32>
    %cst_274 = arith.constant dense<0.000000e+00> : vector<16xf32>
    %575 = vector.multi_reduction <add>, %570, %cst_274 [1] : vector<16x128xf32> to vector<16xf32>
    %576 = vector.shape_cast %575 : vector<16xf32> to vector<16x1xf32>
    %cst_275 = arith.constant 1.280000e+02 : f32
    %577 = vector.broadcast %cst_275 : f32 to vector<16x1xf32>
    %578 = arith.divf %576, %577 : vector<16x1xf32>
    %579 = vector.broadcast %578 : vector<16x1xf32> to vector<16x128xf32>
    %580 = arith.subf %570, %579 : vector<16x128xf32>
    %581 = arith.mulf %580, %580 : vector<16x128xf32>
    %cst_276 = arith.constant dense<0.000000e+00> : vector<16xf32>
    %582 = vector.multi_reduction <add>, %581, %cst_276 [1] : vector<16x128xf32> to vector<16xf32>
    %583 = vector.shape_cast %582 : vector<16xf32> to vector<16x1xf32>
    %cst_277 = arith.constant 1.280000e+02 : f32
    %584 = vector.broadcast %cst_277 : f32 to vector<16x1xf32>
    %585 = arith.divf %583, %584 : vector<16x1xf32>
    %cst_278 = arith.constant 9.99999974E-6 : f32
    %586 = vector.broadcast %cst_278 : f32 to vector<16x1xf32>
    %587 = arith.addf %585, %586 : vector<16x1xf32>
    %588 = math.rsqrt %587 : vector<16x1xf32>
    %589 = vector.broadcast %588 : vector<16x1xf32> to vector<16x128xf32>
    %590 = arith.mulf %580, %589 : vector<16x128xf32>
    %591 = vector.broadcast %572 : vector<1x128xf32> to vector<16x128xf32>
    %592 = arith.mulf %590, %591 : vector<16x128xf32>
    %593 = vector.broadcast %574 : vector<1x128xf32> to vector<16x128xf32>
    %594 = arith.addf %592, %593 : vector<16x128xf32>
    %c1_279 = arith.constant 1 : index
    %c0_280 = arith.constant 0 : index
    %c0_281 = arith.constant 0 : index
    %595 = vector.load %arg21[%c1_279, %c0_280, %c0_281] : memref<2x128x256xbf16, #tpu.memory_space<vmem>>, vector<1x128x256xbf16>
    %596 = vector.shape_cast %595 : vector<1x128x256xbf16> to vector<128x256xbf16>
    %c1_282 = arith.constant 1 : index
    %c0_283 = arith.constant 0 : index
    %c0_284 = arith.constant 0 : index
    %597 = vector.load %arg22[%c1_282, %c0_283, %c0_284] : memref<2x1x256xf32, #tpu.memory_space<vmem>>, vector<1x1x256xf32>
    %598 = vector.shape_cast %597 : vector<1x1x256xf32> to vector<1x256xf32>
    %c1_285 = arith.constant 1 : index
    %c0_286 = arith.constant 0 : index
    %c0_287 = arith.constant 0 : index
    %599 = vector.load %arg23[%c1_285, %c0_286, %c0_287] : memref<2x256x128xbf16, #tpu.memory_space<vmem>>, vector<1x256x128xbf16>
    %600 = vector.shape_cast %599 : vector<1x256x128xbf16> to vector<256x128xbf16>
    %c1_288 = arith.constant 1 : index
    %c0_289 = arith.constant 0 : index
    %c0_290 = arith.constant 0 : index
    %601 = vector.load %arg24[%c1_288, %c0_289, %c0_290] : memref<2x1x128xf32, #tpu.memory_space<vmem>>, vector<1x1x128xf32>
    %602 = vector.shape_cast %601 : vector<1x1x128xf32> to vector<1x128xf32>
    %603 = arith.truncf %594 : vector<16x128xf32> to vector<16x128xbf16>
    %cst_291 = arith.constant dense<0.000000e+00> : vector<16x256xf32>
    %604 = tpu.matmul %603, %596, %cst_291 {dimension_numbers = #tpu.dot_dimension_numbers<[1], [0], [0], [1], [0, 0, 1, 1], [], []>} : vector<16x128xbf16>, vector<128x256xbf16>, vector<16x256xf32> -> vector<16x256xf32>
    %605 = vector.broadcast %598 : vector<1x256xf32> to vector<16x256xf32>
    %606 = arith.addf %604, %605 : vector<16x256xf32>
    %607 = arith.mulf %606, %606 : vector<16x256xf32>
    %608 = arith.mulf %606, %607 : vector<16x256xf32>
    %cst_292 = arith.constant 4.471500e-02 : f32
    %609 = vector.broadcast %cst_292 : f32 to vector<16x256xf32>
    %610 = arith.mulf %609, %608 : vector<16x256xf32>
    %611 = arith.addf %606, %610 : vector<16x256xf32>
    %cst_293 = arith.constant 0.797884583 : f32
    %612 = vector.broadcast %cst_293 : f32 to vector<16x256xf32>
    %613 = arith.mulf %612, %611 : vector<16x256xf32>
    %614 = math.tanh %613 : vector<16x256xf32>
    %cst_294 = arith.constant 1.000000e+00 : f32
    %615 = vector.broadcast %cst_294 : f32 to vector<16x256xf32>
    %616 = arith.addf %615, %614 : vector<16x256xf32>
    %cst_295 = arith.constant 5.000000e-01 : f32
    %617 = vector.broadcast %cst_295 : f32 to vector<16x256xf32>
    %618 = arith.mulf %617, %616 : vector<16x256xf32>
    %619 = arith.mulf %606, %618 : vector<16x256xf32>
    %620 = arith.truncf %619 : vector<16x256xf32> to vector<16x256xbf16>
    %cst_296 = arith.constant dense<0.000000e+00> : vector<16x128xf32>
    %621 = tpu.matmul %620, %600, %cst_296 {dimension_numbers = #tpu.dot_dimension_numbers<[1], [0], [0], [1], [0, 0, 1, 1], [], []>} : vector<16x256xbf16>, vector<256x128xbf16>, vector<16x128xf32> -> vector<16x128xf32>
    %622 = vector.broadcast %602 : vector<1x128xf32> to vector<16x128xf32>
    %623 = arith.addf %621, %622 : vector<16x128xf32>
    %624 = arith.addf %570, %623 : vector<16x128xf32>
    %c0_297 = arith.constant 0 : index
    %c0_298 = arith.constant 0 : index
    %625 = vector.load %arg25[%c0_297, %c0_298] : memref<1x128xf32, #tpu.memory_space<vmem>>, vector<1x128xf32>
    %c0_299 = arith.constant 0 : index
    %c0_300 = arith.constant 0 : index
    %626 = vector.load %arg26[%c0_299, %c0_300] : memref<1x128xf32, #tpu.memory_space<vmem>>, vector<1x128xf32>
    %cst_301 = arith.constant dense<0.000000e+00> : vector<16xf32>
    %627 = vector.multi_reduction <add>, %624, %cst_301 [1] : vector<16x128xf32> to vector<16xf32>
    %628 = vector.shape_cast %627 : vector<16xf32> to vector<16x1xf32>
    %cst_302 = arith.constant 1.280000e+02 : f32
    %629 = vector.broadcast %cst_302 : f32 to vector<16x1xf32>
    %630 = arith.divf %628, %629 : vector<16x1xf32>
    %631 = vector.broadcast %630 : vector<16x1xf32> to vector<16x128xf32>
    %632 = arith.subf %624, %631 : vector<16x128xf32>
    %633 = arith.mulf %632, %632 : vector<16x128xf32>
    %cst_303 = arith.constant dense<0.000000e+00> : vector<16xf32>
    %634 = vector.multi_reduction <add>, %633, %cst_303 [1] : vector<16x128xf32> to vector<16xf32>
    %635 = vector.shape_cast %634 : vector<16xf32> to vector<16x1xf32>
    %cst_304 = arith.constant 1.280000e+02 : f32
    %636 = vector.broadcast %cst_304 : f32 to vector<16x1xf32>
    %637 = arith.divf %635, %636 : vector<16x1xf32>
    %cst_305 = arith.constant 9.99999974E-6 : f32
    %638 = vector.broadcast %cst_305 : f32 to vector<16x1xf32>
    %639 = arith.addf %637, %638 : vector<16x1xf32>
    %640 = math.rsqrt %639 : vector<16x1xf32>
    %641 = vector.broadcast %640 : vector<16x1xf32> to vector<16x128xf32>
    %642 = arith.mulf %632, %641 : vector<16x128xf32>
    %643 = vector.broadcast %625 : vector<1x128xf32> to vector<16x128xf32>
    %644 = arith.mulf %642, %643 : vector<16x128xf32>
    %645 = vector.broadcast %626 : vector<1x128xf32> to vector<16x128xf32>
    %646 = arith.addf %644, %645 : vector<16x128xf32>
    %647 = arith.truncf %646 : vector<16x128xf32> to vector<16x128xbf16>
    %c0_306 = arith.constant 0 : index
    %c0_307 = arith.constant 0 : index
    %648 = vector.load %arg27[%c0_306, %c0_307] : memref<128x512xbf16, #tpu.memory_space<vmem>>, vector<128x512xbf16>
    %cst_308 = arith.constant dense<0.000000e+00> : vector<16x512xf32>
    %649 = tpu.matmul %647, %648, %cst_308 {dimension_numbers = #tpu.dot_dimension_numbers<[1], [0], [0], [1], [0, 0, 1, 1], [], []>} : vector<16x128xbf16>, vector<128x512xbf16>, vector<16x512xf32> -> vector<16x512xf32>
    %c0_309 = arith.constant 0 : index
    %c0_310 = arith.constant 0 : index
    %650 = vector.load %arg28[%c0_309, %c0_310] : memref<1x512xf32, #tpu.memory_space<vmem>>, vector<1x512xf32>
    %651 = vector.broadcast %650 : vector<1x512xf32> to vector<16x512xf32>
    %652 = arith.addf %649, %651 : vector<16x512xf32>
    %c0_311 = arith.constant 0 : index
    %c0_312 = arith.constant 0 : index
    %c0_313 = arith.constant 0 : index
    %653 = vector.load %arg4[%c0_311, %c0_312, %c0_313] : memref<1x16x1xi32, #tpu.memory_space<vmem>>, vector<1x16x1xi32>
    %654 = vector.shape_cast %653 : vector<1x16x1xi32> to vector<16x1xi32>
    %cst_314 = arith.constant dense<0xFF800000> : vector<16xf32>
    %655 = vector.multi_reduction <maximumf>, %652, %cst_314 [1] : vector<16x512xf32> to vector<16xf32>
    %656 = vector.shape_cast %655 : vector<16xf32> to vector<16x1xf32>
    %657 = vector.broadcast %656 : vector<16x1xf32> to vector<16x512xf32>
    %658 = arith.subf %652, %657 : vector<16x512xf32>
    %659 = math.exp %658 : vector<16x512xf32>
    %cst_315 = arith.constant dense<0.000000e+00> : vector<16xf32>
    %660 = vector.multi_reduction <add>, %659, %cst_315 [1] : vector<16x512xf32> to vector<16xf32>
    %661 = vector.shape_cast %660 : vector<16xf32> to vector<16x1xf32>
    %662 = math.log %661 : vector<16x1xf32>
    %663 = arith.addf %662, %656 : vector<16x1xf32>
    %664 = tpu.iota {dimensions = array<i32: 1>} : vector<16x512xi32>
    %665 = vector.broadcast %654 : vector<16x1xi32> to vector<16x512xi32>
    %666 = arith.cmpi eq, %664, %665 : vector<16x512xi32>
    %cst_316 = arith.constant 0.000000e+00 : f32
    %667 = vector.broadcast %cst_316 : f32 to vector<16x512xf32>
    %668 = arith.select %666, %652, %667 : vector<16x512xi1>, vector<16x512xf32>
    %cst_317 = arith.constant dense<0.000000e+00> : vector<16xf32>
    %669 = vector.multi_reduction <add>, %668, %cst_317 [1] : vector<16x512xf32> to vector<16xf32>
    %670 = vector.shape_cast %669 : vector<16xf32> to vector<16x1xf32>
    %c-100_i32 = arith.constant -100 : i32
    %671 = vector.broadcast %c-100_i32 : i32 to vector<16x1xi32>
    %672 = arith.cmpi ne, %654, %671 : vector<16x1xi32>
    %673 = arith.extui %672 : vector<16x1xi1> to vector<16x1xi32>
    %674 = arith.sitofp %673 : vector<16x1xi32> to vector<16x1xf32>
    %675 = arith.subf %663, %670 : vector<16x1xf32>
    %676 = arith.mulf %675, %674 : vector<16x1xf32>
    %677 = vector.shape_cast %676 : vector<16x1xf32> to vector<1x16x1xf32>
    %cst_318 = arith.constant dense<0.000000e+00> : vector<1xf32>
    %678 = vector.multi_reduction <add>, %677, %cst_318 [1, 2] : vector<1x16x1xf32> to vector<1xf32>
    %679 = vector.shape_cast %678 : vector<1xf32> to vector<1x1x1xf32>
    %680 = vector.extract %679[0, 0, 0] : f32 from vector<1x1x1xf32>
    %681 = vector.broadcast %680 : f32 to vector<1x1xf32>
    %c0_319 = arith.constant 0 : index
    %c0_320 = arith.constant 0 : index
    %c0_321 = arith.constant 0 : index
    %682 = vector.load %arg29[%c0_319, %c0_320, %c0_321] : memref<1x1x1xf32, #tpu.memory_space<vmem>>, vector<1x1x1xf32>
    %683 = vector.shape_cast %682 : vector<1x1x1xf32> to vector<1x1xf32>
    %684 = vector.shape_cast %681 : vector<1x1xf32> to vector<1x1x1xf32>
    tpu.vector_store %arg29[%c0_319, %c0_320, %c0_321], %684 {strides = array<i32>} : memref<1x1x1xf32, #tpu.memory_space<vmem>>, vector<1x1x1xf32>,
    %685 = vector.shape_cast %674 : vector<16x1xf32> to vector<1x16x1xf32>
    %cst_322 = arith.constant dense<0.000000e+00> : vector<1xf32>
    %686 = vector.multi_reduction <add>, %685, %cst_322 [1, 2] : vector<1x16x1xf32> to vector<1xf32>
    %687 = vector.shape_cast %686 : vector<1xf32> to vector<1x1x1xf32>
    %688 = vector.extract %687[0, 0, 0] : f32 from vector<1x1x1xf32>
    %689 = vector.broadcast %688 : f32 to vector<1x1xf32>
    %c0_323 = arith.constant 0 : index
    %c0_324 = arith.constant 0 : index
    %c0_325 = arith.constant 0 : index
    %690 = vector.load %arg30[%c0_323, %c0_324, %c0_325] : memref<1x1x1xf32, #tpu.memory_space<vmem>>, vector<1x1x1xf32>
    %691 = vector.shape_cast %690 : vector<1x1x1xf32> to vector<1x1xf32>
    %692 = vector.shape_cast %689 : vector<1x1xf32> to vector<1x1x1xf32>
    tpu.vector_store %arg30[%c0_323, %c0_324, %c0_325], %692 {strides = array<i32>} : memref<1x1x1xf32, #tpu.memory_space<vmem>>, vector<1x1x1xf32>,
    return
  }
  func.func @transform_0(%arg0: i32) -> (i32, i32, i32) {
    %c0_i32 = arith.constant 0 : i32
    %c0_i32_0 = arith.constant 0 : i32
    %c0_i32_1 = arith.constant 0 : i32
    return %arg0, %c0_i32, %c0_i32_0 : i32, i32, i32
  }
  func.func @transform_1(%arg0: i32) -> (i32, i32, i32) {
    %c0_i32 = arith.constant 0 : i32
    %c0_i32_0 = arith.constant 0 : i32
    %c0_i32_1 = arith.constant 0 : i32
    return %arg0, %c0_i32, %c0_i32_0 : i32, i32, i32
  }
  func.func @transform_2(%arg0: i32) -> (i32, i32, i32) {
    %c0_i32 = arith.constant 0 : i32
    %c0_i32_0 = arith.constant 0 : i32
    %c0_i32_1 = arith.constant 0 : i32
    return %arg0, %c0_i32, %c0_i32_0 : i32, i32, i32
  }
  func.func @transform_3(%arg0: i32) -> (i32, i32, i32) {
    %c0_i32 = arith.constant 0 : i32
    %c0_i32_0 = arith.constant 0 : i32
    %c0_i32_1 = arith.constant 0 : i32
    return %arg0, %c0_i32, %c0_i32_0 : i32, i32, i32
  }
  func.func @transform_4(%arg0: i32) -> (i32, i32, i32) {
    %c0_i32 = arith.constant 0 : i32
    %c0_i32_0 = arith.constant 0 : i32
    %c0_i32_1 = arith.constant 0 : i32
    %c0_i32_2 = arith.constant 0 : i32
    return %c0_i32, %c0_i32_0, %c0_i32_1 : i32, i32, i32
  }
  func.func @transform_5(%arg0: i32) -> (i32, i32, i32) {
    %c0_i32 = arith.constant 0 : i32
    %c0_i32_0 = arith.constant 0 : i32
    %c0_i32_1 = arith.constant 0 : i32
    %c0_i32_2 = arith.constant 0 : i32
    return %c0_i32, %c0_i32_0, %c0_i32_1 : i32, i32, i32
  }
  func.func @transform_6(%arg0: i32) -> (i32, i32, i32) {
    %c0_i32 = arith.constant 0 : i32
    %c0_i32_0 = arith.constant 0 : i32
    %c0_i32_1 = arith.constant 0 : i32
    %c0_i32_2 = arith.constant 0 : i32
    return %c0_i32, %c0_i32_0, %c0_i32_1 : i32, i32, i32
  }
  func.func @transform_7(%arg0: i32) -> (i32, i32, i32) {
    %c0_i32 = arith.constant 0 : i32
    %c0_i32_0 = arith.constant 0 : i32
    %c0_i32_1 = arith.constant 0 : i32
    %c0_i32_2 = arith.constant 0 : i32
    return %c0_i32, %c0_i32_0, %c0_i32_1 : i32, i32, i32
  }
  func.func @transform_8(%arg0: i32) -> (i32, i32, i32) {
    %c0_i32 = arith.constant 0 : i32
    %c0_i32_0 = arith.constant 0 : i32
    %c0_i32_1 = arith.constant 0 : i32
    %c0_i32_2 = arith.constant 0 : i32
    return %c0_i32, %c0_i32_0, %c0_i32_1 : i32, i32, i32
  }
  func.func @transform_9(%arg0: i32) -> (i32, i32, i32) {
    %c0_i32 = arith.constant 0 : i32
    %c0_i32_0 = arith.constant 0 : i32
    %c0_i32_1 = arith.constant 0 : i32
    %c0_i32_2 = arith.constant 0 : i32
    return %c0_i32, %c0_i32_0, %c0_i32_1 : i32, i32, i32
  }
  func.func @transform_10(%arg0: i32) -> (i32, i32, i32) {
    %c0_i32 = arith.constant 0 : i32
    %c0_i32_0 = arith.constant 0 : i32
    %c0_i32_1 = arith.constant 0 : i32
    %c0_i32_2 = arith.constant 0 : i32
    return %c0_i32, %c0_i32_0, %c0_i32_1 : i32, i32, i32
  }
  func.func @transform_11(%arg0: i32) -> (i32, i32, i32) {
    %c0_i32 = arith.constant 0 : i32
    %c0_i32_0 = arith.constant 0 : i32
    %c0_i32_1 = arith.constant 0 : i32
    %c0_i32_2 = arith.constant 0 : i32
    return %c0_i32, %c0_i32_0, %c0_i32_1 : i32, i32, i32
  }
  func.func @transform_12(%arg0: i32) -> (i32, i32, i32) {
    %c0_i32 = arith.constant 0 : i32
    %c0_i32_0 = arith.constant 0 : i32
    %c0_i32_1 = arith.constant 0 : i32
    %c0_i32_2 = arith.constant 0 : i32
    return %c0_i32, %c0_i32_0, %c0_i32_1 : i32, i32, i32
  }
  func.func @transform_13(%arg0: i32) -> (i32, i32, i32) {
    %c0_i32 = arith.constant 0 : i32
    %c0_i32_0 = arith.constant 0 : i32
    %c0_i32_1 = arith.constant 0 : i32
    %c0_i32_2 = arith.constant 0 : i32
    return %c0_i32, %c0_i32_0, %c0_i32_1 : i32, i32, i32
  }
  func.func @transform_14(%arg0: i32) -> (i32, i32, i32) {
    %c0_i32 = arith.constant 0 : i32
    %c0_i32_0 = arith.constant 0 : i32
    %c0_i32_1 = arith.constant 0 : i32
    %c0_i32_2 = arith.constant 0 : i32
    return %c0_i32, %c0_i32_0, %c0_i32_1 : i32, i32, i32
  }
  func.func @transform_15(%arg0: i32) -> (i32, i32, i32) {
    %c0_i32 = arith.constant 0 : i32
    %c0_i32_0 = arith.constant 0 : i32
    %c0_i32_1 = arith.constant 0 : i32
    %c0_i32_2 = arith.constant 0 : i32
    return %c0_i32, %c0_i32_0, %c0_i32_1 : i32, i32, i32
  }
  func.func @transform_16(%arg0: i32) -> (i32, i32, i32) {
    %c0_i32 = arith.constant 0 : i32
    %c0_i32_0 = arith.constant 0 : i32
    %c0_i32_1 = arith.constant 0 : i32
    %c0_i32_2 = arith.constant 0 : i32
    return %c0_i32, %c0_i32_0, %c0_i32_1 : i32, i32, i32
  }
  func.func @transform_17(%arg0: i32) -> (i32, i32, i32) {
    %c0_i32 = arith.constant 0 : i32
    %c0_i32_0 = arith.constant 0 : i32
    %c0_i32_1 = arith.constant 0 : i32
    %c0_i32_2 = arith.constant 0 : i32
    return %c0_i32, %c0_i32_0, %c0_i32_1 : i32, i32, i32
  }
  func.func @transform_18(%arg0: i32) -> (i32, i32, i32) {
    %c0_i32 = arith.constant 0 : i32
    %c0_i32_0 = arith.constant 0 : i32
    %c0_i32_1 = arith.constant 0 : i32
    %c0_i32_2 = arith.constant 0 : i32
    return %c0_i32, %c0_i32_0, %c0_i32_1 : i32, i32, i32
  }
  func.func @transform_19(%arg0: i32) -> (i32, i32, i32) {
    %c0_i32 = arith.constant 0 : i32
    %c0_i32_0 = arith.constant 0 : i32
    %c0_i32_1 = arith.constant 0 : i32
    %c0_i32_2 = arith.constant 0 : i32
    return %c0_i32, %c0_i32_0, %c0_i32_1 : i32, i32, i32
  }
  func.func @transform_20(%arg0: i32) -> (i32, i32, i32) {
    %c0_i32 = arith.constant 0 : i32
    %c0_i32_0 = arith.constant 0 : i32
    %c0_i32_1 = arith.constant 0 : i32
    %c0_i32_2 = arith.constant 0 : i32
    return %c0_i32, %c0_i32_0, %c0_i32_1 : i32, i32, i32
  }
  func.func @transform_21(%arg0: i32) -> (i32, i32, i32) {
    %c0_i32 = arith.constant 0 : i32
    %c0_i32_0 = arith.constant 0 : i32
    %c0_i32_1 = arith.constant 0 : i32
    %c0_i32_2 = arith.constant 0 : i32
    return %c0_i32, %c0_i32_0, %c0_i32_1 : i32, i32, i32
  }
  func.func @transform_22(%arg0: i32) -> (i32, i32, i32) {
    %c0_i32 = arith.constant 0 : i32
    %c0_i32_0 = arith.constant 0 : i32
    %c0_i32_1 = arith.constant 0 : i32
    %c0_i32_2 = arith.constant 0 : i32
    return %c0_i32, %c0_i32_0, %c0_i32_1 : i32, i32, i32
  }
  func.func @transform_23(%arg0: i32) -> (i32, i32, i32) {
    %c0_i32 = arith.constant 0 : i32
    %c0_i32_0 = arith.constant 0 : i32
    %c0_i32_1 = arith.constant 0 : i32
    %c0_i32_2 = arith.constant 0 : i32
    return %c0_i32, %c0_i32_0, %c0_i32_1 : i32, i32, i32
  }
  func.func @transform_24(%arg0: i32) -> (i32, i32) {
    %c0_i32 = arith.constant 0 : i32
    %c0_i32_0 = arith.constant 0 : i32
    %c0_i32_1 = arith.constant 0 : i32
    return %c0_i32, %c0_i32_0 : i32, i32
  }
  func.func @transform_25(%arg0: i32) -> (i32, i32) {
    %c0_i32 = arith.constant 0 : i32
    %c0_i32_0 = arith.constant 0 : i32
    %c0_i32_1 = arith.constant 0 : i32
    return %c0_i32, %c0_i32_0 : i32, i32
  }
  func.func @transform_26(%arg0: i32) -> (i32, i32) {
    %c0_i32 = arith.constant 0 : i32
    %c0_i32_0 = arith.constant 0 : i32
    %c0_i32_1 = arith.constant 0 : i32
    return %c0_i32, %c0_i32_0 : i32, i32
  }
  func.func @transform_27(%arg0: i32) -> (i32, i32) {
    %c0_i32 = arith.constant 0 : i32
    %c0_i32_0 = arith.constant 0 : i32
    %c0_i32_1 = arith.constant 0 : i32
    return %c0_i32, %c0_i32_0 : i32, i32
  }
  func.func @transform_28(%arg0: i32) -> (i32, i32, i32) {
    %c0_i32 = arith.constant 0 : i32
    %c0_i32_0 = arith.constant 0 : i32
    %c0_i32_1 = arith.constant 0 : i32
    return %arg0, %c0_i32, %c0_i32_0 : i32, i32, i32
  }
  func.func @transform_29(%arg0: i32) -> (i32, i32, i32) {
    %c0_i32 = arith.constant 0 : i32
    %c0_i32_0 = arith.constant 0 : i32
    %c0_i32_1 = arith.constant 0 : i32
    return %arg0, %c0_i32, %c0_i32_0 : i32, i32, i32
  }
}

module attributes {stable_mosaic.version = 11 : i64} {
  func.func @_encoder_stack_kernel(%arg0: i32, %arg1: memref<1x16x128xbf16, #tpu.memory_space<vmem>>, %arg2: memref<1x1x16xf32, #tpu.memory_space<vmem>>, %arg3: memref<2x1x128xf32, #tpu.memory_space<vmem>>, %arg4: memref<2x1x128xf32, #tpu.memory_space<vmem>>, %arg5: memref<2x128x384xbf16, #tpu.memory_space<vmem>>, %arg6: memref<2x1x384xf32, #tpu.memory_space<vmem>>, %arg7: memref<2x128x128xbf16, #tpu.memory_space<vmem>>, %arg8: memref<2x1x128xf32, #tpu.memory_space<vmem>>, %arg9: memref<2x1x128xf32, #tpu.memory_space<vmem>>, %arg10: memref<2x1x128xf32, #tpu.memory_space<vmem>>, %arg11: memref<2x128x256xbf16, #tpu.memory_space<vmem>>, %arg12: memref<2x1x256xf32, #tpu.memory_space<vmem>>, %arg13: memref<2x256x128xbf16, #tpu.memory_space<vmem>>, %arg14: memref<2x1x128xf32, #tpu.memory_space<vmem>>, %arg15: memref<1x128xf32, #tpu.memory_space<vmem>>, %arg16: memref<1x128xf32, #tpu.memory_space<vmem>>, %arg17: memref<1x16x128xbf16, #tpu.memory_space<vmem>>, %arg18: memref<16x128xf32, #tpu.memory_space<vmem>>) attributes {dimension_semantics = [#tpu.dimension_semantics<parallel>], iteration_bounds = array<i64: 2>, scalar_prefetch = 0 : i64, scratch_operands = 1 : i64, tpu.core_type = #tpu.core_type<tc>, window_params = [{transform_indices = @transform_0, window_bounds = array<i64: 1, 16, 128>}, {transform_indices = @transform_1, window_bounds = array<i64: 1, 1, 16>}, {pipeline_mode = #tpu.pipeline_mode<synchronous>, transform_indices = @transform_2, window_bounds = array<i64: 2, 1, 128>}, {pipeline_mode = #tpu.pipeline_mode<synchronous>, transform_indices = @transform_3, window_bounds = array<i64: 2, 1, 128>}, {pipeline_mode = #tpu.pipeline_mode<synchronous>, transform_indices = @transform_4, window_bounds = array<i64: 2, 128, 384>}, {pipeline_mode = #tpu.pipeline_mode<synchronous>, transform_indices = @transform_5, window_bounds = array<i64: 2, 1, 384>}, {pipeline_mode = #tpu.pipeline_mode<synchronous>, transform_indices = @transform_6, window_bounds = array<i64: 2, 128, 128>}, {pipeline_mode = #tpu.pipeline_mode<synchronous>, transform_indices = @transform_7, window_bounds = array<i64: 2, 1, 128>}, {pipeline_mode = #tpu.pipeline_mode<synchronous>, transform_indices = @transform_8, window_bounds = array<i64: 2, 1, 128>}, {pipeline_mode = #tpu.pipeline_mode<synchronous>, transform_indices = @transform_9, window_bounds = array<i64: 2, 1, 128>}, {pipeline_mode = #tpu.pipeline_mode<synchronous>, transform_indices = @transform_10, window_bounds = array<i64: 2, 128, 256>}, {pipeline_mode = #tpu.pipeline_mode<synchronous>, transform_indices = @transform_11, window_bounds = array<i64: 2, 1, 256>}, {pipeline_mode = #tpu.pipeline_mode<synchronous>, transform_indices = @transform_12, window_bounds = array<i64: 2, 256, 128>}, {pipeline_mode = #tpu.pipeline_mode<synchronous>, transform_indices = @transform_13, window_bounds = array<i64: 2, 1, 128>}, {pipeline_mode = #tpu.pipeline_mode<synchronous>, transform_indices = @transform_14, window_bounds = array<i64: 1, 128>}, {pipeline_mode = #tpu.pipeline_mode<synchronous>, transform_indices = @transform_15, window_bounds = array<i64: 1, 128>}, {transform_indices = @transform_16, window_bounds = array<i64: 1, 16, 128>}]} {
    %c0 = arith.constant 0 : index
    %c0_0 = arith.constant 0 : index
    %c0_1 = arith.constant 0 : index
    %0 = vector.load %arg1[%c0, %c0_0, %c0_1] : memref<1x16x128xbf16, #tpu.memory_space<vmem>>, vector<1x16x128xbf16>
    %1 = vector.shape_cast %0 : vector<1x16x128xbf16> to vector<16x128xbf16>
    %2 = arith.extf %1 : vector<16x128xbf16> to vector<16x128xf32>
    %c0_2 = arith.constant 0 : index
    %c0_3 = arith.constant 0 : index
    %c0_4 = arith.constant 0 : index
    %3 = vector.load %arg2[%c0_2, %c0_3, %c0_4] : memref<1x1x16xf32, #tpu.memory_space<vmem>>, vector<1x1x16xf32>
    %4 = vector.shape_cast %3 : vector<1x1x16xf32> to vector<1x16xf32>
    %c0_5 = arith.constant 0 : index
    %c0_6 = arith.constant 0 : index
    %c0_7 = arith.constant 0 : index
    %5 = vector.load %arg3[%c0_5, %c0_6, %c0_7] : memref<2x1x128xf32, #tpu.memory_space<vmem>>, vector<1x1x128xf32>
    %6 = vector.shape_cast %5 : vector<1x1x128xf32> to vector<1x128xf32>
    %c0_8 = arith.constant 0 : index
    %c0_9 = arith.constant 0 : index
    %c0_10 = arith.constant 0 : index
    %7 = vector.load %arg4[%c0_8, %c0_9, %c0_10] : memref<2x1x128xf32, #tpu.memory_space<vmem>>, vector<1x1x128xf32>
    %8 = vector.shape_cast %7 : vector<1x1x128xf32> to vector<1x128xf32>
    %cst = arith.constant dense<0.000000e+00> : vector<16xf32>
    %9 = vector.multi_reduction <add>, %2, %cst [1] : vector<16x128xf32> to vector<16xf32>
    %10 = vector.shape_cast %9 : vector<16xf32> to vector<16x1xf32>
    %cst_11 = arith.constant 1.280000e+02 : f32
    %11 = vector.broadcast %cst_11 : f32 to vector<16x1xf32>
    %12 = arith.divf %10, %11 : vector<16x1xf32>
    %13 = vector.broadcast %12 : vector<16x1xf32> to vector<16x128xf32>
    %14 = arith.subf %2, %13 : vector<16x128xf32>
    %15 = arith.mulf %14, %14 : vector<16x128xf32>
    %cst_12 = arith.constant dense<0.000000e+00> : vector<16xf32>
    %16 = vector.multi_reduction <add>, %15, %cst_12 [1] : vector<16x128xf32> to vector<16xf32>
    %17 = vector.shape_cast %16 : vector<16xf32> to vector<16x1xf32>
    %cst_13 = arith.constant 1.280000e+02 : f32
    %18 = vector.broadcast %cst_13 : f32 to vector<16x1xf32>
    %19 = arith.divf %17, %18 : vector<16x1xf32>
    %cst_14 = arith.constant 9.99999974E-6 : f32
    %20 = vector.broadcast %cst_14 : f32 to vector<16x1xf32>
    %21 = arith.addf %19, %20 : vector<16x1xf32>
    %22 = math.rsqrt %21 : vector<16x1xf32>
    %23 = vector.broadcast %22 : vector<16x1xf32> to vector<16x128xf32>
    %24 = arith.mulf %14, %23 : vector<16x128xf32>
    %25 = vector.broadcast %6 : vector<1x128xf32> to vector<16x128xf32>
    %26 = arith.mulf %24, %25 : vector<16x128xf32>
    %27 = vector.broadcast %8 : vector<1x128xf32> to vector<16x128xf32>
    %28 = arith.addf %26, %27 : vector<16x128xf32>
    %c0_15 = arith.constant 0 : index
    %c0_16 = arith.constant 0 : index
    %c0_17 = arith.constant 0 : index
    %29 = vector.load %arg5[%c0_15, %c0_16, %c0_17] : memref<2x128x384xbf16, #tpu.memory_space<vmem>>, vector<1x128x384xbf16>
    %30 = vector.shape_cast %29 : vector<1x128x384xbf16> to vector<128x384xbf16>
    %c0_18 = arith.constant 0 : index
    %c0_19 = arith.constant 0 : index
    %c0_20 = arith.constant 0 : index
    %31 = vector.load %arg6[%c0_18, %c0_19, %c0_20] : memref<2x1x384xf32, #tpu.memory_space<vmem>>, vector<1x1x384xf32>
    %32 = vector.shape_cast %31 : vector<1x1x384xf32> to vector<1x384xf32>
    %33 = arith.truncf %28 : vector<16x128xf32> to vector<16x128xbf16>
    %cst_21 = arith.constant dense<0.000000e+00> : vector<16x384xf32>
    %34 = tpu.matmul %33, %30, %cst_21 {dimension_numbers = #tpu.dot_dimension_numbers<[1], [0], [0], [1], [0, 0, 1, 1], [], []>} : vector<16x128xbf16>, vector<128x384xbf16>, vector<16x384xf32> -> vector<16x384xf32>
    %35 = vector.broadcast %32 : vector<1x384xf32> to vector<16x384xf32>
    %36 = arith.addf %34, %35 : vector<16x384xf32>
    %37 = vector.extract_strided_slice %36 {offsets = [0, 0], sizes = [16, 128], strides = [1, 1]} : vector<16x384xf32> to vector<16x128xf32>
    %38 = vector.extract_strided_slice %36 {offsets = [0, 128], sizes = [16, 128], strides = [1, 1]} : vector<16x384xf32> to vector<16x128xf32>
    %39 = vector.extract_strided_slice %36 {offsets = [0, 256], sizes = [16, 128], strides = [1, 1]} : vector<16x384xf32> to vector<16x128xf32>
    %40 = vector.extract_strided_slice %37 {offsets = [0, 0], sizes = [16, 32], strides = [1, 1]} : vector<16x128xf32> to vector<16x32xf32>
    %cst_22 = arith.constant 0.176776692 : f32
    %41 = vector.broadcast %cst_22 : f32 to vector<16x32xf32>
    %42 = arith.mulf %40, %41 : vector<16x32xf32>
    %43 = vector.extract_strided_slice %38 {offsets = [0, 0], sizes = [16, 32], strides = [1, 1]} : vector<16x128xf32> to vector<16x32xf32>
    %44 = vector.extract_strided_slice %39 {offsets = [0, 0], sizes = [16, 32], strides = [1, 1]} : vector<16x128xf32> to vector<16x32xf32>
    %cst_23 = arith.constant dense<0.000000e+00> : vector<16x16xf32>
    %45 = tpu.matmul %42, %43, %cst_23 {dimension_numbers = #tpu.dot_dimension_numbers<[1], [1], [0], [0], [0, 0, 1, 0], [], []>} : vector<16x32xf32>, vector<16x32xf32>, vector<16x16xf32> -> vector<16x16xf32>
    %46 = vector.broadcast %4 : vector<1x16xf32> to vector<16x16xf32>
    %47 = arith.addf %45, %46 : vector<16x16xf32>
    %cst_24 = arith.constant dense<0xFF800000> : vector<16xf32>
    %48 = vector.multi_reduction <maximumf>, %47, %cst_24 [1] : vector<16x16xf32> to vector<16xf32>
    %49 = vector.shape_cast %48 : vector<16xf32> to vector<16x1xf32>
    %50 = vector.broadcast %49 : vector<16x1xf32> to vector<16x16xf32>
    %51 = arith.subf %47, %50 : vector<16x16xf32>
    %52 = math.exp %51 : vector<16x16xf32>
    %cst_25 = arith.constant dense<0.000000e+00> : vector<16xf32>
    %53 = vector.multi_reduction <add>, %52, %cst_25 [1] : vector<16x16xf32> to vector<16xf32>
    %54 = vector.shape_cast %53 : vector<16xf32> to vector<16x1xf32>
    %cst_26 = arith.constant dense<0.000000e+00> : vector<16x32xf32>
    %55 = tpu.matmul %52, %44, %cst_26 {dimension_numbers = #tpu.dot_dimension_numbers<[1], [0], [0], [1], [0, 0, 1, 1], [], []>} : vector<16x16xf32>, vector<16x32xf32>, vector<16x32xf32> -> vector<16x32xf32>
    %56 = tpu.reciprocal %54 {approx = true} : vector<16x1xf32> -> vector<16x1xf32>
    %57 = vector.broadcast %56 : vector<16x1xf32> to vector<16x32xf32>
    %58 = arith.mulf %55, %57 : vector<16x32xf32>
    %c0_27 = arith.constant 0 : index
    %c0_28 = arith.constant 0 : index
    %59 = vector.load %arg18[%c0_27, %c0_28] : memref<16x128xf32, #tpu.memory_space<vmem>>, vector<16x32xf32>
    tpu.vector_store %arg18[%c0_27, %c0_28], %58 {strides = array<i32>} : memref<16x128xf32, #tpu.memory_space<vmem>>, vector<16x32xf32>,
    %60 = vector.extract_strided_slice %37 {offsets = [0, 32], sizes = [16, 32], strides = [1, 1]} : vector<16x128xf32> to vector<16x32xf32>
    %cst_29 = arith.constant 0.176776692 : f32
    %61 = vector.broadcast %cst_29 : f32 to vector<16x32xf32>
    %62 = arith.mulf %60, %61 : vector<16x32xf32>
    %63 = vector.extract_strided_slice %38 {offsets = [0, 32], sizes = [16, 32], strides = [1, 1]} : vector<16x128xf32> to vector<16x32xf32>
    %64 = vector.extract_strided_slice %39 {offsets = [0, 32], sizes = [16, 32], strides = [1, 1]} : vector<16x128xf32> to vector<16x32xf32>
    %cst_30 = arith.constant dense<0.000000e+00> : vector<16x16xf32>
    %65 = tpu.matmul %62, %63, %cst_30 {dimension_numbers = #tpu.dot_dimension_numbers<[1], [1], [0], [0], [0, 0, 1, 0], [], []>} : vector<16x32xf32>, vector<16x32xf32>, vector<16x16xf32> -> vector<16x16xf32>
    %66 = vector.broadcast %4 : vector<1x16xf32> to vector<16x16xf32>
    %67 = arith.addf %65, %66 : vector<16x16xf32>
    %cst_31 = arith.constant dense<0xFF800000> : vector<16xf32>
    %68 = vector.multi_reduction <maximumf>, %67, %cst_31 [1] : vector<16x16xf32> to vector<16xf32>
    %69 = vector.shape_cast %68 : vector<16xf32> to vector<16x1xf32>
    %70 = vector.broadcast %69 : vector<16x1xf32> to vector<16x16xf32>
    %71 = arith.subf %67, %70 : vector<16x16xf32>
    %72 = math.exp %71 : vector<16x16xf32>
    %cst_32 = arith.constant dense<0.000000e+00> : vector<16xf32>
    %73 = vector.multi_reduction <add>, %72, %cst_32 [1] : vector<16x16xf32> to vector<16xf32>
    %74 = vector.shape_cast %73 : vector<16xf32> to vector<16x1xf32>
    %cst_33 = arith.constant dense<0.000000e+00> : vector<16x32xf32>
    %75 = tpu.matmul %72, %64, %cst_33 {dimension_numbers = #tpu.dot_dimension_numbers<[1], [0], [0], [1], [0, 0, 1, 1], [], []>} : vector<16x16xf32>, vector<16x32xf32>, vector<16x32xf32> -> vector<16x32xf32>
    %76 = tpu.reciprocal %74 {approx = true} : vector<16x1xf32> -> vector<16x1xf32>
    %77 = vector.broadcast %76 : vector<16x1xf32> to vector<16x32xf32>
    %78 = arith.mulf %75, %77 : vector<16x32xf32>
    %c0_34 = arith.constant 0 : index
    %c32 = arith.constant 32 : index
    %79 = vector.load %arg18[%c0_34, %c32] : memref<16x128xf32, #tpu.memory_space<vmem>>, vector<16x32xf32>
    tpu.vector_store %arg18[%c0_34, %c32], %78 {strides = array<i32>} : memref<16x128xf32, #tpu.memory_space<vmem>>, vector<16x32xf32>,
    %80 = vector.extract_strided_slice %37 {offsets = [0, 64], sizes = [16, 32], strides = [1, 1]} : vector<16x128xf32> to vector<16x32xf32>
    %cst_35 = arith.constant 0.176776692 : f32
    %81 = vector.broadcast %cst_35 : f32 to vector<16x32xf32>
    %82 = arith.mulf %80, %81 : vector<16x32xf32>
    %83 = vector.extract_strided_slice %38 {offsets = [0, 64], sizes = [16, 32], strides = [1, 1]} : vector<16x128xf32> to vector<16x32xf32>
    %84 = vector.extract_strided_slice %39 {offsets = [0, 64], sizes = [16, 32], strides = [1, 1]} : vector<16x128xf32> to vector<16x32xf32>
    %cst_36 = arith.constant dense<0.000000e+00> : vector<16x16xf32>
    %85 = tpu.matmul %82, %83, %cst_36 {dimension_numbers = #tpu.dot_dimension_numbers<[1], [1], [0], [0], [0, 0, 1, 0], [], []>} : vector<16x32xf32>, vector<16x32xf32>, vector<16x16xf32> -> vector<16x16xf32>
    %86 = vector.broadcast %4 : vector<1x16xf32> to vector<16x16xf32>
    %87 = arith.addf %85, %86 : vector<16x16xf32>
    %cst_37 = arith.constant dense<0xFF800000> : vector<16xf32>
    %88 = vector.multi_reduction <maximumf>, %87, %cst_37 [1] : vector<16x16xf32> to vector<16xf32>
    %89 = vector.shape_cast %88 : vector<16xf32> to vector<16x1xf32>
    %90 = vector.broadcast %89 : vector<16x1xf32> to vector<16x16xf32>
    %91 = arith.subf %87, %90 : vector<16x16xf32>
    %92 = math.exp %91 : vector<16x16xf32>
    %cst_38 = arith.constant dense<0.000000e+00> : vector<16xf32>
    %93 = vector.multi_reduction <add>, %92, %cst_38 [1] : vector<16x16xf32> to vector<16xf32>
    %94 = vector.shape_cast %93 : vector<16xf32> to vector<16x1xf32>
    %cst_39 = arith.constant dense<0.000000e+00> : vector<16x32xf32>
    %95 = tpu.matmul %92, %84, %cst_39 {dimension_numbers = #tpu.dot_dimension_numbers<[1], [0], [0], [1], [0, 0, 1, 1], [], []>} : vector<16x16xf32>, vector<16x32xf32>, vector<16x32xf32> -> vector<16x32xf32>
    %96 = tpu.reciprocal %94 {approx = true} : vector<16x1xf32> -> vector<16x1xf32>
    %97 = vector.broadcast %96 : vector<16x1xf32> to vector<16x32xf32>
    %98 = arith.mulf %95, %97 : vector<16x32xf32>
    %c0_40 = arith.constant 0 : index
    %c64 = arith.constant 64 : index
    %99 = vector.load %arg18[%c0_40, %c64] : memref<16x128xf32, #tpu.memory_space<vmem>>, vector<16x32xf32>
    tpu.vector_store %arg18[%c0_40, %c64], %98 {strides = array<i32>} : memref<16x128xf32, #tpu.memory_space<vmem>>, vector<16x32xf32>,
    %100 = vector.extract_strided_slice %37 {offsets = [0, 96], sizes = [16, 32], strides = [1, 1]} : vector<16x128xf32> to vector<16x32xf32>
    %cst_41 = arith.constant 0.176776692 : f32
    %101 = vector.broadcast %cst_41 : f32 to vector<16x32xf32>
    %102 = arith.mulf %100, %101 : vector<16x32xf32>
    %103 = vector.extract_strided_slice %38 {offsets = [0, 96], sizes = [16, 32], strides = [1, 1]} : vector<16x128xf32> to vector<16x32xf32>
    %104 = vector.extract_strided_slice %39 {offsets = [0, 96], sizes = [16, 32], strides = [1, 1]} : vector<16x128xf32> to vector<16x32xf32>
    %cst_42 = arith.constant dense<0.000000e+00> : vector<16x16xf32>
    %105 = tpu.matmul %102, %103, %cst_42 {dimension_numbers = #tpu.dot_dimension_numbers<[1], [1], [0], [0], [0, 0, 1, 0], [], []>} : vector<16x32xf32>, vector<16x32xf32>, vector<16x16xf32> -> vector<16x16xf32>
    %106 = vector.broadcast %4 : vector<1x16xf32> to vector<16x16xf32>
    %107 = arith.addf %105, %106 : vector<16x16xf32>
    %cst_43 = arith.constant dense<0xFF800000> : vector<16xf32>
    %108 = vector.multi_reduction <maximumf>, %107, %cst_43 [1] : vector<16x16xf32> to vector<16xf32>
    %109 = vector.shape_cast %108 : vector<16xf32> to vector<16x1xf32>
    %110 = vector.broadcast %109 : vector<16x1xf32> to vector<16x16xf32>
    %111 = arith.subf %107, %110 : vector<16x16xf32>
    %112 = math.exp %111 : vector<16x16xf32>
    %cst_44 = arith.constant dense<0.000000e+00> : vector<16xf32>
    %113 = vector.multi_reduction <add>, %112, %cst_44 [1] : vector<16x16xf32> to vector<16xf32>
    %114 = vector.shape_cast %113 : vector<16xf32> to vector<16x1xf32>
    %cst_45 = arith.constant dense<0.000000e+00> : vector<16x32xf32>
    %115 = tpu.matmul %112, %104, %cst_45 {dimension_numbers = #tpu.dot_dimension_numbers<[1], [0], [0], [1], [0, 0, 1, 1], [], []>} : vector<16x16xf32>, vector<16x32xf32>, vector<16x32xf32> -> vector<16x32xf32>
    %116 = tpu.reciprocal %114 {approx = true} : vector<16x1xf32> -> vector<16x1xf32>
    %117 = vector.broadcast %116 : vector<16x1xf32> to vector<16x32xf32>
    %118 = arith.mulf %115, %117 : vector<16x32xf32>
    %c0_46 = arith.constant 0 : index
    %c96 = arith.constant 96 : index
    %119 = vector.load %arg18[%c0_46, %c96] : memref<16x128xf32, #tpu.memory_space<vmem>>, vector<16x32xf32>
    tpu.vector_store %arg18[%c0_46, %c96], %118 {strides = array<i32>} : memref<16x128xf32, #tpu.memory_space<vmem>>, vector<16x32xf32>,
    %c0_47 = arith.constant 0 : index
    %c0_48 = arith.constant 0 : index
    %120 = vector.load %arg18[%c0_47, %c0_48] : memref<16x128xf32, #tpu.memory_space<vmem>>, vector<16x128xf32>
    %c0_49 = arith.constant 0 : index
    %c0_50 = arith.constant 0 : index
    %c0_51 = arith.constant 0 : index
    %121 = vector.load %arg7[%c0_49, %c0_50, %c0_51] : memref<2x128x128xbf16, #tpu.memory_space<vmem>>, vector<1x128x128xbf16>
    %122 = vector.shape_cast %121 : vector<1x128x128xbf16> to vector<128x128xbf16>
    %c0_52 = arith.constant 0 : index
    %c0_53 = arith.constant 0 : index
    %c0_54 = arith.constant 0 : index
    %123 = vector.load %arg8[%c0_52, %c0_53, %c0_54] : memref<2x1x128xf32, #tpu.memory_space<vmem>>, vector<1x1x128xf32>
    %124 = vector.shape_cast %123 : vector<1x1x128xf32> to vector<1x128xf32>
    %125 = arith.truncf %120 : vector<16x128xf32> to vector<16x128xbf16>
    %cst_55 = arith.constant dense<0.000000e+00> : vector<16x128xf32>
    %126 = tpu.matmul %125, %122, %cst_55 {dimension_numbers = #tpu.dot_dimension_numbers<[1], [0], [0], [1], [0, 0, 1, 1], [], []>} : vector<16x128xbf16>, vector<128x128xbf16>, vector<16x128xf32> -> vector<16x128xf32>
    %127 = vector.broadcast %124 : vector<1x128xf32> to vector<16x128xf32>
    %128 = arith.addf %126, %127 : vector<16x128xf32>
    %129 = arith.addf %2, %128 : vector<16x128xf32>
    %c0_56 = arith.constant 0 : index
    %c0_57 = arith.constant 0 : index
    %c0_58 = arith.constant 0 : index
    %130 = vector.load %arg9[%c0_56, %c0_57, %c0_58] : memref<2x1x128xf32, #tpu.memory_space<vmem>>, vector<1x1x128xf32>
    %131 = vector.shape_cast %130 : vector<1x1x128xf32> to vector<1x128xf32>
    %c0_59 = arith.constant 0 : index
    %c0_60 = arith.constant 0 : index
    %c0_61 = arith.constant 0 : index
    %132 = vector.load %arg10[%c0_59, %c0_60, %c0_61] : memref<2x1x128xf32, #tpu.memory_space<vmem>>, vector<1x1x128xf32>
    %133 = vector.shape_cast %132 : vector<1x1x128xf32> to vector<1x128xf32>
    %cst_62 = arith.constant dense<0.000000e+00> : vector<16xf32>
    %134 = vector.multi_reduction <add>, %129, %cst_62 [1] : vector<16x128xf32> to vector<16xf32>
    %135 = vector.shape_cast %134 : vector<16xf32> to vector<16x1xf32>
    %cst_63 = arith.constant 1.280000e+02 : f32
    %136 = vector.broadcast %cst_63 : f32 to vector<16x1xf32>
    %137 = arith.divf %135, %136 : vector<16x1xf32>
    %138 = vector.broadcast %137 : vector<16x1xf32> to vector<16x128xf32>
    %139 = arith.subf %129, %138 : vector<16x128xf32>
    %140 = arith.mulf %139, %139 : vector<16x128xf32>
    %cst_64 = arith.constant dense<0.000000e+00> : vector<16xf32>
    %141 = vector.multi_reduction <add>, %140, %cst_64 [1] : vector<16x128xf32> to vector<16xf32>
    %142 = vector.shape_cast %141 : vector<16xf32> to vector<16x1xf32>
    %cst_65 = arith.constant 1.280000e+02 : f32
    %143 = vector.broadcast %cst_65 : f32 to vector<16x1xf32>
    %144 = arith.divf %142, %143 : vector<16x1xf32>
    %cst_66 = arith.constant 9.99999974E-6 : f32
    %145 = vector.broadcast %cst_66 : f32 to vector<16x1xf32>
    %146 = arith.addf %144, %145 : vector<16x1xf32>
    %147 = math.rsqrt %146 : vector<16x1xf32>
    %148 = vector.broadcast %147 : vector<16x1xf32> to vector<16x128xf32>
    %149 = arith.mulf %139, %148 : vector<16x128xf32>
    %150 = vector.broadcast %131 : vector<1x128xf32> to vector<16x128xf32>
    %151 = arith.mulf %149, %150 : vector<16x128xf32>
    %152 = vector.broadcast %133 : vector<1x128xf32> to vector<16x128xf32>
    %153 = arith.addf %151, %152 : vector<16x128xf32>
    %c0_67 = arith.constant 0 : index
    %c0_68 = arith.constant 0 : index
    %c0_69 = arith.constant 0 : index
    %154 = vector.load %arg11[%c0_67, %c0_68, %c0_69] : memref<2x128x256xbf16, #tpu.memory_space<vmem>>, vector<1x128x256xbf16>
    %155 = vector.shape_cast %154 : vector<1x128x256xbf16> to vector<128x256xbf16>
    %c0_70 = arith.constant 0 : index
    %c0_71 = arith.constant 0 : index
    %c0_72 = arith.constant 0 : index
    %156 = vector.load %arg12[%c0_70, %c0_71, %c0_72] : memref<2x1x256xf32, #tpu.memory_space<vmem>>, vector<1x1x256xf32>
    %157 = vector.shape_cast %156 : vector<1x1x256xf32> to vector<1x256xf32>
    %c0_73 = arith.constant 0 : index
    %c0_74 = arith.constant 0 : index
    %c0_75 = arith.constant 0 : index
    %158 = vector.load %arg13[%c0_73, %c0_74, %c0_75] : memref<2x256x128xbf16, #tpu.memory_space<vmem>>, vector<1x256x128xbf16>
    %159 = vector.shape_cast %158 : vector<1x256x128xbf16> to vector<256x128xbf16>
    %c0_76 = arith.constant 0 : index
    %c0_77 = arith.constant 0 : index
    %c0_78 = arith.constant 0 : index
    %160 = vector.load %arg14[%c0_76, %c0_77, %c0_78] : memref<2x1x128xf32, #tpu.memory_space<vmem>>, vector<1x1x128xf32>
    %161 = vector.shape_cast %160 : vector<1x1x128xf32> to vector<1x128xf32>
    %162 = arith.truncf %153 : vector<16x128xf32> to vector<16x128xbf16>
    %cst_79 = arith.constant dense<0.000000e+00> : vector<16x256xf32>
    %163 = tpu.matmul %162, %155, %cst_79 {dimension_numbers = #tpu.dot_dimension_numbers<[1], [0], [0], [1], [0, 0, 1, 1], [], []>} : vector<16x128xbf16>, vector<128x256xbf16>, vector<16x256xf32> -> vector<16x256xf32>
    %164 = vector.broadcast %157 : vector<1x256xf32> to vector<16x256xf32>
    %165 = arith.addf %163, %164 : vector<16x256xf32>
    %166 = arith.mulf %165, %165 : vector<16x256xf32>
    %167 = arith.mulf %165, %166 : vector<16x256xf32>
    %cst_80 = arith.constant 4.471500e-02 : f32
    %168 = vector.broadcast %cst_80 : f32 to vector<16x256xf32>
    %169 = arith.mulf %168, %167 : vector<16x256xf32>
    %170 = arith.addf %165, %169 : vector<16x256xf32>
    %cst_81 = arith.constant 0.797884583 : f32
    %171 = vector.broadcast %cst_81 : f32 to vector<16x256xf32>
    %172 = arith.mulf %171, %170 : vector<16x256xf32>
    %173 = math.tanh %172 : vector<16x256xf32>
    %cst_82 = arith.constant 1.000000e+00 : f32
    %174 = vector.broadcast %cst_82 : f32 to vector<16x256xf32>
    %175 = arith.addf %174, %173 : vector<16x256xf32>
    %cst_83 = arith.constant 5.000000e-01 : f32
    %176 = vector.broadcast %cst_83 : f32 to vector<16x256xf32>
    %177 = arith.mulf %176, %175 : vector<16x256xf32>
    %178 = arith.mulf %165, %177 : vector<16x256xf32>
    %179 = arith.truncf %178 : vector<16x256xf32> to vector<16x256xbf16>
    %cst_84 = arith.constant dense<0.000000e+00> : vector<16x128xf32>
    %180 = tpu.matmul %179, %159, %cst_84 {dimension_numbers = #tpu.dot_dimension_numbers<[1], [0], [0], [1], [0, 0, 1, 1], [], []>} : vector<16x256xbf16>, vector<256x128xbf16>, vector<16x128xf32> -> vector<16x128xf32>
    %181 = vector.broadcast %161 : vector<1x128xf32> to vector<16x128xf32>
    %182 = arith.addf %180, %181 : vector<16x128xf32>
    %183 = arith.addf %129, %182 : vector<16x128xf32>
    %c1 = arith.constant 1 : index
    %c0_85 = arith.constant 0 : index
    %c0_86 = arith.constant 0 : index
    %184 = vector.load %arg3[%c1, %c0_85, %c0_86] : memref<2x1x128xf32, #tpu.memory_space<vmem>>, vector<1x1x128xf32>
    %185 = vector.shape_cast %184 : vector<1x1x128xf32> to vector<1x128xf32>
    %c1_87 = arith.constant 1 : index
    %c0_88 = arith.constant 0 : index
    %c0_89 = arith.constant 0 : index
    %186 = vector.load %arg4[%c1_87, %c0_88, %c0_89] : memref<2x1x128xf32, #tpu.memory_space<vmem>>, vector<1x1x128xf32>
    %187 = vector.shape_cast %186 : vector<1x1x128xf32> to vector<1x128xf32>
    %cst_90 = arith.constant dense<0.000000e+00> : vector<16xf32>
    %188 = vector.multi_reduction <add>, %183, %cst_90 [1] : vector<16x128xf32> to vector<16xf32>
    %189 = vector.shape_cast %188 : vector<16xf32> to vector<16x1xf32>
    %cst_91 = arith.constant 1.280000e+02 : f32
    %190 = vector.broadcast %cst_91 : f32 to vector<16x1xf32>
    %191 = arith.divf %189, %190 : vector<16x1xf32>
    %192 = vector.broadcast %191 : vector<16x1xf32> to vector<16x128xf32>
    %193 = arith.subf %183, %192 : vector<16x128xf32>
    %194 = arith.mulf %193, %193 : vector<16x128xf32>
    %cst_92 = arith.constant dense<0.000000e+00> : vector<16xf32>
    %195 = vector.multi_reduction <add>, %194, %cst_92 [1] : vector<16x128xf32> to vector<16xf32>
    %196 = vector.shape_cast %195 : vector<16xf32> to vector<16x1xf32>
    %cst_93 = arith.constant 1.280000e+02 : f32
    %197 = vector.broadcast %cst_93 : f32 to vector<16x1xf32>
    %198 = arith.divf %196, %197 : vector<16x1xf32>
    %cst_94 = arith.constant 9.99999974E-6 : f32
    %199 = vector.broadcast %cst_94 : f32 to vector<16x1xf32>
    %200 = arith.addf %198, %199 : vector<16x1xf32>
    %201 = math.rsqrt %200 : vector<16x1xf32>
    %202 = vector.broadcast %201 : vector<16x1xf32> to vector<16x128xf32>
    %203 = arith.mulf %193, %202 : vector<16x128xf32>
    %204 = vector.broadcast %185 : vector<1x128xf32> to vector<16x128xf32>
    %205 = arith.mulf %203, %204 : vector<16x128xf32>
    %206 = vector.broadcast %187 : vector<1x128xf32> to vector<16x128xf32>
    %207 = arith.addf %205, %206 : vector<16x128xf32>
    %c1_95 = arith.constant 1 : index
    %c0_96 = arith.constant 0 : index
    %c0_97 = arith.constant 0 : index
    %208 = vector.load %arg5[%c1_95, %c0_96, %c0_97] : memref<2x128x384xbf16, #tpu.memory_space<vmem>>, vector<1x128x384xbf16>
    %209 = vector.shape_cast %208 : vector<1x128x384xbf16> to vector<128x384xbf16>
    %c1_98 = arith.constant 1 : index
    %c0_99 = arith.constant 0 : index
    %c0_100 = arith.constant 0 : index
    %210 = vector.load %arg6[%c1_98, %c0_99, %c0_100] : memref<2x1x384xf32, #tpu.memory_space<vmem>>, vector<1x1x384xf32>
    %211 = vector.shape_cast %210 : vector<1x1x384xf32> to vector<1x384xf32>
    %212 = arith.truncf %207 : vector<16x128xf32> to vector<16x128xbf16>
    %cst_101 = arith.constant dense<0.000000e+00> : vector<16x384xf32>
    %213 = tpu.matmul %212, %209, %cst_101 {dimension_numbers = #tpu.dot_dimension_numbers<[1], [0], [0], [1], [0, 0, 1, 1], [], []>} : vector<16x128xbf16>, vector<128x384xbf16>, vector<16x384xf32> -> vector<16x384xf32>
    %214 = vector.broadcast %211 : vector<1x384xf32> to vector<16x384xf32>
    %215 = arith.addf %213, %214 : vector<16x384xf32>
    %216 = vector.extract_strided_slice %215 {offsets = [0, 0], sizes = [16, 128], strides = [1, 1]} : vector<16x384xf32> to vector<16x128xf32>
    %217 = vector.extract_strided_slice %215 {offsets = [0, 128], sizes = [16, 128], strides = [1, 1]} : vector<16x384xf32> to vector<16x128xf32>
    %218 = vector.extract_strided_slice %215 {offsets = [0, 256], sizes = [16, 128], strides = [1, 1]} : vector<16x384xf32> to vector<16x128xf32>
    %219 = vector.extract_strided_slice %216 {offsets = [0, 0], sizes = [16, 32], strides = [1, 1]} : vector<16x128xf32> to vector<16x32xf32>
    %cst_102 = arith.constant 0.176776692 : f32
    %220 = vector.broadcast %cst_102 : f32 to vector<16x32xf32>
    %221 = arith.mulf %219, %220 : vector<16x32xf32>
    %222 = vector.extract_strided_slice %217 {offsets = [0, 0], sizes = [16, 32], strides = [1, 1]} : vector<16x128xf32> to vector<16x32xf32>
    %223 = vector.extract_strided_slice %218 {offsets = [0, 0], sizes = [16, 32], strides = [1, 1]} : vector<16x128xf32> to vector<16x32xf32>
    %cst_103 = arith.constant dense<0.000000e+00> : vector<16x16xf32>
    %224 = tpu.matmul %221, %222, %cst_103 {dimension_numbers = #tpu.dot_dimension_numbers<[1], [1], [0], [0], [0, 0, 1, 0], [], []>} : vector<16x32xf32>, vector<16x32xf32>, vector<16x16xf32> -> vector<16x16xf32>
    %225 = vector.broadcast %4 : vector<1x16xf32> to vector<16x16xf32>
    %226 = arith.addf %224, %225 : vector<16x16xf32>
    %cst_104 = arith.constant dense<0xFF800000> : vector<16xf32>
    %227 = vector.multi_reduction <maximumf>, %226, %cst_104 [1] : vector<16x16xf32> to vector<16xf32>
    %228 = vector.shape_cast %227 : vector<16xf32> to vector<16x1xf32>
    %229 = vector.broadcast %228 : vector<16x1xf32> to vector<16x16xf32>
    %230 = arith.subf %226, %229 : vector<16x16xf32>
    %231 = math.exp %230 : vector<16x16xf32>
    %cst_105 = arith.constant dense<0.000000e+00> : vector<16xf32>
    %232 = vector.multi_reduction <add>, %231, %cst_105 [1] : vector<16x16xf32> to vector<16xf32>
    %233 = vector.shape_cast %232 : vector<16xf32> to vector<16x1xf32>
    %cst_106 = arith.constant dense<0.000000e+00> : vector<16x32xf32>
    %234 = tpu.matmul %231, %223, %cst_106 {dimension_numbers = #tpu.dot_dimension_numbers<[1], [0], [0], [1], [0, 0, 1, 1], [], []>} : vector<16x16xf32>, vector<16x32xf32>, vector<16x32xf32> -> vector<16x32xf32>
    %235 = tpu.reciprocal %233 {approx = true} : vector<16x1xf32> -> vector<16x1xf32>
    %236 = vector.broadcast %235 : vector<16x1xf32> to vector<16x32xf32>
    %237 = arith.mulf %234, %236 : vector<16x32xf32>
    %c0_107 = arith.constant 0 : index
    %c0_108 = arith.constant 0 : index
    %238 = vector.load %arg18[%c0_107, %c0_108] : memref<16x128xf32, #tpu.memory_space<vmem>>, vector<16x32xf32>
    tpu.vector_store %arg18[%c0_107, %c0_108], %237 {strides = array<i32>} : memref<16x128xf32, #tpu.memory_space<vmem>>, vector<16x32xf32>,
    %239 = vector.extract_strided_slice %216 {offsets = [0, 32], sizes = [16, 32], strides = [1, 1]} : vector<16x128xf32> to vector<16x32xf32>
    %cst_109 = arith.constant 0.176776692 : f32
    %240 = vector.broadcast %cst_109 : f32 to vector<16x32xf32>
    %241 = arith.mulf %239, %240 : vector<16x32xf32>
    %242 = vector.extract_strided_slice %217 {offsets = [0, 32], sizes = [16, 32], strides = [1, 1]} : vector<16x128xf32> to vector<16x32xf32>
    %243 = vector.extract_strided_slice %218 {offsets = [0, 32], sizes = [16, 32], strides = [1, 1]} : vector<16x128xf32> to vector<16x32xf32>
    %cst_110 = arith.constant dense<0.000000e+00> : vector<16x16xf32>
    %244 = tpu.matmul %241, %242, %cst_110 {dimension_numbers = #tpu.dot_dimension_numbers<[1], [1], [0], [0], [0, 0, 1, 0], [], []>} : vector<16x32xf32>, vector<16x32xf32>, vector<16x16xf32> -> vector<16x16xf32>
    %245 = vector.broadcast %4 : vector<1x16xf32> to vector<16x16xf32>
    %246 = arith.addf %244, %245 : vector<16x16xf32>
    %cst_111 = arith.constant dense<0xFF800000> : vector<16xf32>
    %247 = vector.multi_reduction <maximumf>, %246, %cst_111 [1] : vector<16x16xf32> to vector<16xf32>
    %248 = vector.shape_cast %247 : vector<16xf32> to vector<16x1xf32>
    %249 = vector.broadcast %248 : vector<16x1xf32> to vector<16x16xf32>
    %250 = arith.subf %246, %249 : vector<16x16xf32>
    %251 = math.exp %250 : vector<16x16xf32>
    %cst_112 = arith.constant dense<0.000000e+00> : vector<16xf32>
    %252 = vector.multi_reduction <add>, %251, %cst_112 [1] : vector<16x16xf32> to vector<16xf32>
    %253 = vector.shape_cast %252 : vector<16xf32> to vector<16x1xf32>
    %cst_113 = arith.constant dense<0.000000e+00> : vector<16x32xf32>
    %254 = tpu.matmul %251, %243, %cst_113 {dimension_numbers = #tpu.dot_dimension_numbers<[1], [0], [0], [1], [0, 0, 1, 1], [], []>} : vector<16x16xf32>, vector<16x32xf32>, vector<16x32xf32> -> vector<16x32xf32>
    %255 = tpu.reciprocal %253 {approx = true} : vector<16x1xf32> -> vector<16x1xf32>
    %256 = vector.broadcast %255 : vector<16x1xf32> to vector<16x32xf32>
    %257 = arith.mulf %254, %256 : vector<16x32xf32>
    %c0_114 = arith.constant 0 : index
    %c32_115 = arith.constant 32 : index
    %258 = vector.load %arg18[%c0_114, %c32_115] : memref<16x128xf32, #tpu.memory_space<vmem>>, vector<16x32xf32>
    tpu.vector_store %arg18[%c0_114, %c32_115], %257 {strides = array<i32>} : memref<16x128xf32, #tpu.memory_space<vmem>>, vector<16x32xf32>,
    %259 = vector.extract_strided_slice %216 {offsets = [0, 64], sizes = [16, 32], strides = [1, 1]} : vector<16x128xf32> to vector<16x32xf32>
    %cst_116 = arith.constant 0.176776692 : f32
    %260 = vector.broadcast %cst_116 : f32 to vector<16x32xf32>
    %261 = arith.mulf %259, %260 : vector<16x32xf32>
    %262 = vector.extract_strided_slice %217 {offsets = [0, 64], sizes = [16, 32], strides = [1, 1]} : vector<16x128xf32> to vector<16x32xf32>
    %263 = vector.extract_strided_slice %218 {offsets = [0, 64], sizes = [16, 32], strides = [1, 1]} : vector<16x128xf32> to vector<16x32xf32>
    %cst_117 = arith.constant dense<0.000000e+00> : vector<16x16xf32>
    %264 = tpu.matmul %261, %262, %cst_117 {dimension_numbers = #tpu.dot_dimension_numbers<[1], [1], [0], [0], [0, 0, 1, 0], [], []>} : vector<16x32xf32>, vector<16x32xf32>, vector<16x16xf32> -> vector<16x16xf32>
    %265 = vector.broadcast %4 : vector<1x16xf32> to vector<16x16xf32>
    %266 = arith.addf %264, %265 : vector<16x16xf32>
    %cst_118 = arith.constant dense<0xFF800000> : vector<16xf32>
    %267 = vector.multi_reduction <maximumf>, %266, %cst_118 [1] : vector<16x16xf32> to vector<16xf32>
    %268 = vector.shape_cast %267 : vector<16xf32> to vector<16x1xf32>
    %269 = vector.broadcast %268 : vector<16x1xf32> to vector<16x16xf32>
    %270 = arith.subf %266, %269 : vector<16x16xf32>
    %271 = math.exp %270 : vector<16x16xf32>
    %cst_119 = arith.constant dense<0.000000e+00> : vector<16xf32>
    %272 = vector.multi_reduction <add>, %271, %cst_119 [1] : vector<16x16xf32> to vector<16xf32>
    %273 = vector.shape_cast %272 : vector<16xf32> to vector<16x1xf32>
    %cst_120 = arith.constant dense<0.000000e+00> : vector<16x32xf32>
    %274 = tpu.matmul %271, %263, %cst_120 {dimension_numbers = #tpu.dot_dimension_numbers<[1], [0], [0], [1], [0, 0, 1, 1], [], []>} : vector<16x16xf32>, vector<16x32xf32>, vector<16x32xf32> -> vector<16x32xf32>
    %275 = tpu.reciprocal %273 {approx = true} : vector<16x1xf32> -> vector<16x1xf32>
    %276 = vector.broadcast %275 : vector<16x1xf32> to vector<16x32xf32>
    %277 = arith.mulf %274, %276 : vector<16x32xf32>
    %c0_121 = arith.constant 0 : index
    %c64_122 = arith.constant 64 : index
    %278 = vector.load %arg18[%c0_121, %c64_122] : memref<16x128xf32, #tpu.memory_space<vmem>>, vector<16x32xf32>
    tpu.vector_store %arg18[%c0_121, %c64_122], %277 {strides = array<i32>} : memref<16x128xf32, #tpu.memory_space<vmem>>, vector<16x32xf32>,
    %279 = vector.extract_strided_slice %216 {offsets = [0, 96], sizes = [16, 32], strides = [1, 1]} : vector<16x128xf32> to vector<16x32xf32>
    %cst_123 = arith.constant 0.176776692 : f32
    %280 = vector.broadcast %cst_123 : f32 to vector<16x32xf32>
    %281 = arith.mulf %279, %280 : vector<16x32xf32>
    %282 = vector.extract_strided_slice %217 {offsets = [0, 96], sizes = [16, 32], strides = [1, 1]} : vector<16x128xf32> to vector<16x32xf32>
    %283 = vector.extract_strided_slice %218 {offsets = [0, 96], sizes = [16, 32], strides = [1, 1]} : vector<16x128xf32> to vector<16x32xf32>
    %cst_124 = arith.constant dense<0.000000e+00> : vector<16x16xf32>
    %284 = tpu.matmul %281, %282, %cst_124 {dimension_numbers = #tpu.dot_dimension_numbers<[1], [1], [0], [0], [0, 0, 1, 0], [], []>} : vector<16x32xf32>, vector<16x32xf32>, vector<16x16xf32> -> vector<16x16xf32>
    %285 = vector.broadcast %4 : vector<1x16xf32> to vector<16x16xf32>
    %286 = arith.addf %284, %285 : vector<16x16xf32>
    %cst_125 = arith.constant dense<0xFF800000> : vector<16xf32>
    %287 = vector.multi_reduction <maximumf>, %286, %cst_125 [1] : vector<16x16xf32> to vector<16xf32>
    %288 = vector.shape_cast %287 : vector<16xf32> to vector<16x1xf32>
    %289 = vector.broadcast %288 : vector<16x1xf32> to vector<16x16xf32>
    %290 = arith.subf %286, %289 : vector<16x16xf32>
    %291 = math.exp %290 : vector<16x16xf32>
    %cst_126 = arith.constant dense<0.000000e+00> : vector<16xf32>
    %292 = vector.multi_reduction <add>, %291, %cst_126 [1] : vector<16x16xf32> to vector<16xf32>
    %293 = vector.shape_cast %292 : vector<16xf32> to vector<16x1xf32>
    %cst_127 = arith.constant dense<0.000000e+00> : vector<16x32xf32>
    %294 = tpu.matmul %291, %283, %cst_127 {dimension_numbers = #tpu.dot_dimension_numbers<[1], [0], [0], [1], [0, 0, 1, 1], [], []>} : vector<16x16xf32>, vector<16x32xf32>, vector<16x32xf32> -> vector<16x32xf32>
    %295 = tpu.reciprocal %293 {approx = true} : vector<16x1xf32> -> vector<16x1xf32>
    %296 = vector.broadcast %295 : vector<16x1xf32> to vector<16x32xf32>
    %297 = arith.mulf %294, %296 : vector<16x32xf32>
    %c0_128 = arith.constant 0 : index
    %c96_129 = arith.constant 96 : index
    %298 = vector.load %arg18[%c0_128, %c96_129] : memref<16x128xf32, #tpu.memory_space<vmem>>, vector<16x32xf32>
    tpu.vector_store %arg18[%c0_128, %c96_129], %297 {strides = array<i32>} : memref<16x128xf32, #tpu.memory_space<vmem>>, vector<16x32xf32>,
    %c0_130 = arith.constant 0 : index
    %c0_131 = arith.constant 0 : index
    %299 = vector.load %arg18[%c0_130, %c0_131] : memref<16x128xf32, #tpu.memory_space<vmem>>, vector<16x128xf32>
    %c1_132 = arith.constant 1 : index
    %c0_133 = arith.constant 0 : index
    %c0_134 = arith.constant 0 : index
    %300 = vector.load %arg7[%c1_132, %c0_133, %c0_134] : memref<2x128x128xbf16, #tpu.memory_space<vmem>>, vector<1x128x128xbf16>
    %301 = vector.shape_cast %300 : vector<1x128x128xbf16> to vector<128x128xbf16>
    %c1_135 = arith.constant 1 : index
    %c0_136 = arith.constant 0 : index
    %c0_137 = arith.constant 0 : index
    %302 = vector.load %arg8[%c1_135, %c0_136, %c0_137] : memref<2x1x128xf32, #tpu.memory_space<vmem>>, vector<1x1x128xf32>
    %303 = vector.shape_cast %302 : vector<1x1x128xf32> to vector<1x128xf32>
    %304 = arith.truncf %299 : vector<16x128xf32> to vector<16x128xbf16>
    %cst_138 = arith.constant dense<0.000000e+00> : vector<16x128xf32>
    %305 = tpu.matmul %304, %301, %cst_138 {dimension_numbers = #tpu.dot_dimension_numbers<[1], [0], [0], [1], [0, 0, 1, 1], [], []>} : vector<16x128xbf16>, vector<128x128xbf16>, vector<16x128xf32> -> vector<16x128xf32>
    %306 = vector.broadcast %303 : vector<1x128xf32> to vector<16x128xf32>
    %307 = arith.addf %305, %306 : vector<16x128xf32>
    %308 = arith.addf %183, %307 : vector<16x128xf32>
    %c1_139 = arith.constant 1 : index
    %c0_140 = arith.constant 0 : index
    %c0_141 = arith.constant 0 : index
    %309 = vector.load %arg9[%c1_139, %c0_140, %c0_141] : memref<2x1x128xf32, #tpu.memory_space<vmem>>, vector<1x1x128xf32>
    %310 = vector.shape_cast %309 : vector<1x1x128xf32> to vector<1x128xf32>
    %c1_142 = arith.constant 1 : index
    %c0_143 = arith.constant 0 : index
    %c0_144 = arith.constant 0 : index
    %311 = vector.load %arg10[%c1_142, %c0_143, %c0_144] : memref<2x1x128xf32, #tpu.memory_space<vmem>>, vector<1x1x128xf32>
    %312 = vector.shape_cast %311 : vector<1x1x128xf32> to vector<1x128xf32>
    %cst_145 = arith.constant dense<0.000000e+00> : vector<16xf32>
    %313 = vector.multi_reduction <add>, %308, %cst_145 [1] : vector<16x128xf32> to vector<16xf32>
    %314 = vector.shape_cast %313 : vector<16xf32> to vector<16x1xf32>
    %cst_146 = arith.constant 1.280000e+02 : f32
    %315 = vector.broadcast %cst_146 : f32 to vector<16x1xf32>
    %316 = arith.divf %314, %315 : vector<16x1xf32>
    %317 = vector.broadcast %316 : vector<16x1xf32> to vector<16x128xf32>
    %318 = arith.subf %308, %317 : vector<16x128xf32>
    %319 = arith.mulf %318, %318 : vector<16x128xf32>
    %cst_147 = arith.constant dense<0.000000e+00> : vector<16xf32>
    %320 = vector.multi_reduction <add>, %319, %cst_147 [1] : vector<16x128xf32> to vector<16xf32>
    %321 = vector.shape_cast %320 : vector<16xf32> to vector<16x1xf32>
    %cst_148 = arith.constant 1.280000e+02 : f32
    %322 = vector.broadcast %cst_148 : f32 to vector<16x1xf32>
    %323 = arith.divf %321, %322 : vector<16x1xf32>
    %cst_149 = arith.constant 9.99999974E-6 : f32
    %324 = vector.broadcast %cst_149 : f32 to vector<16x1xf32>
    %325 = arith.addf %323, %324 : vector<16x1xf32>
    %326 = math.rsqrt %325 : vector<16x1xf32>
    %327 = vector.broadcast %326 : vector<16x1xf32> to vector<16x128xf32>
    %328 = arith.mulf %318, %327 : vector<16x128xf32>
    %329 = vector.broadcast %310 : vector<1x128xf32> to vector<16x128xf32>
    %330 = arith.mulf %328, %329 : vector<16x128xf32>
    %331 = vector.broadcast %312 : vector<1x128xf32> to vector<16x128xf32>
    %332 = arith.addf %330, %331 : vector<16x128xf32>
    %c1_150 = arith.constant 1 : index
    %c0_151 = arith.constant 0 : index
    %c0_152 = arith.constant 0 : index
    %333 = vector.load %arg11[%c1_150, %c0_151, %c0_152] : memref<2x128x256xbf16, #tpu.memory_space<vmem>>, vector<1x128x256xbf16>
    %334 = vector.shape_cast %333 : vector<1x128x256xbf16> to vector<128x256xbf16>
    %c1_153 = arith.constant 1 : index
    %c0_154 = arith.constant 0 : index
    %c0_155 = arith.constant 0 : index
    %335 = vector.load %arg12[%c1_153, %c0_154, %c0_155] : memref<2x1x256xf32, #tpu.memory_space<vmem>>, vector<1x1x256xf32>
    %336 = vector.shape_cast %335 : vector<1x1x256xf32> to vector<1x256xf32>
    %c1_156 = arith.constant 1 : index
    %c0_157 = arith.constant 0 : index
    %c0_158 = arith.constant 0 : index
    %337 = vector.load %arg13[%c1_156, %c0_157, %c0_158] : memref<2x256x128xbf16, #tpu.memory_space<vmem>>, vector<1x256x128xbf16>
    %338 = vector.shape_cast %337 : vector<1x256x128xbf16> to vector<256x128xbf16>
    %c1_159 = arith.constant 1 : index
    %c0_160 = arith.constant 0 : index
    %c0_161 = arith.constant 0 : index
    %339 = vector.load %arg14[%c1_159, %c0_160, %c0_161] : memref<2x1x128xf32, #tpu.memory_space<vmem>>, vector<1x1x128xf32>
    %340 = vector.shape_cast %339 : vector<1x1x128xf32> to vector<1x128xf32>
    %341 = arith.truncf %332 : vector<16x128xf32> to vector<16x128xbf16>
    %cst_162 = arith.constant dense<0.000000e+00> : vector<16x256xf32>
    %342 = tpu.matmul %341, %334, %cst_162 {dimension_numbers = #tpu.dot_dimension_numbers<[1], [0], [0], [1], [0, 0, 1, 1], [], []>} : vector<16x128xbf16>, vector<128x256xbf16>, vector<16x256xf32> -> vector<16x256xf32>
    %343 = vector.broadcast %336 : vector<1x256xf32> to vector<16x256xf32>
    %344 = arith.addf %342, %343 : vector<16x256xf32>
    %345 = arith.mulf %344, %344 : vector<16x256xf32>
    %346 = arith.mulf %344, %345 : vector<16x256xf32>
    %cst_163 = arith.constant 4.471500e-02 : f32
    %347 = vector.broadcast %cst_163 : f32 to vector<16x256xf32>
    %348 = arith.mulf %347, %346 : vector<16x256xf32>
    %349 = arith.addf %344, %348 : vector<16x256xf32>
    %cst_164 = arith.constant 0.797884583 : f32
    %350 = vector.broadcast %cst_164 : f32 to vector<16x256xf32>
    %351 = arith.mulf %350, %349 : vector<16x256xf32>
    %352 = math.tanh %351 : vector<16x256xf32>
    %cst_165 = arith.constant 1.000000e+00 : f32
    %353 = vector.broadcast %cst_165 : f32 to vector<16x256xf32>
    %354 = arith.addf %353, %352 : vector<16x256xf32>
    %cst_166 = arith.constant 5.000000e-01 : f32
    %355 = vector.broadcast %cst_166 : f32 to vector<16x256xf32>
    %356 = arith.mulf %355, %354 : vector<16x256xf32>
    %357 = arith.mulf %344, %356 : vector<16x256xf32>
    %358 = arith.truncf %357 : vector<16x256xf32> to vector<16x256xbf16>
    %cst_167 = arith.constant dense<0.000000e+00> : vector<16x128xf32>
    %359 = tpu.matmul %358, %338, %cst_167 {dimension_numbers = #tpu.dot_dimension_numbers<[1], [0], [0], [1], [0, 0, 1, 1], [], []>} : vector<16x256xbf16>, vector<256x128xbf16>, vector<16x128xf32> -> vector<16x128xf32>
    %360 = vector.broadcast %340 : vector<1x128xf32> to vector<16x128xf32>
    %361 = arith.addf %359, %360 : vector<16x128xf32>
    %362 = arith.addf %308, %361 : vector<16x128xf32>
    %c0_168 = arith.constant 0 : index
    %c0_169 = arith.constant 0 : index
    %363 = vector.load %arg15[%c0_168, %c0_169] : memref<1x128xf32, #tpu.memory_space<vmem>>, vector<1x128xf32>
    %c0_170 = arith.constant 0 : index
    %c0_171 = arith.constant 0 : index
    %364 = vector.load %arg16[%c0_170, %c0_171] : memref<1x128xf32, #tpu.memory_space<vmem>>, vector<1x128xf32>
    %cst_172 = arith.constant dense<0.000000e+00> : vector<16xf32>
    %365 = vector.multi_reduction <add>, %362, %cst_172 [1] : vector<16x128xf32> to vector<16xf32>
    %366 = vector.shape_cast %365 : vector<16xf32> to vector<16x1xf32>
    %cst_173 = arith.constant 1.280000e+02 : f32
    %367 = vector.broadcast %cst_173 : f32 to vector<16x1xf32>
    %368 = arith.divf %366, %367 : vector<16x1xf32>
    %369 = vector.broadcast %368 : vector<16x1xf32> to vector<16x128xf32>
    %370 = arith.subf %362, %369 : vector<16x128xf32>
    %371 = arith.mulf %370, %370 : vector<16x128xf32>
    %cst_174 = arith.constant dense<0.000000e+00> : vector<16xf32>
    %372 = vector.multi_reduction <add>, %371, %cst_174 [1] : vector<16x128xf32> to vector<16xf32>
    %373 = vector.shape_cast %372 : vector<16xf32> to vector<16x1xf32>
    %cst_175 = arith.constant 1.280000e+02 : f32
    %374 = vector.broadcast %cst_175 : f32 to vector<16x1xf32>
    %375 = arith.divf %373, %374 : vector<16x1xf32>
    %cst_176 = arith.constant 9.99999974E-6 : f32
    %376 = vector.broadcast %cst_176 : f32 to vector<16x1xf32>
    %377 = arith.addf %375, %376 : vector<16x1xf32>
    %378 = math.rsqrt %377 : vector<16x1xf32>
    %379 = vector.broadcast %378 : vector<16x1xf32> to vector<16x128xf32>
    %380 = arith.mulf %370, %379 : vector<16x128xf32>
    %381 = vector.broadcast %363 : vector<1x128xf32> to vector<16x128xf32>
    %382 = arith.mulf %380, %381 : vector<16x128xf32>
    %383 = vector.broadcast %364 : vector<1x128xf32> to vector<16x128xf32>
    %384 = arith.addf %382, %383 : vector<16x128xf32>
    %385 = arith.truncf %384 : vector<16x128xf32> to vector<16x128xbf16>
    %c0_177 = arith.constant 0 : index
    %c0_178 = arith.constant 0 : index
    %c0_179 = arith.constant 0 : index
    %386 = vector.load %arg17[%c0_177, %c0_178, %c0_179] : memref<1x16x128xbf16, #tpu.memory_space<vmem>>, vector<1x16x128xbf16>
    %387 = vector.shape_cast %386 : vector<1x16x128xbf16> to vector<16x128xbf16>
    %388 = vector.shape_cast %385 : vector<16x128xbf16> to vector<1x16x128xbf16>
    tpu.vector_store %arg17[%c0_177, %c0_178, %c0_179], %388 {strides = array<i32>} : memref<1x16x128xbf16, #tpu.memory_space<vmem>>, vector<1x16x128xbf16>,
    return
  }
  func.func @transform_0(%arg0: i32) -> (i32, i32, i32) {
    %c0_i32 = arith.constant 0 : i32
    %c0_i32_0 = arith.constant 0 : i32
    %c0_i32_1 = arith.constant 0 : i32
    return %arg0, %c0_i32, %c0_i32_0 : i32, i32, i32
  }
  func.func @transform_1(%arg0: i32) -> (i32, i32, i32) {
    %c0_i32 = arith.constant 0 : i32
    %c0_i32_0 = arith.constant 0 : i32
    %c0_i32_1 = arith.constant 0 : i32
    return %arg0, %c0_i32, %c0_i32_0 : i32, i32, i32
  }
  func.func @transform_2(%arg0: i32) -> (i32, i32, i32) {
    %c0_i32 = arith.constant 0 : i32
    %c0_i32_0 = arith.constant 0 : i32
    %c0_i32_1 = arith.constant 0 : i32
    %c0_i32_2 = arith.constant 0 : i32
    return %c0_i32, %c0_i32_0, %c0_i32_1 : i32, i32, i32
  }
  func.func @transform_3(%arg0: i32) -> (i32, i32, i32) {
    %c0_i32 = arith.constant 0 : i32
    %c0_i32_0 = arith.constant 0 : i32
    %c0_i32_1 = arith.constant 0 : i32
    %c0_i32_2 = arith.constant 0 : i32
    return %c0_i32, %c0_i32_0, %c0_i32_1 : i32, i32, i32
  }
  func.func @transform_4(%arg0: i32) -> (i32, i32, i32) {
    %c0_i32 = arith.constant 0 : i32
    %c0_i32_0 = arith.constant 0 : i32
    %c0_i32_1 = arith.constant 0 : i32
    %c0_i32_2 = arith.constant 0 : i32
    return %c0_i32, %c0_i32_0, %c0_i32_1 : i32, i32, i32
  }
  func.func @transform_5(%arg0: i32) -> (i32, i32, i32) {
    %c0_i32 = arith.constant 0 : i32
    %c0_i32_0 = arith.constant 0 : i32
    %c0_i32_1 = arith.constant 0 : i32
    %c0_i32_2 = arith.constant 0 : i32
    return %c0_i32, %c0_i32_0, %c0_i32_1 : i32, i32, i32
  }
  func.func @transform_6(%arg0: i32) -> (i32, i32, i32) {
    %c0_i32 = arith.constant 0 : i32
    %c0_i32_0 = arith.constant 0 : i32
    %c0_i32_1 = arith.constant 0 : i32
    %c0_i32_2 = arith.constant 0 : i32
    return %c0_i32, %c0_i32_0, %c0_i32_1 : i32, i32, i32
  }
  func.func @transform_7(%arg0: i32) -> (i32, i32, i32) {
    %c0_i32 = arith.constant 0 : i32
    %c0_i32_0 = arith.constant 0 : i32
    %c0_i32_1 = arith.constant 0 : i32
    %c0_i32_2 = arith.constant 0 : i32
    return %c0_i32, %c0_i32_0, %c0_i32_1 : i32, i32, i32
  }
  func.func @transform_8(%arg0: i32) -> (i32, i32, i32) {
    %c0_i32 = arith.constant 0 : i32
    %c0_i32_0 = arith.constant 0 : i32
    %c0_i32_1 = arith.constant 0 : i32
    %c0_i32_2 = arith.constant 0 : i32
    return %c0_i32, %c0_i32_0, %c0_i32_1 : i32, i32, i32
  }
  func.func @transform_9(%arg0: i32) -> (i32, i32, i32) {
    %c0_i32 = arith.constant 0 : i32
    %c0_i32_0 = arith.constant 0 : i32
    %c0_i32_1 = arith.constant 0 : i32
    %c0_i32_2 = arith.constant 0 : i32
    return %c0_i32, %c0_i32_0, %c0_i32_1 : i32, i32, i32
  }
  func.func @transform_10(%arg0: i32) -> (i32, i32, i32) {
    %c0_i32 = arith.constant 0 : i32
    %c0_i32_0 = arith.constant 0 : i32
    %c0_i32_1 = arith.constant 0 : i32
    %c0_i32_2 = arith.constant 0 : i32
    return %c0_i32, %c0_i32_0, %c0_i32_1 : i32, i32, i32
  }
  func.func @transform_11(%arg0: i32) -> (i32, i32, i32) {
    %c0_i32 = arith.constant 0 : i32
    %c0_i32_0 = arith.constant 0 : i32
    %c0_i32_1 = arith.constant 0 : i32
    %c0_i32_2 = arith.constant 0 : i32
    return %c0_i32, %c0_i32_0, %c0_i32_1 : i32, i32, i32
  }
  func.func @transform_12(%arg0: i32) -> (i32, i32, i32) {
    %c0_i32 = arith.constant 0 : i32
    %c0_i32_0 = arith.constant 0 : i32
    %c0_i32_1 = arith.constant 0 : i32
    %c0_i32_2 = arith.constant 0 : i32
    return %c0_i32, %c0_i32_0, %c0_i32_1 : i32, i32, i32
  }
  func.func @transform_13(%arg0: i32) -> (i32, i32, i32) {
    %c0_i32 = arith.constant 0 : i32
    %c0_i32_0 = arith.constant 0 : i32
    %c0_i32_1 = arith.constant 0 : i32
    %c0_i32_2 = arith.constant 0 : i32
    return %c0_i32, %c0_i32_0, %c0_i32_1 : i32, i32, i32
  }
  func.func @transform_14(%arg0: i32) -> (i32, i32) {
    %c0_i32 = arith.constant 0 : i32
    %c0_i32_0 = arith.constant 0 : i32
    %c0_i32_1 = arith.constant 0 : i32
    return %c0_i32, %c0_i32_0 : i32, i32
  }
  func.func @transform_15(%arg0: i32) -> (i32, i32) {
    %c0_i32 = arith.constant 0 : i32
    %c0_i32_0 = arith.constant 0 : i32
    %c0_i32_1 = arith.constant 0 : i32
    return %c0_i32, %c0_i32_0 : i32, i32
  }
  func.func @transform_16(%arg0: i32) -> (i32, i32, i32) {
    %c0_i32 = arith.constant 0 : i32
    %c0_i32_0 = arith.constant 0 : i32
    %c0_i32_1 = arith.constant 0 : i32
    return %arg0, %c0_i32, %c0_i32_0 : i32, i32, i32
  }
}

</mosaic_0001>

<bundles_post_ra>
// kernel: bagualu_summary_forward.2
= control target key start
LH: loop header
LB: loop body
LE: loop exit
PB: predicated region body
PF: predicated region fallthrough
CT: control target
= control target key end

     0   :  { %s6004_s0 = inlined_call_operand.vmem [shape: bf16[2,16,128], index: 0, kind: input, shape index: {}]   ;;  %s6005_s1 = inlined_call_operand.vmem [shape: f32[2,1,16], index: 1, kind: input, shape index: {}]   ;;  %s6006_s2 = inlined_call_operand.vmem [shape: f32[2,1,128], index: 2, kind: input, shape index: {}]   ;;  %s6007_s3 = inlined_call_operand.vmem [shape: f32[2,1,128], index: 3, kind: input, shape index: {}]   ;;  %s6008_s4 = inlined_call_operand.vmem [shape: bf16[2,128,384], index: 4, kind: input, shape index: {}]   ;;  %s6009_s5 = inlined_call_operand.vmem [shape: f32[2,1,384], index: 5, kind: input, shape index: {}]   ;;  %s6010_s6 = inlined_call_operand.hbm [shape: bf16[2,128,128], index: 6, kind: input, shape index: {}]   ;;  %s6011_s7 = inlined_call_operand.vmem [shape: f32[2,1,128], index: 7, kind: input, shape index: {}]   ;;  %s6012_s8 = inlined_call_operand.vmem [shape: f32[2,1,128], index: 8, kind: input, shape index: {}]   ;;  %s6013_s9 = inlined_call_operand.vmem [shape: f32[2,1,128], index: 9, kind: input, shape index: {}]   ;;  %s6014_s10 = inlined_call_operand.hbm [shape: bf16[2,128,256], index: 10, kind: input, shape index: {}]   ;;  %s6015_s11 = inlined_call_operand.vmem [shape: f32[2,1,256], index: 11, kind: input, shape index: {}]   ;;  %s6016_s12 = inlined_call_operand.hbm [shape: bf16[2,256,128], index: 12, kind: input, shape index: {}]   ;;  %s6017_s13 = inlined_call_operand.vmem [shape: f32[2,1,128], index: 13, kind: input, shape index: {}]   ;;  %s6018_s14 = inlined_call_operand.vmem [shape: f32[1,128], index: 14, kind: input, shape index: {}]   ;;  %s6019_s15 = inlined_call_operand.vmem [shape: f32[1,128], index: 15, kind: input, shape index: {}]   ;;  %s6020_s16 = inlined_call_operand.vmem [shape: bf16[2,16,128], index: 16, kind: output, shape index: {}]  }
   0x1   :  { %6024 = sst [smem:[#allocation11_spill]] %s6004_s0 }
   0x2   :  { %6025 = sst [smem:[#allocation12_spill]] %s6018_s14 }
   0x3   :  { %6026 = sst [smem:[#allocation13_spill]] %s6019_s15 }
   0x4   :  { %6027 = sst [smem:[#allocation14_spill]] %s6020_s16 }
   0x5   :  { %21 = vsyncpa [#allocation4], 0 }
   0x6   :  { %22 = vsyncpa [#allocation6], 0  ;;  %s5308_s21 = smov 0  }
   0x7 LB: > { %6028 = sst [smem:[#allocation10_spill]] %s5208_s21  ;;  %s5210_s22 = smov [#allocation5]   ;;  %s5208_s21 = sphi %s5308_s21, %s28_s21  }
   0x8   : > { %s451_s23 = sshll.u32 %s5210_s22, 4  ;;  %s5314_s24 = sadd.s32 4294967295, %s5208_s21   ;;  %s5323_s23 = int_to_ptr.vmem [resolvable:$true] %s451_s23 }
   0x9   : > { %p4063_p0 = scmp.ge.s32.totalorder %s5208_s21, 1  ;;  %p405_p1 = scmp.lt.s32.totalorder %s5208_s21, 3 }
   0xa   : > { %p6022_p2 = scmp.eq.s32.totalorder %s5314_s24, 0  ;;  %s5211_s26 = smov [#allocation3]  }
   0xb   : > { %p5319_p3 = pnand %p4063_p0, %p405_p1  ;;  %s429_s27 = sshll.u32 %s5211_s26, 4  ;;  %s5327_s27 = int_to_ptr.vmem [resolvable:$true] %s429_s27 }
   0xc   : > { %s5212_s29 = smov [#allocation7]   ;;  %s5110_s18 = scalar_lea.hbm %s6014_s10, 4096 }
   0xd   : > { %s6029_s25 = scalar_select %p5319_p3, 1, 0 }
   0xe   : > { %p4752_p4 = pneg %p5319_p3  ;;  %s5335_s30 = sshll.u32 %s5212_s29, 4  ;;  %s468_s30 = int_to_ptr.vmem [resolvable:$true] %s5335_s30 }
   0xf   : > { %p5111_p6 = scmp.ne.s32.totalorder %s6014_s10, %s5110_s18  ;;  %p5117_p10 = scmp.lt.u32.totalorder %s5110_s18, %s6014_s10 }
  0x10   : > { %p5331_p5 = pnand %p6022_p2, %p4752_p4 }
  0x12   : > { %p5345_p7 = pneg %p5331_p5 }
  0x14   : > { %p5113_p8 = pnand %p5345_p7, %p5111_p6 }
  0x16   : > { %p5114_p9 = pneg %p5113_p8 }
  0x18   : > { %p5119_p11 = pnand %p5117_p10, %p5114_p9 }
  0x1a   : > { %5122 = shalt.err (!%p5119_p11)
}
  0x1b   : > { %s5123_s0 = scalar_lea.vmem %s5323_s23, 4096  ;;  %p5131_p1 = scmp.lt.s32.totalorder %s5323_s23, %s5323_s23 }
  0x1c   : > { %p5124_p12 = scmp.ne.s32.totalorder %s5323_s23, %s5123_s0  ;;  %p5132_p4 = scmp.lt.s32.totalorder %s5123_s0, %s5123_s0 }
  0x1e   : > { %p5126_p13 = pnand %p5124_p12, %p5345_p7  ;;  %p5133_p6 = por %p5132_p4, %p5131_p1 }
  0x20   : > { %p5127_p0 = pneg %p5126_p13 }
  0x22   : > { %p5134_p8 = pnand %p5133_p6, %p5127_p0 }
  0x24   : > { %5137 = shalt.err (!%p5134_p8)
}
  0x25   : > { %s5213_s17 = smov 128   ;;  %s5214_s18 = smov 8  }
  0x26   : > { %4758 = dma.hbm_to_vmem [thread:$0]  (!%p5331_p5), %s6014_s10, 4096, %s5323_s23, [#allocation6], %s5213_s17, %s5213_s17, %s5214_s18  }
  0x27   : > { %s5138_s21 = scalar_lea.hbm %s6010_s6, 2048 }
  0x28   : > { %p5139_p9 = scmp.ne.s32.totalorder %s6010_s6, %s5138_s21  ;;  %p5145_p12 = scmp.lt.u32.totalorder %s5138_s21, %s6010_s6 }
  0x2a   : > { %p5141_p10 = pnand %p5139_p9, %p5345_p7 }
  0x2c   : > { %p5142_p11 = pneg %p5141_p10 }
  0x2e   : > { %p5147_p13 = pnand %p5145_p12, %p5142_p11 }
  0x30   : > { %5150 = shalt.err (!%p5147_p13)
}
  0x31   : > { %s5151_s23 = scalar_lea.vmem %s5327_s27, 2048  ;;  %p5159_p6 = scmp.lt.s32.totalorder %s5327_s27, %s5327_s27 }
  0x32   : > { %p5152_p0 = scmp.ne.s32.totalorder %s5327_s27, %s5151_s23  ;;  %p5160_p8 = scmp.lt.s32.totalorder %s5151_s23, %s5151_s23 }
  0x34   : > { %p5154_p1 = pnand %p5152_p0, %p5345_p7  ;;  %p5161_p9 = por %p5160_p8, %p5159_p6 }
  0x36   : > { %p5155_p4 = pneg %p5154_p1 }
  0x38   : > { %p5162_p10 = pnand %p5161_p9, %p5155_p4 }
  0x3a   : > { %5165 = shalt.err (!%p5162_p10)
}
  0x3b   : > { %s5215_s15 = smov 64   ;;  %s5216_s14 = smov 4  }
  0x3c   : > { %4755 = dma.hbm_to_vmem [thread:$0]  (!%p5331_p5), %s6010_s6, 2048, %s5327_s27, [#allocation4], %s5215_s15, %s5215_s15, %s5216_s14  }
  0x3d   : > { %s5166_s19 = scalar_lea.hbm %s6016_s12, 4096 }
  0x3e   : > { %p5167_p11 = scmp.ne.s32.totalorder %s6016_s12, %s5166_s19  ;;  %p5173_p0 = scmp.lt.u32.totalorder %s5166_s19, %s6016_s12 }
  0x40   : > { %p5169_p12 = pnand %p5167_p11, %p5345_p7 }
  0x42   : > { %p5170_p13 = pneg %p5169_p12 }
  0x44   : > { %p5175_p1 = pnand %p5173_p0, %p5170_p13 }
  0x46   : > { %5178 = shalt.err (!%p5175_p1)
}
  0x47   : > { %s5179_s23 = scalar_lea.vmem %s468_s30, 4096  ;;  %p5187_p9 = scmp.lt.s32.totalorder %s468_s30, %s468_s30 }
  0x48   : > { %p5180_p4 = scmp.ne.s32.totalorder %s468_s30, %s5179_s23  ;;  %p5188_p10 = scmp.lt.s32.totalorder %s5179_s23, %s5179_s23 }
  0x4a   : > { %p5182_p6 = pnand %p5180_p4, %p5345_p7  ;;  %p5189_p2 = por %p5188_p10, %p5187_p9 }
  0x4c   : > { %p5183_p8 = pneg %p5182_p6 }
  0x4e   : > { %p5190_p3 = pnand %p5189_p2, %p5183_p8 }
  0x50   : > { %5193 = shalt.err (!%p5190_p3)
}
  0x51   : > { %4761 = dma.hbm_to_vmem [thread:$0]  (!%p5331_p5), %s6016_s12, 4096, %s468_s30, [#allocation6], %s5215_s15, %s5215_s15, %s5216_s14  }
  0x52   : > { %p6032_p11 = scmp.ne.s32.totalorder %s6029_s25, 0 }
  0x53   : > { %p6033_p12 = scmp.eq.s32.totalorder (!%p6032_p11), %s5314_s24, 0 }
  0x54   : > { %506 = sbr.rel (%p6032_p11) target bundleno = 6488 (0x1958), region = 84 }
  0x5b   : > { %5199 = dma.done.wait (%p6033_p12), [#allocation4], 2048   ;;  %p6034_p7 = pmov %p6033_p12 }
  0x5d   : > { %5201 = vsyncadd (%p6034_p7), [#allocation4], 4294965248  ;;  %p6035_p13 = pmov %p6034_p7 }
  0x5e   : > { %p6036_p2 = pmov %p6034_p7 }
  0x5f   : > { %5203 = dma.done.wait (%p6035_p13), [#allocation6], 8192  }
  0x60   : > { %5205 = vsyncadd (%p6036_p2), [#allocation6], 4294959104  ;;  %p567_p3 = scmp.lt.s32.totalorder %s5314_s24, 1  ;;  %s6037_s22 = sld [smem:[#allocation11_spill]]  ;;  %v4849_v3 = vld [vmem:[%s6008_s4 + $0x4] ss:$12 sps:$4 sm:$0xff]   ;;  %v662_v54 = vlaneseq }
  0x61   : > { %v4851_v4 = vld [vmem:[%s6008_s4] ss:$12 sps:$4 sm:$0xff]   ;;  %v5217_v5 = vmov 0.0   ;;  %v4852_v6 = vld [vmem:[%s6008_s4 + $0x8] ss:$12 sps:$4 sm:$0xff]   ;;  %805 = vmatprep.subr.bf16.mxu0 %v4849_v3  ;;  %v5218_v31 = vmov 0  }
  0x62   : > { %s6045_s24 = smov (!%p567_p3, %s5314_s24), 1  ;;  %4468 = vmatprep.subr.bf16.mxu1 %v5217_v5  ;;  %v4853_v7 = vld [vmem:[%s6008_s4 + $0x1c] ss:$12 sps:$4 sm:$0xff]   ;;  %806 = vmatpush1.bf16.msra.mxu0 %v4851_v4  ;;  %v4855_v16 = vld [vmem:[%s6008_s4 + $0x18] ss:$12 sps:$4 sm:$0xff]   ;;  %vm5219_vm0 = vmmov 0  }
  0x63   : > { %s4311_s25 = sshll.u32 %s6045_s24, 3  ;;  %4469 = vmatpush3.bf16.msra.mxu1 %v4852_v6  ;;  %807 = vmatprep.subr.bf16.mxu0 %v4853_v7  ;;  %v4856_v17 = vld [vmem:[%s6008_s4 + $0x20] ss:$12 sps:$4 sm:$0xff]   ;;  %v4859_v19 = vld [vmem:[%s6008_s4 + $0x30] ss:$12 sps:$4 sm:$0xff]   ;;  %v5535_v55 = vshrl.u32 %v662_v54, 7  ;;  %s5577_s0 = scalar_lea.vmem %s6005_s1, %s6045_s24 }
  0x64   : > { %4470 = vmatprep.subr.bf16.mxu1 %v5217_v5  ;;  %v4857_v18 = vld [vmem:[%s6008_s4 + $0x34] ss:$12 sps:$4 sm:$0xff]   ;;  %v4860_v20 = vld [vmem:[%s6008_s4 + $0x38] ss:$12 sps:$4 sm:$0xff]   ;;  %v4864_v23 = vld [vmem:[%s6008_s4 + $0x50] ss:$12 sps:$4 sm:$0xff]   ;;  %837 = vmatprep.mubr.bf16.mxu0 %v5218_v31 }
  0x65   : > { %v4861_v21 = vld [vmem:[%s6008_s4 + $0x4c] ss:$12 sps:$4 sm:$0xff]   ;;  %v4863_v22 = vld [vmem:[%s6008_s4 + $0x48] ss:$12 sps:$4 sm:$0xff]   ;;  %v4865_v24 = vld [vmem:[%s6008_s4 + $0x64] ss:$12 sps:$4 sm:$0xff]   ;;  %4484 = vmatprep.mubr.msk.bf16.mxu1 %vm5219_vm0, %v5217_v5 }
  0x66   : > { %s571_s15 = scalar_lea.vmem %s6037_s22, %s4311_s25  ;;  %808 = vmatpush1.bf16.msra.mxu0 %v4855_v16  ;;  %v4867_v25 = vld [vmem:[%s6008_s4 + $0x60] ss:$12 sps:$4 sm:$0xff]   ;;  %v4868_v26 = vld [vmem:[%s6008_s4 + $0x68] ss:$12 sps:$4 sm:$0xff]   ;;  %v4871_v28 = vld [vmem:[%s6008_s4 + $0x78] ss:$12 sps:$4 sm:$0xff]  }
  0x67   : > { %v4316_v0 = vld [vmem:[%s571_s15] sm:$0xff]   ;;  %4471 = vmatpush3.bf16.msra.mxu1 %v4856_v17  ;;  %809 = vmatprep.subr.bf16.mxu0 %v4857_v18  ;;  %v4869_v27 = vld [vmem:[%s6008_s4 + $0x7c] ss:$12 sps:$4 sm:$0xff]   ;;  %v4877_v34 = vld [vmem:[%s6008_s4 + $0xac] ss:$12 sps:$4 sm:$0xff]   ;;  %v5538_v56 = vsub.s32 0, %v5535_v55 }
  0x68   : > { %v5428_v1 = vunpack.c.l.bf16 %v4316_v0  ;;  %v5431_v2 = vunpack.c.h.bf16 %v4316_v0  ;;  %4472 = vmatprep.subr.bf16.mxu1 %v5217_v5  ;;  %v4872_v29 = vld [vmem:[%s6008_s4 + $0x80] ss:$12 sps:$4 sm:$0xff]   ;;  %v4875_v32 = vld [vmem:[%s6008_s4 + $0x90] ss:$12 sps:$4 sm:$0xff]   ;;  %v4876_v33 = vld [vmem:[%s6008_s4 + $0x98] ss:$12 sps:$4 sm:$0xff]  }
  0x69   : > { %v4873_v30 = vld [vmem:[%s6008_s4 + $0x94] ss:$12 sps:$4 sm:$0xff]   ;;  %v4880_v36 = vld [vmem:[%s6008_s4 + $0xb0] ss:$12 sps:$4 sm:$0xff]   ;;  %v672_v58 = vsub.s32 2, %v5535_v55  ;;  %v5545_v59 = vsub.s32 1, %v5535_v55 }
  0x6a   : > { %588 = vadd.xlane.f32.xlu0 %v5428_v1  ;;  %810 = vmatpush1.bf16.msra.mxu0 %v4859_v19  ;;  %v4879_v35 = vld [vmem:[%s6008_s4 + $0xa8] ss:$12 sps:$4 sm:$0xff]   ;;  %v4076_v45 = vld [vmem:[%s6006_s2] ss:$0 sm:$0xff]  ;;  %vm897_vm1 = vcmask 261120   ;;  %vm985_vm3 = vcmask 130048  }
  0x6b   : > { %4473 = vmatpush3.bf16.msra.mxu1 %v4860_v20  ;;  %811 = vmatprep.subr.bf16.mxu0 %v4861_v21  ;;  %v4077_v49 = vld [vmem:[%s6007_s3] ss:$0 sm:$0xff]  ;;  %vm5557_vm2 = vmpackc.low %vm897_vm1, %vm897_vm1  ;;  %s5220_s23 = smov 64   ;;  %s5221_s27 = smov 96   ;;  %vm1301_vm4 = vcmask 523520   ;;  %vm1512_vm5 = vcmask 785920  }
  0x6c   : > { %4474 = vmatprep.subr.bf16.mxu1 %v5217_v5  ;;  %v659_v57 = vld [vmem:[%s6009_s5] sm:$0x7]  ;;  %s5222_s16 = smov 32   ;;  %vm1723_vm6 = vcmask 1048320   ;;  %s6040_s28 = sld [smem:[#allocation12_spill]] }
  0x6d   : > { %v665_v60 = vrot.slane %v659_v57, %v5538_v56  ;;  %v673_v61 = vrot.slane %v659_v57, %v672_v58  ;;  %v669_v0 = vrot.slane %v659_v57, %v5545_v59  ;;  %s6041_s15 = sld [smem:[#allocation13_spill]] }
  0x6e   : > { %590 = vadd.xlane.f32.xlu0 %v5431_v2  ;;  %812 = vmatpush1.bf16.msra.mxu0 %v4863_v22 }
  0x6f   : > { %4475 = vmatpush3.bf16.msra.mxu1 %v4864_v23  ;;  %813 = vmatprep.subr.bf16.mxu0 %v4865_v24  ;;  %v5580_v23 = vld [vmem:[%s5577_s0] ss:$0 sm:$0xff] }
  0x70   : > { %4476 = vmatprep.subr.bf16.mxu1 %v5217_v5 }
  0x72   : > { %814 = vmatpush1.bf16.msra.mxu0 %v4867_v25 }
  0x73   : > { %4477 = vmatpush3.bf16.msra.mxu1 %v4868_v26  ;;  %815 = vmatprep.subr.bf16.mxu0 %v4869_v27 }
  0x74   : > { %4478 = vmatprep.subr.bf16.mxu1 %v5217_v5 }
  0x76   : > { %816 = vmatpush1.bf16.msra.mxu0 %v4871_v28 }
  0x77   : > { %4479 = vmatpush3.bf16.msra.mxu1 %v4872_v29  ;;  %817 = vmatprep.subr.bf16.mxu0 %v4873_v30 }
  0x78   : > { %4480 = vmatprep.subr.bf16.mxu1 %v5217_v5 }
  0x7a   : > { %818 = vmatpush1.bf16.msra.mxu0 %v4875_v32 }
  0x7b   : > { %4481 = vmatpush3.bf16.msra.mxu1 %v4876_v33  ;;  %819 = vmatprep.subr.bf16.mxu0 %v4877_v34 }
  0x7c   : > { %4482 = vmatprep.subr.bf16.mxu1 %v5217_v5 }
  0x7e   : > { %820 = vmatpush1.bf16.msra.mxu0 %v4879_v35 }
  0x7f   : > { %4483 = vmatpush3.bf16.msra.mxu1 %v4880_v36 }
  0xf7   : > { %v589_v8 = vpop.xlane.xlu0 %588 }
  0xf8   : > { %v593_v9 = vmul.f32 0.0078125, %v589_v8 }
  0xfa   : > { %v5449_v10 = vsub.f32 %v5428_v1, %v593_v9 }
  0xfb   : > { %v591_v11 = vpop.xlane.xlu0 %590 }
  0xfc   : > { %v594_v12 = vmul.f32 0.0078125, %v591_v11  ;;  %v597_v13 = vmul.f32 %v5449_v10, %v5449_v10 }
  0xfe   : > { %v5454_v14 = vsub.f32 %v5431_v2, %v594_v12  ;;  %599 = vadd.xlane.f32.xlu1 %v597_v13 }
 0x100   : > { %v598_v15 = vmul.f32 %v5454_v14, %v5454_v14 }
 0x102   : > { %601 = vadd.xlane.f32.xlu1 %v598_v15 }
 0x18b   : > { %v600_v37 = vpop.xlane.xlu1 %599 }
 0x18c   : > { %v603_v38 = vmul.f32 0.0078125, %v600_v37 }
 0x18e   : > { %v605_v39 = vadd.f32 1e-05, %v603_v38 }
 0x18f   : > { %v602_v40 = vpop.xlane.xlu1 %601 }
 0x190   : > { %5009 = vrsqrt.f32 %v605_v39  ;;  %v604_v41 = vmul.f32 0.0078125, %v602_v40 }
 0x192   : > { %v606_v42 = vadd.f32 1e-05, %v604_v41 }
 0x194   : > { %5011 = vrsqrt.f32 %v606_v42 }
 0x19a   : > { %v5010_v43 = vpop.eup %5009 }
 0x19b   : > { %v609_v44 = vmul.f32 %v5010_v43, %v5449_v10 }
 0x19d   : > { %v617_v48 = vmul.f32 %v4076_v45, %v609_v44 }
 0x19e   : > { %v5012_v46 = vpop.eup %5011 }
 0x19f   : > { %v610_v47 = vmul.f32 %v5012_v46, %v5454_v14  ;;  %v625_v51 = vadd.f32 %v4077_v49, %v617_v48 }
 0x1a1   : > { %v618_v50 = vmul.f32 %v4076_v45, %v610_v47 }
 0x1a3   : > { %v626_v52 = vadd.f32 %v4077_v49, %v618_v50 }
 0x1a5   : > { %v660_v53 = vpack.c.bf16 %v626_v52, %v625_v51 }
 0x1a7   : > { %838 = vmatmul.mubr.bf16.vlgmr.msra.gmra.mrb[0].mxu0 %v660_v53  ;;  %4485 = vmatmul.mubr.bf16.vlgmr.msra.gmra.mrb[0].mxu1 %v660_v53 }
 0x27a   : > { %v839_v62 = vpop.f32.mrb[0].mxu0  ;;  %v882_v63 = vpop.f32.mrb[0].mxu1 }
 0x27b   : > { %v840_v3 = vadd.f32 %v839_v62, %v665_v60  ;;  %v841_v4 = vpop.f32.mrb[1].mxu0  ;;  %v4486_v6 = vpop.f32.mrb[1].mxu1  ;;  %v883_v10 = vadd.f32 %v882_v63, %v673_v61 }
 0x27c   : > { %v843_v7 = vpop.f32.mrb[2].mxu0  ;;  %v885_v8 = vpop.f32.mrb[2].mxu1  ;;  %v842_v14 = vadd.f32 %v841_v4, %v669_v0 }
 0x27d   : > { %v5551_v9 = vmul.f32 0.17677669, %v840_v3  ;;  %v886_v11 = vadd.f32 %v885_v8, %v673_v61  ;;  %v845_v12 = vpop.f32.mrb[3].mxu0  ;;  %v4487_v13 = vpop.f32.mrb[3].mxu1  ;;  %v844_v21 = vadd.f32 %v843_v7, %v665_v60 }
 0x27e   : > { %v846_v15 = vadd.f32 %v845_v12, %v669_v0 }
 0x27f   : > { %4492 = vmatprep.mubr.msk.f32.mxu0 %vm897_vm1, %v5551_v9  ;;  %v4666_v17 = vpack.c.bf16 %v886_v11, %v883_v10  ;;  %v5561_v18 = vpack.i.bf16 %v886_v11, %v883_v10  ;;  %v5569_v22 = vmul.f32 0.17677669, %v844_v21 }
 0x280   : > { %v4660_v19 = vpack.c.bf16 %v846_v15, %v842_v14  ;;  %v5563_v20 = vpack.i.bf16 %v846_v15, %v842_v14 }
 0x282   : > { %4662 = vmatprep.subr.msk.bf16.mxu0 %vm5557_vm2, %v4660_v19 }
 0x283   : > { %4665 = vmatpush3.bf16.xpose.msk.msra.mxu0 %vm5557_vm2, %v4660_v19 }
 0x284   : > { %4667 = vmatprep.subr.bf16.mxu0 %v4666_v17 }
 0x28a   : > { %4493 = vmatmul.mubr.msk.f32.vlgmr.msra.gmra.mrb[4].mxu0 %vm897_vm1, %v5569_v22 }
 0x28b   : > { %4669 = vmatpush3.bf16.msra.mxu0 %v4666_v17 }
 0x35d   : > { %v4494_v24 = vpop.f32.mrb[4].mxu0 }
 0x35e   : > { %v982_v25 = vadd.f32 %v4494_v24, %v5580_v23  ;;  %v976_v26 = vpop.f32.mrb[5].mxu0 }
 0x35f   : > { %v977_v27 = vadd.f32 %v5580_v23, %v976_v26 }
 0x360   : > { %v989_v28 = vsel %vm985_vm3, %v982_v25, -inf }
 0x361   : > { %990 = vmax.xlane.f32.xlu1 %v989_v28  ;;  %v986_v29 = vsel %vm985_vm3, %v977_v27, -inf }
 0x362   : > { %987 = vmax.xlane.f32.xlu0 %v986_v29 }
 0x372   : > { %4795 = vrot.lane.b32.xlu1 %v5563_v20, %s5220_s23 }
 0x376   : > { %1091 = vrot.lane.b32.xlu1 %v5551_v9, %s5221_s27 }
 0x378   : > { %4790 = vrot.lane.b32.xlu0 %v5563_v20, %s5221_s27 }
 0x37a   : > { %1093 = vrot.lane.b32.xlu1 %v5569_v22, %s5221_s27 }
 0x37c   : > { %1304 = vrot.lane.b32.xlu0 %v5551_v9, %s5220_s23 }
 0x37e   : > { %1306 = vrot.lane.b32.xlu1 %v5569_v22, %s5220_s23 }
 0x3ee   : > { %v991_v30 = vpop.xlane.xlu1 %990 }
 0x3ef   : > { %v993_v32 = vsub.f32 %v982_v25, %v991_v30  ;;  %v988_v33 = vpop.xlane.xlu0 %987 }
 0x3f0   : > { %v992_v34 = vsub.f32 %v977_v27, %v988_v33 }
 0x3f1   : > { %v996_v35 = vmul.f32 1.442695, %v993_v32 }
 0x3f2   : > { %v994_v36 = vmul.f32 1.442695, %v992_v34  ;;  %v4796_v41 = vpop.permute.xlu1 %4795 }
 0x3f3   : > { %v4791_v37 = vpop.permute.xlu0 %4790  ;;  %v4798_v42 = vunpack.i.h.bf16 %v4796_v41  ;;  %v4797_v43 = vunpack.i.l.bf16 %v4796_v41 }
 0x3f4   : > { %5013 = vpow2.f32 %v994_v36  ;;  %v4793_v38 = vunpack.i.h.bf16 %v4791_v37  ;;  %v4792_v39 = vunpack.i.l.bf16 %v4791_v37 }
 0x3f5   : > { %5015 = vpow2.f32 %v996_v35  ;;  %v4680_v46 = vpack.c.bf16 %v4798_v42, %v4797_v43 }
 0x3f6   : > { %v4670_v40 = vpack.c.bf16 %v4793_v38, %v4792_v39  ;;  %v1092_v47 = vpop.permute.xlu1 %1091 }
 0x3f7   : > { %v1305_v49 = vpop.permute.xlu0 %1304 }
 0x3f8   : > { %4672 = vmatprep.subr.msk.bf16.mxu0 %vm5557_vm2, %v4670_v40 }
 0x3fa   : > { %v1094_v48 = vpop.permute.xlu1 %1093 }
 0x3fe   : > { %v5600_v44 = vpop.eup %5013  ;;  %v1307_v50 = vpop.permute.xlu1 %1306 }
 0x3ff   : > { %v5602_v45 = vpop.eup %5015  ;;  %4499 = vmatprep.mubr.msk.f32.mxu0 %vm985_vm3, %v5600_v44 }
 0x400   : > { %4500 = vmatmul.mubr.msk.f32.vlgmr.msra.gmra.mrb[6].mxu0 %vm985_vm3, %v5602_v45 }
 0x401   : > { %4675 = vmatpush3.bf16.xpose.msk.msra.mxu0 %vm5557_vm2, %v4670_v40  ;;  %4506 = vmatprep.mubr.msk.f32.mxu0 %vm897_vm1, %v1092_v47 }
 0x402   : > { %4682 = vmatprep.subr.msk.bf16.mxu0 %vm5557_vm2, %v4680_v46 }
 0x408   : > { %4507 = vmatmul.mubr.msk.f32.vlgmr.msra.gmra.mrb[8].mxu0 %vm897_vm1, %v1094_v48 }
 0x409   : > { %4685 = vmatpush3.bf16.xpose.msk.msra.mxu0 %vm5557_vm2, %v4680_v46  ;;  %4520 = vmatprep.mubr.msk.f32.mxu0 %vm897_vm1, %v1305_v49 }
 0x410   : > { %4521 = vmatmul.mubr.msk.f32.vlgmr.msra.gmra.mrb[10].mxu0 %vm897_vm1, %v1307_v50 }
 0x4d3   : > { %v5618_v51 = vpop.f32.mrb[6].mxu0 }
 0x4d4   : > { %v5620_v52 = vpop.f32.mrb[7].mxu0 }
 0x4db   : > { %v4508_v53 = vpop.f32.mrb[8].mxu0 }
 0x4dc   : > { %v1173_v54 = vpop.f32.mrb[9].mxu0  ;;  %v1179_v3 = vadd.f32 %v4508_v53, %v5580_v23 }
 0x4dd   : > { %v1174_v4 = vadd.f32 %v5580_v23, %v1173_v54 }
 0x4de   : > { %v1185_v6 = vsel %vm985_vm3, %v1179_v3, -inf }
 0x4df   : > { %v1182_v7 = vsel %vm985_vm3, %v1174_v4, -inf }
 0x4e3   : > { %v4522_v57 = vpop.f32.mrb[10].mxu0 }
 0x4e4   : > { %v1392_v60 = vadd.f32 %v4522_v57, %v5580_v23  ;;  %v1386_v61 = vpop.f32.mrb[11].mxu0 }
 0x4e5   : > { %v1387_v62 = vadd.f32 %v5580_v23, %v1386_v61 }
 0x4e6   : > { %v1398_v63 = vsel %vm985_vm3, %v1392_v60, -inf }
 0x4e7   : > { %1399 = vmax.xlane.f32.xlu1 %v1398_v63  ;;  %v1395_v0 = vsel %vm985_vm3, %v1387_v62, -inf }
 0x4e8   : > { %1396 = vmax.xlane.f32.xlu0 %v1395_v0 }
 0x4f8   : > { %4805 = vrot.lane.b32.xlu1 %v5563_v20, %s5222_s16 }
 0x4fc   : > { %1517 = vrot.lane.b32.xlu1 %v5569_v22, %s5222_s16 }
 0x4fe   : > { %4800 = vrot.lane.b32.xlu0 %v5561_v18, %s5220_s23 }
 0x502   : > { %1515 = vrot.lane.b32.xlu0 %v5551_v9, %s5222_s16 }
 0x520   : > { %1186 = vmax.xlane.f32.xlu1 %v1185_v6 }
 0x521   : > { %1183 = vmax.xlane.f32.xlu0 %v1182_v7 }
 0x531   : > { %4815 = vrot.lane.b32.xlu1 %v5561_v18, %s5222_s16 }
 0x574   : > { %v1400_v8 = vpop.xlane.xlu1 %1399 }
 0x575   : > { %v1402_v10 = vsub.f32 %v1392_v60, %v1400_v8  ;;  %v1397_v11 = vpop.xlane.xlu0 %1396 }
 0x576   : > { %v1401_v12 = vsub.f32 %v1387_v62, %v1397_v11 }
 0x577   : > { %v1405_v13 = vmul.f32 1.442695, %v1402_v10 }
 0x578   : > { %v1403_v14 = vmul.f32 1.442695, %v1401_v12  ;;  %v4806_v9 = vpop.permute.xlu1 %4805 }
 0x579   : > { %v4808_v15 = vunpack.i.h.bf16 %v4806_v9  ;;  %v4801_v17 = vpop.permute.xlu0 %4800  ;;  %v4807_v19 = vunpack.i.l.bf16 %v4806_v9  ;;  %v998_v9 = vsel %vm985_vm3, %v5600_v44, 0.0 }
 0x57a   : > { %5017 = vpow2.f32 %v1403_v14  ;;  %v4803_v20 = vunpack.i.h.bf16 %v4801_v17  ;;  %v4802_v21 = vunpack.i.l.bf16 %v4801_v17  ;;  %v4882_v17 = vld [vmem:[#allocation3 + $0x8] sm:$0xff]  }
 0x57b   : > { %5019 = vpow2.f32 %v1405_v13  ;;  %v4690_v24 = vpack.c.bf16 %v4808_v15, %v4807_v19  ;;  %v1001_v13 = vsel %vm985_vm3, %v5602_v45, 0.0  ;;  %v4881_v15 = vld [vmem:[#allocation3] sm:$0xff]   ;;  %v4883_v45 = vld [vmem:[#allocation3 + $0x10] sm:$0xff]  }
 0x57c   : > { %v4686_v22 = vpack.c.bf16 %v4803_v20, %v4802_v21  ;;  %v1518_v28 = vpop.permute.xlu1 %1517 }
 0x57d   : > { %v1516_v27 = vpop.permute.xlu0 %1515 }
 0x57e   : > { %4687 = vmatprep.subr.bf16.mxu0 %v4686_v22 }
 0x57f   : > { %4689 = vmatpush3.bf16.msra.mxu0 %v4686_v22 }
 0x580   : > { %4692 = vmatprep.subr.msk.bf16.mxu0 %vm5557_vm2, %v4690_v24 }
 0x584   : > { %v5018_v25 = vpop.eup %5017 }
 0x585   : > { %v5020_v26 = vpop.eup %5019  ;;  %4527 = vmatprep.mubr.msk.f32.mxu0 %vm985_vm3, %v5018_v25  ;;  %v1407_v53 = vsel %vm985_vm3, %v5018_v25, 0.0 }
 0x586   : > { %4528 = vmatmul.mubr.msk.f32.vlgmr.msra.gmra.mrb[12].mxu0 %vm985_vm3, %v5020_v26  ;;  %v1410_v35 = vsel %vm985_vm3, %v5020_v26, 0.0 }
 0x587   : > { %4534 = vmatprep.mubr.msk.f32.mxu0 %vm897_vm1, %v1516_v27 }
 0x588   : > { %4695 = vmatpush3.bf16.xpose.msk.msra.mxu0 %vm5557_vm2, %v4690_v24 }
 0x58f   : > { %4535 = vmatmul.mubr.msk.f32.vlgmr.msra.gmra.mrb[14].mxu0 %vm897_vm1, %v1518_v28 }
 0x590   : > { %2057 = vmatprep.mubr.bf16.mxu0 %v5218_v31 }
 0x5ad   : > { %v1187_v46 = vpop.xlane.xlu1 %1186 }
 0x5ae   : > { %v1184_v29 = vpop.xlane.xlu0 %1183  ;;  %v1189_v47 = vsub.f32 %v1179_v3, %v1187_v46 }
 0x5af   : > { %v1188_v30 = vsub.f32 %v1174_v4, %v1184_v29 }
 0x5b0   : > { %v1192_v48 = vmul.f32 1.442695, %v1189_v47 }
 0x5b1   : > { %v1190_v32 = vmul.f32 1.442695, %v1188_v30  ;;  %v4816_v61 = vpop.permute.xlu1 %4815 }
 0x5b2   : > { %v4817_v3 = vunpack.i.l.bf16 %v4816_v61 }
 0x5b3   : > { %5021 = vpow2.f32 %v1190_v32  ;;  %v4884_v32 = vld [vmem:[#allocation3 + $0x18] sm:$0xff]  }
 0x5b4   : > { %5023 = vpow2.f32 %v1192_v48 }
 0x5bd   : > { %v5022_v33 = vpop.eup %5021 }
 0x5be   : > { %4513 = vmatprep.mubr.msk.f32.mxu1 %vm985_vm3, %v5022_v33  ;;  %v1194_v34 = vsel %vm985_vm3, %v5022_v33, 0.0  ;;  %v5024_v49 = vpop.eup %5023  ;;  %v4885_v33 = vld [vmem:[#allocation3 + $0x20] sm:$0xff]  }
 0x5bf   : > { %1195 = vadd.xlane.f32.xlu1 %v1194_v34  ;;  %v1197_v50 = vsel %vm985_vm3, %v5024_v49, 0.0 }
 0x5c3   : > { %1411 = vadd.xlane.f32.xlu1 %v1410_v35 }
 0x64c   : > { %v1196_v19 = vpop.xlane.xlu1 %1195 }
 0x650   : > { %v1412_v21 = vpop.xlane.xlu1 %1411 }
 0x659   : > { %v5652_v36 = vpop.f32.mrb[12].mxu0 }
 0x65a   : > { %v5654_v37 = vpop.f32.mrb[13].mxu0 }
 0x662   : > { %v4536_v38 = vpop.f32.mrb[14].mxu0 }
 0x663   : > { %v1603_v39 = vadd.f32 %v4536_v38, %v5580_v23  ;;  %v1597_v40 = vpop.f32.mrb[15].mxu0 }
 0x664   : > { %v1598_v41 = vadd.f32 %v5580_v23, %v1597_v40 }
 0x665   : > { %v1609_v42 = vsel %vm985_vm3, %v1603_v39, -inf }
 0x666   : > { %1610 = vmax.xlane.f32.xlu0 %v1609_v42  ;;  %v1606_v43 = vsel %vm985_vm3, %v1598_v41, -inf  ;;  %v4887_v42 = vld [vmem:[#allocation3 + $0x30] sm:$0xff]  }
 0x66a   : > { %1607 = vmax.xlane.f32.xlu0 %v1606_v43 }
 0x680   : > { %4810 = vrot.lane.b32.xlu0 %v5561_v18, %s5221_s27  ;;  %v4818_v18 = vunpack.i.h.bf16 %v4816_v61 }
 0x682   : > { %v4696_v8 = vpack.c.bf16 %v4818_v18, %v4817_v3 }
 0x69f   : > { %1198 = vadd.xlane.f32.xlu0 %v1197_v50 }
 0x6a3   : > { %1408 = vadd.xlane.f32.xlu0 %v1407_v53 }
 0x6f3   : > { %v1611_v23 = vpop.xlane.xlu0 %1610 }
 0x6f4   : > { %v1613_v54 = vsub.f32 %v1603_v39, %v1611_v23  ;;  %v4888_v23 = vld [vmem:[#allocation3 + $0x38] sm:$0xff]  }
 0x6f6   : > { %v1616_v57 = vmul.f32 1.442695, %v1613_v54 }
 0x6f7   : > { %v1608_v60 = vpop.xlane.xlu0 %1607 }
 0x6f8   : > { %5025 = vpow2.f32 %v1616_v57  ;;  %v1612_v62 = vsub.f32 %v1598_v41, %v1608_v60 }
 0x6fa   : > { %v1614_v63 = vmul.f32 1.442695, %v1612_v62 }
 0x6fb   : > { %v4811_v0 = vpop.permute.xlu0 %4810 }
 0x6fc   : > { %5027 = vpow2.f32 %v1614_v63  ;;  %v4813_v4 = vunpack.i.h.bf16 %v4811_v0  ;;  %v4812_v6 = vunpack.i.l.bf16 %v4811_v0 }
 0x6fe   : > { %v4676_v7 = vpack.c.bf16 %v4813_v4, %v4812_v6  ;;  %v4127_v4 = vld [vmem:[%s6011_s7] ss:$0 sm:$0xff] }
 0x700   : > { %4677 = vmatprep.subr.bf16.mxu1 %v4676_v7 }
 0x701   : > { %4679 = vmatpush3.bf16.msra.mxu1 %v4676_v7 }
 0x702   : > { %v5026_v10 = vpop.eup %5025  ;;  %4697 = vmatprep.subr.bf16.mxu1 %v4696_v8 }
 0x703   : > { %v1621_v11 = vsel %vm985_vm3, %v5026_v10, 0.0 }
 0x704   : > { %1622 = vadd.xlane.f32.xlu1 %v1621_v11  ;;  %4514 = vmatmul.mubr.msk.f32.vlgmr.msra.gmra.mrb[4].mxu1 %vm985_vm3, %v5024_v49 }
 0x705   : > { %4699 = vmatpush3.bf16.msra.mxu1 %v4696_v8 }
 0x706   : > { %v5028_v12 = vpop.eup %5027  ;;  %4544 = vmatprep.subr.bf16.mxu1 %v5217_v5 }
 0x707   : > { %4541 = vmatprep.mubr.msk.f32.mxu1 %vm985_vm3, %v5028_v12  ;;  %v1618_v14 = vsel %vm985_vm3, %v5028_v12, 0.0 }
 0x708   : > { %1002 = vadd.xlane.f32.xlu1 %v1001_v13  ;;  %1619 = vadd.xlane.f32.xlu0 %v1618_v14 }
 0x709   : > { %4542 = vmatmul.mubr.msk.f32.vlgmr.msra.gmra.mrb[6].mxu1 %vm985_vm3, %v5026_v10 }
 0x70a   : > { %4560 = vmatprep.mubr.msk.bf16.mxu1 %vm5219_vm0, %v5217_v5  ;;  %4545 = vmatpush3.bf16.msra.mxu1 %v4881_v15  ;;  %v4891_v15 = vld [vmem:[#allocation5 + $0x4] ss:$8 sps:$4 sm:$0xff]  }
 0x70b   : > { %4546 = vmatprep.subr.bf16.mxu1 %v5217_v5  ;;  %2025 = vmatprep.subr.bf16.mxu0 %v4891_v15  ;;  %v4928_v15 = vld [vmem:[#allocation7 + $0x38] sm:$0xff]  }
 0x70c   : > { %999 = vadd.xlane.f32.xlu0 %v998_v9  ;;  %v4889_v9 = vld [vmem:[#allocation5] ss:$8 sps:$4 sm:$0xff]  }
 0x70d   : > { %2026 = vmatpush1.bf16.msra.mxu0 %v4889_v9  ;;  %v4927_v9 = vld [vmem:[#allocation7 + $0x78] sm:$0xff]  }
 0x70e   : > { %4547 = vmatpush3.bf16.msra.mxu1 %v4882_v17  ;;  %v4894_v17 = vld [vmem:[#allocation5 + $0x14] ss:$8 sps:$4 sm:$0xff]  }
 0x70f   : > { %4548 = vmatprep.subr.bf16.mxu1 %v5217_v5  ;;  %2027 = vmatprep.subr.bf16.mxu0 %v4894_v17  ;;  %v1899_v17 = vld [vmem:[%s6015_s11] sm:$0x3] }
 0x712   : > { %4549 = vmatpush3.bf16.msra.mxu1 %v4883_v45  ;;  %v4892_v45 = vld [vmem:[#allocation5 + $0x10] ss:$8 sps:$4 sm:$0xff]  }
 0x713   : > { %4550 = vmatprep.subr.bf16.mxu1 %v5217_v5  ;;  %2028 = vmatpush1.bf16.msra.mxu0 %v4892_v45  ;;  %v1938_v45 = vrot.slane %v1899_v17, %v5538_v56 }
 0x716   : > { %4551 = vmatpush3.bf16.msra.mxu1 %v4884_v32  ;;  %v4906_v32 = vld [vmem:[#allocation5 + $0x54] ss:$8 sps:$4 sm:$0xff]  }
 0x717   : > { %4552 = vmatprep.subr.bf16.mxu1 %v5217_v5 }
 0x71a   : > { %4553 = vmatpush3.bf16.msra.mxu1 %v4885_v33  ;;  %v4904_v33 = vld [vmem:[#allocation5 + $0x50] ss:$8 sps:$4 sm:$0xff]  }
 0x71b   : > { %4554 = vmatprep.subr.bf16.mxu1 %v5217_v5 }
 0x72c   : > { %v1199_v20 = vpop.xlane.xlu0 %1198 }
 0x730   : > { %v1409_v22 = vpop.xlane.xlu0 %1408 }
 0x791   : > { %v1623_v24 = vpop.xlane.xlu1 %1622 }
 0x795   : > { %v1003_v25 = vpop.xlane.xlu1 %1002  ;;  %v1620_v44 = vpop.xlane.xlu0 %1619 }
 0x796   : > { %5029 = vrcp.f32 %v1003_v25 }
 0x799   : > { %v1000_v26 = vpop.xlane.xlu0 %999 }
 0x79a   : > { %5031 = vrcp.f32 %v1000_v26  ;;  %v4895_v26 = vld [vmem:[#allocation5 + $0x20] ss:$8 sps:$4 sm:$0xff]  }
 0x79b   : > { %5033 = vrcp.f32 %v1199_v20 }
 0x79c   : > { %5035 = vrcp.f32 %v1196_v19 }
 0x79d   : > { %5037 = vrcp.f32 %v1409_v22 }
 0x79e   : > { %5039 = vrcp.f32 %v1412_v21 }
 0x79f   : > { %5041 = vrcp.f32 %v1623_v24 }
 0x7a0   : > { %v5030_v27 = vpop.eup %5029  ;;  %5043 = vrcp.f32 %v1620_v44  ;;  %v4897_v44 = vld [vmem:[#allocation5 + $0x24] ss:$8 sps:$4 sm:$0xff]  }
 0x7a1   : > { %v1088_v28 = vmul.f32 %v5030_v27, %v5618_v51  ;;  %v4886_v51 = vld [vmem:[#allocation3 + $0x28] sm:$0xff]   ;;  %2029 = vmatprep.subr.bf16.mxu0 %v4897_v44  ;;  %v4900_v27 = vld [vmem:[#allocation5 + $0x34] ss:$8 sps:$4 sm:$0xff]  }
 0x7a2   : > { %4555 = vmatpush3.bf16.msra.mxu1 %v4886_v51  ;;  %2030 = vmatpush1.bf16.msra.mxu0 %v4895_v26  ;;  %v4909_v51 = vld [vmem:[#allocation5 + $0x64] ss:$8 sps:$4 sm:$0xff]  }
 0x7a3   : > { %1090 = vst.msk [vmem:[#allocation2 + $0x8] sm:$0xff] %vm897_vm1, %v1088_v28  ;;  %4556 = vmatprep.subr.bf16.mxu1 %v5217_v5  ;;  %v4898_v28 = vld [vmem:[#allocation5 + $0x30] ss:$8 sps:$4 sm:$0xff]   ;;  %2031 = vmatprep.subr.bf16.mxu0 %v4900_v27 }
 0x7a4   : > { %v5032_v29 = vpop.eup %5031 }
 0x7a5   : > { %v1087_v30 = vmul.f32 %v5032_v29, %v5620_v52  ;;  %v5034_v34 = vpop.eup %5033  ;;  %v4903_v29 = vld [vmem:[#allocation5 + $0x44] ss:$8 sps:$4 sm:$0xff]  }
 0x7a6   : > { %v5036_v52 = vpop.eup %5035  ;;  %4557 = vmatpush3.bf16.msra.mxu1 %v4887_v42  ;;  %2032 = vmatpush1.bf16.msra.mxu0 %v4898_v28 }
 0x7a7   : > { %1089 = vst.msk [vmem:[#allocation2] sm:$0xff] %vm897_vm1, %v1087_v30  ;;  %v5038_v40 = vpop.eup %5037  ;;  %4558 = vmatprep.subr.bf16.mxu1 %v5217_v5  ;;  %v4901_v30 = vld [vmem:[#allocation5 + $0x40] ss:$8 sps:$4 sm:$0xff]   ;;  %2033 = vmatprep.subr.bf16.mxu0 %v4903_v29 }
 0x7a8   : > { %v5040_v43 = vpop.eup %5039  ;;  %v1502_v48 = vmul.f32 %v5038_v40, %v5654_v37 }
 0x7a9   : > { %v5042_v46 = vpop.eup %5041  ;;  %v1503_v57 = vmul.f32 %v5040_v43, %v5652_v36 }
 0x7aa   : > { %v5044_v49 = vpop.eup %5043  ;;  %4559 = vmatpush3.bf16.msra.mxu1 %v4888_v23  ;;  %2034 = vmatpush1.bf16.msra.mxu0 %v4901_v30  ;;  %v4137_v23 = vld [vmem:[%s6013_s9] ss:$0 sm:$0xff] }
 0x7ab   : > { %2035 = vmatprep.subr.bf16.mxu0 %v4906_v32 }
 0x7ae   : > { %2036 = vmatpush1.bf16.msra.mxu0 %v4904_v33 }
 0x7af   : > { %2037 = vmatprep.subr.bf16.mxu0 %v4909_v51 }
 0x7d7   : > { %v4515_v35 = vpop.f32.mrb[4].mxu1 }
 0x7d8   : > { %v1292_v38 = vmul.f32 %v5034_v34, %v4515_v35  ;;  %v1280_v39 = vpop.f32.mrb[5].mxu1  ;;  %v4907_v34 = vld [vmem:[#allocation5 + $0x60] ss:$8 sps:$4 sm:$0xff]   ;;  %v4912_v35 = vld [vmem:[#allocation5 + $0x74] ss:$8 sps:$4 sm:$0xff]  }
 0x7d9   : > { %v1291_v41 = vmul.f32 %v5036_v52, %v1280_v39  ;;  %2038 = vmatpush1.bf16.msra.mxu0 %v4907_v34  ;;  %v4910_v52 = vld [vmem:[#allocation5 + $0x70] ss:$8 sps:$4 sm:$0xff]  }
 0x7da   : > { %1297 = vrot.lane.b32.xlu1 %v1292_v38, %s5222_s16  ;;  %2039 = vmatprep.subr.bf16.mxu0 %v4912_v35 }
 0x7db   : > { %1295 = vrot.lane.b32.xlu0 %v1291_v41, %s5222_s16 }
 0x7dc   : > { %v4543_v47 = vpop.f32.mrb[6].mxu1 }
 0x7dd   : > { %v1714_v50 = vmul.f32 %v5042_v46, %v4543_v47  ;;  %v1702_v53 = vpop.f32.mrb[7].mxu1  ;;  %2040 = vmatpush1.bf16.msra.mxu0 %v4910_v52 }
 0x7de   : > { %v1713_v54 = vmul.f32 %v5044_v49, %v1702_v53  ;;  %1506 = vrot.lane.b32.xlu1 %v1502_v48, %s5220_s23  ;;  %v4136_v48 = vld [vmem:[%s6012_s8] ss:$0 sm:$0xff] }
 0x7e0   : > { %1717 = vrot.lane.b32.xlu0 %v1713_v54, %s5221_s27 }
 0x7e2   : > { %1508 = vrot.lane.b32.xlu1 %v1503_v57, %s5220_s23 }
 0x7e6   : > { %1719 = vrot.lane.b32.xlu1 %v1714_v50, %s5221_s27 }
 0x84c   : > { %v1298_v37 = vpop.permute.xlu1 %1297 }
 0x84d   : > { %1303 = vst.msk [vmem:[#allocation2 + $0x8] sm:$0xff] %vm1301_vm4, %v1298_v37  ;;  %v1296_v60 = vpop.permute.xlu0 %1295 }
 0x84e   : > { %1302 = vst.msk [vmem:[#allocation2] sm:$0xff] %vm1301_vm4, %v1296_v60 }
 0x850   : > { %v1507_v61 = vpop.permute.xlu1 %1506 }
 0x851   : > { %1513 = vst.msk [vmem:[#allocation2] sm:$0xff] %vm1512_vm5, %v1507_v61  ;;  %v4913_v61 = vld [vmem:[#allocation7 + $0x40] sm:$0xff]  }
 0x852   : > { %v1718_v36 = vpop.permute.xlu0 %1717  ;;  %4374 = vmatprep.subr.bf16.mxu1 %v4913_v61 }
 0x853   : > { %1724 = vst.msk [vmem:[#allocation2] sm:$0xff] %vm1723_vm6, %v1718_v36  ;;  %v4914_v36 = vld [vmem:[#allocation7] sm:$0xff]  }
 0x854   : > { %v1509_v62 = vpop.permute.xlu1 %1508 }
 0x855   : > { %1514 = vst.msk [vmem:[#allocation2 + $0x8] sm:$0xff] %vm1512_vm5, %v1509_v62  ;;  %v4915_v62 = vld [vmem:[#allocation7 + $0x48] sm:$0xff]  }
 0x858   : > { %v1720_v63 = vpop.permute.xlu1 %1719 }
 0x859   : > { %1725 = vst.msk [vmem:[#allocation2 + $0x8] sm:$0xff] %vm1723_vm6, %v1720_v63  ;;  %v4916_v63 = vld [vmem:[#allocation7 + $0x8] sm:$0xff]  }
 0x85a   : > { %v1726_v18 = vld [vmem:[#allocation2] sm:$0xff] }
 0x860   : > { %v1727_v0 = vld [vmem:[#allocation2 + $0x8] sm:$0xff] }
 0x861   : > { %v1745_v3 = vpack.c.bf16 %v1727_v0, %v1726_v18  ;;  %v4917_v18 = vld [vmem:[#allocation7 + $0x50] sm:$0xff]  }
 0x862   : > { %v4918_v0 = vld [vmem:[#allocation7 + $0x10] sm:$0xff]  }
 0x863   : > { %4561 = vmatmul.mubr.bf16.vlgmr.msra.gmra.mrb[8].mxu1 %v1745_v3  ;;  %v4919_v3 = vld [vmem:[#allocation7 + $0x58] sm:$0xff]  }
 0x864   : > { %4375 = vmatpush3.bf16.msra.mxu1 %v4914_v36 }
 0x865   : > { %4376 = vmatprep.subr.bf16.mxu1 %v4915_v62 }
 0x868   : > { %4377 = vmatpush3.bf16.msra.mxu1 %v4916_v63 }
 0x869   : > { %4378 = vmatprep.subr.bf16.mxu1 %v4917_v18 }
 0x86c   : > { %4379 = vmatpush3.bf16.msra.mxu1 %v4918_v0 }
 0x86d   : > { %4380 = vmatprep.subr.bf16.mxu1 %v4919_v3 }
 0x936   : > { %v1834_v6 = vpop.f32.mrb[8].mxu1 }
 0x937   : > { %v1835_v7 = vadd.f32 %v4127_v4, %v1834_v6  ;;  %v4562_v8 = vpop.f32.mrb[9].mxu1  ;;  %v4921_v6 = vld [vmem:[#allocation7 + $0x60] sm:$0xff]  }
 0x938   : > { %v1837_v10 = vpop.f32.mrb[10].mxu1  ;;  %v4923_v8 = vld [vmem:[#allocation7 + $0x68] sm:$0xff]  }
 0x939   : > { %v5705_v11 = vadd.f32 %v5428_v1, %v1835_v7  ;;  %v1838_v12 = vadd.f32 %v4127_v4, %v1837_v10  ;;  %v4563_v13 = vpop.f32.mrb[11].mxu1  ;;  %v4920_v4 = vld [vmem:[#allocation7 + $0x18] sm:$0xff]   ;;  %v4922_v7 = vld [vmem:[#allocation7 + $0x20] sm:$0xff]   ;;  %v4924_v10 = vld [vmem:[#allocation7 + $0x28] sm:$0xff]  }
 0x93a   : > { %4381 = vmatpush3.bf16.msra.mxu1 %v4920_v4  ;;  %v4926_v13 = vld [vmem:[#allocation7 + $0x30] sm:$0xff]  }
 0x93b   : > { %v5708_v14 = vadd.f32 %v5431_v2, %v1838_v12  ;;  %1845 = vadd.xlane.f32.xlu0 %v5705_v11  ;;  %4382 = vmatprep.subr.bf16.mxu1 %v4921_v6  ;;  %v4925_v12 = vld [vmem:[#allocation7 + $0x70] sm:$0xff]  }
 0x93d   : > { %1847 = vadd.xlane.f32.xlu1 %v5708_v14 }
 0x93e   : > { %4383 = vmatpush3.bf16.msra.mxu1 %v4922_v7 }
 0x93f   : > { %4384 = vmatprep.subr.bf16.mxu1 %v4923_v8 }
 0x942   : > { %4385 = vmatpush3.bf16.msra.mxu1 %v4924_v10  ;;  %v4154_v10 = vld [vmem:[%s6017_s13] ss:$0 sm:$0xff] }
 0x943   : > { %4386 = vmatprep.subr.bf16.mxu1 %v4925_v12 }
 0x946   : > { %4387 = vmatpush3.bf16.msra.mxu1 %v4926_v13 }
 0x947   : > { %4388 = vmatprep.subr.bf16.mxu1 %v4927_v9 }
 0x94a   : > { %4389 = vmatpush3.bf16.msra.mxu1 %v4928_v15 }
 0x94b   : > { %4564 = vmatprep.subr.bf16.mxu1 %v5217_v5 }
 0x9c8   : > { %v1846_v19 = vpop.xlane.xlu0 %1845 }
 0x9c9   : > { %v1849_v1 = vmul.f32 0.0078125, %v1846_v19  ;;  %v1942_v19 = vrot.slane %v1899_v17, %v5545_v59 }
 0x9ca   : > { %v1848_v20 = vpop.xlane.xlu1 %1847 }
 0x9cb   : > { %v1851_v21 = vsub.f32 %v5705_v11, %v1849_v1  ;;  %v1850_v22 = vmul.f32 0.0078125, %v1848_v20 }
 0x9cd   : > { %v1852_v2 = vsub.f32 %v5708_v14, %v1850_v22  ;;  %v1853_v24 = vmul.f32 %v1851_v21, %v1851_v21 }
 0x9cf   : > { %1855 = vadd.xlane.f32.xlu0 %v1853_v24  ;;  %v1854_v25 = vmul.f32 %v1852_v2, %v1852_v2 }
 0x9d3   : > { %1857 = vadd.xlane.f32.xlu0 %v1854_v25 }
 0xa5c   : > { %v1856_v38 = vpop.xlane.xlu0 %1855 }
 0xa5d   : > { %v1859_v39 = vmul.f32 0.0078125, %v1856_v38 }
 0xa5f   : > { %v1861_v40 = vadd.f32 1e-05, %v1859_v39 }
 0xa60   : > { %v1858_v41 = vpop.xlane.xlu0 %1857 }
 0xa61   : > { %5045 = vrsqrt.f32 %v1861_v40  ;;  %v1860_v42 = vmul.f32 0.0078125, %v1858_v41 }
 0xa63   : > { %v1862_v43 = vadd.f32 1e-05, %v1860_v42 }
 0xa65   : > { %5047 = vrsqrt.f32 %v1862_v43 }
 0xa6b   : > { %v5046_v46 = vpop.eup %5045 }
 0xa6c   : > { %v1865_v47 = vmul.f32 %v5046_v46, %v1851_v21 }
 0xa6e   : > { %v1873_v53 = vmul.f32 %v4136_v48, %v1865_v47 }
 0xa6f   : > { %v5048_v49 = vpop.eup %5047 }
 0xa70   : > { %v1866_v50 = vmul.f32 %v5048_v49, %v1852_v2  ;;  %v1881_v57 = vadd.f32 %v4137_v23, %v1873_v53 }
 0xa72   : > { %v1874_v54 = vmul.f32 %v4136_v48, %v1866_v50 }
 0xa74   : > { %v1882_v37 = vadd.f32 %v4137_v23, %v1874_v54 }
 0xa76   : > { %v1933_v60 = vpack.c.bf16 %v1882_v37, %v1881_v57 }
 0xa78   : > { %2058 = vmatmul.mubr.bf16.vlgmr.msra.gmra.mrb[16].mxu0 %v1933_v60 }
 0xa79   : > { %2505 = vmatprep.mubr.bf16.mxu0 %v5218_v31 }
 0xb4b   : > { %v2059_v1 = vpop.f32.mrb[16].mxu0 }
 0xb4c   : > { %v2060_v20 = vadd.f32 %v2059_v1, %v1938_v45  ;;  %v2061_v21 = vpop.f32.mrb[17].mxu0 }
 0xb4d   : > { %v2062_v22 = vadd.f32 %v2061_v21, %v1942_v19  ;;  %v2063_v2 = vpop.f32.mrb[18].mxu0  ;;  %v4929_v21 = vld [vmem:[%s6008_s4 + $0xc0] ss:$12 sps:$4 sm:$0xff]  }
 0xb4e   : > { %v2068_v24 = vmul.f32 %v2060_v20, %v2060_v20  ;;  %v2064_v25 = vadd.f32 %v2063_v2, %v1938_v45  ;;  %v2065_v44 = vpop.f32.mrb[19].mxu0  ;;  %v4935_v2 = vld [vmem:[%s6008_s4 + $0xdc] ss:$12 sps:$4 sm:$0xff]  }
 0xb4f   : > { %v2069_v26 = vmul.f32 %v2062_v22, %v2062_v22  ;;  %v2066_v27 = vadd.f32 %v2065_v44, %v1942_v19 }
 0xb50   : > { %v2072_v28 = vmul.f32 %v2068_v24, %v2060_v20  ;;  %v2070_v29 = vmul.f32 %v2064_v25, %v2064_v25  ;;  %v4933_v24 = vld [vmem:[%s6008_s4 + $0xd8] ss:$12 sps:$4 sm:$0xff]  }
 0xb51   : > { %v2073_v30 = vmul.f32 %v2069_v26, %v2062_v22  ;;  %v2071_v32 = vmul.f32 %v2066_v27, %v2066_v27 }
 0xb52   : > { %v2076_v33 = vmul.f32 0.044715, %v2072_v28  ;;  %v2074_v51 = vmul.f32 %v2070_v29, %v2064_v25 }
 0xb53   : > { %v2077_v34 = vmul.f32 0.044715, %v2073_v30  ;;  %v2075_v35 = vmul.f32 %v2071_v32, %v2066_v27 }
 0xb54   : > { %v2080_v52 = vadd.f32 %v2076_v33, %v2060_v20  ;;  %v2078_v38 = vmul.f32 0.044715, %v2074_v51  ;;  %v4939_v33 = vld [vmem:[%s6008_s4 + $0xf4] ss:$12 sps:$4 sm:$0xff]   ;;  %v4937_v51 = vld [vmem:[%s6008_s4 + $0xf0] ss:$12 sps:$4 sm:$0xff]  }
 0xb55   : > { %v2081_v39 = vadd.f32 %v2077_v34, %v2062_v22  ;;  %v2079_v40 = vmul.f32 0.044715, %v2075_v35  ;;  %v4940_v34 = vld [vmem:[%s6008_s4 + $0xf8] ss:$12 sps:$4 sm:$0xff]  }
 0xb56   : > { %v2084_v41 = vmul.f32 0.7978846, %v2080_v52  ;;  %v2082_v42 = vadd.f32 %v2078_v38, %v2064_v25  ;;  %v4943_v35 = vld [vmem:[%s6008_s4 + $0x10c] ss:$12 sps:$4 sm:$0xff]   ;;  %v4941_v52 = vld [vmem:[%s6008_s4 + $0x108] ss:$12 sps:$4 sm:$0xff]  }
 0xb57   : > { %v2085_v43 = vmul.f32 0.7978846, %v2081_v39  ;;  %v2083_v46 = vadd.f32 %v2079_v40, %v2066_v27  ;;  %v4944_v38 = vld [vmem:[%s6008_s4 + $0x110] ss:$12 sps:$4 sm:$0xff]   ;;  %v4945_v40 = vld [vmem:[%s6008_s4 + $0x120] ss:$12 sps:$4 sm:$0xff]  }
 0xb58   : > { %5049 = vtanh.f32 %v2084_v41  ;;  %v2086_v47 = vmul.f32 0.7978846, %v2082_v42  ;;  %v4947_v39 = vld [vmem:[%s6008_s4 + $0x124] ss:$12 sps:$4 sm:$0xff]   ;;  %v4948_v41 = vld [vmem:[%s6008_s4 + $0x128] ss:$12 sps:$4 sm:$0xff]  }
 0xb59   : > { %5051 = vtanh.f32 %v2085_v43  ;;  %v2087_v48 = vmul.f32 0.7978846, %v2083_v46  ;;  %v4951_v42 = vld [vmem:[%s6008_s4 + $0x13c] ss:$12 sps:$4 sm:$0xff]   ;;  %v4949_v43 = vld [vmem:[%s6008_s4 + $0x138] ss:$12 sps:$4 sm:$0xff]  }
 0xb5a   : > { %5053 = vtanh.f32 %v2086_v47  ;;  %v4952_v46 = vld [vmem:[%s6008_s4 + $0x140] ss:$12 sps:$4 sm:$0xff]  }
 0xb5b   : > { %5055 = vtanh.f32 %v2087_v48  ;;  %v4955_v47 = vld [vmem:[%s6008_s4 + $0x154] ss:$12 sps:$4 sm:$0xff]   ;;  %v4953_v48 = vld [vmem:[%s6008_s4 + $0x150] ss:$12 sps:$4 sm:$0xff]  }
 0xb62   : > { %v5050_v49 = vpop.eup %5049 }
 0xb63   : > { %v5052_v50 = vpop.eup %5051  ;;  %v2092_v53 = vadd.f32 1.0, %v5050_v49  ;;  %v4956_v49 = vld [vmem:[%s6008_s4 + $0x158] ss:$12 sps:$4 sm:$0xff]  }
 0xb64   : > { %v5054_v23 = vpop.eup %5053  ;;  %v2093_v54 = vadd.f32 1.0, %v5052_v50  ;;  %v4959_v50 = vld [vmem:[%s6008_s4 + $0x16c] ss:$12 sps:$4 sm:$0xff]  }
 0xb65   : > { %v5056_v57 = vpop.eup %5055  ;;  %v2096_v37 = vmul.f32 0.5, %v2092_v53  ;;  %v2094_v60 = vadd.f32 1.0, %v5054_v23  ;;  %v4957_v53 = vld [vmem:[%s6008_s4 + $0x168] ss:$12 sps:$4 sm:$0xff]   ;;  %v4960_v23 = vld [vmem:[%s6008_s4 + $0x170] ss:$12 sps:$4 sm:$0xff]  }
 0xb66   : > { %v2095_v61 = vadd.f32 1.0, %v5056_v57  ;;  %v2097_v36 = vmul.f32 0.5, %v2093_v54 }
 0xb67   : > { %v2098_v62 = vmul.f32 0.5, %v2094_v60  ;;  %v2100_v18 = vmul.f32 %v2096_v37, %v2060_v20 }
 0xb68   : > { %v2099_v63 = vmul.f32 0.5, %v2095_v61  ;;  %v2101_v3 = vmul.f32 %v2097_v36, %v2062_v22  ;;  %v4931_v22 = vld [vmem:[%s6008_s4 + $0xc4] ss:$12 sps:$4 sm:$0xff]  }
 0xb69   : > { %v2102_v0 = vmul.f32 %v2098_v62, %v2064_v25  ;;  %2473 = vmatprep.subr.bf16.mxu0 %v4931_v22 }
 0xb6a   : > { %v2103_v4 = vmul.f32 %v2099_v63, %v2066_v27  ;;  %2474 = vmatpush1.bf16.msra.mxu0 %v4929_v21  ;;  %v4173_v63 = vld [vmem:[%s6006_s2 + $0x1] ss:$0 sm:$0xff] }
 0xb6b   : > { %v2104_v6 = vpack.c.bf16 %v2102_v0, %v2100_v18  ;;  %2475 = vmatprep.subr.bf16.mxu0 %v4935_v2 }
 0xb6c   : > { %v2105_v7 = vpack.c.bf16 %v2103_v4, %v2101_v3 }
 0xb6e   : > { %2240 = vmatprep.mubr.bf16.mxu1 %v2105_v7  ;;  %2476 = vmatpush1.bf16.msra.mxu0 %v4933_v24 }
 0xb6f   : > { %2241 = vmatmul.mubr.bf16.vlgmr.msra.gmra.mrb[12].mxu1 %v2104_v6  ;;  %2477 = vmatprep.subr.bf16.mxu0 %v4939_v33  ;;  %v4174_v6 = vld [vmem:[%s6007_s3 + $0x1] ss:$0 sm:$0xff] }
 0xb70   : > { %4580 = vmatprep.mubr.msk.bf16.mxu1 %vm5219_vm0, %v5217_v5 }
 0xb72   : > { %2478 = vmatpush1.bf16.msra.mxu0 %v4937_v51 }
 0xb73   : > { %2479 = vmatprep.subr.bf16.mxu0 %v4943_v35  ;;  %v5846_v35 = vld [vmem:[%s5577_s0] ss:$0 sm:$0xff] }
 0xb76   : > { %2480 = vmatpush1.bf16.msra.mxu0 %v4941_v52 }
 0xb77   : > { %2481 = vmatprep.subr.bf16.mxu0 %v4947_v39 }
 0xb7a   : > { %2482 = vmatpush1.bf16.msra.mxu0 %v4945_v40 }
 0xb7b   : > { %2483 = vmatprep.subr.bf16.mxu0 %v4951_v42 }
 0xb7e   : > { %2484 = vmatpush1.bf16.msra.mxu0 %v4949_v43 }
 0xb7f   : > { %2485 = vmatprep.subr.bf16.mxu0 %v4955_v47 }
 0xb82   : > { %2486 = vmatpush1.bf16.msra.mxu0 %v4953_v48 }
 0xb83   : > { %2487 = vmatprep.subr.bf16.mxu0 %v4959_v50 }
 0xb86   : > { %2488 = vmatpush1.bf16.msra.mxu0 %v4957_v53 }
 0xc42   : > { %v4390_v8 = vpop.f32.mrb[12].mxu1 }
 0xc43   : > { %v4391_v12 = vpop.f32.mrb[13].mxu1 }
 0xc44   : > { %v4392_v13 = vadd.f32 %v4391_v12, %v4390_v8  ;;  %v4393_v9 = vpop.f32.mrb[14].mxu1 }
 0xc45   : > { %v4394_v15 = vpop.f32.mrb[15].mxu1 }
 0xc46   : > { %v2243_v17 = vadd.f32 %v4392_v13, %v4154_v10  ;;  %v4395_v45 = vadd.f32 %v4394_v15, %v4393_v9  ;;  %v4207_v13 = vld [vmem:[%s6009_s5 + $0x3] sm:$0x7] }
 0xc47   : > { %v2333_v9 = vrot.slane %v4207_v13, %v5538_v56  ;;  %v2341_v15 = vrot.slane %v4207_v13, %v672_v58 }
 0xc48   : > { %v2246_v19 = vadd.f32 %v4395_v45, %v4154_v10  ;;  %v5733_v1 = vadd.f32 %v2243_v17, %v5705_v11  ;;  %v4932_v11 = vld [vmem:[%s6008_s4 + $0xc8] ss:$12 sps:$4 sm:$0xff]  }
 0xc49   : > { %4565 = vmatpush3.bf16.msra.mxu1 %v4932_v11 }
 0xc4a   : > { %2255 = vadd.xlane.f32.xlu0 %v5733_v1  ;;  %v5737_v20 = vadd.f32 %v2246_v19, %v5708_v14  ;;  %v4936_v14 = vld [vmem:[%s6008_s4 + $0xe0] ss:$12 sps:$4 sm:$0xff]   ;;  %4566 = vmatprep.subr.bf16.mxu1 %v5217_v5  ;;  %v2337_v19 = vrot.slane %v4207_v13, %v5545_v59 }
 0xc4c   : > { %2257 = vadd.xlane.f32.xlu1 %v5737_v20 }
 0xc4d   : > { %4567 = vmatpush3.bf16.msra.mxu1 %v4936_v14 }
 0xc4e   : > { %4568 = vmatprep.subr.bf16.mxu1 %v5217_v5 }
 0xc51   : > { %4569 = vmatpush3.bf16.msra.mxu1 %v4940_v34 }
 0xc52   : > { %4570 = vmatprep.subr.bf16.mxu1 %v5217_v5 }
 0xc55   : > { %4571 = vmatpush3.bf16.msra.mxu1 %v4944_v38 }
 0xc56   : > { %4572 = vmatprep.subr.bf16.mxu1 %v5217_v5 }
 0xc59   : > { %4573 = vmatpush3.bf16.msra.mxu1 %v4948_v41 }
 0xc5a   : > { %4574 = vmatprep.subr.bf16.mxu1 %v5217_v5 }
 0xc5d   : > { %4575 = vmatpush3.bf16.msra.mxu1 %v4952_v46 }
 0xc5e   : > { %4576 = vmatprep.subr.bf16.mxu1 %v5217_v5 }
 0xc61   : > { %4577 = vmatpush3.bf16.msra.mxu1 %v4956_v49 }
 0xc62   : > { %4578 = vmatprep.subr.bf16.mxu1 %v5217_v5 }
 0xc65   : > { %4579 = vmatpush3.bf16.msra.mxu1 %v4960_v23 }
 0xcd7   : > { %v2256_v25 = vpop.xlane.xlu0 %2255 }
 0xcd8   : > { %v2259_v44 = vmul.f32 0.0078125, %v2256_v25 }
 0xcd9   : > { %v2258_v26 = vpop.xlane.xlu1 %2257 }
 0xcda   : > { %v2261_v27 = vsub.f32 %v5733_v1, %v2259_v44  ;;  %v2260_v28 = vmul.f32 0.0078125, %v2258_v26 }
 0xcdc   : > { %v2262_v29 = vsub.f32 %v5737_v20, %v2260_v28  ;;  %v2263_v30 = vmul.f32 %v2261_v27, %v2261_v27 }
 0xcde   : > { %2265 = vadd.xlane.f32.xlu0 %v2263_v30  ;;  %v2264_v32 = vmul.f32 %v2262_v29, %v2262_v29 }
 0xce0   : > { %2267 = vadd.xlane.f32.xlu1 %v2264_v32 }
 0xd6b   : > { %v2266_v54 = vpop.xlane.xlu0 %2265 }
 0xd6c   : > { %v2269_v57 = vmul.f32 0.0078125, %v2266_v54 }
 0xd6d   : > { %v2268_v37 = vpop.xlane.xlu1 %2267 }
 0xd6e   : > { %v2271_v60 = vadd.f32 1e-05, %v2269_v57  ;;  %v2270_v61 = vmul.f32 0.0078125, %v2268_v37 }
 0xd70   : > { %5057 = vrsqrt.f32 %v2271_v60  ;;  %v2272_v36 = vadd.f32 1e-05, %v2270_v61 }
 0xd72   : > { %5059 = vrsqrt.f32 %v2272_v36 }
 0xd7a   : > { %v5058_v62 = vpop.eup %5057 }
 0xd7b   : > { %v2275_v18 = vmul.f32 %v5058_v62, %v2261_v27 }
 0xd7c   : > { %v5060_v0 = vpop.eup %5059 }
 0xd7d   : > { %v2276_v3 = vmul.f32 %v5060_v0, %v2262_v29  ;;  %v2283_v4 = vmul.f32 %v4173_v63, %v2275_v18 }
 0xd7f   : > { %v2284_v7 = vmul.f32 %v4173_v63, %v2276_v3  ;;  %v2291_v8 = vadd.f32 %v4174_v6, %v2283_v4 }
 0xd81   : > { %v2292_v10 = vadd.f32 %v4174_v6, %v2284_v7 }
 0xd83   : > { %v2328_v12 = vpack.c.bf16 %v2292_v10, %v2291_v8 }
 0xd85   : > { %2506 = vmatmul.mubr.bf16.vlgmr.msra.gmra.mrb[20].mxu0 %v2328_v12  ;;  %4581 = vmatmul.mubr.bf16.vlgmr.msra.gmra.mrb[16].mxu1 %v2328_v12 }
 0xe58   : > { %v2507_v17 = vpop.f32.mrb[20].mxu0  ;;  %v2550_v45 = vpop.f32.mrb[16].mxu1 }
 0xe59   : > { %v2508_v21 = vadd.f32 %v2507_v17, %v2333_v9  ;;  %v2509_v22 = vpop.f32.mrb[21].mxu0  ;;  %v4582_v11 = vpop.f32.mrb[17].mxu1  ;;  %v2551_v25 = vadd.f32 %v2550_v45, %v2341_v15 }
 0xe5a   : > { %v2511_v2 = vpop.f32.mrb[22].mxu0  ;;  %v2553_v14 = vpop.f32.mrb[18].mxu1  ;;  %v2510_v28 = vadd.f32 %v2509_v22, %v2337_v19 }
 0xe5b   : > { %v5834_v24 = vmul.f32 0.17677669, %v2508_v21  ;;  %v2554_v44 = vadd.f32 %v2553_v14, %v2341_v15  ;;  %v2513_v26 = vpop.f32.mrb[23].mxu0  ;;  %v4583_v27 = vpop.f32.mrb[19].mxu1  ;;  %v2512_v33 = vadd.f32 %v2511_v2, %v2333_v9 }
 0xe5c   : > { %v2514_v29 = vadd.f32 %v2513_v26, %v2337_v19 }
 0xe5d   : > { %4588 = vmatprep.mubr.msk.f32.mxu0 %vm897_vm1, %v5834_v24  ;;  %v4706_v55 = vpack.c.bf16 %v2554_v44, %v2551_v25  ;;  %v5838_v58 = vpack.i.bf16 %v2554_v44, %v2551_v25  ;;  %v2558_v51 = vmul.f32 0.17677669, %v2512_v33 }
 0xe5e   : > { %v4700_v30 = vpack.c.bf16 %v2514_v29, %v2510_v28  ;;  %v4819_v32 = vpack.i.bf16 %v2514_v29, %v2510_v28 }
 0xe60   : > { %4702 = vmatprep.subr.msk.bf16.mxu0 %vm5557_vm2, %v4700_v30 }
 0xe61   : > { %4705 = vmatpush3.bf16.xpose.msk.msra.mxu0 %vm5557_vm2, %v4700_v30 }
 0xe62   : > { %4707 = vmatprep.subr.bf16.mxu0 %v4706_v55 }
 0xe68   : > { %4589 = vmatmul.mubr.msk.f32.vlgmr.msra.gmra.mrb[24].mxu0 %vm897_vm1, %v2558_v51 }
 0xe69   : > { %4709 = vmatpush3.bf16.msra.mxu0 %v4706_v55 }
 0xf3b   : > { %v4590_v34 = vpop.f32.mrb[24].mxu0 }
 0xf3c   : > { %v2643_v52 = vadd.f32 %v5846_v35, %v4590_v34  ;;  %v2637_v38 = vpop.f32.mrb[25].mxu0 }
 0xf3d   : > { %v2638_v39 = vadd.f32 %v5846_v35, %v2637_v38 }
 0xf3e   : > { %v2649_v40 = vsel %vm985_vm3, %v2643_v52, -inf }
 0xf3f   : > { %2650 = vmax.xlane.f32.xlu1 %v2649_v40  ;;  %v2646_v41 = vsel %vm985_vm3, %v2638_v39, -inf }
 0xf40   : > { %2647 = vmax.xlane.f32.xlu0 %v2646_v41 }
 0xf50   : > { %2751 = vrot.lane.b32.xlu1 %v5834_v24, %s5221_s27 }
 0xf54   : > { %2753 = vrot.lane.b32.xlu1 %v2558_v51, %s5221_s27 }
 0xf56   : > { %4820 = vrot.lane.b32.xlu0 %v4819_v32, %s5221_s27 }
 0xf58   : > { %4830 = vrot.lane.b32.xlu1 %v4819_v32, %s5220_s23 }
 0xfcc   : > { %v2651_v42 = vpop.xlane.xlu1 %2650 }
 0xfcd   : > { %v2653_v43 = vsub.f32 %v2643_v52, %v2651_v42  ;;  %v2648_v46 = vpop.xlane.xlu0 %2647 }
 0xfce   : > { %v2652_v47 = vsub.f32 %v2638_v39, %v2648_v46 }
 0xfcf   : > { %v2656_v48 = vmul.f32 1.442695, %v2653_v43 }
 0xfd0   : > { %v2654_v49 = vmul.f32 1.442695, %v2652_v47  ;;  %v2752_v60 = vpop.permute.xlu1 %2751 }
 0xfd1   : > { %v4821_v50 = vpop.permute.xlu0 %4820 }
 0xfd2   : > { %5061 = vpow2.f32 %v2654_v49  ;;  %v4823_v53 = vunpack.i.h.bf16 %v4821_v50  ;;  %v4822_v23 = vunpack.i.l.bf16 %v4821_v50 }
 0xfd3   : > { %5063 = vpow2.f32 %v2656_v48 }
 0xfd4   : > { %v4710_v54 = vpack.c.bf16 %v4823_v53, %v4822_v23  ;;  %v2754_v61 = vpop.permute.xlu1 %2753 }
 0xfd6   : > { %4712 = vmatprep.subr.msk.bf16.mxu0 %vm5557_vm2, %v4710_v54 }
 0xfd8   : > { %v4831_v7 = vpop.permute.xlu1 %4830 }
 0xfd9   : > { %v4833_v45 = vunpack.i.h.bf16 %v4831_v7  ;;  %v4832_v19 = vunpack.i.l.bf16 %v4831_v7 }
 0xfdb   : > { %v4720_v26 = vpack.c.bf16 %v4833_v45, %v4832_v19 }
 0xfdc   : > { %v5859_v57 = vpop.eup %5061 }
 0xfdd   : > { %v5861_v37 = vpop.eup %5063  ;;  %4595 = vmatprep.mubr.msk.f32.mxu0 %vm985_vm3, %v5859_v57 }
 0xfde   : > { %4596 = vmatmul.mubr.msk.f32.vlgmr.msra.gmra.mrb[26].mxu0 %vm985_vm3, %v5861_v37 }
 0xfdf   : > { %4715 = vmatpush3.bf16.xpose.msk.msra.mxu0 %vm5557_vm2, %v4710_v54  ;;  %4602 = vmatprep.mubr.msk.f32.mxu0 %vm897_vm1, %v2752_v60 }
 0xfe6   : > { %4603 = vmatmul.mubr.msk.f32.vlgmr.msra.gmra.mrb[28].mxu0 %vm897_vm1, %v2754_v61 }
0x10b1   : > { %v5871_v36 = vpop.f32.mrb[26].mxu0 }
0x10b2   : > { %v5873_v62 = vpop.f32.mrb[27].mxu0 }
0x10b9   : > { %v4604_v63 = vpop.f32.mrb[28].mxu0 }
0x10ba   : > { %v2839_v18 = vadd.f32 %v5846_v35, %v4604_v63  ;;  %v2833_v0 = vpop.f32.mrb[29].mxu0 }
0x10bb   : > { %v2834_v3 = vadd.f32 %v5846_v35, %v2833_v0 }
0x10bc   : > { %v2845_v4 = vsel %vm985_vm3, %v2839_v18, -inf }
0x10bd   : > { %2846 = vmax.xlane.f32.xlu0 %v2845_v4  ;;  %v2842_v6 = vsel %vm985_vm3, %v2834_v3, -inf }
0x10be   : > { %2843 = vmax.xlane.f32.xlu1 %v2842_v6 }
0x10cf   : > { %4835 = vrot.lane.b32.xlu1 %v4819_v32, %s5222_s16 }
0x10d3   : > { %4825 = vrot.lane.b32.xlu0 %v5838_v58, %s5221_s27  ;;  %2965 = vrot.lane.b32.xlu1 %v2558_v51, %s5220_s23 }
0x10d7   : > { %2963 = vrot.lane.b32.xlu0 %v5834_v24, %s5220_s23  ;;  %3175 = vrot.lane.b32.xlu1 %v2558_v51, %s5222_s16 }
0x10db   : > { %3173 = vrot.lane.b32.xlu0 %v5834_v24, %s5222_s16 }
0x114a   : > { %v2847_v8 = vpop.xlane.xlu0 %2846 }
0x114b   : > { %v2849_v10 = vsub.f32 %v2839_v18, %v2847_v8  ;;  %v2844_v12 = vpop.xlane.xlu1 %2843 }
0x114c   : > { %v2848_v13 = vsub.f32 %v2834_v3, %v2844_v12 }
0x114d   : > { %v2852_v9 = vmul.f32 1.442695, %v2849_v10 }
0x114e   : > { %v2850_v15 = vmul.f32 1.442695, %v2848_v13  ;;  %v4826_v17 = vpop.permute.xlu0 %4825 }
0x114f   : > { %v4828_v21 = vunpack.i.h.bf16 %v4826_v17  ;;  %v4827_v22 = vunpack.i.l.bf16 %v4826_v17  ;;  %v4836_v11 = vpop.permute.xlu1 %4835 }
0x1150   : > { %5065 = vpow2.f32 %v2850_v15  ;;  %v4838_v2 = vunpack.i.h.bf16 %v4836_v11  ;;  %v4837_v14 = vunpack.i.l.bf16 %v4836_v11 }
0x1151   : > { %5067 = vpow2.f32 %v2852_v9  ;;  %v4716_v25 = vpack.c.bf16 %v4828_v21, %v4827_v22 }
0x1152   : > { %v4730_v44 = vpack.c.bf16 %v4838_v2, %v4837_v14  ;;  %v2964_v24 = vpop.permute.xlu0 %2963  ;;  %v2661_v14 = vsel %vm985_vm3, %v5861_v37, 0.0  ;;  %v4962_v37 = vld [vmem:[#allocation3 + $0x48] sm:$0xff]  }
0x1153   : > { %4717 = vmatprep.subr.bf16.mxu0 %v4716_v25  ;;  %v2966_v27 = vpop.permute.xlu1 %2965 }
0x1154   : > { %4719 = vmatpush3.bf16.msra.mxu0 %v4716_v25  ;;  %4732 = vmatprep.subr.msk.bf16.mxu1 %vm5557_vm2, %v4730_v44  ;;  %v2658_v25 = vsel %vm985_vm3, %v5859_v57, 0.0  ;;  %v4963_v57 = vld [vmem:[#allocation3 + $0x50] sm:$0xff]  }
0x1155   : > { %4722 = vmatprep.subr.msk.bf16.mxu0 %vm5557_vm2, %v4720_v26  ;;  %4735 = vmatpush3.bf16.xpose.msk.msra.mxu1 %vm5557_vm2, %v4730_v44 }
0x1156   : > { %v3174_v28 = vpop.permute.xlu0 %3173  ;;  %4640 = vmatprep.subr.bf16.mxu1 %v5217_v5 }
0x1157   : > { %4630 = vmatprep.mubr.msk.f32.mxu1 %vm897_vm1, %v3174_v28  ;;  %v3176_v30 = vpop.permute.xlu1 %3175 }
0x115a   : > { %v5066_v29 = vpop.eup %5065 }
0x115b   : > { %v5068_v55 = vpop.eup %5067  ;;  %4609 = vmatprep.mubr.msk.f32.mxu0 %vm985_vm3, %v5066_v29  ;;  %v2854_v48 = vsel %vm985_vm3, %v5066_v29, 0.0 }
0x115c   : > { %4610 = vmatmul.mubr.msk.f32.vlgmr.msra.gmra.mrb[30].mxu0 %vm985_vm3, %v5068_v55  ;;  %4631 = vmatmul.mubr.msk.f32.vlgmr.msra.gmra.mrb[20].mxu1 %vm897_vm1, %v3176_v30  ;;  %v2857_v49 = vsel %vm985_vm3, %v5068_v55, 0.0  ;;  %v4964_v55 = vld [vmem:[#allocation3 + $0x58] sm:$0xff]  }
0x115d   : > { %4725 = vmatpush3.bf16.xpose.msk.msra.mxu0 %vm5557_vm2, %v4720_v26  ;;  %4616 = vmatprep.mubr.msk.f32.mxu0 %vm897_vm1, %v2964_v24 }
0x115e   : > { %4656 = vmatprep.mubr.msk.bf16.mxu1 %vm5219_vm0, %v5217_v5 }
0x1164   : > { %4617 = vmatmul.mubr.msk.f32.vlgmr.msra.gmra.mrb[32].mxu0 %vm897_vm1, %v2966_v27 }
0x122f   : > { %v5905_v32 = vpop.f32.mrb[30].mxu0  ;;  %v4632_v33 = vpop.f32.mrb[20].mxu1 }
0x1230   : > { %v5907_v51 = vpop.f32.mrb[31].mxu0  ;;  %v3255_v34 = vpop.f32.mrb[21].mxu1  ;;  %v3261_v38 = vadd.f32 %v5846_v35, %v4632_v33 }
0x1231   : > { %v3256_v52 = vadd.f32 %v5846_v35, %v3255_v34 }
0x1232   : > { %v3267_v40 = vsel %vm985_vm3, %v3261_v38, -inf }
0x1233   : > { %v3264_v16 = vsel %vm985_vm3, %v3256_v52, -inf }
0x1234   : > { %3265 = vmax.xlane.f32.xlu0 %v3264_v16 }
0x1237   : > { %v4618_v39 = vpop.f32.mrb[32].mxu0 }
0x1238   : > { %v3051_v41 = vadd.f32 %v5846_v35, %v4618_v39  ;;  %v3045_v42 = vpop.f32.mrb[33].mxu0  ;;  %3268 = vmax.xlane.f32.xlu0 %v3267_v40 }
0x1239   : > { %v3046_v43 = vadd.f32 %v5846_v35, %v3045_v42 }
0x123a   : > { %v3057_v46 = vsel %vm985_vm3, %v3051_v41, -inf }
0x123b   : > { %3058 = vmax.xlane.f32.xlu1 %v3057_v46  ;;  %v3054_v47 = vsel %vm985_vm3, %v3046_v43, -inf }
0x123c   : > { %3055 = vmax.xlane.f32.xlu0 %v3054_v47 }
0x124c   : > { %4845 = vrot.lane.b32.xlu1 %v5838_v58, %s5222_s16 }
0x1252   : > { %4840 = vrot.lane.b32.xlu0 %v5838_v58, %s5220_s23 }
0x1270   : > { %2855 = vadd.xlane.f32.xlu1 %v2854_v48 }
0x1271   : > { %2858 = vadd.xlane.f32.xlu0 %v2857_v49 }
0x12c1   : > { %v3266_v50 = vpop.xlane.xlu0 %3265 }
0x12c2   : > { %v3270_v23 = vsub.f32 %v3256_v52, %v3266_v50  ;;  %v4968_v50 = vld [vmem:[#allocation3 + $0x78] sm:$0xff]  }
0x12c4   : > { %v3272_v3 = vmul.f32 1.442695, %v3270_v23 }
0x12c5   : > { %v3269_v35 = vpop.xlane.xlu0 %3268 }
0x12c6   : > { %v3271_v53 = vsub.f32 %v3261_v38, %v3269_v35 }
0x12c8   : > { %v3059_v54 = vpop.xlane.xlu1 %3058  ;;  %v3274_v18 = vmul.f32 1.442695, %v3271_v53 }
0x12c9   : > { %v3061_v60 = vsub.f32 %v3051_v41, %v3059_v54  ;;  %v3056_v61 = vpop.xlane.xlu0 %3055 }
0x12ca   : > { %v3060_v63 = vsub.f32 %v3046_v43, %v3056_v61  ;;  %v4965_v43 = vld [vmem:[#allocation3 + $0x60] sm:$0xff]  }
0x12cb   : > { %v3064_v0 = vmul.f32 1.442695, %v3061_v60 }
0x12cc   : > { %v3062_v4 = vmul.f32 1.442695, %v3060_v63  ;;  %v4846_v6 = vpop.permute.xlu1 %4845 }
0x12cd   : > { %5069 = vpow2.f32 %v3064_v0  ;;  %v4848_v58 = vunpack.i.h.bf16 %v4846_v6  ;;  %v4841_v7 = vpop.permute.xlu0 %4840  ;;  %v4847_v8 = vunpack.i.l.bf16 %v4846_v6 }
0x12ce   : > { %5071 = vpow2.f32 %v3062_v4  ;;  %v4843_v10 = vunpack.i.h.bf16 %v4841_v7  ;;  %v4842_v12 = vunpack.i.l.bf16 %v4841_v7 }
0x12cf   : > { %5073 = vpow2.f32 %v3274_v18  ;;  %v4736_v9 = vpack.c.bf16 %v4848_v58, %v4847_v8  ;;  %v4257_v8 = vld [vmem:[%s6011_s7 + $0x1] ss:$0 sm:$0xff] }
0x12d0   : > { %5075 = vpow2.f32 %v3272_v3  ;;  %v4726_v13 = vpack.c.bf16 %v4843_v10, %v4842_v12 }
0x12d2   : > { %4727 = vmatprep.subr.bf16.mxu0 %v4726_v13 }
0x12d3   : > { %4729 = vmatpush3.bf16.msra.mxu0 %v4726_v13 }
0x12d4   : > { %4737 = vmatprep.subr.bf16.mxu0 %v4736_v9 }
0x12d7   : > { %v5070_v15 = vpop.eup %5069 }
0x12d8   : > { %v5072_v17 = vpop.eup %5071  ;;  %v3069_v45 = vsel %vm985_vm3, %v5070_v15, 0.0 }
0x12d9   : > { %v5074_v19 = vpop.eup %5073  ;;  %3070 = vadd.xlane.f32.xlu1 %v3069_v45  ;;  %4623 = vmatprep.mubr.msk.f32.mxu0 %vm985_vm3, %v5072_v17  ;;  %v3066_v21 = vsel %vm985_vm3, %v5072_v17, 0.0 }
0x12da   : > { %v5076_v22 = vpop.eup %5075  ;;  %3067 = vadd.xlane.f32.xlu0 %v3066_v21  ;;  %4624 = vmatmul.mubr.msk.f32.vlgmr.msra.gmra.mrb[34].mxu0 %vm985_vm3, %v5070_v15  ;;  %v3279_v11 = vsel %vm985_vm3, %v5074_v19, 0.0  ;;  %v4969_v21 = vld [vmem:[#allocation5 + $0x80] ss:$8 sps:$4 sm:$0xff]  }
0x12db   : > { %4739 = vmatpush3.bf16.msra.mxu0 %v4736_v9  ;;  %4637 = vmatprep.mubr.msk.f32.mxu0 %vm985_vm3, %v5076_v22  ;;  %v3276_v2 = vsel %vm985_vm3, %v5076_v22, 0.0  ;;  %v4971_v22 = vld [vmem:[#allocation5 + $0x84] ss:$8 sps:$4 sm:$0xff]  }
0x12dc   : > { %3690 = vmatprep.subr.bf16.mxu0 %v4971_v22 }
0x12dd   : > { %3280 = vadd.xlane.f32.xlu1 %v3279_v11  ;;  %v4974_v11 = vld [vmem:[#allocation5 + $0x94] ss:$8 sps:$4 sm:$0xff]  }
0x12de   : > { %3277 = vadd.xlane.f32.xlu0 %v3276_v2  ;;  %4638 = vmatmul.mubr.msk.f32.vlgmr.msra.gmra.mrb[36].mxu0 %vm985_vm3, %v5074_v19  ;;  %v4972_v2 = vld [vmem:[#allocation5 + $0x90] ss:$8 sps:$4 sm:$0xff]  }
0x12df   : > { %3722 = vmatprep.mubr.bf16.mxu0 %v5218_v31  ;;  %v4961_v31 = vld [vmem:[#allocation3 + $0x40] sm:$0xff]   ;;  %3691 = vmatpush1.bf16.msra.mxu0 %v4969_v21 }
0x12e0   : > { %4641 = vmatpush3.bf16.msra.mxu1 %v4961_v31  ;;  %3692 = vmatprep.subr.bf16.mxu0 %v4974_v11  ;;  %v4980_v31 = vld [vmem:[#allocation5 + $0xb4] ss:$8 sps:$4 sm:$0xff]  }
0x12e1   : > { %2662 = vadd.xlane.f32.xlu1 %v2661_v14  ;;  %4642 = vmatprep.subr.bf16.mxu1 %v5217_v5 }
0x12e2   : > { %2659 = vadd.xlane.f32.xlu0 %v2658_v25 }
0x12e3   : > { %3693 = vmatpush1.bf16.msra.mxu0 %v4972_v2 }
0x12e4   : > { %4643 = vmatpush3.bf16.msra.mxu1 %v4962_v37  ;;  %v4978_v37 = vld [vmem:[#allocation5 + $0xb0] ss:$8 sps:$4 sm:$0xff]  }
0x12e5   : > { %4644 = vmatprep.subr.bf16.mxu1 %v5217_v5 }
0x12e8   : > { %4645 = vmatpush3.bf16.msra.mxu1 %v4963_v57  ;;  %v4983_v57 = vld [vmem:[#allocation5 + $0xc4] ss:$8 sps:$4 sm:$0xff]  }
0x12e9   : > { %4646 = vmatprep.subr.bf16.mxu1 %v5217_v5 }
0x12ec   : > { %4647 = vmatpush3.bf16.msra.mxu1 %v4964_v55  ;;  %v4981_v55 = vld [vmem:[#allocation5 + $0xc0] ss:$8 sps:$4 sm:$0xff]  }
0x12ed   : > { %4648 = vmatprep.subr.bf16.mxu1 %v5217_v5 }
0x12f0   : > { %4649 = vmatpush3.bf16.msra.mxu1 %v4965_v43 }
0x12f1   : > { %4650 = vmatprep.subr.bf16.mxu1 %v5217_v5 }
0x12fd   : > { %v2856_v44 = vpop.xlane.xlu1 %2855 }
0x12fe   : > { %5077 = vrcp.f32 %v2856_v44  ;;  %v2859_v24 = vpop.xlane.xlu0 %2858 }
0x12ff   : > { %5079 = vrcp.f32 %v2859_v24 }
0x1308   : > { %v5078_v26 = vpop.eup %5077 }
0x1309   : > { %v5080_v27 = vpop.eup %5079  ;;  %v2951_v28 = vmul.f32 %v5078_v26, %v5907_v51 }
0x130a   : > { %v2952_v29 = vmul.f32 %v5080_v27, %v5905_v32 }
0x130b   : > { %2955 = vrot.lane.b32.xlu0 %v2951_v28, %s5222_s16  ;;  %v4977_v28 = vld [vmem:[#allocation5 + $0xa4] ss:$8 sps:$4 sm:$0xff]  }
0x130c   : > { %2957 = vrot.lane.b32.xlu1 %v2952_v29, %s5222_s16  ;;  %v4975_v29 = vld [vmem:[#allocation5 + $0xa0] ss:$8 sps:$4 sm:$0xff]   ;;  %3694 = vmatprep.subr.bf16.mxu0 %v4977_v28 }
0x130d   : > { %3695 = vmatpush1.bf16.msra.mxu0 %v4975_v29 }
0x130e   : > { %3696 = vmatprep.subr.bf16.mxu0 %v4980_v31 }
0x1311   : > { %3697 = vmatpush1.bf16.msra.mxu0 %v4978_v37 }
0x1312   : > { %3698 = vmatprep.subr.bf16.mxu0 %v4983_v57 }
0x1315   : > { %3699 = vmatpush1.bf16.msra.mxu0 %v4981_v55 }
0x1366   : > { %v3071_v30 = vpop.xlane.xlu1 %3070 }
0x1367   : > { %v3068_v32 = vpop.xlane.xlu0 %3067 }
0x136a   : > { %v3281_v33 = vpop.xlane.xlu1 %3280 }
0x136b   : > { %v3278_v51 = vpop.xlane.xlu0 %3277 }
0x136e   : > { %v2663_v34 = vpop.xlane.xlu1 %2662 }
0x136f   : > { %5081 = vrcp.f32 %v2663_v34  ;;  %v2660_v52 = vpop.xlane.xlu0 %2659  ;;  %v4992_v34 = vld [vmem:[#allocation5 + $0xf4] ss:$8 sps:$4 sm:$0xff]  }
0x1370   : > { %5083 = vrcp.f32 %v2660_v52  ;;  %v4990_v52 = vld [vmem:[#allocation5 + $0xf0] ss:$8 sps:$4 sm:$0xff]  }
0x1371   : > { %5085 = vrcp.f32 %v3071_v30  ;;  %v4986_v30 = vld [vmem:[#allocation5 + $0xd4] ss:$8 sps:$4 sm:$0xff]  }
0x1372   : > { %5087 = vrcp.f32 %v3068_v32  ;;  %v4984_v32 = vld [vmem:[#allocation5 + $0xd0] ss:$8 sps:$4 sm:$0xff]   ;;  %3700 = vmatprep.subr.bf16.mxu0 %v4986_v30 }
0x1373   : > { %5089 = vrcp.f32 %v3281_v33  ;;  %3701 = vmatpush1.bf16.msra.mxu0 %v4984_v32  ;;  %v4989_v33 = vld [vmem:[#allocation5 + $0xe4] ss:$8 sps:$4 sm:$0xff]  }
0x1374   : > { %5091 = vrcp.f32 %v3278_v51  ;;  %v4987_v51 = vld [vmem:[#allocation5 + $0xe0] ss:$8 sps:$4 sm:$0xff]   ;;  %3702 = vmatprep.subr.bf16.mxu0 %v4989_v33 }
0x1377   : > { %3703 = vmatpush1.bf16.msra.mxu0 %v4987_v51 }
0x1378   : > { %3704 = vmatprep.subr.bf16.mxu0 %v4992_v34 }
0x1379   : > { %v5082_v38 = vpop.eup %5081 }
0x137a   : > { %v5084_v16 = vpop.eup %5083  ;;  %v2748_v39 = vmul.f32 %v5082_v38, %v5871_v36  ;;  %v4966_v36 = vld [vmem:[#allocation3 + $0x68] sm:$0xff]  }
0x137b   : > { %v2747_v40 = vmul.f32 %v5084_v16, %v5873_v62  ;;  %4651 = vmatpush3.bf16.msra.mxu1 %v4966_v36  ;;  %v4967_v62 = vld [vmem:[#allocation3 + $0x70] sm:$0xff]   ;;  %v5086_v46 = vpop.eup %5085  ;;  %3705 = vmatpush1.bf16.msra.mxu0 %v4990_v52 }
0x137c   : > { %2750 = vst.msk [vmem:[#allocation2 + $0x8] sm:$0xff] %vm897_vm1, %v2748_v39  ;;  %4652 = vmatprep.subr.bf16.mxu1 %v5217_v5  ;;  %v5088_v35 = vpop.eup %5087 }
0x137d   : > { %2749 = vst.msk [vmem:[#allocation2] sm:$0xff] %vm897_vm1, %v2747_v40  ;;  %v2956_v41 = vpop.permute.xlu0 %2955  ;;  %v5090_v53 = vpop.eup %5089 }
0x137e   : > { %2961 = vst.msk [vmem:[#allocation2] sm:$0xff] %vm1301_vm4, %v2956_v41  ;;  %v2958_v42 = vpop.permute.xlu1 %2957  ;;  %v5092_v54 = vpop.eup %5091 }
0x137f   : > { %2962 = vst.msk [vmem:[#allocation2 + $0x8] sm:$0xff] %vm1301_vm4, %v2958_v42  ;;  %4653 = vmatpush3.bf16.msra.mxu1 %v4967_v62  ;;  %v4268_v62 = vld [vmem:[%s6012_s8 + $0x1] ss:$0 sm:$0xff] }
0x1380   : > { %4654 = vmatprep.subr.bf16.mxu1 %v5217_v5 }
0x1383   : > { %4655 = vmatpush3.bf16.msra.mxu1 %v4968_v50 }
0x13ad   : > { %v4625_v47 = vpop.f32.mrb[34].mxu0 }
0x13ae   : > { %v3162_v48 = vmul.f32 %v5086_v46, %v4625_v47  ;;  %v3150_v49 = vpop.f32.mrb[35].mxu0 }
0x13af   : > { %v3161_v60 = vmul.f32 %v5088_v35, %v3150_v49  ;;  %v4269_v49 = vld [vmem:[%s6013_s9 + $0x1] ss:$0 sm:$0xff] }
0x13b0   : > { %3167 = vrot.lane.b32.xlu1 %v3162_v48, %s5220_s23 }
0x13b1   : > { %v4639_v23 = vpop.f32.mrb[36].mxu0 }
0x13b2   : > { %v3372_v61 = vmul.f32 %v5090_v53, %v4639_v23  ;;  %v3360_v63 = vpop.f32.mrb[37].mxu0 }
0x13b3   : > { %v3371_v18 = vmul.f32 %v5092_v54, %v3360_v63  ;;  %v4993_v54 = vld [vmem:[#allocation7 + $0xc0] sm:$0xff]   ;;  %v4996_v63 = vld [vmem:[#allocation7 + $0x88] sm:$0xff]  }
0x13b4   : > { %3165 = vrot.lane.b32.xlu1 %v3161_v60, %s5220_s23  ;;  %v4994_v60 = vld [vmem:[#allocation7 + $0x80] sm:$0xff]   ;;  %4446 = vmatprep.subr.bf16.mxu1 %v4993_v54 }
0x13b5   : > { %3375 = vrot.lane.b32.xlu0 %v3371_v18, %s5221_s27  ;;  %v4997_v18 = vld [vmem:[#allocation7 + $0xd0] sm:$0xff]  }
0x13b8   : > { %3377 = vrot.lane.b32.xlu1 %v3372_v61, %s5221_s27  ;;  %v4995_v61 = vld [vmem:[#allocation7 + $0xc8] sm:$0xff]   ;;  %s6042_s27 = sld [smem:[#allocation14_spill]] }
0x13be   : > { %s579_s16 = scalar_lea.vmem %s6042_s27, %s4311_s25 }
0x1422   : > { %v3168_v0 = vpop.permute.xlu1 %3167 }
0x1423   : > { %3172 = vst.msk [vmem:[#allocation2 + $0x8] sm:$0xff] %vm1512_vm5, %v3168_v0  ;;  %v4998_v0 = vld [vmem:[#allocation7 + $0x90] sm:$0xff]  }
0x1426   : > { %v3166_v5 = vpop.permute.xlu1 %3165 }
0x1427   : > { %3171 = vst.msk [vmem:[#allocation2] sm:$0xff] %vm1512_vm5, %v3166_v5  ;;  %v3376_v3 = vpop.permute.xlu0 %3375  ;;  %v4999_v5 = vld [vmem:[#allocation7 + $0xd8] sm:$0xff]  }
0x1428   : > { %3381 = vst.msk [vmem:[#allocation2] sm:$0xff] %vm1723_vm6, %v3376_v3  ;;  %v5000_v3 = vld [vmem:[#allocation7 + $0x98] sm:$0xff]  }
0x142a   : > { %v3378_v4 = vpop.permute.xlu1 %3377 }
0x142b   : > { %3382 = vst.msk [vmem:[#allocation2 + $0x8] sm:$0xff] %vm1723_vm6, %v3378_v4  ;;  %v5001_v4 = vld [vmem:[#allocation7 + $0xe0] sm:$0xff]  }
0x142f   : > { %v3383_v6 = vld [vmem:[#allocation2] sm:$0xff] }
0x1432   : > { %v3384_v58 = vld [vmem:[#allocation2 + $0x8] sm:$0xff] }
0x1433   : > { %v3404_v7 = vpack.c.bf16 %v3384_v58, %v3383_v6  ;;  %v5002_v6 = vld [vmem:[#allocation7 + $0xa0] sm:$0xff]   ;;  %v5003_v58 = vld [vmem:[#allocation7 + $0xe8] sm:$0xff]  }
0x1435   : > { %4657 = vmatmul.mubr.bf16.vlgmr.msra.gmra.mrb[24].mxu1 %v3404_v7  ;;  %v5004_v7 = vld [vmem:[#allocation7 + $0xa8] sm:$0xff]  }
0x1436   : > { %4447 = vmatpush3.bf16.msra.mxu1 %v4994_v60 }
0x1437   : > { %4448 = vmatprep.subr.bf16.mxu1 %v4995_v61 }
0x143a   : > { %4449 = vmatpush3.bf16.msra.mxu1 %v4996_v63 }
0x143b   : > { %4450 = vmatprep.subr.bf16.mxu1 %v4997_v18  ;;  %v4288_v18 = vld [vmem:[%s6017_s13 + $0x1] ss:$0 sm:$0xff] }
0x143e   : > { %4451 = vmatpush3.bf16.msra.mxu1 %v4998_v0 }
0x143f   : > { %4452 = vmatprep.subr.bf16.mxu1 %v4999_v5 }
0x1442   : > { %4453 = vmatpush3.bf16.msra.mxu1 %v5000_v3 }
0x1443   : > { %4454 = vmatprep.subr.bf16.mxu1 %v5001_v4 }
0x1446   : > { %4455 = vmatpush3.bf16.msra.mxu1 %v5002_v6 }
0x1447   : > { %4456 = vmatprep.subr.bf16.mxu1 %v5003_v58 }
0x144a   : > { %4457 = vmatpush3.bf16.msra.mxu1 %v5004_v7 }
0x1508   : > { %v3493_v10 = vpop.f32.mrb[24].mxu1 }
0x1509   : > { %v3494_v12 = vadd.f32 %v4257_v8, %v3493_v10  ;;  %v4658_v13 = vpop.f32.mrb[25].mxu1  ;;  %v5006_v10 = vld [vmem:[#allocation7 + $0xb0] sm:$0xff]  }
0x150a   : > { %v3496_v9 = vpop.f32.mrb[26].mxu1  ;;  %v5008_v13 = vld [vmem:[#allocation7 + $0xb8] sm:$0xff]  }
0x150b   : > { %v5965_v15 = vadd.f32 %v3494_v12, %v5733_v1  ;;  %v3497_v17 = vadd.f32 %v4257_v8, %v3496_v9  ;;  %v4659_v45 = vpop.f32.mrb[27].mxu1  ;;  %v5005_v8 = vld [vmem:[#allocation7 + $0xf0] sm:$0xff]   ;;  %v5007_v12 = vld [vmem:[#allocation7 + $0xf8] sm:$0xff]  }
0x150c   : > { %4458 = vmatprep.subr.bf16.mxu1 %v5005_v8  ;;  %v4270_v9 = vld [vmem:[%s6015_s11 + $0x2] sm:$0x3] }
0x150d   : > { %v5968_v19 = vadd.f32 %v3497_v17, %v5737_v20  ;;  %3506 = vadd.xlane.f32.xlu0 %v5965_v15  ;;  %4459 = vmatpush3.bf16.msra.mxu1 %v5006_v10  ;;  %v3603_v17 = vrot.slane %v4270_v9, %v5538_v56  ;;  %v3607_v45 = vrot.slane %v4270_v9, %v5545_v59 }
0x150e   : > { %4460 = vmatprep.subr.bf16.mxu1 %v5007_v12 }
0x150f   : > { %3508 = vadd.xlane.f32.xlu1 %v5968_v19 }
0x1511   : > { %4461 = vmatpush3.bf16.msra.mxu1 %v5008_v13 }
0x159a   : > { %v3507_v14 = vpop.xlane.xlu0 %3506 }
0x159b   : > { %v3510_v1 = vmul.f32 0.0078125, %v3507_v14 }
0x159c   : > { %v3509_v25 = vpop.xlane.xlu1 %3508 }
0x159d   : > { %v3512_v44 = vsub.f32 %v5965_v15, %v3510_v1  ;;  %v3511_v24 = vmul.f32 0.0078125, %v3509_v25 }
0x159f   : > { %v3513_v20 = vsub.f32 %v5968_v19, %v3511_v24  ;;  %v3514_v26 = vmul.f32 %v3512_v44, %v3512_v44 }
0x15a1   : > { %3516 = vadd.xlane.f32.xlu0 %v3514_v26  ;;  %v3515_v27 = vmul.f32 %v3513_v20, %v3513_v20 }
0x15a5   : > { %3518 = vadd.xlane.f32.xlu0 %v3515_v27 }
0x162e   : > { %v3517_v38 = vpop.xlane.xlu0 %3516 }
0x162f   : > { %v3520_v16 = vmul.f32 0.0078125, %v3517_v38 }
0x1631   : > { %v3522_v39 = vadd.f32 1e-05, %v3520_v16 }
0x1632   : > { %v3519_v40 = vpop.xlane.xlu0 %3518 }
0x1633   : > { %5093 = vrsqrt.f32 %v3522_v39  ;;  %v3521_v41 = vmul.f32 0.0078125, %v3519_v40 }
0x1635   : > { %v3523_v42 = vadd.f32 1e-05, %v3521_v41 }
0x1637   : > { %5095 = vrsqrt.f32 %v3523_v42 }
0x163d   : > { %v5094_v43 = vpop.eup %5093 }
0x163e   : > { %v3526_v36 = vmul.f32 %v5094_v43, %v3512_v44 }
0x1640   : > { %v3534_v48 = vmul.f32 %v4268_v62, %v3526_v36 }
0x1641   : > { %v5096_v46 = vpop.eup %5095 }
0x1642   : > { %v3527_v47 = vmul.f32 %v5096_v46, %v3513_v20  ;;  %v3542_v35 = vadd.f32 %v4269_v49, %v3534_v48 }
0x1644   : > { %v3535_v50 = vmul.f32 %v4268_v62, %v3527_v47 }
0x1646   : > { %v3543_v53 = vadd.f32 %v4269_v49, %v3535_v50 }
0x1648   : > { %v3598_v23 = vpack.c.bf16 %v3543_v53, %v3542_v35 }
0x164a   : > { %3723 = vmatmul.mubr.bf16.vlgmr.msra.gmra.mrb[40].mxu0 %v3598_v23 }
0x171d   : > { %v3724_v21 = vpop.f32.mrb[40].mxu0 }
0x171e   : > { %v3725_v22 = vadd.f32 %v3724_v21, %v3603_v17  ;;  %v3726_v11 = vpop.f32.mrb[41].mxu0 }
0x171f   : > { %v3727_v2 = vadd.f32 %v3726_v11, %v3607_v45  ;;  %v3728_v14 = vpop.f32.mrb[42].mxu0 }
0x1720   : > { %v3733_v1 = vmul.f32 %v3725_v22, %v3725_v22  ;;  %v3729_v25 = vadd.f32 %v3728_v14, %v3603_v17  ;;  %v3730_v44 = vpop.f32.mrb[43].mxu0 }
0x1721   : > { %v3734_v24 = vmul.f32 %v3727_v2, %v3727_v2  ;;  %v3731_v20 = vadd.f32 %v3730_v44, %v3607_v45 }
0x1722   : > { %v3737_v26 = vmul.f32 %v3733_v1, %v3725_v22  ;;  %v3735_v27 = vmul.f32 %v3729_v25, %v3729_v25 }
0x1723   : > { %v3738_v28 = vmul.f32 %v3734_v24, %v3727_v2  ;;  %v3736_v29 = vmul.f32 %v3731_v20, %v3731_v20  ;;  %v4305_v24 = vld [vmem:[%s6040_s28] ss:$0 sm:$0xff] }
0x1724   : > { %v3741_v31 = vmul.f32 0.044715, %v3737_v26  ;;  %v3739_v37 = vmul.f32 %v3735_v27, %v3729_v25 }
0x1725   : > { %v3742_v57 = vmul.f32 0.044715, %v3738_v28  ;;  %v3740_v56 = vmul.f32 %v3736_v29, %v3731_v20  ;;  %v4306_v29 = vld [vmem:[%s6041_s15] ss:$0 sm:$0xff] }
0x1726   : > { %v3745_v55 = vadd.f32 %v3741_v31, %v3725_v22  ;;  %v3743_v59 = vmul.f32 0.044715, %v3739_v37 }
0x1727   : > { %v3746_v30 = vadd.f32 %v3742_v57, %v3727_v2  ;;  %v3744_v32 = vmul.f32 0.044715, %v3740_v56 }
0x1728   : > { %v3749_v33 = vmul.f32 0.7978846, %v3745_v55  ;;  %v3747_v51 = vadd.f32 %v3743_v59, %v3729_v25 }
0x1729   : > { %v3750_v34 = vmul.f32 0.7978846, %v3746_v30  ;;  %v3748_v52 = vadd.f32 %v3744_v32, %v3731_v20 }
0x172a   : > { %5097 = vtanh.f32 %v3749_v33  ;;  %v3751_v38 = vmul.f32 0.7978846, %v3747_v51 }
0x172b   : > { %5099 = vtanh.f32 %v3750_v34  ;;  %v3752_v16 = vmul.f32 0.7978846, %v3748_v52 }
0x172c   : > { %5101 = vtanh.f32 %v3751_v38 }
0x172d   : > { %5103 = vtanh.f32 %v3752_v16 }
0x1734   : > { %v5098_v39 = vpop.eup %5097 }
0x1735   : > { %v5100_v40 = vpop.eup %5099  ;;  %v3757_v41 = vadd.f32 1.0, %v5098_v39 }
0x1736   : > { %v5102_v42 = vpop.eup %5101  ;;  %v3758_v43 = vadd.f32 1.0, %v5100_v40 }
0x1737   : > { %v5104_v36 = vpop.eup %5103  ;;  %v3761_v62 = vmul.f32 0.5, %v3757_v41  ;;  %v3759_v46 = vadd.f32 1.0, %v5102_v42 }
0x1738   : > { %v3760_v47 = vadd.f32 1.0, %v5104_v36  ;;  %v3762_v48 = vmul.f32 0.5, %v3758_v43 }
0x1739   : > { %v3763_v49 = vmul.f32 0.5, %v3759_v46  ;;  %v3765_v35 = vmul.f32 %v3761_v62, %v3725_v22 }
0x173a   : > { %v3764_v50 = vmul.f32 0.5, %v3760_v47  ;;  %v3766_v23 = vmul.f32 %v3762_v48, %v3727_v2 }
0x173b   : > { %v3767_v53 = vmul.f32 %v3763_v49, %v3729_v25 }
0x173c   : > { %v3768_v54 = vmul.f32 %v3764_v50, %v3731_v20 }
0x173d   : > { %v3769_v60 = vpack.c.bf16 %v3767_v53, %v3765_v35 }
0x173e   : > { %v3770_v61 = vpack.c.bf16 %v3768_v54, %v3766_v23 }
0x1740   : > { %3905 = vmatprep.mubr.bf16.mxu1 %v3770_v61 }
0x1741   : > { %3906 = vmatmul.mubr.bf16.vlgmr.msra.gmra.mrb[28].mxu1 %v3769_v60 }
0x1814   : > { %v4462_v63 = vpop.f32.mrb[28].mxu1 }
0x1815   : > { %v4463_v0 = vpop.f32.mrb[29].mxu1 }
0x1816   : > { %v4464_v5 = vadd.f32 %v4463_v0, %v4462_v63  ;;  %v4465_v3 = vpop.f32.mrb[30].mxu1 }
0x1817   : > { %v4466_v4 = vpop.f32.mrb[31].mxu1 }
0x1818   : > { %v3908_v6 = vadd.f32 %v4464_v5, %v4288_v18  ;;  %v4467_v58 = vadd.f32 %v4466_v4, %v4465_v3 }
0x181a   : > { %v3911_v7 = vadd.f32 %v4467_v58, %v4288_v18  ;;  %v3914_v8 = vadd.f32 %v3908_v6, %v5965_v15 }
0x181c   : > { %3918 = vadd.xlane.f32.xlu0 %v3914_v8  ;;  %v3915_v10 = vadd.f32 %v3911_v7, %v5968_v19 }
0x181e   : > { %3920 = vadd.xlane.f32.xlu1 %v3915_v10 }
0x18a9   : > { %v3919_v12 = vpop.xlane.xlu0 %3918 }
0x18aa   : > { %v3922_v13 = vmul.f32 0.0078125, %v3919_v12 }
0x18ab   : > { %v3921_v9 = vpop.xlane.xlu1 %3920 }
0x18ac   : > { %v3924_v17 = vsub.f32 %v3914_v8, %v3922_v13  ;;  %v3923_v45 = vmul.f32 0.0078125, %v3921_v9 }
0x18ae   : > { %v3925_v21 = vsub.f32 %v3915_v10, %v3923_v45  ;;  %v3926_v22 = vmul.f32 %v3924_v17, %v3924_v17 }
0x18b0   : > { %3928 = vadd.xlane.f32.xlu0 %v3926_v22  ;;  %v3927_v11 = vmul.f32 %v3925_v21, %v3925_v21 }
0x18b2   : > { %3930 = vadd.xlane.f32.xlu1 %v3927_v11 }
0x193d   : > { %v3929_v2 = vpop.xlane.xlu0 %3928 }
0x193e   : > { %v3932_v14 = vmul.f32 0.0078125, %v3929_v2 }
0x193f   : > { %v3931_v1 = vpop.xlane.xlu1 %3930 }
0x1940   : > { %v3934_v25 = vadd.f32 1e-05, %v3932_v14  ;;  %v3933_v15 = vmul.f32 0.0078125, %v3931_v1 }
0x1942   : > { %5105 = vrsqrt.f32 %v3934_v25  ;;  %v3935_v44 = vadd.f32 1e-05, %v3933_v15 }
0x1944   : > { %5107 = vrsqrt.f32 %v3935_v44 }
0x194c   : > { %v5106_v19 = vpop.eup %5105 }
0x194d   : > { %v3938_v20 = vmul.f32 %v5106_v19, %v3924_v17 }
0x194e   : > { %v5108_v26 = vpop.eup %5107 }
0x194f   : > { %v3946_v27 = vmul.f32 %v4305_v24, %v3938_v20  ;;  %v3939_v28 = vmul.f32 %v5108_v26, %v3925_v21 }
0x1951   : > { %v3947_v31 = vmul.f32 %v4305_v24, %v3939_v28  ;;  %v3954_v37 = vadd.f32 %v4306_v29, %v3946_v27 }
0x1953   : > { %v3955_v57 = vadd.f32 %v4306_v29, %v3947_v31 }
0x1955   : > { %v4322_v56 = vpack.c.bf16 %v3955_v57, %v3954_v37 }
0x1957   : > { %4323 = vst [vmem:[%s579_s16] sm:$0xff] %v4322_v56  }
0x1958 PF: > { %s6043_s14 = sld [smem:[#allocation10_spill]] }
0x195e   : > { %s28_s21 = sadd.s32 1, %s6043_s14  }
0x195f   : > { %p25_p5 = scmp.ge.s32.totalorder %s28_s21, 4  }
0x1961   :  { %27 = sbr.rel (!%p25_p5) target bundleno = 7 (0x7), region = 142 }
0x1968   :  { %3987 = vsyncpa [#allocation4], 1 }
0x1969   :  { %3989 = vsyncpa [#allocation4 + $0x1], 1 }
0x196a   :  { %3990 = vsyncpa [#allocation6], 1 }

// kernel: bagualu_summary_forward.3
= control target key start
LH: loop header
LB: loop body
LE: loop exit
PB: predicated region body
PF: predicated region fallthrough
CT: control target
= control target key end

     0   :  { %s9390_s6 = smov 1   ;;  %s9391_s10 = smov 2   ;;  %s10589_s0 = inlined_call_operand.smem [shape: u32[30], index: -1, kind: input, shape index: {}] }
   0x1   :  { %s9434_s5 = sld [smem:[%s10589_s0]]   ;;  %s9392_s14 = smov 3  }
   0x2   :  { %s9439_s9 = sld [smem:[%s10589_s0 + %s9390_s6]]   ;;  %s9393_s18 = smov 4  }
   0x3   :  { %s9444_s13 = sld [smem:[%s10589_s0 + %s9391_s10]]   ;;  %s9394_s22 = smov 5  }
   0x4   :  { %s9449_s17 = sld [smem:[%s10589_s0 + %s9392_s14]]   ;;  %s9395_s26 = smov 6  }
   0x5   :  { %s9454_s21 = sld [smem:[%s10589_s0 + %s9393_s18]]   ;;  %s9396_s30 = smov 7  }
   0x6   :  { %s9459_s25 = sld [smem:[%s10589_s0 + %s9394_s22]]   ;;  %s9397_s4 = smov 8  }
   0x7   :  { %s9464_s29 = sld [smem:[%s10589_s0 + %s9395_s26]]   ;;  %s9398_s10 = smov 9  }
   0x8   :  { %s9469_s3 = sld [smem:[%s10589_s0 + %s9396_s30]]   ;;  %s9399_s15 = smov 10  }
   0x9   :  { %10603 = sst [smem:[#allocation3_spill]] %s9444_s13  ;;  %s9400_s20 = smov 11  }
   0xa   :  { %10604 = sst [smem:[#allocation4_spill]] %s9449_s17  ;;  %s9401_s26 = smov 12  }
   0xb   :  { %s9474_s8 = sld [smem:[%s10589_s0 + %s9397_s4]]   ;;  %s9402_s1 = smov 13  }
   0xc   :  { %s9479_s14 = sld [smem:[%s10589_s0 + %s9398_s10]]   ;;  %s9403_s7 = smov 14  }
   0xd   :  { %s9484_s19 = sld [smem:[%s10589_s0 + %s9399_s15]]   ;;  %s9404_s15 = smov 15  }
   0xe   :  { %10605 = sst [smem:[#allocation5_spill]] %s9469_s3  ;;  %s9405_s22 = smov 16  }
   0xf   :  { %s9489_s24 = sld [smem:[%s10589_s0 + %s9400_s20]]   ;;  %s9406_s28 = smov 17  }
  0x10   :  { %s9494_s30 = sld [smem:[%s10589_s0 + %s9401_s26]]  }
  0x11   :  { %s9499_s6 = sld [smem:[%s10589_s0 + %s9402_s1]]  }
  0x12   :  { %s9504_s12 = sld [smem:[%s10589_s0 + %s9403_s7]]   ;;  %s9407_s7 = smov 18  }
  0x13   :  { %s9509_s20 = sld [smem:[%s10589_s0 + %s9404_s15]]   ;;  %s9408_s15 = smov 19  }
  0x14   :  { %s9514_s27 = sld [smem:[%s10589_s0 + %s9405_s22]]   ;;  %s9409_s22 = smov 20  }
  0x15   :  { %s9519_s4 = sld [smem:[%s10589_s0 + %s9406_s28]]   ;;  %s9410_s28 = smov 21  }
  0x16   :  { %s9524_s17 = sld [smem:[%s10589_s0 + %s9407_s7]]   ;;  %s9411_s7 = smov 22  }
  0x17   :  { %s9529_s13 = sld [smem:[%s10589_s0 + %s9408_s15]]   ;;  %s9412_s15 = smov 23  }
  0x1a   :  { %10606 = sst [smem:[#allocation6_spill]] %s9514_s27 }
  0x1b   :  { %10607 = sst [smem:[#allocation7_spill]] %s9519_s4 }
  0x1c   :  { %10608 = sst [smem:[#allocation8_spill]] %s9524_s17 }
  0x1d   :  { %10609 = sst [smem:[#allocation9_spill]] %s9529_s13 }
  0x1e   :  { %s9534_s27 = sld [smem:[%s10589_s0 + %s9409_s22]]   ;;  %s9413_s22 = smov 24  }
  0x1f   :  { %s9539_s4 = sld [smem:[%s10589_s0 + %s9410_s28]]   ;;  %s9414_s28 = smov 25  }
  0x20   :  { %s9544_s17 = sld [smem:[%s10589_s0 + %s9411_s7]]   ;;  %s9415_s7 = smov 26  }
  0x21   :  { %s9549_s13 = sld [smem:[%s10589_s0 + %s9412_s15]]   ;;  %s9416_s15 = smov 27  }
  0x24   :  { %10610 = sst [smem:[#allocation10_spill]] %s9534_s27 }
  0x25   :  { %10611 = sst [smem:[#allocation11_spill]] %s9539_s4 }
  0x26   :  { %10612 = sst [smem:[#allocation12_spill]] %s9544_s17 }
  0x27   :  { %10613 = sst [smem:[#allocation13_spill]] %s9549_s13 }
  0x28   :  { %s9554_s27 = sld [smem:[%s10589_s0 + %s9413_s22]]   ;;  %s9417_s22 = smov 28  }
  0x29   :  { %s9559_s4 = sld [smem:[%s10589_s0 + %s9414_s28]]   ;;  %s9418_s28 = smov 29  }
  0x2a   :  { %s9564_s17 = sld [smem:[%s10589_s0 + %s9415_s7]]   ;;  %s9581_s7 = smov 0  }
  0x2b   :  { %s9569_s13 = sld [smem:[%s10589_s0 + %s9416_s15]]  }
  0x2e   :  { %10614 = sst [smem:[#allocation14_spill]] %s9554_s27 }
  0x2f   :  { %10615 = sst [smem:[#allocation15_spill]] %s9559_s4 }
  0x30   :  { %s9574_s27 = sld [smem:[%s10589_s0 + %s9417_s22]]  }
  0x31   :  { %s9579_s4 = sld [smem:[%s10589_s0 + %s9418_s28]]  }
  0x32 LB: > { %s10616_s3 = sld [smem:[#allocation5_spill]]  ;;  %s7419_s10 = sadd.s32 4294967295, %s9388_s7   ;;  %s9388_s7 = sphi %s9581_s7, %s70_s7  }
  0x33   : > { %p7423_p0 = scmp.ge.s32.totalorder %s9388_s7, 1  ;;  %p848_p1 = scmp.lt.s32.totalorder %s9388_s7, 3 }
  0x35   : > { %p849_p2 = pnand %p7423_p0, %p848_p1 }
  0x36   : > { %p938_p3 = scmp.lt.s32.totalorder (!%p849_p2), %s7419_s10, 1  ;;  %v8900_v3 = vld [vmem:[%s9464_s29 + $0x4] ss:$12 sps:$4 sm:$0xff] (!%p849_p2)   ;;  %v8902_v4 = vld [vmem:[%s9464_s29] ss:$12 sps:$4 sm:$0xff] (!%p849_p2)   ;;  %v9419_v5 = vmov (!%p849_p2), 0.0   ;;  %v970_v54 = vlaneseq (!%p849_p2) }
  0x37   : > { %852 = sbr.rel (%p849_p2) target bundleno = 11682 (0x2da2), region = 132  ;;  %8186 = vmatprep.subr.bf16.mxu1 (!%p849_p2), %v9419_v5  ;;  %v8903_v6 = vld [vmem:[%s9464_s29 + $0x8] ss:$12 sps:$4 sm:$0xff] (!%p849_p2)   ;;  %1198 = vmatprep.subr.bf16.mxu0 (!%p849_p2), %v8900_v3  ;;  %v8906_v16 = vld [vmem:[%s9464_s29 + $0x18] ss:$12 sps:$4 sm:$0xff] (!%p849_p2)   ;;  %v9420_v31 = vmov (!%p849_p2), 0  }
  0x38   : > { %v8904_v7 = vld [vmem:[%s9464_s29 + $0x1c] ss:$12 sps:$4 sm:$0xff] (!%p849_p2)   ;;  %1199 = vmatpush1.bf16.msra.mxu0 (!%p849_p2), %v8902_v4  ;;  %8187 = vmatpush3.bf16.msra.mxu1 (!%p849_p2), %v8903_v6  ;;  %v8907_v17 = vld [vmem:[%s9464_s29 + $0x20] ss:$12 sps:$4 sm:$0xff] (!%p849_p2)   ;;  %v8911_v20 = vld [vmem:[%s9464_s29 + $0x38] ss:$12 sps:$4 sm:$0xff] (!%p849_p2)  }
  0x39   : > { %1200 = vmatprep.subr.bf16.mxu0 (!%p849_p2), %v8904_v7  ;;  %8188 = vmatprep.subr.bf16.mxu1 (!%p849_p2), %v9419_v5  ;;  %v8908_v18 = vld [vmem:[%s9464_s29 + $0x34] ss:$12 sps:$4 sm:$0xff] (!%p849_p2)   ;;  %v8910_v19 = vld [vmem:[%s9464_s29 + $0x30] ss:$12 sps:$4 sm:$0xff] (!%p849_p2)   ;;  %v8912_v21 = vld [vmem:[%s9464_s29 + $0x4c] ss:$12 sps:$4 sm:$0xff] (!%p849_p2)  }
  0x3a   : > { %v8914_v22 = vld [vmem:[%s9464_s29 + $0x48] ss:$12 sps:$4 sm:$0xff] (!%p849_p2)   ;;  %v8915_v23 = vld [vmem:[%s9464_s29 + $0x50] ss:$12 sps:$4 sm:$0xff] (!%p849_p2)   ;;  %v8918_v25 = vld [vmem:[%s9464_s29 + $0x60] ss:$12 sps:$4 sm:$0xff] (!%p849_p2)   ;;  %1230 = vmatprep.mubr.bf16.mxu0 (!%p849_p2), %v9420_v31  ;;  %8899 = vset.pattern.permute.xlu1 (!%p849_p2), %v9420_v31 }
  0x3b   : > { %v8916_v24 = vld [vmem:[%s9464_s29 + $0x64] ss:$12 sps:$4 sm:$0xff] (!%p849_p2)   ;;  %v8919_v26 = vld [vmem:[%s9464_s29 + $0x68] ss:$12 sps:$4 sm:$0xff] (!%p849_p2)   ;;  %v8923_v29 = vld [vmem:[%s9464_s29 + $0x80] ss:$12 sps:$4 sm:$0xff] (!%p849_p2)   ;;  %8898 = vset.pattern.permute.xlu0 (!%p849_p2), %v9420_v31 }
  0x3c   : > { %1201 = vmatpush1.bf16.msra.mxu0 (!%p849_p2), %v8906_v16  ;;  %8189 = vmatpush3.bf16.msra.mxu1 (!%p849_p2), %v8907_v17  ;;  %v8920_v27 = vld [vmem:[%s9464_s29 + $0x7c] ss:$12 sps:$4 sm:$0xff] (!%p849_p2)   ;;  %v8922_v28 = vld [vmem:[%s9464_s29 + $0x78] ss:$12 sps:$4 sm:$0xff] (!%p849_p2)   ;;  %v8924_v30 = vld [vmem:[%s9464_s29 + $0x94] ss:$12 sps:$4 sm:$0xff] (!%p849_p2)  }
  0x3d   : > { %8190 = vmatprep.subr.bf16.mxu1 (!%p849_p2), %v9419_v5  ;;  %1202 = vmatprep.subr.bf16.mxu0 (!%p849_p2), %v8908_v18  ;;  %vm9421_vm0 = vmmov (!%p849_p2), 0   ;;  %v8926_v32 = vld [vmem:[%s9464_s29 + $0x90] ss:$12 sps:$4 sm:$0xff] (!%p849_p2)   ;;  %v8927_v33 = vld [vmem:[%s9464_s29 + $0x98] ss:$12 sps:$4 sm:$0xff] (!%p849_p2)   ;;  %v9652_v55 = vshrl.u32 (!%p849_p2), %v970_v54, 7 }
  0x3e   : > { %s10634_s10 = smov (!%p938_p3, %s7419_s10), 1  ;;  %8202 = vmatprep.mubr.msk.bf16.mxu1 %vm9421_vm0, %v9419_v5  ;;  %v8928_v34 = vld [vmem:[%s9464_s29 + $0xac] ss:$12 sps:$4 sm:$0xff]   ;;  %v8930_v35 = vld [vmem:[%s9464_s29 + $0xa8] ss:$12 sps:$4 sm:$0xff]   ;;  %vm1284_vm1 = vcmask 261120  }
  0x3f   : > { %s7935_s0 = sshll.u32 %s10634_s10, 3  ;;  %v8931_v36 = vld [vmem:[%s9464_s29 + $0xb0] ss:$12 sps:$4 sm:$0xff]   ;;  %v7430_v45 = vld [vmem:[%s9454_s21] ss:$0 sm:$0xff]  ;;  %v9655_v56 = vsub.s32 0, %v9652_v55  ;;  %vm9673_vm2 = vmpackc.low %vm1284_vm1, %vm1284_vm1 }
  0x40   : > { %s942_s11 = scalar_lea.vmem %s9434_s5, %s7935_s0  ;;  %1203 = vmatpush1.bf16.msra.mxu0 %v8910_v19  ;;  %8191 = vmatpush3.bf16.msra.mxu1 %v8911_v20  ;;  %v7431_v49 = vld [vmem:[%s9459_s25] ss:$0 sm:$0xff]  ;;  %v9659_v58 = vsub.s32 2, %v9652_v55  ;;  %v9662_v59 = vsub.s32 1, %v9652_v55  ;;  %vm1372_vm5 = vcmask 130048   ;;  %s10600_s15 = smov 64  }
  0x41   : > { %v7939_v0 = vld [vmem:[%s942_s11] sm:$0xff]   ;;  %8192 = vmatprep.subr.bf16.mxu1 %v9419_v5  ;;  %1204 = vmatprep.subr.bf16.mxu0 %v8912_v21  ;;  %s9424_s16 = smov 96   ;;  %s10598_s18 = smov 32   ;;  %vm1688_vm6 = vcmask 523520   ;;  %vm1899_vm7 = vcmask 785920   ;;  %vm2110_vm8 = vcmask 1048320  }
  0x42   : > { %v9595_v1 = vunpack.c.l.bf16 %v7939_v0  ;;  %v9598_v2 = vunpack.c.h.bf16 %v7939_v0  ;;  %v1052_v57 = vld [vmem:[%s10616_s3] sm:$0x7]  ;;  %s947_s22 = scalar_lea.vmem %s9439_s9, %s7935_s0  ;;  %s10619_s23 = sld [smem:[#allocation3_spill]] }
  0x43   : > { %v1058_v60 = vrot.slane %v1052_v57, %v9655_v56  ;;  %v1066_v61 = vrot.slane %v1052_v57, %v9659_v58  ;;  %v1062_v0 = vrot.slane %v1052_v57, %v9662_v59  ;;  %s10620_s28 = sld [smem:[#allocation6_spill]]  ;;  %s10621_s1 = sld [smem:[#allocation7_spill]] }
  0x44   : > { %981 = vadd.xlane.f32.xlu0 %v9595_v1  ;;  %1205 = vmatpush1.bf16.msra.mxu0 %v8914_v22  ;;  %s10622_s2 = sld [smem:[#allocation10_spill]]  ;;  %s10623_s0 = sld [smem:[#allocation8_spill]] }
  0x45   : > { %8193 = vmatpush3.bf16.msra.mxu1 %v8915_v23  ;;  %1206 = vmatprep.subr.bf16.mxu0 %v8916_v24  ;;  %v972_v23 = vadd.s32 8, %v9652_v55  ;;  %v9690_v24 = vand.u32 127, %v970_v54  ;;  %s10624_s11 = sld [smem:[#allocation9_spill]] }
  0x46   : > { %8194 = vmatprep.subr.bf16.mxu1 %v9419_v5 }
  0x47   : > { %vm976_vm3 = vcmp.le.s32.totalorder %v9690_v24, %v972_v23  ;;  %vm975_vm4 = vcmp.le.s32.totalorder %v9690_v24, %v9652_v55 }
  0x48   : > { %983 = vadd.xlane.f32.xlu0 %v9598_v2  ;;  %1207 = vmatpush1.bf16.msra.mxu0 %v8918_v25  ;;  %v9422_v25 = vmov -1e+09   ;;  %s9893_s26 = scalar_lea.vmem %s10619_s23, %s10634_s10  ;;  %s10626_s23 = sld [smem:[#allocation11_spill]] }
  0x49   : > { %8195 = vmatpush3.bf16.msra.mxu1 %v8919_v26  ;;  %1208 = vmatprep.subr.bf16.mxu0 %v8920_v27  ;;  %v9695_v26 = vsel %vm976_vm3, 0.0, %v9422_v25  ;;  %v9697_v27 = vsel %vm975_vm4, 0.0, %v9422_v25  ;;  %vm7255_vm3 = vcmask 7168   ;;  %vm7269_vm4 = vcmask 0  }
  0x4a   : > { %8196 = vmatprep.subr.bf16.mxu1 %v9419_v5 }
  0x4c   : > { %1209 = vmatpush1.bf16.msra.mxu0 %v8922_v28 }
  0x4d   : > { %8197 = vmatpush3.bf16.msra.mxu1 %v8923_v29  ;;  %1210 = vmatprep.subr.bf16.mxu0 %v8924_v30 }
  0x4e   : > { %8198 = vmatprep.subr.bf16.mxu1 %v9419_v5 }
  0x50   : > { %1211 = vmatpush1.bf16.msra.mxu0 %v8926_v32 }
  0x51   : > { %8199 = vmatpush3.bf16.msra.mxu1 %v8927_v33  ;;  %1212 = vmatprep.subr.bf16.mxu0 %v8928_v34 }
  0x52   : > { %8200 = vmatprep.subr.bf16.mxu1 %v9419_v5 }
  0x54   : > { %1213 = vmatpush1.bf16.msra.mxu0 %v8930_v35 }
  0x55   : > { %8201 = vmatpush3.bf16.msra.mxu1 %v8931_v36 }
  0xd1   : > { %v982_v8 = vpop.xlane.xlu0 %981 }
  0xd2   : > { %v986_v9 = vmul.f32 0.0078125, %v982_v8 }
  0xd4   : > { %v9608_v10 = vsub.f32 %v9595_v1, %v986_v9 }
  0xd5   : > { %v984_v11 = vpop.xlane.xlu0 %983 }
  0xd6   : > { %v987_v12 = vmul.f32 0.0078125, %v984_v11  ;;  %v990_v13 = vmul.f32 %v9608_v10, %v9608_v10 }
  0xd8   : > { %992 = vadd.xlane.f32.xlu1 %v990_v13  ;;  %v9613_v14 = vsub.f32 %v9598_v2, %v987_v12 }
  0xda   : > { %v991_v15 = vmul.f32 %v9613_v14, %v9613_v14 }
  0xdc   : > { %994 = vadd.xlane.f32.xlu1 %v991_v15 }
 0x165   : > { %v993_v37 = vpop.xlane.xlu1 %992 }
 0x166   : > { %v996_v38 = vmul.f32 0.0078125, %v993_v37 }
 0x168   : > { %v998_v39 = vadd.f32 1e-05, %v996_v38 }
 0x169   : > { %v995_v40 = vpop.xlane.xlu1 %994 }
 0x16a   : > { %9189 = vrsqrt.f32 %v998_v39  ;;  %v997_v41 = vmul.f32 0.0078125, %v995_v40 }
 0x16c   : > { %v999_v42 = vadd.f32 1e-05, %v997_v41 }
 0x16e   : > { %9191 = vrsqrt.f32 %v999_v42 }
 0x174   : > { %v9190_v43 = vpop.eup %9189 }
 0x175   : > { %v1002_v44 = vmul.f32 %v9190_v43, %v9608_v10 }
 0x177   : > { %v1010_v48 = vmul.f32 %v7430_v45, %v1002_v44 }
 0x178   : > { %v9192_v46 = vpop.eup %9191 }
 0x179   : > { %v1003_v47 = vmul.f32 %v9192_v46, %v9613_v14  ;;  %v1018_v51 = vadd.f32 %v7431_v49, %v1010_v48 }
 0x17b   : > { %v1011_v50 = vmul.f32 %v7430_v45, %v1003_v47 }
 0x17d   : > { %v1019_v52 = vadd.f32 %v7431_v49, %v1011_v50 }
 0x17f   : > { %v1053_v53 = vpack.c.bf16 %v1019_v52, %v1018_v51 }
 0x181   : > { %1231 = vmatmul.mubr.bf16.vlgmr.msra.gmra.mrb[0].mxu0 %v1053_v53  ;;  %8203 = vmatmul.mubr.bf16.vlgmr.msra.gmra.mrb[0].mxu1 %v1053_v53 }
 0x254   : > { %v1232_v62 = vpop.f32.mrb[0].mxu0  ;;  %v1275_v63 = vpop.f32.mrb[0].mxu1 }
 0x255   : > { %v1233_v3 = vadd.f32 %v1232_v62, %v1058_v60  ;;  %v1234_v4 = vpop.f32.mrb[1].mxu0  ;;  %v8204_v6 = vpop.f32.mrb[1].mxu1  ;;  %v1276_v10 = vadd.f32 %v1275_v63, %v1066_v61 }
 0x256   : > { %v1236_v7 = vpop.f32.mrb[2].mxu0  ;;  %v1278_v8 = vpop.f32.mrb[2].mxu1  ;;  %v1235_v14 = vadd.f32 %v1234_v4, %v1062_v0 }
 0x257   : > { %v9667_v9 = vmul.f32 0.17677669, %v1233_v3  ;;  %v1279_v11 = vadd.f32 %v1278_v8, %v1066_v61  ;;  %v1238_v12 = vpop.f32.mrb[3].mxu0  ;;  %v8205_v13 = vpop.f32.mrb[3].mxu1  ;;  %v1237_v21 = vadd.f32 %v1236_v7, %v1058_v60 }
 0x258   : > { %v1239_v15 = vadd.f32 %v1238_v12, %v1062_v0 }
 0x259   : > { %8210 = vmatprep.mubr.msk.f32.mxu0 %vm1284_vm1, %v9667_v9  ;;  %v8576_v17 = vpack.c.bf16 %v1279_v11, %v1276_v10  ;;  %v9677_v18 = vpack.i.bf16 %v1279_v11, %v1276_v10  ;;  %v9685_v22 = vmul.f32 0.17677669, %v1237_v21 }
 0x25a   : > { %v8570_v19 = vpack.c.bf16 %v1239_v15, %v1235_v14  ;;  %v9679_v20 = vpack.i.bf16 %v1239_v15, %v1235_v14 }
 0x25c   : > { %8572 = vmatprep.subr.msk.bf16.mxu0 %vm9673_vm2, %v8570_v19 }
 0x25d   : > { %8575 = vmatpush3.bf16.xpose.msk.msra.mxu0 %vm9673_vm2, %v8570_v19 }
 0x25e   : > { %8577 = vmatprep.subr.bf16.mxu0 %v8576_v17 }
 0x264   : > { %8211 = vmatmul.mubr.msk.f32.vlgmr.msra.gmra.mrb[4].mxu0 %vm1284_vm1, %v9685_v22 }
 0x265   : > { %8579 = vmatpush3.bf16.msra.mxu0 %v8576_v17 }
 0x337   : > { %v8212_v28 = vpop.f32.mrb[4].mxu0 }
 0x338   : > { %v1369_v29 = vadd.f32 %v8212_v28, %v9695_v26  ;;  %v1363_v30 = vpop.f32.mrb[5].mxu0 }
 0x339   : > { %v1364_v32 = vadd.f32 %v1363_v30, %v9697_v27 }
 0x33a   : > { %v1376_v33 = vsel %vm1372_vm5, %v1369_v29, -inf }
 0x33b   : > { %1377 = vmax.xlane.f32.xlu1 %v1376_v33  ;;  %v1373_v34 = vsel %vm1372_vm5, %v1364_v32, -inf }
 0x33c   : > { %1374 = vmax.xlane.f32.xlu0 %v1373_v34 }
 0x34c   : > { %8784 = vrot.lane.b32.xlu1 %v9679_v20, %s10600_s15 }
 0x350   : > { %1478 = vrot.lane.b32.xlu1 %v9667_v9, %s9424_s16 }
 0x352   : > { %8779 = vrot.lane.b32.xlu0 %v9679_v20, %s9424_s16 }
 0x354   : > { %1480 = vrot.lane.b32.xlu1 %v9685_v22, %s9424_s16 }
 0x356   : > { %1691 = vrot.lane.b32.xlu0 %v9667_v9, %s10600_s15 }
 0x358   : > { %1693 = vrot.lane.b32.xlu1 %v9685_v22, %s10600_s15 }
 0x3c8   : > { %v1378_v35 = vpop.xlane.xlu1 %1377 }
 0x3c9   : > { %v1380_v36 = vsub.f32 %v1369_v29, %v1378_v35  ;;  %v1375_v37 = vpop.xlane.xlu0 %1374 }
 0x3ca   : > { %v1379_v38 = vsub.f32 %v1364_v32, %v1375_v37 }
 0x3cb   : > { %v1383_v39 = vmul.f32 1.442695, %v1380_v36 }
 0x3cc   : > { %v1381_v40 = vmul.f32 1.442695, %v1379_v38  ;;  %v8785_v45 = vpop.permute.xlu1 %8784 }
 0x3cd   : > { %v8780_v41 = vpop.permute.xlu0 %8779  ;;  %v8787_v46 = vunpack.i.h.bf16 %v8785_v45  ;;  %v8786_v47 = vunpack.i.l.bf16 %v8785_v45 }
 0x3ce   : > { %9193 = vpow2.f32 %v1381_v40  ;;  %v8782_v42 = vunpack.i.h.bf16 %v8780_v41  ;;  %v8781_v43 = vunpack.i.l.bf16 %v8780_v41 }
 0x3cf   : > { %9195 = vpow2.f32 %v1383_v39  ;;  %v8590_v50 = vpack.c.bf16 %v8787_v46, %v8786_v47 }
 0x3d0   : > { %v8580_v44 = vpack.c.bf16 %v8782_v42, %v8781_v43  ;;  %v1479_v51 = vpop.permute.xlu1 %1478 }
 0x3d1   : > { %v1692_v53 = vpop.permute.xlu0 %1691 }
 0x3d2   : > { %8582 = vmatprep.subr.msk.bf16.mxu0 %vm9673_vm2, %v8580_v44 }
 0x3d4   : > { %v1481_v52 = vpop.permute.xlu1 %1480 }
 0x3d8   : > { %v9717_v48 = vpop.eup %9193  ;;  %v1694_v54 = vpop.permute.xlu1 %1693 }
 0x3d9   : > { %v9719_v49 = vpop.eup %9195  ;;  %8217 = vmatprep.mubr.msk.f32.mxu0 %vm1372_vm5, %v9717_v48 }
 0x3da   : > { %8218 = vmatmul.mubr.msk.f32.vlgmr.msra.gmra.mrb[6].mxu0 %vm1372_vm5, %v9719_v49 }
 0x3db   : > { %8585 = vmatpush3.bf16.xpose.msk.msra.mxu0 %vm9673_vm2, %v8580_v44  ;;  %8224 = vmatprep.mubr.msk.f32.mxu0 %vm1284_vm1, %v1479_v51 }
 0x3dc   : > { %8592 = vmatprep.subr.msk.bf16.mxu0 %vm9673_vm2, %v8590_v50 }
 0x3e2   : > { %8225 = vmatmul.mubr.msk.f32.vlgmr.msra.gmra.mrb[8].mxu0 %vm1284_vm1, %v1481_v52 }
 0x3e3   : > { %8595 = vmatpush3.bf16.xpose.msk.msra.mxu0 %vm9673_vm2, %v8590_v50  ;;  %8238 = vmatprep.mubr.msk.f32.mxu0 %vm1284_vm1, %v1692_v53 }
 0x3ea   : > { %8239 = vmatmul.mubr.msk.f32.vlgmr.msra.gmra.mrb[10].mxu0 %vm1284_vm1, %v1694_v54 }
 0x4ad   : > { %v9735_v57 = vpop.f32.mrb[6].mxu0 }
 0x4ae   : > { %v9737_v60 = vpop.f32.mrb[7].mxu0 }
 0x4b5   : > { %v8226_v61 = vpop.f32.mrb[8].mxu0 }
 0x4b6   : > { %v1560_v62 = vpop.f32.mrb[9].mxu0  ;;  %v1566_v8 = vadd.f32 %v8226_v61, %v9695_v26 }
 0x4b7   : > { %v1561_v10 = vadd.f32 %v1560_v62, %v9697_v27 }
 0x4b8   : > { %v1572_v11 = vsel %vm1372_vm5, %v1566_v8, -inf }
 0x4b9   : > { %v1569_v12 = vsel %vm1372_vm5, %v1561_v10, -inf }
 0x4bd   : > { %v8240_v63 = vpop.f32.mrb[10].mxu0 }
 0x4be   : > { %v1779_v0 = vadd.f32 %v8240_v63, %v9695_v26  ;;  %v1773_v3 = vpop.f32.mrb[11].mxu0 }
 0x4bf   : > { %v1774_v4 = vadd.f32 %v1773_v3, %v9697_v27 }
 0x4c0   : > { %v1785_v6 = vsel %vm1372_vm5, %v1779_v0, -inf }
 0x4c1   : > { %1786 = vmax.xlane.f32.xlu1 %v1785_v6  ;;  %v1782_v7 = vsel %vm1372_vm5, %v1774_v4, -inf }
 0x4c2   : > { %1783 = vmax.xlane.f32.xlu0 %v1782_v7 }
 0x4d2   : > { %8794 = vrot.lane.b32.xlu1 %v9679_v20, %s10598_s18 }
 0x4d6   : > { %1904 = vrot.lane.b32.xlu1 %v9685_v22, %s10598_s18 }
 0x4d8   : > { %8789 = vrot.lane.b32.xlu0 %v9677_v18, %s10600_s15 }
 0x4dc   : > { %1902 = vrot.lane.b32.xlu0 %v9667_v9, %s10598_s18 }
 0x4fa   : > { %1573 = vmax.xlane.f32.xlu1 %v1572_v11 }
 0x4fb   : > { %1570 = vmax.xlane.f32.xlu0 %v1569_v12 }
 0x50b   : > { %8804 = vrot.lane.b32.xlu1 %v9677_v18, %s10598_s18 }
 0x54e   : > { %v1787_v13 = vpop.xlane.xlu1 %1786 }
 0x54f   : > { %v1789_v14 = vsub.f32 %v1779_v0, %v1787_v13  ;;  %v1784_v15 = vpop.xlane.xlu0 %1783 }
 0x550   : > { %v1788_v17 = vsub.f32 %v1774_v4, %v1784_v15 }
 0x551   : > { %v1792_v19 = vmul.f32 1.442695, %v1789_v14 }
 0x552   : > { %v1790_v20 = vmul.f32 1.442695, %v1788_v17  ;;  %v8795_v9 = vpop.permute.xlu1 %8794 }
 0x553   : > { %v8797_v21 = vunpack.i.h.bf16 %v8795_v9  ;;  %v8790_v22 = vpop.permute.xlu0 %8789  ;;  %v8796_v23 = vunpack.i.l.bf16 %v8795_v9 }
 0x554   : > { %9197 = vpow2.f32 %v1790_v20  ;;  %v8792_v25 = vunpack.i.h.bf16 %v8790_v22  ;;  %v8791_v28 = vunpack.i.l.bf16 %v8790_v22 }
 0x555   : > { %9199 = vpow2.f32 %v1792_v19  ;;  %v8600_v30 = vpack.c.bf16 %v8797_v21, %v8796_v23  ;;  %v1388_v21 = vsel %vm1372_vm5, %v9719_v49, 0.0  ;;  %v1385_v23 = vsel %vm1372_vm5, %v9717_v48, 0.0  ;;  %v8934_v49 = vld [vmem:[%s9474_s8 + $0x10] sm:$0xff]  }
 0x556   : > { %v8596_v29 = vpack.c.bf16 %v8792_v25, %v8791_v28  ;;  %v1905_v35 = vpop.permute.xlu1 %1904  ;;  %v8932_v25 = vld [vmem:[%s9474_s8] sm:$0xff]   ;;  %v8933_v28 = vld [vmem:[%s9474_s8 + $0x8] sm:$0xff]  }
 0x557   : > { %v1903_v34 = vpop.permute.xlu0 %1902 }
 0x558   : > { %8597 = vmatprep.subr.bf16.mxu0 %v8596_v29 }
 0x559   : > { %8599 = vmatpush3.bf16.msra.mxu0 %v8596_v29 }
 0x55a   : > { %8602 = vmatprep.subr.msk.bf16.mxu0 %vm9673_vm2, %v8600_v30 }
 0x55e   : > { %v9198_v32 = vpop.eup %9197 }
 0x55f   : > { %v9200_v33 = vpop.eup %9199  ;;  %8245 = vmatprep.mubr.msk.f32.mxu0 %vm1372_vm5, %v9198_v32  ;;  %v1794_v63 = vsel %vm1372_vm5, %v9198_v32, 0.0 }
 0x560   : > { %8246 = vmatmul.mubr.msk.f32.vlgmr.msra.gmra.mrb[12].mxu0 %vm1372_vm5, %v9200_v33  ;;  %v1797_v41 = vsel %vm1372_vm5, %v9200_v33, 0.0 }
 0x561   : > { %8252 = vmatprep.mubr.msk.f32.mxu0 %vm1284_vm1, %v1903_v34 }
 0x562   : > { %8605 = vmatpush3.bf16.xpose.msk.msra.mxu0 %vm9673_vm2, %v8600_v30 }
 0x563   : > { %8282 = vmatprep.subr.bf16.mxu0 %v9419_v5 }
 0x569   : > { %8253 = vmatmul.mubr.msk.f32.vlgmr.msra.gmra.mrb[14].mxu0 %vm1284_vm1, %v1905_v35 }
 0x56a   : > { %8298 = vmatprep.mubr.msk.bf16.mxu0 %vm9421_vm0, %v9419_v5 }
 0x587   : > { %v1574_v52 = vpop.xlane.xlu1 %1573 }
 0x588   : > { %v1571_v36 = vpop.xlane.xlu0 %1570  ;;  %v1576_v53 = vsub.f32 %v1566_v8, %v1574_v52 }
 0x589   : > { %v1575_v37 = vsub.f32 %v1561_v10, %v1571_v36 }
 0x58a   : > { %v1579_v54 = vmul.f32 1.442695, %v1576_v53  ;;  %v8938_v53 = vld [vmem:[%s9474_s8 + $0x30] sm:$0xff]  }
 0x58b   : > { %v1577_v38 = vmul.f32 1.442695, %v1575_v37  ;;  %v8805_v7 = vpop.permute.xlu1 %8804 }
 0x58c   : > { %v8806_v8 = vunpack.i.l.bf16 %v8805_v7 }
 0x58d   : > { %9201 = vpow2.f32 %v1577_v38 }
 0x58e   : > { %9203 = vpow2.f32 %v1579_v54 }
 0x597   : > { %v9202_v39 = vpop.eup %9201 }
 0x598   : > { %8231 = vmatprep.mubr.msk.f32.mxu1 %vm1372_vm5, %v9202_v39  ;;  %v1581_v40 = vsel %vm1372_vm5, %v9202_v39, 0.0  ;;  %v9204_v61 = vpop.eup %9203 }
 0x599   : > { %1582 = vadd.xlane.f32.xlu1 %v1581_v40  ;;  %v1584_v62 = vsel %vm1372_vm5, %v9204_v61, 0.0 }
 0x59d   : > { %1798 = vadd.xlane.f32.xlu1 %v1797_v41  ;;  %v8935_v41 = vld [vmem:[%s9474_s8 + $0x18] sm:$0xff]  }
 0x626   : > { %v1583_v29 = vpop.xlane.xlu1 %1582 }
 0x62a   : > { %v1799_v32 = vpop.xlane.xlu1 %1798 }
 0x633   : > { %v9771_v42 = vpop.f32.mrb[12].mxu0 }
 0x634   : > { %v9773_v43 = vpop.f32.mrb[13].mxu0 }
 0x63c   : > { %v8254_v44 = vpop.f32.mrb[14].mxu0 }
 0x63d   : > { %v1990_v45 = vadd.f32 %v8254_v44, %v9695_v26  ;;  %v1984_v46 = vpop.f32.mrb[15].mxu0  ;;  %v8936_v44 = vld [vmem:[%s9474_s8 + $0x20] sm:$0xff]  }
 0x63e   : > { %v1985_v47 = vadd.f32 %v1984_v46, %v9697_v27 }
 0x63f   : > { %v1996_v50 = vsel %vm1372_vm5, %v1990_v45, -inf }
 0x640   : > { %1997 = vmax.xlane.f32.xlu0 %v1996_v50  ;;  %v1993_v51 = vsel %vm1372_vm5, %v1985_v47, -inf }
 0x644   : > { %1994 = vmax.xlane.f32.xlu0 %v1993_v51 }
 0x65a   : > { %8799 = vrot.lane.b32.xlu0 %v9677_v18, %s9424_s16  ;;  %v8807_v18 = vunpack.i.h.bf16 %v8805_v7 }
 0x65c   : > { %v8606_v17 = vpack.c.bf16 %v8807_v18, %v8806_v8 }
 0x679   : > { %1585 = vadd.xlane.f32.xlu0 %v1584_v62 }
 0x67d   : > { %1795 = vadd.xlane.f32.xlu0 %v1794_v63 }
 0x6cd   : > { %v1998_v0 = vpop.xlane.xlu0 %1997 }
 0x6ce   : > { %v2000_v3 = vsub.f32 %v1990_v45, %v1998_v0 }
 0x6d0   : > { %v2003_v4 = vmul.f32 1.442695, %v2000_v3  ;;  %v8939_v3 = vld [vmem:[%s9474_s8 + $0x38] sm:$0xff]  }
 0x6d1   : > { %v1995_v6 = vpop.xlane.xlu0 %1994 }
 0x6d2   : > { %9205 = vpow2.f32 %v2003_v4  ;;  %v1999_v10 = vsub.f32 %v1985_v47, %v1995_v6 }
 0x6d4   : > { %v2001_v11 = vmul.f32 1.442695, %v1999_v10 }
 0x6d5   : > { %v8800_v12 = vpop.permute.xlu0 %8799 }
 0x6d6   : > { %9207 = vpow2.f32 %v2001_v11  ;;  %v8802_v13 = vunpack.i.h.bf16 %v8800_v12  ;;  %v8801_v14 = vunpack.i.l.bf16 %v8800_v12 }
 0x6d8   : > { %v8586_v15 = vpack.c.bf16 %v8802_v13, %v8801_v14 }
 0x6da   : > { %8587 = vmatprep.subr.bf16.mxu1 %v8586_v15 }
 0x6db   : > { %8589 = vmatpush3.bf16.msra.mxu1 %v8586_v15 }
 0x6dc   : > { %v9206_v19 = vpop.eup %9205  ;;  %8607 = vmatprep.subr.bf16.mxu1 %v8606_v17 }
 0x6dd   : > { %v2008_v20 = vsel %vm1372_vm5, %v9206_v19, 0.0 }
 0x6de   : > { %2009 = vadd.xlane.f32.xlu1 %v2008_v20  ;;  %8232 = vmatmul.mubr.msk.f32.vlgmr.msra.gmra.mrb[4].mxu1 %vm1372_vm5, %v9204_v61 }
 0x6df   : > { %8609 = vmatpush3.bf16.msra.mxu1 %v8606_v17  ;;  %v7480_v17 = vld [vmem:[%s9479_s14] ss:$0 sm:$0xff] }
 0x6e0   : > { %v9208_v9 = vpop.eup %9207  ;;  %8262 = vmatprep.subr.bf16.mxu1 %v9419_v5 }
 0x6e1   : > { %8259 = vmatprep.mubr.msk.f32.mxu1 %vm1372_vm5, %v9208_v9  ;;  %v2005_v22 = vsel %vm1372_vm5, %v9208_v9, 0.0 }
 0x6e2   : > { %1389 = vadd.xlane.f32.xlu1 %v1388_v21  ;;  %2006 = vadd.xlane.f32.xlu0 %v2005_v22 }
 0x6e3   : > { %8260 = vmatmul.mubr.msk.f32.vlgmr.msra.gmra.mrb[6].mxu1 %vm1372_vm5, %v9206_v19 }
 0x6e4   : > { %8278 = vmatprep.mubr.msk.bf16.mxu1 %vm9421_vm0, %v9419_v5  ;;  %8263 = vmatpush3.bf16.msra.mxu1 %v8932_v25 }
 0x6e5   : > { %8264 = vmatprep.subr.bf16.mxu1 %v9419_v5 }
 0x6e6   : > { %1386 = vadd.xlane.f32.xlu0 %v1385_v23 }
 0x6e8   : > { %8265 = vmatpush3.bf16.msra.mxu1 %v8933_v28 }
 0x6e9   : > { %8266 = vmatprep.subr.bf16.mxu1 %v9419_v5 }
 0x6ec   : > { %8267 = vmatpush3.bf16.msra.mxu1 %v8934_v49  ;;  %v8940_v49 = vld [vmem:[%s9504_s12] ss:$8 sps:$4 sm:$0xff]  }
 0x6ed   : > { %8268 = vmatprep.subr.bf16.mxu1 %v9419_v5 }
 0x6f0   : > { %8269 = vmatpush3.bf16.msra.mxu1 %v8935_v41 }
 0x6f1   : > { %8270 = vmatprep.subr.bf16.mxu1 %v9419_v5 }
 0x6f4   : > { %8271 = vmatpush3.bf16.msra.mxu1 %v8936_v44 }
 0x6f5   : > { %8272 = vmatprep.subr.bf16.mxu1 %v9419_v5 }
 0x706   : > { %v1586_v30 = vpop.xlane.xlu0 %1585 }
 0x70a   : > { %v1796_v33 = vpop.xlane.xlu0 %1795 }
 0x76b   : > { %v2010_v34 = vpop.xlane.xlu1 %2009 }
 0x76f   : > { %v1390_v48 = vpop.xlane.xlu1 %1389  ;;  %v2007_v35 = vpop.xlane.xlu0 %2006 }
 0x770   : > { %9209 = vrcp.f32 %v1390_v48  ;;  %v8950_v48 = vld [vmem:[%s9504_s12 + $0x30] ss:$8 sps:$4 sm:$0xff]  }
 0x773   : > { %v1387_v36 = vpop.xlane.xlu0 %1386 }
 0x774   : > { %9211 = vrcp.f32 %v1387_v36 }
 0x775   : > { %9213 = vrcp.f32 %v1586_v30  ;;  %v8945_v30 = vld [vmem:[%s9504_s12 + $0x14] ss:$8 sps:$4 sm:$0xff]  }
 0x776   : > { %9215 = vrcp.f32 %v1583_v29  ;;  %v8942_v29 = vld [vmem:[%s9504_s12 + $0x4] ss:$8 sps:$4 sm:$0xff]  }
 0x777   : > { %9217 = vrcp.f32 %v1796_v33  ;;  %v8948_v33 = vld [vmem:[%s9504_s12 + $0x24] ss:$8 sps:$4 sm:$0xff]  }
 0x778   : > { %9219 = vrcp.f32 %v1799_v32  ;;  %v8949_v32 = vld [vmem:[%s9494_s30] sm:$0xff]  }
 0x779   : > { %9221 = vrcp.f32 %v2007_v35  ;;  %8283 = vmatpush3.bf16.msra.mxu0 %v8949_v32 }
 0x77a   : > { %v9210_v37 = vpop.eup %9209  ;;  %9223 = vrcp.f32 %v2010_v34  ;;  %8284 = vmatprep.subr.bf16.mxu0 %v9419_v5  ;;  %v8952_v34 = vld [vmem:[%s9504_s12 + $0x34] ss:$8 sps:$4 sm:$0xff]  }
 0x77b   : > { %v1475_v38 = vmul.f32 %v9210_v37, %v9735_v57  ;;  %v8937_v57 = vld [vmem:[%s9474_s8 + $0x28] sm:$0xff]  }
 0x77c   : > { %8273 = vmatpush3.bf16.msra.mxu1 %v8937_v57  ;;  %v8956_v57 = vld [vmem:[%s9504_s12 + $0x44] ss:$8 sps:$4 sm:$0xff]  }
 0x77d   : > { %1477 = vst.msk [vmem:[#allocation2 + $0x8] sm:$0xff] %vm1284_vm1, %v1475_v38  ;;  %8274 = vmatprep.subr.bf16.mxu1 %v9419_v5 }
 0x77e   : > { %v9212_v39 = vpop.eup %9211 }
 0x77f   : > { %v1474_v40 = vmul.f32 %v9212_v39, %v9737_v60  ;;  %v9214_v45 = vpop.eup %9213 }
 0x780   : > { %v9216_v60 = vpop.eup %9215  ;;  %8275 = vmatpush3.bf16.msra.mxu1 %v8938_v53  ;;  %v8962_v53 = vld [vmem:[%s9504_s12 + $0x60] ss:$8 sps:$4 sm:$0xff]  }
 0x781   : > { %1476 = vst.msk [vmem:[#allocation2] sm:$0xff] %vm1284_vm1, %v1474_v40  ;;  %v9218_v51 = vpop.eup %9217  ;;  %8276 = vmatprep.subr.bf16.mxu1 %v9419_v5 }
 0x782   : > { %v9220_v54 = vpop.eup %9219  ;;  %v1889_v62 = vmul.f32 %v9218_v51, %v9773_v43  ;;  %v8964_v51 = vld [vmem:[%s9504_s12 + $0x64] ss:$8 sps:$4 sm:$0xff]  }
 0x783   : > { %v9222_v63 = vpop.eup %9221  ;;  %v1890_v6 = vmul.f32 %v9220_v54, %v9771_v42  ;;  %v8968_v54 = vld [vmem:[%s9504_s12 + $0x74] ss:$8 sps:$4 sm:$0xff]  }
 0x784   : > { %8277 = vmatpush3.bf16.msra.mxu1 %v8939_v3  ;;  %v9224_v7 = vpop.eup %9223  ;;  %v8970_v3 = vld [vmem:[%s9494_s30 + $0x30] sm:$0xff]  }
 0x785   : > { %2497 = vmatprep.subr.bf16.mxu1 %v8942_v29 }
 0x7b1   : > { %v8233_v46 = vpop.f32.mrb[4].mxu1 }
 0x7b2   : > { %v1679_v47 = vmul.f32 %v9214_v45, %v8233_v46  ;;  %v1667_v50 = vpop.f32.mrb[5].mxu1  ;;  %v8953_v45 = vld [vmem:[%s9494_s30 + $0x8] sm:$0xff]  }
 0x7b3   : > { %v1678_v52 = vmul.f32 %v9216_v60, %v1667_v50  ;;  %v8954_v46 = vld [vmem:[%s9504_s12 + $0x40] ss:$8 sps:$4 sm:$0xff]   ;;  %8285 = vmatpush3.bf16.msra.mxu0 %v8953_v45  ;;  %v8960_v60 = vld [vmem:[%s9504_s12 + $0x54] ss:$8 sps:$4 sm:$0xff]   ;;  %v8958_v50 = vld [vmem:[%s9504_s12 + $0x50] ss:$8 sps:$4 sm:$0xff]  }
 0x7b4   : > { %1684 = vrot.lane.b32.xlu1 %v1679_v47, %s10598_s18  ;;  %8286 = vmatprep.subr.bf16.mxu0 %v9419_v5  ;;  %v8957_v47 = vld [vmem:[%s9494_s30 + $0x10] sm:$0xff]  }
 0x7b5   : > { %1682 = vrot.lane.b32.xlu0 %v1678_v52, %s10598_s18  ;;  %v8961_v52 = vld [vmem:[%s9494_s30 + $0x18] sm:$0xff]  }
 0x7b6   : > { %v8261_v61 = vpop.f32.mrb[6].mxu1 }
 0x7b7   : > { %v2089_v0 = vpop.f32.mrb[7].mxu1  ;;  %v2101_v10 = vmul.f32 %v9224_v7, %v8261_v61  ;;  %8287 = vmatpush3.bf16.msra.mxu0 %v8957_v47  ;;  %v9865_v61 = vld [vmem:[%s947_s22] sm:$0xff]   ;;  %s10625_s22 = sld [smem:[#allocation12_spill]] }
 0x7b8   : > { %v2100_v4 = vmul.f32 %v9222_v63, %v2089_v0  ;;  %1893 = vrot.lane.b32.xlu1 %v1889_v62, %s10600_s15  ;;  %8288 = vmatprep.subr.bf16.mxu0 %v9419_v5  ;;  %v8965_v62 = vld [vmem:[%s9494_s30 + $0x20] sm:$0xff]   ;;  %v8966_v63 = vld [vmem:[%s9504_s12 + $0x70] ss:$8 sps:$4 sm:$0xff]   ;;  %v8969_v0 = vld [vmem:[%s9494_s30 + $0x28] sm:$0xff]  }
 0x7ba   : > { %2104 = vrot.lane.b32.xlu0 %v2100_v4, %s9424_s16  ;;  %v8971_v4 = vld [vmem:[%s9494_s30 + $0x38] sm:$0xff]  }
 0x7bb   : > { %8289 = vmatpush3.bf16.msra.mxu0 %v8961_v52 }
 0x7bc   : > { %1895 = vrot.lane.b32.xlu1 %v1890_v6, %s10600_s15  ;;  %8290 = vmatprep.subr.bf16.mxu0 %v9419_v5 }
 0x7bf   : > { %8291 = vmatpush3.bf16.msra.mxu0 %v8965_v62 }
 0x7c0   : > { %2106 = vrot.lane.b32.xlu1 %v2101_v10, %s9424_s16  ;;  %8292 = vmatprep.subr.bf16.mxu0 %v9419_v5 }
 0x7c3   : > { %8293 = vmatpush3.bf16.msra.mxu0 %v8969_v0 }
 0x7c4   : > { %8294 = vmatprep.subr.bf16.mxu0 %v9419_v5 }
 0x7c7   : > { %8295 = vmatpush3.bf16.msra.mxu0 %v8970_v3 }
 0x7c8   : > { %8296 = vmatprep.subr.bf16.mxu0 %v9419_v5 }
 0x7cb   : > { %8297 = vmatpush3.bf16.msra.mxu0 %v8971_v4 }
 0x826   : > { %v1685_v43 = vpop.permute.xlu1 %1684 }
 0x827   : > { %1690 = vst.msk [vmem:[#allocation2 + $0x8] sm:$0xff] %vm1688_vm6, %v1685_v43  ;;  %v1683_v11 = vpop.permute.xlu0 %1682 }
 0x828   : > { %1689 = vst.msk [vmem:[#allocation2] sm:$0xff] %vm1688_vm6, %v1683_v11 }
 0x82a   : > { %v1894_v18 = vpop.permute.xlu1 %1893 }
 0x82b   : > { %1900 = vst.msk [vmem:[#allocation2] sm:$0xff] %vm1899_vm7, %v1894_v18 }
 0x82c   : > { %v2105_v42 = vpop.permute.xlu0 %2104 }
 0x82d   : > { %2111 = vst.msk [vmem:[#allocation2] sm:$0xff] %vm2110_vm8, %v2105_v42 }
 0x82e   : > { %v1896_v12 = vpop.permute.xlu1 %1895 }
 0x82f   : > { %1901 = vst.msk [vmem:[#allocation2 + $0x8] sm:$0xff] %vm1899_vm7, %v1896_v12 }
 0x832   : > { %v2107_v8 = vpop.permute.xlu1 %2106 }
 0x833   : > { %2112 = vst.msk [vmem:[#allocation2 + $0x8] sm:$0xff] %vm2110_vm8, %v2107_v8  ;;  %v7489_v8 = vld [vmem:[%s9484_s19] ss:$0 sm:$0xff] }
 0x834   : > { %v2113_v13 = vld [vmem:[#allocation2] sm:$0xff] }
 0x83a   : > { %v2114_v14 = vld [vmem:[#allocation2 + $0x8] sm:$0xff] }
 0x83b   : > { %v2132_v15 = vpack.c.bf16 %v2114_v14, %v2113_v13 }
 0x83d   : > { %8279 = vmatmul.mubr.bf16.vlgmr.msra.gmra.mrb[8].mxu1 %v2132_v15 }
 0x83e   : > { %2529 = vmatprep.mubr.bf16.mxu1 %v9420_v31  ;;  %2498 = vmatpush1.bf16.msra.mxu1 %v8940_v49 }
 0x83f   : > { %2499 = vmatprep.subr.bf16.mxu1 %v8945_v30 }
 0x910   : > { %v2221_v19 = vpop.f32.mrb[8].mxu1 }
 0x911   : > { %v2222_v20 = vadd.f32 %v7480_v17, %v2221_v19  ;;  %v8280_v9 = vpop.f32.mrb[9].mxu1 }
 0x912   : > { %v2224_v21 = vpop.f32.mrb[10].mxu1 }
 0x913   : > { %v9831_v22 = vadd.f32 %v9595_v1, %v2222_v20  ;;  %v2225_v23 = vadd.f32 %v7480_v17, %v2224_v21  ;;  %v8281_v25 = vpop.f32.mrb[11].mxu1  ;;  %v8943_v1 = vld [vmem:[%s9504_s12 + $0x10] ss:$8 sps:$4 sm:$0xff]   ;;  %v7490_v17 = vld [vmem:[%s9489_s24] ss:$0 sm:$0xff] }
 0x914   : > { %2500 = vmatpush1.bf16.msra.mxu1 %v8943_v1 }
 0x915   : > { %v9834_v28 = vadd.f32 %v9598_v2, %v2225_v23  ;;  %2232 = vadd.xlane.f32.xlu0 %v9831_v22  ;;  %v8946_v2 = vld [vmem:[%s9504_s12 + $0x20] ss:$8 sps:$4 sm:$0xff]   ;;  %2501 = vmatprep.subr.bf16.mxu1 %v8948_v33 }
 0x916   : > { %v2399_v23 = vld [vmem:[%s9509_s20] sm:$0x3] }
 0x917   : > { %2234 = vadd.xlane.f32.xlu1 %v9834_v28  ;;  %v2404_v25 = vrot.slane %v2399_v23, %v9655_v56  ;;  %v2408_v49 = vrot.slane %v2399_v23, %v9662_v59 }
 0x918   : > { %2502 = vmatpush1.bf16.msra.mxu1 %v8946_v2 }
 0x919   : > { %2503 = vmatprep.subr.bf16.mxu1 %v8952_v34 }
 0x91c   : > { %2504 = vmatpush1.bf16.msra.mxu1 %v8950_v48 }
 0x91d   : > { %2505 = vmatprep.subr.bf16.mxu1 %v8956_v57 }
 0x920   : > { %2506 = vmatpush1.bf16.msra.mxu1 %v8954_v46 }
 0x921   : > { %2507 = vmatprep.subr.bf16.mxu1 %v8960_v60 }
 0x924   : > { %2508 = vmatpush1.bf16.msra.mxu1 %v8958_v50  ;;  %v9896_v50 = vld [vmem:[%s9893_s26] ss:$0 sm:$0xff] }
 0x925   : > { %2509 = vmatprep.subr.bf16.mxu1 %v8964_v51 }
 0x928   : > { %2510 = vmatpush1.bf16.msra.mxu1 %v8962_v53 }
 0x929   : > { %2511 = vmatprep.subr.bf16.mxu1 %v8968_v54 }
 0x92c   : > { %2512 = vmatpush1.bf16.msra.mxu1 %v8966_v63 }
 0x92f   : > { %2530 = vmatmul.mubr.bf16.vlgmr.msra.gmra.mrb[12].mxu1 %v9865_v61 }
 0x9a2   : > { %v2233_v35 = vpop.xlane.xlu0 %2232 }
 0x9a3   : > { %v2236_v36 = vmul.f32 0.0078125, %v2233_v35 }
 0x9a4   : > { %v2235_v37 = vpop.xlane.xlu1 %2234 }
 0x9a5   : > { %v2237_v38 = vmul.f32 0.0078125, %v2235_v37  ;;  %v2238_v39 = vsub.f32 %v9831_v22, %v2236_v36 }
 0x9a7   : > { %v2240_v40 = vmul.f32 %v2238_v39, %v2238_v39  ;;  %v2239_v41 = vsub.f32 %v9834_v28, %v2237_v38 }
 0x9a9   : > { %2242 = vadd.xlane.f32.xlu0 %v2240_v40  ;;  %v2241_v44 = vmul.f32 %v2239_v41, %v2239_v41 }
 0x9ad   : > { %2244 = vadd.xlane.f32.xlu0 %v2241_v44 }
 0xa02   : > { %v2531_v29 = vpop.f32.mrb[12].mxu1 }
 0xa03   : > { %v2532_v30 = vadd.f32 %v2531_v29, %v2404_v25  ;;  %v2533_v32 = vpop.f32.mrb[13].mxu1 }
 0xa04   : > { %v2535_v1 = vpop.f32.mrb[14].mxu1  ;;  %v2534_v33 = vadd.f32 %v2533_v32, %v2408_v49 }
 0xa05   : > { %v2536_v2 = vadd.f32 %v2535_v1, %v2404_v25  ;;  %v2537_v34 = vpop.f32.mrb[15].mxu1 }
 0xa06   : > { %v2538_v48 = vadd.f32 %v2537_v34, %v2408_v49 }
 0xa07   : > { %v8610_v35 = vpack.c.bf16 %v2536_v2, %v2532_v30  ;;  %v8808_v37 = vpack.i.bf16 %v2536_v2, %v2532_v30 }
 0xa08   : > { %v8616_v36 = vpack.c.bf16 %v2538_v48, %v2534_v33  ;;  %v9886_v38 = vpack.i.bf16 %v2538_v48, %v2534_v33 }
 0xa09   : > { %8612 = vmatprep.subr.msk.bf16.mxu0 %vm9673_vm2, %v8610_v35 }
 0xa36   : > { %v2243_v6 = vpop.xlane.xlu0 %2242 }
 0xa37   : > { %v2246_v7 = vmul.f32 0.0078125, %v2243_v6 }
 0xa39   : > { %v2248_v10 = vadd.f32 1e-05, %v2246_v7 }
 0xa3a   : > { %v2245_v43 = vpop.xlane.xlu0 %2244 }
 0xa3b   : > { %9225 = vrsqrt.f32 %v2248_v10  ;;  %v2247_v11 = vmul.f32 0.0078125, %v2245_v43 }
 0xa3d   : > { %v2249_v18 = vadd.f32 1e-05, %v2247_v11 }
 0xa3f   : > { %9227 = vrsqrt.f32 %v2249_v18 }
 0xa45   : > { %v9226_v42 = vpop.eup %9225 }
 0xa46   : > { %v2252_v12 = vmul.f32 %v9226_v42, %v2238_v39  ;;  %v7491_v39 = vld [vmem:[%s9499_s6] ss:$0 sm:$0xff] }
 0xa48   : > { %v2260_v15 = vmul.f32 %v7489_v8, %v2252_v12 }
 0xa49   : > { %v9228_v13 = vpop.eup %9227 }
 0xa4a   : > { %v2253_v14 = vmul.f32 %v9228_v13, %v2239_v41  ;;  %v2268_v20 = vadd.f32 %v7490_v17, %v2260_v15 }
 0xa4c   : > { %v2261_v19 = vmul.f32 %v7489_v8, %v2253_v14 }
 0xa4e   : > { %v2269_v9 = vadd.f32 %v7490_v17, %v2261_v19 }
 0xa50   : > { %v2287_v21 = vpack.c.bf16 %v2269_v9, %v2268_v20 }
 0xa52   : > { %8299 = vmatmul.mubr.bf16.vlgmr.msra.gmra.mrb[16].mxu0 %v2287_v21 }
 0xa53   : > { %8615 = vmatpush3.bf16.xpose.msk.msra.mxu0 %vm9673_vm2, %v8610_v35 }
 0xa54   : > { %8617 = vmatprep.subr.bf16.mxu0 %v8616_v36 }
 0xb25   : > { %v2376_v40 = vpop.f32.mrb[16].mxu0 }
 0xb26   : > { %v2377_v41 = vadd.f32 %v7491_v39, %v2376_v40  ;;  %v8300_v44 = vpop.f32.mrb[17].mxu0 }
 0xb27   : > { %v2379_v57 = vpop.f32.mrb[18].mxu0 }
 0xb28   : > { %v2540_v45 = vmul.f32 0.17677669, %v2377_v41  ;;  %v2380_v46 = vadd.f32 %v7491_v39, %v2379_v57  ;;  %v8301_v60 = vpop.f32.mrb[19].mxu0 }
 0xb2a   : > { %v2541_v47 = vmul.f32 0.17677669, %v2380_v46  ;;  %8306 = vmatprep.mubr.msk.f32.mxu0 %vm1284_vm1, %v2540_v45 }
 0xb2c   : > { %8307 = vmatmul.mubr.msk.f32.vlgmr.msra.gmra.mrb[20].mxu0 %vm1284_vm1, %v2541_v47 }
 0xb2d   : > { %8619 = vmatpush3.bf16.msra.mxu0 %v8616_v36 }
 0xbff   : > { %v8308_v51 = vpop.f32.mrb[20].mxu0 }
 0xc00   : > { %v2632_v52 = vadd.f32 %v8308_v51, %v9896_v50  ;;  %v2626_v53 = vpop.f32.mrb[21].mxu0 }
 0xc01   : > { %v2627_v54 = vadd.f32 %v9896_v50, %v2626_v53 }
 0xc02   : > { %v2638_v62 = vsel %vm1372_vm5, %v2632_v52, -inf }
 0xc03   : > { %2639 = vmax.xlane.f32.xlu1 %v2638_v62  ;;  %v2635_v63 = vsel %vm1372_vm5, %v2627_v54, -inf }
 0xc04   : > { %2636 = vmax.xlane.f32.xlu0 %v2635_v63 }
 0xc14   : > { %2740 = vrot.lane.b32.xlu1 %v2540_v45, %s9424_s16 }
 0xc18   : > { %2742 = vrot.lane.b32.xlu1 %v2541_v47, %s9424_s16 }
 0xc1a   : > { %8809 = vrot.lane.b32.xlu0 %v8808_v37, %s9424_s16 }
 0xc1c   : > { %8819 = vrot.lane.b32.xlu1 %v8808_v37, %s10600_s15 }
 0xc90   : > { %v2640_v0 = vpop.xlane.xlu1 %2639 }
 0xc91   : > { %v2642_v3 = vsub.f32 %v2632_v52, %v2640_v0  ;;  %v2637_v4 = vpop.xlane.xlu0 %2636 }
 0xc92   : > { %v2641_v6 = vsub.f32 %v2627_v54, %v2637_v4 }
 0xc93   : > { %v2645_v7 = vmul.f32 1.442695, %v2642_v3 }
 0xc94   : > { %v2643_v10 = vmul.f32 1.442695, %v2641_v6  ;;  %v2741_v13 = vpop.permute.xlu1 %2740 }
 0xc95   : > { %v8810_v43 = vpop.permute.xlu0 %8809 }
 0xc96   : > { %9229 = vpow2.f32 %v2643_v10  ;;  %v8812_v11 = vunpack.i.h.bf16 %v8810_v43  ;;  %v8811_v18 = vunpack.i.l.bf16 %v8810_v43 }
 0xc97   : > { %9231 = vpow2.f32 %v2645_v7 }
 0xc98   : > { %v8620_v42 = vpack.c.bf16 %v8812_v11, %v8811_v18  ;;  %v2743_v14 = vpop.permute.xlu1 %2742 }
 0xc9a   : > { %8622 = vmatprep.subr.msk.bf16.mxu0 %vm9673_vm2, %v8620_v42 }
 0xc9c   : > { %v8820_v49 = vpop.permute.xlu1 %8819 }
 0xc9d   : > { %v8822_v48 = vunpack.i.h.bf16 %v8820_v49  ;;  %v8821_v35 = vunpack.i.l.bf16 %v8820_v49 }
 0xc9f   : > { %v8630_v46 = vpack.c.bf16 %v8822_v48, %v8821_v35 }
 0xca0   : > { %v9908_v12 = vpop.eup %9229 }
 0xca1   : > { %v9910_v8 = vpop.eup %9231  ;;  %8313 = vmatprep.mubr.msk.f32.mxu0 %vm1372_vm5, %v9908_v12 }
 0xca2   : > { %8314 = vmatmul.mubr.msk.f32.vlgmr.msra.gmra.mrb[22].mxu0 %vm1372_vm5, %v9910_v8 }
 0xca3   : > { %8625 = vmatpush3.bf16.xpose.msk.msra.mxu0 %vm9673_vm2, %v8620_v42  ;;  %8320 = vmatprep.mubr.msk.f32.mxu0 %vm1284_vm1, %v2741_v13 }
 0xcaa   : > { %8321 = vmatmul.mubr.msk.f32.vlgmr.msra.gmra.mrb[24].mxu0 %vm1284_vm1, %v2743_v14 }
 0xd75   : > { %v9920_v15 = vpop.f32.mrb[22].mxu0 }
 0xd76   : > { %v9922_v17 = vpop.f32.mrb[23].mxu0 }
 0xd7d   : > { %v8322_v19 = vpop.f32.mrb[24].mxu0 }
 0xd7e   : > { %v2828_v20 = vadd.f32 %v8322_v19, %v9896_v50  ;;  %v2822_v9 = vpop.f32.mrb[25].mxu0 }
 0xd7f   : > { %v2823_v21 = vadd.f32 %v9896_v50, %v2822_v9 }
 0xd80   : > { %v2834_v23 = vsel %vm1372_vm5, %v2828_v20, -inf }
 0xd81   : > { %2835 = vmax.xlane.f32.xlu0 %v2834_v23  ;;  %v2831_v25 = vsel %vm1372_vm5, %v2823_v21, -inf }
 0xd82   : > { %2832 = vmax.xlane.f32.xlu1 %v2831_v25 }
 0xd93   : > { %8824 = vrot.lane.b32.xlu1 %v8808_v37, %s10598_s18 }
 0xd97   : > { %8814 = vrot.lane.b32.xlu0 %v9886_v38, %s9424_s16  ;;  %2954 = vrot.lane.b32.xlu1 %v2541_v47, %s10600_s15 }
 0xd9b   : > { %2952 = vrot.lane.b32.xlu0 %v2540_v45, %s10600_s15  ;;  %3164 = vrot.lane.b32.xlu1 %v2541_v47, %s10598_s18 }
 0xd9f   : > { %3162 = vrot.lane.b32.xlu0 %v2540_v45, %s10598_s18 }
 0xe0e   : > { %v2836_v29 = vpop.xlane.xlu0 %2835 }
 0xe0f   : > { %v2838_v30 = vsub.f32 %v2828_v20, %v2836_v29  ;;  %v2833_v32 = vpop.xlane.xlu1 %2832 }
 0xe10   : > { %v2837_v1 = vsub.f32 %v2823_v21, %v2833_v32 }
 0xe11   : > { %v2841_v33 = vmul.f32 1.442695, %v2838_v30 }
 0xe12   : > { %v2839_v2 = vmul.f32 1.442695, %v2837_v1  ;;  %v8815_v34 = vpop.permute.xlu0 %8814 }
 0xe13   : > { %v8817_v36 = vunpack.i.h.bf16 %v8815_v34  ;;  %v8816_v37 = vunpack.i.l.bf16 %v8815_v34  ;;  %v8825_v39 = vpop.permute.xlu1 %8824 }
 0xe14   : > { %9233 = vpow2.f32 %v2839_v2  ;;  %v8827_v40 = vunpack.i.h.bf16 %v8825_v39  ;;  %v8826_v41 = vunpack.i.l.bf16 %v8825_v39 }
 0xe15   : > { %9235 = vpow2.f32 %v2841_v33  ;;  %v8626_v44 = vpack.c.bf16 %v8817_v36, %v8816_v37 }
 0xe16   : > { %v8640_v57 = vpack.c.bf16 %v8827_v40, %v8826_v41  ;;  %v2953_v45 = vpop.permute.xlu0 %2952 }
 0xe17   : > { %8627 = vmatprep.subr.bf16.mxu0 %v8626_v44  ;;  %v2955_v60 = vpop.permute.xlu1 %2954 }
 0xe18   : > { %8629 = vmatpush3.bf16.msra.mxu0 %v8626_v44  ;;  %8642 = vmatprep.subr.msk.bf16.mxu1 %vm9673_vm2, %v8640_v57 }
 0xe19   : > { %8632 = vmatprep.subr.msk.bf16.mxu0 %vm9673_vm2, %v8630_v46  ;;  %8645 = vmatpush3.bf16.xpose.msk.msra.mxu1 %vm9673_vm2, %v8640_v57 }
 0xe1a   : > { %v3163_v47 = vpop.permute.xlu0 %3162  ;;  %8358 = vmatprep.subr.bf16.mxu1 %v9419_v5 }
 0xe1b   : > { %8348 = vmatprep.mubr.msk.f32.mxu1 %vm1284_vm1, %v3163_v47  ;;  %v3165_v53 = vpop.permute.xlu1 %3164 }
 0xe1e   : > { %v9234_v51 = vpop.eup %9233 }
 0xe1f   : > { %v9236_v52 = vpop.eup %9235  ;;  %8327 = vmatprep.mubr.msk.f32.mxu0 %vm1372_vm5, %v9234_v51  ;;  %v2843_v14 = vsel %vm1372_vm5, %v9234_v51, 0.0  ;;  %v2650_v51 = vsel %vm1372_vm5, %v9910_v8, 0.0  ;;  %v8972_v8 = vld [vmem:[%s10620_s28] sm:$0xff]  }
 0xe20   : > { %8328 = vmatmul.mubr.msk.f32.vlgmr.msra.gmra.mrb[26].mxu0 %vm1372_vm5, %v9236_v52  ;;  %8349 = vmatmul.mubr.msk.f32.vlgmr.msra.gmra.mrb[16].mxu1 %vm1284_vm1, %v3165_v53  ;;  %v2846_v19 = vsel %vm1372_vm5, %v9236_v52, 0.0  ;;  %v2647_v52 = vsel %vm1372_vm5, %v9908_v12, 0.0  ;;  %v8973_v12 = vld [vmem:[%s10620_s28 + $0x8] sm:$0xff]  }
 0xe21   : > { %8635 = vmatpush3.bf16.xpose.msk.msra.mxu0 %vm9673_vm2, %v8630_v46  ;;  %8334 = vmatprep.mubr.msk.f32.mxu0 %vm1284_vm1, %v2953_v45 }
 0xe22   : > { %8374 = vmatprep.mubr.msk.bf16.mxu1 %vm9421_vm0, %v9419_v5  ;;  %8359 = vmatpush3.bf16.msra.mxu1 %v8972_v8  ;;  %v8983_v8 = vld [vmem:[%s10622_s2 + $0x10] ss:$8 sps:$4 sm:$0xff]  }
 0xe23   : > { %8360 = vmatprep.subr.bf16.mxu1 %v9419_v5 }
 0xe26   : > { %8361 = vmatpush3.bf16.msra.mxu1 %v8973_v12 }
 0xe27   : > { %8362 = vmatprep.subr.bf16.mxu1 %v9419_v5 }
 0xe28   : > { %8335 = vmatmul.mubr.msk.f32.vlgmr.msra.gmra.mrb[28].mxu0 %vm1284_vm1, %v2955_v60 }
 0xef3   : > { %v9952_v54 = vpop.f32.mrb[26].mxu0  ;;  %v8350_v62 = vpop.f32.mrb[16].mxu1 }
 0xef4   : > { %v9954_v63 = vpop.f32.mrb[27].mxu0  ;;  %v3244_v0 = vpop.f32.mrb[17].mxu1  ;;  %v3250_v4 = vadd.f32 %v8350_v62, %v9896_v50 }
 0xef5   : > { %v3245_v3 = vadd.f32 %v9896_v50, %v3244_v0 }
 0xef6   : > { %v3256_v10 = vsel %vm1372_vm5, %v3250_v4, -inf }
 0xef7   : > { %v3253_v6 = vsel %vm1372_vm5, %v3245_v3, -inf }
 0xef8   : > { %3254 = vmax.xlane.f32.xlu0 %v3253_v6 }
 0xefb   : > { %v8336_v7 = vpop.f32.mrb[28].mxu0 }
 0xefc   : > { %v3040_v43 = vadd.f32 %v8336_v7, %v9896_v50  ;;  %v3034_v11 = vpop.f32.mrb[29].mxu0  ;;  %3257 = vmax.xlane.f32.xlu0 %v3256_v10  ;;  %v8974_v7 = vld [vmem:[%s10620_s28 + $0x10] sm:$0xff]   ;;  %v8975_v10 = vld [vmem:[%s10620_s28 + $0x18] sm:$0xff]  }
 0xefd   : > { %v3035_v18 = vadd.f32 %v9896_v50, %v3034_v11  ;;  %8363 = vmatpush3.bf16.msra.mxu1 %v8974_v7 }
 0xefe   : > { %v3046_v42 = vsel %vm1372_vm5, %v3040_v43, -inf  ;;  %8364 = vmatprep.subr.bf16.mxu1 %v9419_v5 }
 0xeff   : > { %3047 = vmax.xlane.f32.xlu1 %v3046_v42  ;;  %v3043_v13 = vsel %vm1372_vm5, %v3035_v18, -inf }
 0xf00   : > { %3044 = vmax.xlane.f32.xlu0 %v3043_v13 }
 0xf01   : > { %8365 = vmatpush3.bf16.msra.mxu1 %v8975_v10 }
 0xf02   : > { %8366 = vmatprep.subr.bf16.mxu1 %v9419_v5 }
 0xf10   : > { %8834 = vrot.lane.b32.xlu1 %v9886_v38, %s10598_s18 }
 0xf16   : > { %8829 = vrot.lane.b32.xlu0 %v9886_v38, %s10600_s15 }
 0xf34   : > { %2844 = vadd.xlane.f32.xlu1 %v2843_v14 }
 0xf35   : > { %2847 = vadd.xlane.f32.xlu0 %v2846_v19 }
 0xf85   : > { %v3255_v20 = vpop.xlane.xlu0 %3254 }
 0xf86   : > { %v3259_v21 = vsub.f32 %v3245_v3, %v3255_v20 }
 0xf88   : > { %v3261_v1 = vmul.f32 1.442695, %v3259_v21  ;;  %v8976_v21 = vld [vmem:[%s10620_s28 + $0x20] sm:$0xff]  }
 0xf89   : > { %v3258_v50 = vpop.xlane.xlu0 %3257  ;;  %8367 = vmatpush3.bf16.msra.mxu1 %v8976_v21  ;;  %v8998_v21 = vld [vmem:[%s10622_s2 + $0x60] ss:$8 sps:$4 sm:$0xff]  }
 0xf8a   : > { %v3260_v9 = vsub.f32 %v3250_v4, %v3258_v50  ;;  %8368 = vmatprep.subr.bf16.mxu1 %v9419_v5 }
 0xf8c   : > { %v3048_v23 = vpop.xlane.xlu1 %3047  ;;  %v3263_v30 = vmul.f32 1.442695, %v3260_v9 }
 0xf8d   : > { %v3050_v25 = vsub.f32 %v3040_v43, %v3048_v23  ;;  %v3045_v49 = vpop.xlane.xlu0 %3044 }
 0xf8e   : > { %v3049_v29 = vsub.f32 %v3035_v18, %v3045_v49 }
 0xf8f   : > { %v3053_v32 = vmul.f32 1.442695, %v3050_v25 }
 0xf90   : > { %v3051_v33 = vmul.f32 1.442695, %v3049_v29  ;;  %v8835_v2 = vpop.permute.xlu1 %8834 }
 0xf91   : > { %9237 = vpow2.f32 %v3053_v32  ;;  %v8837_v38 = vunpack.i.h.bf16 %v8835_v2  ;;  %v8830_v34 = vpop.permute.xlu0 %8829  ;;  %v8836_v48 = vunpack.i.l.bf16 %v8835_v2 }
 0xf92   : > { %9239 = vpow2.f32 %v3051_v33  ;;  %v8832_v35 = vunpack.i.h.bf16 %v8830_v34  ;;  %v8831_v36 = vunpack.i.l.bf16 %v8830_v34 }
 0xf93   : > { %9241 = vpow2.f32 %v3263_v30  ;;  %v8646_v39 = vpack.c.bf16 %v8837_v38, %v8836_v48  ;;  %v8979_v30 = vld [vmem:[%s10620_s28 + $0x38] sm:$0xff]  }
 0xf94   : > { %9243 = vpow2.f32 %v3261_v1  ;;  %v8636_v37 = vpack.c.bf16 %v8832_v35, %v8831_v36 }
 0xf96   : > { %8637 = vmatprep.subr.bf16.mxu0 %v8636_v37 }
 0xf97   : > { %8639 = vmatpush3.bf16.msra.mxu0 %v8636_v37 }
 0xf98   : > { %8647 = vmatprep.subr.bf16.mxu0 %v8646_v39 }
 0xf9b   : > { %v9238_v40 = vpop.eup %9237 }
 0xf9c   : > { %v9240_v41 = vpop.eup %9239  ;;  %v3058_v44 = vsel %vm1372_vm5, %v9238_v40, 0.0 }
 0xf9d   : > { %v9242_v57 = vpop.eup %9241  ;;  %3059 = vadd.xlane.f32.xlu1 %v3058_v44  ;;  %8341 = vmatprep.mubr.msk.f32.mxu0 %vm1372_vm5, %v9240_v41  ;;  %v3055_v45 = vsel %vm1372_vm5, %v9240_v41, 0.0 }
 0xf9e   : > { %v9244_v46 = vpop.eup %9243  ;;  %3056 = vadd.xlane.f32.xlu0 %v3055_v45  ;;  %8342 = vmatmul.mubr.msk.f32.vlgmr.msra.gmra.mrb[30].mxu0 %vm1372_vm5, %v9238_v40  ;;  %v3268_v60 = vsel %vm1372_vm5, %v9242_v57, 0.0  ;;  %v7542_v45 = vld [vmem:[%s10621_s1] ss:$0 sm:$0xff] }
 0xf9f   : > { %8649 = vmatpush3.bf16.msra.mxu0 %v8646_v39  ;;  %8355 = vmatprep.mubr.msk.f32.mxu0 %vm1372_vm5, %v9244_v46  ;;  %v3265_v47 = vsel %vm1372_vm5, %v9244_v46, 0.0 }
 0xfa1   : > { %3269 = vadd.xlane.f32.xlu1 %v3268_v60 }
 0xfa2   : > { %3266 = vadd.xlane.f32.xlu0 %v3265_v47  ;;  %8356 = vmatmul.mubr.msk.f32.vlgmr.msra.gmra.mrb[32].mxu0 %vm1372_vm5, %v9242_v57 }
 0xfa3   : > { %3703 = vmatprep.mubr.bf16.mxu0 %v9420_v31 }
 0xfa5   : > { %2651 = vadd.xlane.f32.xlu1 %v2650_v51 }
 0xfa6   : > { %2648 = vadd.xlane.f32.xlu0 %v2647_v52 }
 0xfc1   : > { %v2845_v53 = vpop.xlane.xlu1 %2844 }
 0xfc2   : > { %9245 = vrcp.f32 %v2845_v53  ;;  %v2848_v62 = vpop.xlane.xlu0 %2847 }
 0xfc3   : > { %9247 = vrcp.f32 %v2848_v62 }
 0xfcc   : > { %v9246_v0 = vpop.eup %9245 }
 0xfcd   : > { %v9248_v3 = vpop.eup %9247  ;;  %v2940_v4 = vmul.f32 %v9246_v0, %v9954_v63 }
 0xfce   : > { %v2941_v6 = vmul.f32 %v9248_v3, %v9952_v54  ;;  %v8980_v3 = vld [vmem:[%s10622_s2] ss:$8 sps:$4 sm:$0xff]  }
 0xfcf   : > { %2944 = vrot.lane.b32.xlu0 %v2940_v4, %s10598_s18  ;;  %v8982_v4 = vld [vmem:[%s10622_s2 + $0x4] ss:$8 sps:$4 sm:$0xff]  }
 0xfd0   : > { %2946 = vrot.lane.b32.xlu1 %v2941_v6, %s10598_s18  ;;  %v8985_v6 = vld [vmem:[%s10622_s2 + $0x14] ss:$8 sps:$4 sm:$0xff]   ;;  %3671 = vmatprep.subr.bf16.mxu0 %v8982_v4  ;;  %v9015_v4 = vld [vmem:[%s10625_s22 + $0x28] sm:$0xff]   ;;  %s10627_s18 = sld [smem:[#allocation13_spill]] }
 0xfd1   : > { %3672 = vmatpush1.bf16.msra.mxu0 %v8980_v3  ;;  %v9014_v3 = vld [vmem:[%s10625_s22 + $0x68] sm:$0xff]  }
 0xfd2   : > { %3673 = vmatprep.subr.bf16.mxu0 %v8985_v6  ;;  %v9016_v6 = vld [vmem:[%s10625_s22 + $0x70] sm:$0xff]  }
 0xfd5   : > { %3674 = vmatpush1.bf16.msra.mxu0 %v8983_v8  ;;  %v9017_v8 = vld [vmem:[%s10625_s22 + $0x30] sm:$0xff]  }
0x102a   : > { %v3060_v54 = vpop.xlane.xlu1 %3059 }
0x102b   : > { %v3057_v63 = vpop.xlane.xlu0 %3056 }
0x102e   : > { %v3270_v43 = vpop.xlane.xlu1 %3269 }
0x102f   : > { %v3267_v11 = vpop.xlane.xlu0 %3266 }
0x1032   : > { %v2652_v18 = vpop.xlane.xlu1 %2651 }
0x1033   : > { %9249 = vrcp.f32 %v2652_v18  ;;  %v2649_v42 = vpop.xlane.xlu0 %2648  ;;  %v8986_v18 = vld [vmem:[%s10622_s2 + $0x20] ss:$8 sps:$4 sm:$0xff]  }
0x1034   : > { %9251 = vrcp.f32 %v2649_v42  ;;  %v8991_v42 = vld [vmem:[%s10622_s2 + $0x34] ss:$8 sps:$4 sm:$0xff]  }
0x1035   : > { %9253 = vrcp.f32 %v3060_v54 }
0x1036   : > { %9255 = vrcp.f32 %v3057_v63 }
0x1037   : > { %9257 = vrcp.f32 %v3267_v11  ;;  %v8988_v11 = vld [vmem:[%s10622_s2 + $0x24] ss:$8 sps:$4 sm:$0xff]  }
0x1038   : > { %9259 = vrcp.f32 %v3270_v43  ;;  %3675 = vmatprep.subr.bf16.mxu0 %v8988_v11 }
0x1039   : > { %3676 = vmatpush1.bf16.msra.mxu0 %v8986_v18 }
0x103a   : > { %3677 = vmatprep.subr.bf16.mxu0 %v8991_v42 }
0x103d   : > { %v9250_v13 = vpop.eup %9249 }
0x103e   : > { %v9252_v14 = vpop.eup %9251  ;;  %v2737_v19 = vmul.f32 %v9250_v13, %v9920_v15  ;;  %v8977_v15 = vld [vmem:[%s10620_s28 + $0x28] sm:$0xff]   ;;  %v8989_v13 = vld [vmem:[%s10622_s2 + $0x30] ss:$8 sps:$4 sm:$0xff]  }
0x103f   : > { %v2736_v20 = vmul.f32 %v9252_v14, %v9922_v17  ;;  %8369 = vmatpush3.bf16.msra.mxu1 %v8977_v15  ;;  %v8978_v17 = vld [vmem:[%s10620_s28 + $0x30] sm:$0xff]   ;;  %v9254_v23 = vpop.eup %9253  ;;  %3678 = vmatpush1.bf16.msra.mxu0 %v8989_v13  ;;  %v8994_v14 = vld [vmem:[%s10622_s2 + $0x44] ss:$8 sps:$4 sm:$0xff]  }
0x1040   : > { %2739 = vst.msk [vmem:[#allocation2 + $0x8] sm:$0xff] %vm1284_vm1, %v2737_v19  ;;  %8370 = vmatprep.subr.bf16.mxu1 %v9419_v5  ;;  %v9256_v32 = vpop.eup %9255  ;;  %v8992_v19 = vld [vmem:[%s10622_s2 + $0x40] ss:$8 sps:$4 sm:$0xff]   ;;  %3679 = vmatprep.subr.bf16.mxu0 %v8994_v14  ;;  %v9003_v15 = vld [vmem:[%s10622_s2 + $0x74] ss:$8 sps:$4 sm:$0xff]  }
0x1041   : > { %2738 = vst.msk [vmem:[#allocation2] sm:$0xff] %vm1284_vm1, %v2736_v20  ;;  %v2945_v50 = vpop.permute.xlu0 %2944  ;;  %v9258_v33 = vpop.eup %9257  ;;  %v8997_v20 = vld [vmem:[%s10622_s2 + $0x54] ss:$8 sps:$4 sm:$0xff]  }
0x1042   : > { %2950 = vst.msk [vmem:[#allocation2] sm:$0xff] %vm1688_vm6, %v2945_v50  ;;  %v2947_v9 = vpop.permute.xlu1 %2946  ;;  %v9260_v48 = vpop.eup %9259  ;;  %v8995_v50 = vld [vmem:[%s10622_s2 + $0x50] ss:$8 sps:$4 sm:$0xff]  }
0x1043   : > { %2951 = vst.msk [vmem:[#allocation2 + $0x8] sm:$0xff] %vm1688_vm6, %v2947_v9  ;;  %8371 = vmatpush3.bf16.msra.mxu1 %v8978_v17  ;;  %3680 = vmatpush1.bf16.msra.mxu0 %v8992_v19  ;;  %v9000_v9 = vld [vmem:[%s10622_s2 + $0x64] ss:$8 sps:$4 sm:$0xff]   ;;  %v9001_v17 = vld [vmem:[%s10622_s2 + $0x70] ss:$8 sps:$4 sm:$0xff]  }
0x1044   : > { %8372 = vmatprep.subr.bf16.mxu1 %v9419_v5  ;;  %3681 = vmatprep.subr.bf16.mxu0 %v8997_v20 }
0x1047   : > { %8373 = vmatpush3.bf16.msra.mxu1 %v8979_v30  ;;  %3682 = vmatpush1.bf16.msra.mxu0 %v8995_v50 }
0x1048   : > { %3683 = vmatprep.subr.bf16.mxu0 %v9000_v9 }
0x104b   : > { %3684 = vmatpush1.bf16.msra.mxu0 %v8998_v21 }
0x104c   : > { %3685 = vmatprep.subr.bf16.mxu0 %v9003_v15 }
0x104f   : > { %3686 = vmatpush1.bf16.msra.mxu0 %v9001_v17 }
0x1071   : > { %v8343_v25 = vpop.f32.mrb[30].mxu0 }
0x1072   : > { %v3151_v49 = vmul.f32 %v9254_v23, %v8343_v25  ;;  %v3139_v29 = vpop.f32.mrb[31].mxu0 }
0x1073   : > { %v3150_v2 = vmul.f32 %v9256_v32, %v3139_v29 }
0x1074   : > { %3156 = vrot.lane.b32.xlu1 %v3151_v49, %s10600_s15 }
0x1075   : > { %v8357_v1 = vpop.f32.mrb[32].mxu0 }
0x1076   : > { %v3349_v38 = vpop.f32.mrb[33].mxu0  ;;  %v3361_v35 = vmul.f32 %v9260_v48, %v8357_v1 }
0x1077   : > { %v3360_v34 = vmul.f32 %v9258_v33, %v3349_v38 }
0x1078   : > { %3154 = vrot.lane.b32.xlu1 %v3150_v2, %s10600_s15  ;;  %v7551_v2 = vld [vmem:[%s10623_s0] ss:$0 sm:$0xff] }
0x1079   : > { %3364 = vrot.lane.b32.xlu0 %v3360_v34, %s9424_s16 }
0x107c   : > { %3366 = vrot.lane.b32.xlu1 %v3361_v35, %s9424_s16  ;;  %v7552_v35 = vld [vmem:[%s10624_s11] ss:$0 sm:$0xff] }
0x10e6   : > { %v3157_v36 = vpop.permute.xlu1 %3156 }
0x10e7   : > { %3161 = vst.msk [vmem:[#allocation2 + $0x8] sm:$0xff] %vm1899_vm7, %v3157_v36 }
0x10ea   : > { %v3155_v37 = vpop.permute.xlu1 %3154 }
0x10eb   : > { %3160 = vst.msk [vmem:[#allocation2] sm:$0xff] %vm1899_vm7, %v3155_v37  ;;  %v3365_v39 = vpop.permute.xlu0 %3364 }
0x10ec   : > { %3370 = vst.msk [vmem:[#allocation2] sm:$0xff] %vm2110_vm8, %v3365_v39 }
0x10ee   : > { %v3367_v40 = vpop.permute.xlu1 %3366 }
0x10ef   : > { %3371 = vst.msk [vmem:[#allocation2 + $0x8] sm:$0xff] %vm2110_vm8, %v3367_v40 }
0x10f3   : > { %v3372_v41 = vld [vmem:[#allocation2] sm:$0xff] }
0x10f6   : > { %v3373_v44 = vld [vmem:[#allocation2 + $0x8] sm:$0xff] }
0x10f7   : > { %v3391_v57 = vpack.c.bf16 %v3373_v44, %v3372_v41  ;;  %v9004_v41 = vld [vmem:[%s10625_s22 + $0x40] sm:$0xff]  }
0x10f8   : > { %v9005_v44 = vld [vmem:[%s10625_s22] sm:$0xff]   ;;  %8042 = vmatprep.subr.bf16.mxu1 %v9004_v41 }
0x10f9   : > { %8375 = vmatmul.mubr.bf16.vlgmr.msra.gmra.mrb[20].mxu1 %v3391_v57  ;;  %v9006_v57 = vld [vmem:[%s10625_s22 + $0x48] sm:$0xff]  }
0x10fa   : > { %8043 = vmatpush3.bf16.msra.mxu1 %v9005_v44 }
0x10fb   : > { %8044 = vmatprep.subr.bf16.mxu1 %v9006_v57 }
0x11cc   : > { %v3480_v46 = vpop.f32.mrb[20].mxu1 }
0x11cd   : > { %v3481_v60 = vadd.f32 %v7542_v45, %v3480_v46  ;;  %v8376_v47 = vpop.f32.mrb[21].mxu1  ;;  %v9008_v46 = vld [vmem:[%s10625_s22 + $0x50] sm:$0xff]  }
0x11ce   : > { %v3483_v51 = vpop.f32.mrb[22].mxu1  ;;  %v9010_v47 = vld [vmem:[%s10625_s22 + $0x58] sm:$0xff]  }
0x11cf   : > { %v10018_v52 = vadd.f32 %v3481_v60, %v9831_v22  ;;  %v3484_v53 = vadd.f32 %v7542_v45, %v3483_v51  ;;  %v8377_v62 = vpop.f32.mrb[23].mxu1  ;;  %v9007_v45 = vld [vmem:[%s10625_s22 + $0x8] sm:$0xff]   ;;  %v9009_v60 = vld [vmem:[%s10625_s22 + $0x10] sm:$0xff]   ;;  %v9011_v51 = vld [vmem:[%s10625_s22 + $0x18] sm:$0xff]  }
0x11d0   : > { %8045 = vmatpush3.bf16.msra.mxu1 %v9007_v45  ;;  %v9013_v62 = vld [vmem:[%s10625_s22 + $0x20] sm:$0xff]  }
0x11d1   : > { %v10021_v0 = vadd.f32 %v3484_v53, %v9834_v28  ;;  %3491 = vadd.xlane.f32.xlu0 %v10018_v52  ;;  %8046 = vmatprep.subr.bf16.mxu1 %v9008_v46  ;;  %v9012_v53 = vld [vmem:[%s10625_s22 + $0x60] sm:$0xff]  }
0x11d3   : > { %3493 = vadd.xlane.f32.xlu1 %v10021_v0 }
0x11d4   : > { %8047 = vmatpush3.bf16.msra.mxu1 %v9009_v60 }
0x11d5   : > { %8048 = vmatprep.subr.bf16.mxu1 %v9010_v47 }
0x11d8   : > { %8049 = vmatpush3.bf16.msra.mxu1 %v9011_v51 }
0x11d9   : > { %8050 = vmatprep.subr.bf16.mxu1 %v9012_v53 }
0x11dc   : > { %8051 = vmatpush3.bf16.msra.mxu1 %v9013_v62 }
0x11dd   : > { %8052 = vmatprep.subr.bf16.mxu1 %v9014_v3 }
0x11e0   : > { %8053 = vmatpush3.bf16.msra.mxu1 %v9015_v4 }
0x11e1   : > { %8054 = vmatprep.subr.bf16.mxu1 %v9016_v6 }
0x11e4   : > { %8055 = vmatpush3.bf16.msra.mxu1 %v9017_v8 }
0x125e   : > { %v3492_v22 = vpop.xlane.xlu0 %3491 }
0x125f   : > { %v3495_v12 = vmul.f32 0.0078125, %v3492_v22  ;;  %v9018_v22 = vld [vmem:[%s10625_s22 + $0x78] sm:$0xff]  }
0x1260   : > { %v3494_v28 = vpop.xlane.xlu1 %3493  ;;  %8056 = vmatprep.subr.bf16.mxu1 %v9018_v22 }
0x1261   : > { %v3497_v7 = vsub.f32 %v10018_v52, %v3495_v12  ;;  %v3496_v10 = vmul.f32 0.0078125, %v3494_v28  ;;  %v9019_v12 = vld [vmem:[%s10625_s22 + $0x38] sm:$0xff]   ;;  %v3545_v28 = vld [vmem:[%s10626_s23] sm:$0x3] }
0x1262   : > { %8057 = vmatpush3.bf16.msra.mxu1 %v9019_v12  ;;  %v7569_v12 = vld [vmem:[%s10627_s18] ss:$0 sm:$0xff] }
0x1263   : > { %v3499_v54 = vmul.f32 %v3497_v7, %v3497_v7  ;;  %v3498_v63 = vsub.f32 %v10021_v0, %v3496_v10  ;;  %8378 = vmatprep.subr.bf16.mxu1 %v9419_v5  ;;  %v3588_v10 = vrot.slane %v3545_v28, %v9662_v59 }
0x1265   : > { %3501 = vadd.xlane.f32.xlu0 %v3499_v54  ;;  %v3500_v43 = vmul.f32 %v3498_v63, %v3498_v63 }
0x1269   : > { %3503 = vadd.xlane.f32.xlu0 %v3500_v43 }
0x12f2   : > { %v3502_v23 = vpop.xlane.xlu0 %3501 }
0x12f3   : > { %v3505_v25 = vmul.f32 0.0078125, %v3502_v23 }
0x12f5   : > { %v3507_v49 = vadd.f32 1e-05, %v3505_v25 }
0x12f6   : > { %v3504_v29 = vpop.xlane.xlu0 %3503 }
0x12f7   : > { %9261 = vrsqrt.f32 %v3507_v49  ;;  %v3506_v30 = vmul.f32 0.0078125, %v3504_v29 }
0x12f9   : > { %v3508_v32 = vadd.f32 1e-05, %v3506_v30 }
0x12fb   : > { %9263 = vrsqrt.f32 %v3508_v32 }
0x1301   : > { %v9262_v1 = vpop.eup %9261 }
0x1302   : > { %v3511_v33 = vmul.f32 %v9262_v1, %v3497_v7  ;;  %v3584_v7 = vrot.slane %v3545_v28, %v9655_v56 }
0x1304   : > { %v3519_v48 = vmul.f32 %v7551_v2, %v3511_v33 }
0x1305   : > { %v9264_v38 = vpop.eup %9263 }
0x1306   : > { %v3512_v34 = vmul.f32 %v9264_v38, %v3498_v63  ;;  %v3527_v37 = vadd.f32 %v7552_v35, %v3519_v48 }
0x1308   : > { %v3520_v36 = vmul.f32 %v7551_v2, %v3512_v34 }
0x130a   : > { %v3528_v39 = vadd.f32 %v7552_v35, %v3520_v36 }
0x130c   : > { %v3579_v40 = vpack.c.bf16 %v3528_v39, %v3527_v37 }
0x130e   : > { %3704 = vmatmul.mubr.bf16.vlgmr.msra.gmra.mrb[36].mxu0 %v3579_v40 }
0x130f   : > { %4151 = vmatprep.mubr.bf16.mxu0 %v9420_v31 }
0x13e1   : > { %v3705_v54 = vpop.f32.mrb[36].mxu0 }
0x13e2   : > { %v3706_v63 = vadd.f32 %v3705_v54, %v3584_v7  ;;  %v3707_v43 = vpop.f32.mrb[37].mxu0 }
0x13e3   : > { %v3708_v11 = vadd.f32 %v3707_v43, %v3588_v10  ;;  %v3709_v18 = vpop.f32.mrb[38].mxu0 }
0x13e4   : > { %v3714_v42 = vmul.f32 %v3706_v63, %v3706_v63  ;;  %v3710_v13 = vadd.f32 %v3709_v18, %v3584_v7  ;;  %v3711_v14 = vpop.f32.mrb[39].mxu0 }
0x13e5   : > { %v3715_v19 = vmul.f32 %v3708_v11, %v3708_v11  ;;  %v3712_v20 = vadd.f32 %v3711_v14, %v3588_v10  ;;  %v9022_v14 = vld [vmem:[%s9464_s29 + $0xc4] ss:$12 sps:$4 sm:$0xff]  }
0x13e6   : > { %v3718_v50 = vmul.f32 %v3714_v42, %v3706_v63  ;;  %v3716_v9 = vmul.f32 %v3710_v13, %v3710_v13  ;;  %4119 = vmatprep.subr.bf16.mxu0 %v9022_v14 }
0x13e7   : > { %v3719_v21 = vmul.f32 %v3715_v19, %v3708_v11  ;;  %v3717_v15 = vmul.f32 %v3712_v20, %v3712_v20  ;;  %v9023_v19 = vld [vmem:[%s9464_s29 + $0xc8] ss:$12 sps:$4 sm:$0xff]  }
0x13e8   : > { %v3722_v17 = vmul.f32 0.044715, %v3718_v50  ;;  %v3720_v23 = vmul.f32 %v3716_v9, %v3710_v13  ;;  %v9027_v50 = vld [vmem:[%s9464_s29 + $0xe0] ss:$12 sps:$4 sm:$0xff]   ;;  %v9024_v9 = vld [vmem:[%s9464_s29 + $0xd8] ss:$12 sps:$4 sm:$0xff]  }
0x13e9   : > { %v3723_v25 = vmul.f32 0.044715, %v3719_v21  ;;  %v3721_v49 = vmul.f32 %v3717_v15, %v3712_v20 }
0x13ea   : > { %v3726_v29 = vadd.f32 %v3722_v17, %v3706_v63  ;;  %v3724_v30 = vmul.f32 0.044715, %v3720_v23 }
0x13eb   : > { %v3727_v32 = vadd.f32 %v3723_v25, %v3708_v11  ;;  %v3725_v1 = vmul.f32 0.044715, %v3721_v49 }
0x13ec   : > { %v3730_v33 = vmul.f32 0.7978846, %v3726_v29  ;;  %v3728_v2 = vadd.f32 %v3724_v30, %v3710_v13  ;;  %v9030_v29 = vld [vmem:[%s9464_s29 + $0xf4] ss:$12 sps:$4 sm:$0xff]   ;;  %v9028_v30 = vld [vmem:[%s9464_s29 + $0xf0] ss:$12 sps:$4 sm:$0xff]  }
0x13ed   : > { %v3731_v38 = vmul.f32 0.7978846, %v3727_v32  ;;  %v3729_v34 = vadd.f32 %v3725_v1, %v3712_v20  ;;  %v9031_v32 = vld [vmem:[%s9464_s29 + $0xf8] ss:$12 sps:$4 sm:$0xff]  }
0x13ee   : > { %9265 = vtanh.f32 %v3730_v33  ;;  %v3732_v48 = vmul.f32 0.7978846, %v3728_v2  ;;  %v9034_v1 = vld [vmem:[%s9464_s29 + $0x10c] ss:$12 sps:$4 sm:$0xff]   ;;  %v9032_v33 = vld [vmem:[%s9464_s29 + $0x108] ss:$12 sps:$4 sm:$0xff]  }
0x13ef   : > { %9267 = vtanh.f32 %v3731_v38  ;;  %v3733_v35 = vmul.f32 0.7978846, %v3729_v34  ;;  %v9035_v2 = vld [vmem:[%s9464_s29 + $0x110] ss:$12 sps:$4 sm:$0xff]   ;;  %v9036_v34 = vld [vmem:[%s9464_s29 + $0x120] ss:$12 sps:$4 sm:$0xff]  }
0x13f0   : > { %9269 = vtanh.f32 %v3732_v48  ;;  %v9038_v38 = vld [vmem:[%s9464_s29 + $0x124] ss:$12 sps:$4 sm:$0xff]   ;;  %v9039_v48 = vld [vmem:[%s9464_s29 + $0x128] ss:$12 sps:$4 sm:$0xff]  }
0x13f1   : > { %9271 = vtanh.f32 %v3733_v35  ;;  %v9042_v35 = vld [vmem:[%s9464_s29 + $0x13c] ss:$12 sps:$4 sm:$0xff]  }
0x13f8   : > { %v9266_v36 = vpop.eup %9265 }
0x13f9   : > { %v9268_v37 = vpop.eup %9267  ;;  %v3738_v39 = vadd.f32 1.0, %v9266_v36  ;;  %v9040_v36 = vld [vmem:[%s9464_s29 + $0x138] ss:$12 sps:$4 sm:$0xff]  }
0x13fa   : > { %v9270_v40 = vpop.eup %9269  ;;  %v3739_v41 = vadd.f32 1.0, %v9268_v37  ;;  %v9043_v37 = vld [vmem:[%s9464_s29 + $0x140] ss:$12 sps:$4 sm:$0xff]  }
0x13fb   : > { %v9272_v44 = vpop.eup %9271  ;;  %v3742_v57 = vmul.f32 0.5, %v3738_v39  ;;  %v3740_v45 = vadd.f32 1.0, %v9270_v40  ;;  %v9046_v39 = vld [vmem:[%s9464_s29 + $0x154] ss:$12 sps:$4 sm:$0xff]   ;;  %v9044_v40 = vld [vmem:[%s9464_s29 + $0x150] ss:$12 sps:$4 sm:$0xff]  }
0x13fc   : > { %v3741_v46 = vadd.f32 1.0, %v9272_v44  ;;  %v3743_v60 = vmul.f32 0.5, %v3739_v41  ;;  %v9047_v41 = vld [vmem:[%s9464_s29 + $0x158] ss:$12 sps:$4 sm:$0xff]  }
0x13fd   : > { %v3744_v47 = vmul.f32 0.5, %v3740_v45  ;;  %v3746_v53 = vmul.f32 %v3742_v57, %v3706_v63  ;;  %v9050_v44 = vld [vmem:[%s9464_s29 + $0x16c] ss:$12 sps:$4 sm:$0xff]   ;;  %v9048_v57 = vld [vmem:[%s9464_s29 + $0x168] ss:$12 sps:$4 sm:$0xff]  }
0x13fe   : > { %v3745_v51 = vmul.f32 0.5, %v3741_v46  ;;  %v3747_v3 = vmul.f32 %v3743_v60, %v3708_v11  ;;  %v9051_v45 = vld [vmem:[%s9464_s29 + $0x170] ss:$12 sps:$4 sm:$0xff]  }
0x13ff   : > { %v3748_v62 = vmul.f32 %v3744_v47, %v3710_v13  ;;  %v9020_v13 = vld [vmem:[%s9464_s29 + $0xc0] ss:$12 sps:$4 sm:$0xff]  }
0x1400   : > { %v3749_v4 = vmul.f32 %v3745_v51, %v3712_v20  ;;  %v9026_v20 = vld [vmem:[%s9464_s29 + $0xdc] ss:$12 sps:$4 sm:$0xff]   ;;  %4120 = vmatpush1.bf16.msra.mxu0 %v9020_v13 }
0x1401   : > { %v3750_v6 = vpack.c.bf16 %v3748_v62, %v3746_v53  ;;  %4121 = vmatprep.subr.bf16.mxu0 %v9026_v20 }
0x1402   : > { %v3751_v8 = vpack.c.bf16 %v3749_v4, %v3747_v3  ;;  %v7588_v4 = vld [vmem:[%s9454_s21 + $0x1] ss:$0 sm:$0xff] }
0x1404   : > { %3886 = vmatprep.mubr.bf16.mxu1 %v3751_v8  ;;  %4122 = vmatpush1.bf16.msra.mxu0 %v9024_v9 }
0x1405   : > { %3887 = vmatmul.mubr.bf16.vlgmr.msra.gmra.mrb[24].mxu1 %v3750_v6  ;;  %4123 = vmatprep.subr.bf16.mxu0 %v9030_v29 }
0x1406   : > { %8394 = vmatprep.mubr.msk.bf16.mxu1 %vm9421_vm0, %v9419_v5  ;;  %8379 = vmatpush3.bf16.msra.mxu1 %v9023_v19 }
0x1407   : > { %8380 = vmatprep.subr.bf16.mxu1 %v9419_v5 }
0x1408   : > { %4124 = vmatpush1.bf16.msra.mxu0 %v9028_v30 }
0x1409   : > { %4125 = vmatprep.subr.bf16.mxu0 %v9034_v1 }
0x140a   : > { %8381 = vmatpush3.bf16.msra.mxu1 %v9027_v50 }
0x140b   : > { %8382 = vmatprep.subr.bf16.mxu1 %v9419_v5 }
0x140c   : > { %4126 = vmatpush1.bf16.msra.mxu0 %v9032_v33 }
0x140d   : > { %4127 = vmatprep.subr.bf16.mxu0 %v9038_v38 }
0x140e   : > { %8383 = vmatpush3.bf16.msra.mxu1 %v9031_v32 }
0x140f   : > { %8384 = vmatprep.subr.bf16.mxu1 %v9419_v5 }
0x1410   : > { %4128 = vmatpush1.bf16.msra.mxu0 %v9036_v34 }
0x1411   : > { %4129 = vmatprep.subr.bf16.mxu0 %v9042_v35 }
0x1412   : > { %8385 = vmatpush3.bf16.msra.mxu1 %v9035_v2 }
0x1413   : > { %8386 = vmatprep.subr.bf16.mxu1 %v9419_v5 }
0x1414   : > { %4130 = vmatpush1.bf16.msra.mxu0 %v9040_v36 }
0x1415   : > { %4131 = vmatprep.subr.bf16.mxu0 %v9046_v39 }
0x1416   : > { %8387 = vmatpush3.bf16.msra.mxu1 %v9039_v48 }
0x1417   : > { %8388 = vmatprep.subr.bf16.mxu1 %v9419_v5 }
0x1418   : > { %4132 = vmatpush1.bf16.msra.mxu0 %v9044_v40 }
0x1419   : > { %4133 = vmatprep.subr.bf16.mxu0 %v9050_v44 }
0x141a   : > { %8389 = vmatpush3.bf16.msra.mxu1 %v9043_v37 }
0x141b   : > { %8390 = vmatprep.subr.bf16.mxu1 %v9419_v5 }
0x141c   : > { %4134 = vmatpush1.bf16.msra.mxu0 %v9048_v57 }
0x141e   : > { %8391 = vmatpush3.bf16.msra.mxu1 %v9047_v41 }
0x141f   : > { %8392 = vmatprep.subr.bf16.mxu1 %v9419_v5 }
0x1422   : > { %8393 = vmatpush3.bf16.msra.mxu1 %v9051_v45 }
0x14d8   : > { %v8058_v22 = vpop.f32.mrb[24].mxu1 }
0x14d9   : > { %v8059_v28 = vpop.f32.mrb[25].mxu1 }
0x14da   : > { %v8060_v7 = vadd.f32 %v8059_v28, %v8058_v22  ;;  %v8061_v10 = vpop.f32.mrb[26].mxu1  ;;  %v7589_v28 = vld [vmem:[%s9459_s25 + $0x1] ss:$0 sm:$0xff] }
0x14db   : > { %v8062_v54 = vpop.f32.mrb[27].mxu1 }
0x14dc   : > { %v3889_v63 = vadd.f32 %v8060_v7, %v7569_v12  ;;  %v8063_v43 = vadd.f32 %v8062_v54, %v8061_v10 }
0x14de   : > { %v3892_v11 = vadd.f32 %v8063_v43, %v7569_v12  ;;  %v10070_v18 = vadd.f32 %v3889_v63, %v10018_v52  ;;  %v7622_v43 = vld [vmem:[%s10616_s3 + $0x3] sm:$0x7]  ;;  %s10629_s3 = smov 64  }
0x14df   : > { %v3987_v13 = vrot.slane %v7622_v43, %v9659_v58  ;;  %v3983_v20 = vrot.slane %v7622_v43, %v9662_v59 }
0x14e0   : > { %3901 = vadd.xlane.f32.xlu0 %v10070_v18  ;;  %v10074_v42 = vadd.f32 %v3892_v11, %v10021_v0  ;;  %v3979_v11 = vrot.slane %v7622_v43, %v9655_v56 }
0x14e2   : > { %3903 = vadd.xlane.f32.xlu1 %v10074_v42 }
0x156d   : > { %v3902_v52 = vpop.xlane.xlu0 %3901 }
0x156e   : > { %v3905_v0 = vmul.f32 0.0078125, %v3902_v52 }
0x156f   : > { %v3904_v21 = vpop.xlane.xlu1 %3903 }
0x1570   : > { %v3907_v15 = vsub.f32 %v10070_v18, %v3905_v0  ;;  %v3906_v17 = vmul.f32 0.0078125, %v3904_v21 }
0x1572   : > { %v3908_v23 = vsub.f32 %v10074_v42, %v3906_v17  ;;  %v3909_v25 = vmul.f32 %v3907_v15, %v3907_v15 }
0x1574   : > { %3911 = vadd.xlane.f32.xlu0 %v3909_v25  ;;  %v3910_v49 = vmul.f32 %v3908_v23, %v3908_v23 }
0x1576   : > { %3913 = vadd.xlane.f32.xlu1 %v3910_v49 }
0x1601   : > { %v3912_v46 = vpop.xlane.xlu0 %3911 }
0x1602   : > { %v3915_v60 = vmul.f32 0.0078125, %v3912_v46 }
0x1603   : > { %v3914_v47 = vpop.xlane.xlu1 %3913 }
0x1604   : > { %v3917_v51 = vadd.f32 1e-05, %v3915_v60  ;;  %v3916_v53 = vmul.f32 0.0078125, %v3914_v47 }
0x1606   : > { %9273 = vrsqrt.f32 %v3917_v51  ;;  %v3918_v62 = vadd.f32 1e-05, %v3916_v53 }
0x1608   : > { %9275 = vrsqrt.f32 %v3918_v62 }
0x1610   : > { %v9274_v3 = vpop.eup %9273 }
0x1611   : > { %v3921_v6 = vmul.f32 %v9274_v3, %v3907_v15 }
0x1612   : > { %v9276_v8 = vpop.eup %9275 }
0x1613   : > { %v3922_v22 = vmul.f32 %v9276_v8, %v3908_v23  ;;  %v3929_v12 = vmul.f32 %v7588_v4, %v3921_v6 }
0x1615   : > { %v3930_v7 = vmul.f32 %v7588_v4, %v3922_v22  ;;  %v3937_v10 = vadd.f32 %v7589_v28, %v3929_v12 }
0x1617   : > { %v3938_v54 = vadd.f32 %v7589_v28, %v3930_v7 }
0x1619   : > { %v3974_v63 = vpack.c.bf16 %v3938_v54, %v3937_v10 }
0x161b   : > { %4152 = vmatmul.mubr.bf16.vlgmr.msra.gmra.mrb[40].mxu0 %v3974_v63  ;;  %8395 = vmatmul.mubr.bf16.vlgmr.msra.gmra.mrb[28].mxu1 %v3974_v63 }
0x16ee   : > { %v4153_v14 = vpop.f32.mrb[40].mxu0  ;;  %v4196_v19 = vpop.f32.mrb[28].mxu1 }
0x16ef   : > { %v4154_v50 = vadd.f32 %v4153_v14, %v3979_v11  ;;  %v4155_v9 = vpop.f32.mrb[41].mxu0  ;;  %v8396_v52 = vpop.f32.mrb[29].mxu1  ;;  %v4197_v17 = vadd.f32 %v4196_v19, %v3987_v13 }
0x16f0   : > { %v4157_v0 = vpop.f32.mrb[42].mxu0  ;;  %v4199_v21 = vpop.f32.mrb[30].mxu1  ;;  %v4156_v29 = vadd.f32 %v4155_v9, %v3983_v20 }
0x16f1   : > { %v10116_v15 = vmul.f32 0.17677669, %v4154_v50  ;;  %v4200_v23 = vadd.f32 %v4199_v21, %v3987_v13  ;;  %v4159_v25 = vpop.f32.mrb[43].mxu0  ;;  %v8397_v49 = vpop.f32.mrb[31].mxu1  ;;  %v4158_v38 = vadd.f32 %v4157_v0, %v3979_v11 }
0x16f2   : > { %v4160_v30 = vadd.f32 %v4159_v25, %v3983_v20 }
0x16f3   : > { %8402 = vmatprep.mubr.msk.f32.mxu0 %vm1284_vm1, %v10116_v15  ;;  %v8656_v32 = vpack.c.bf16 %v4200_v23, %v4197_v17  ;;  %v10120_v1 = vpack.i.bf16 %v4200_v23, %v4197_v17  ;;  %v4204_v34 = vmul.f32 0.17677669, %v4158_v38 }
0x16f4   : > { %v8650_v33 = vpack.c.bf16 %v4160_v30, %v4156_v29  ;;  %v8838_v2 = vpack.i.bf16 %v4160_v30, %v4156_v29 }
0x16f6   : > { %8652 = vmatprep.subr.msk.bf16.mxu0 %vm9673_vm2, %v8650_v33 }
0x16f7   : > { %8655 = vmatpush3.bf16.xpose.msk.msra.mxu0 %vm9673_vm2, %v8650_v33 }
0x16f8   : > { %8657 = vmatprep.subr.bf16.mxu0 %v8656_v32 }
0x16fe   : > { %8403 = vmatmul.mubr.msk.f32.vlgmr.msra.gmra.mrb[34].mxu0 %vm1284_vm1, %v4204_v34 }
0x16ff   : > { %8659 = vmatpush3.bf16.msra.mxu0 %v8656_v32 }
0x17d1   : > { %v8404_v48 = vpop.f32.mrb[34].mxu0 }
0x17d2   : > { %v4289_v35 = vadd.f32 %v8404_v48, %v9695_v26  ;;  %v4283_v36 = vpop.f32.mrb[35].mxu0 }
0x17d3   : > { %v4284_v37 = vadd.f32 %v4283_v36, %v9697_v27 }
0x17d4   : > { %v4295_v39 = vsel %vm1372_vm5, %v4289_v35, -inf }
0x17d5   : > { %4296 = vmax.xlane.f32.xlu1 %v4295_v39  ;;  %v4292_v40 = vsel %vm1372_vm5, %v4284_v37, -inf }
0x17d6   : > { %4293 = vmax.xlane.f32.xlu0 %v4292_v40 }
0x17e6   : > { %4397 = vrot.lane.b32.xlu1 %v10116_v15, %s9424_s16 }
0x17ea   : > { %4399 = vrot.lane.b32.xlu1 %v4204_v34, %s9424_s16 }
0x17ec   : > { %8839 = vrot.lane.b32.xlu0 %v8838_v2, %s9424_s16 }
0x17ee   : > { %8849 = vrot.lane.b32.xlu1 %v8838_v2, %s10600_s15  ;;  %s10628_s15 = smov 32  }
0x1862   : > { %v4297_v41 = vpop.xlane.xlu1 %4296 }
0x1863   : > { %v4299_v44 = vsub.f32 %v4289_v35, %v4297_v41  ;;  %v4294_v57 = vpop.xlane.xlu0 %4293 }
0x1864   : > { %v4298_v45 = vsub.f32 %v4284_v37, %v4294_v57 }
0x1865   : > { %v4302_v46 = vmul.f32 1.442695, %v4299_v44 }
0x1866   : > { %v4300_v60 = vmul.f32 1.442695, %v4298_v45  ;;  %v4398_v6 = vpop.permute.xlu1 %4397 }
0x1867   : > { %v8840_v47 = vpop.permute.xlu0 %8839 }
0x1868   : > { %9277 = vpow2.f32 %v4300_v60  ;;  %v8842_v51 = vunpack.i.h.bf16 %v8840_v47  ;;  %v8841_v53 = vunpack.i.l.bf16 %v8840_v47 }
0x1869   : > { %9279 = vpow2.f32 %v4302_v46 }
0x186a   : > { %v8660_v62 = vpack.c.bf16 %v8842_v51, %v8841_v53  ;;  %v4400_v8 = vpop.permute.xlu1 %4399 }
0x186c   : > { %8662 = vmatprep.subr.msk.bf16.mxu0 %vm9673_vm2, %v8660_v62 }
0x186e   : > { %v8850_v11 = vpop.permute.xlu1 %8849 }
0x186f   : > { %v8852_v0 = vunpack.i.h.bf16 %v8850_v11  ;;  %v8851_v21 = vunpack.i.l.bf16 %v8850_v11 }
0x1871   : > { %v8670_v33 = vpack.c.bf16 %v8852_v0, %v8851_v21 }
0x1872   : > { %v10138_v3 = vpop.eup %9277 }
0x1873   : > { %v10140_v4 = vpop.eup %9279  ;;  %8409 = vmatprep.mubr.msk.f32.mxu0 %vm1372_vm5, %v10138_v3 }
0x1874   : > { %8410 = vmatmul.mubr.msk.f32.vlgmr.msra.gmra.mrb[44].mxu0 %vm1372_vm5, %v10140_v4 }
0x1875   : > { %8665 = vmatpush3.bf16.xpose.msk.msra.mxu0 %vm9673_vm2, %v8660_v62  ;;  %8416 = vmatprep.mubr.msk.f32.mxu0 %vm1284_vm1, %v4398_v6 }
0x187c   : > { %8417 = vmatmul.mubr.msk.f32.vlgmr.msra.gmra.mrb[46].mxu0 %vm1284_vm1, %v4400_v8 }
0x1947   : > { %v10150_v22 = vpop.f32.mrb[44].mxu0 }
0x1948   : > { %v10152_v12 = vpop.f32.mrb[45].mxu0 }
0x194f   : > { %v8418_v28 = vpop.f32.mrb[46].mxu0 }
0x1950   : > { %v4485_v7 = vadd.f32 %v8418_v28, %v9695_v26  ;;  %v4479_v10 = vpop.f32.mrb[47].mxu0 }
0x1951   : > { %v4480_v54 = vadd.f32 %v4479_v10, %v9697_v27 }
0x1952   : > { %v4491_v63 = vsel %vm1372_vm5, %v4485_v7, -inf }
0x1953   : > { %4492 = vmax.xlane.f32.xlu0 %v4491_v63  ;;  %v4488_v43 = vsel %vm1372_vm5, %v4480_v54, -inf }
0x1954   : > { %4489 = vmax.xlane.f32.xlu1 %v4488_v43 }
0x1965   : > { %8854 = vrot.lane.b32.xlu1 %v8838_v2, %s10628_s15 }
0x1969   : > { %8844 = vrot.lane.b32.xlu0 %v10120_v1, %s9424_s16  ;;  %4611 = vrot.lane.b32.xlu1 %v4204_v34, %s10629_s3 }
0x196d   : > { %4609 = vrot.lane.b32.xlu0 %v10116_v15, %s10629_s3  ;;  %4821 = vrot.lane.b32.xlu1 %v4204_v34, %s10628_s15 }
0x1971   : > { %4819 = vrot.lane.b32.xlu0 %v10116_v15, %s10628_s15 }
0x19e0   : > { %v4493_v13 = vpop.xlane.xlu0 %4492 }
0x19e1   : > { %v4495_v14 = vsub.f32 %v4485_v7, %v4493_v13  ;;  %v4490_v19 = vpop.xlane.xlu1 %4489 }
0x19e2   : > { %v4494_v20 = vsub.f32 %v4480_v54, %v4490_v19 }
0x19e3   : > { %v4498_v50 = vmul.f32 1.442695, %v4495_v14 }
0x19e4   : > { %v4496_v9 = vmul.f32 1.442695, %v4494_v20  ;;  %v8845_v52 = vpop.permute.xlu0 %8844 }
0x19e5   : > { %v8847_v17 = vunpack.i.h.bf16 %v8845_v52  ;;  %v8846_v23 = vunpack.i.l.bf16 %v8845_v52  ;;  %v8855_v25 = vpop.permute.xlu1 %8854 }
0x19e6   : > { %9281 = vpow2.f32 %v4496_v9  ;;  %v8857_v49 = vunpack.i.h.bf16 %v8855_v25  ;;  %v8856_v29 = vunpack.i.l.bf16 %v8855_v25 }
0x19e7   : > { %9283 = vpow2.f32 %v4498_v50  ;;  %v8666_v30 = vpack.c.bf16 %v8847_v17, %v8846_v23 }
0x19e8   : > { %v8680_v32 = vpack.c.bf16 %v8857_v49, %v8856_v29  ;;  %v4610_v15 = vpop.permute.xlu0 %4609 }
0x19e9   : > { %8667 = vmatprep.subr.bf16.mxu0 %v8666_v30  ;;  %v4612_v2 = vpop.permute.xlu1 %4611 }
0x19ea   : > { %8669 = vmatpush3.bf16.msra.mxu0 %v8666_v30  ;;  %8682 = vmatprep.subr.msk.bf16.mxu1 %vm9673_vm2, %v8680_v32 }
0x19eb   : > { %8672 = vmatprep.subr.msk.bf16.mxu0 %vm9673_vm2, %v8670_v33  ;;  %8685 = vmatpush3.bf16.xpose.msk.msra.mxu1 %vm9673_vm2, %v8680_v32 }
0x19ec   : > { %v4820_v38 = vpop.permute.xlu0 %4819  ;;  %8454 = vmatprep.subr.bf16.mxu1 %v9419_v5 }
0x19ed   : > { %8444 = vmatprep.mubr.msk.f32.mxu1 %vm1284_vm1, %v4820_v38  ;;  %v4822_v35 = vpop.permute.xlu1 %4821  ;;  %v4304_v38 = vsel %vm1372_vm5, %v10138_v3, 0.0  ;;  %v9053_v3 = vld [vmem:[%s9474_s8 + $0x48] sm:$0xff]  }
0x19f0   : > { %v9282_v34 = vpop.eup %9281 }
0x19f1   : > { %v9284_v48 = vpop.eup %9283  ;;  %8423 = vmatprep.mubr.msk.f32.mxu0 %vm1372_vm5, %v9282_v34  ;;  %v4500_v6 = vsel %vm1372_vm5, %v9282_v34, 0.0 }
0x19f2   : > { %8424 = vmatmul.mubr.msk.f32.vlgmr.msra.gmra.mrb[48].mxu0 %vm1372_vm5, %v9284_v48  ;;  %8445 = vmatmul.mubr.msk.f32.vlgmr.msra.gmra.mrb[18].mxu1 %vm1284_vm1, %v4822_v35 }
0x19f3   : > { %8675 = vmatpush3.bf16.xpose.msk.msra.mxu0 %vm9673_vm2, %v8670_v33  ;;  %8430 = vmatprep.mubr.msk.f32.mxu0 %vm1284_vm1, %v4610_v15 }
0x19f4   : > { %8470 = vmatprep.mubr.msk.bf16.mxu1 %vm9421_vm0, %v9419_v5 }
0x19fa   : > { %8431 = vmatmul.mubr.msk.f32.vlgmr.msra.gmra.mrb[50].mxu0 %vm1284_vm1, %v4612_v2  ;;  %v4307_v2 = vsel %vm1372_vm5, %v10140_v4, 0.0  ;;  %v9052_v4 = vld [vmem:[%s9474_s8 + $0x40] sm:$0xff]  }
0x19fb   : > { %8455 = vmatpush3.bf16.msra.mxu1 %v9052_v4  ;;  %v9072_v4 = vld [vmem:[%s9504_s12 + $0xb4] ss:$8 sps:$4 sm:$0xff]  }
0x19fc   : > { %8456 = vmatprep.subr.bf16.mxu1 %v9419_v5 }
0x19ff   : > { %8457 = vmatpush3.bf16.msra.mxu1 %v9053_v3  ;;  %v9070_v3 = vld [vmem:[%s9504_s12 + $0xb0] ss:$8 sps:$4 sm:$0xff]  }
0x1a00   : > { %8458 = vmatprep.subr.bf16.mxu1 %v9419_v5 }
0x1ac5   : > { %v10184_v36 = vpop.f32.mrb[48].mxu0  ;;  %v8446_v37 = vpop.f32.mrb[18].mxu1 }
0x1ac6   : > { %v10186_v39 = vpop.f32.mrb[49].mxu0  ;;  %v4901_v40 = vpop.f32.mrb[19].mxu1  ;;  %v4907_v44 = vadd.f32 %v8446_v37, %v9695_v26 }
0x1ac7   : > { %v4902_v41 = vadd.f32 %v4901_v40, %v9697_v27 }
0x1ac8   : > { %v4913_v46 = vsel %vm1372_vm5, %v4907_v44, -inf }
0x1ac9   : > { %v4910_v57 = vsel %vm1372_vm5, %v4902_v41, -inf }
0x1aca   : > { %4911 = vmax.xlane.f32.xlu0 %v4910_v57  ;;  %v9055_v57 = vld [vmem:[%s9474_s8 + $0x58] sm:$0xff]  }
0x1acd   : > { %v8432_v45 = vpop.f32.mrb[50].mxu0 }
0x1ace   : > { %v4697_v60 = vadd.f32 %v8432_v45, %v9695_v26  ;;  %v4691_v47 = vpop.f32.mrb[51].mxu0  ;;  %4914 = vmax.xlane.f32.xlu0 %v4913_v46  ;;  %v4503_v26 = vsel %vm1372_vm5, %v9284_v48, 0.0 }
0x1acf   : > { %v4692_v51 = vadd.f32 %v4691_v47, %v9697_v27 }
0x1ad0   : > { %v4703_v53 = vsel %vm1372_vm5, %v4697_v60, -inf }
0x1ad1   : > { %4704 = vmax.xlane.f32.xlu1 %v4703_v53  ;;  %v4700_v62 = vsel %vm1372_vm5, %v4692_v51, -inf }
0x1ad2   : > { %4701 = vmax.xlane.f32.xlu0 %v4700_v62 }
0x1ae2   : > { %8864 = vrot.lane.b32.xlu1 %v10120_v1, %s10628_s15 }
0x1ae8   : > { %8859 = vrot.lane.b32.xlu0 %v10120_v1, %s10629_s3 }
0x1b06   : > { %4501 = vadd.xlane.f32.xlu1 %v4500_v6 }
0x1b07   : > { %4504 = vadd.xlane.f32.xlu0 %v4503_v26 }
0x1b57   : > { %v4912_v8 = vpop.xlane.xlu0 %4911 }
0x1b58   : > { %v4916_v7 = vsub.f32 %v4902_v41, %v4912_v8 }
0x1b5a   : > { %v4918_v14 = vmul.f32 1.442695, %v4916_v7 }
0x1b5b   : > { %v4915_v27 = vpop.xlane.xlu0 %4914 }
0x1b5c   : > { %v4917_v28 = vsub.f32 %v4907_v44, %v4915_v27  ;;  %v9054_v44 = vld [vmem:[%s9474_s8 + $0x50] sm:$0xff]   ;;  %v9056_v27 = vld [vmem:[%s9474_s8 + $0x60] sm:$0xff]  }
0x1b5d   : > { %8459 = vmatpush3.bf16.msra.mxu1 %v9054_v44 }
0x1b5e   : > { %v4705_v10 = vpop.xlane.xlu1 %4704  ;;  %v4920_v11 = vmul.f32 1.442695, %v4917_v28  ;;  %8460 = vmatprep.subr.bf16.mxu1 %v9419_v5 }
0x1b5f   : > { %v4707_v54 = vsub.f32 %v4697_v60, %v4705_v10  ;;  %v4702_v63 = vpop.xlane.xlu0 %4701 }
0x1b60   : > { %v4706_v43 = vsub.f32 %v4692_v51, %v4702_v63  ;;  %v9059_v63 = vld [vmem:[%s9474_s8 + $0x78] sm:$0xff]  }
0x1b61   : > { %v4710_v13 = vmul.f32 1.442695, %v4707_v54  ;;  %8461 = vmatpush3.bf16.msra.mxu1 %v9055_v57 }
0x1b62   : > { %v4708_v19 = vmul.f32 1.442695, %v4706_v43  ;;  %v8865_v20 = vpop.permute.xlu1 %8864  ;;  %8462 = vmatprep.subr.bf16.mxu1 %v9419_v5 }
0x1b63   : > { %9285 = vpow2.f32 %v4710_v13  ;;  %v8867_v1 = vunpack.i.h.bf16 %v8865_v20  ;;  %v8860_v50 = vpop.permute.xlu0 %8859  ;;  %v8866_v9 = vunpack.i.l.bf16 %v8865_v20 }
0x1b64   : > { %9287 = vpow2.f32 %v4708_v19  ;;  %v8862_v52 = vunpack.i.h.bf16 %v8860_v50  ;;  %v8861_v0 = vunpack.i.l.bf16 %v8860_v50 }
0x1b65   : > { %9289 = vpow2.f32 %v4920_v11  ;;  %v8686_v17 = vpack.c.bf16 %v8867_v1, %v8866_v9  ;;  %8463 = vmatpush3.bf16.msra.mxu1 %v9056_v27  ;;  %v9084_v27 = vld [vmem:[%s9504_s12 + $0xe4] ss:$8 sps:$4 sm:$0xff]  }
0x1b66   : > { %9291 = vpow2.f32 %v4918_v14  ;;  %v8676_v21 = vpack.c.bf16 %v8862_v52, %v8861_v0  ;;  %8464 = vmatprep.subr.bf16.mxu1 %v9419_v5 }
0x1b68   : > { %8677 = vmatprep.subr.bf16.mxu0 %v8676_v21 }
0x1b69   : > { %8679 = vmatpush3.bf16.msra.mxu0 %v8676_v21 }
0x1b6a   : > { %8687 = vmatprep.subr.bf16.mxu0 %v8686_v17 }
0x1b6d   : > { %v9286_v23 = vpop.eup %9285 }
0x1b6e   : > { %v9288_v25 = vpop.eup %9287  ;;  %v4715_v49 = vsel %vm1372_vm5, %v9286_v23, 0.0 }
0x1b6f   : > { %v9290_v29 = vpop.eup %9289  ;;  %4716 = vadd.xlane.f32.xlu1 %v4715_v49  ;;  %8437 = vmatprep.mubr.msk.f32.mxu0 %vm1372_vm5, %v9288_v25  ;;  %v4712_v30 = vsel %vm1372_vm5, %v9288_v25, 0.0  ;;  %v7688_v49 = vld [vmem:[%s9479_s14 + $0x1] ss:$0 sm:$0xff] }
0x1b70   : > { %v9292_v32 = vpop.eup %9291  ;;  %4713 = vadd.xlane.f32.xlu0 %v4712_v30  ;;  %8438 = vmatmul.mubr.msk.f32.vlgmr.msra.gmra.mrb[52].mxu0 %vm1372_vm5, %v9286_v23  ;;  %v4925_v15 = vsel %vm1372_vm5, %v9290_v29, 0.0 }
0x1b71   : > { %8689 = vmatpush3.bf16.msra.mxu0 %v8686_v17  ;;  %8451 = vmatprep.mubr.msk.f32.mxu0 %vm1372_vm5, %v9292_v32  ;;  %v4922_v33 = vsel %vm1372_vm5, %v9292_v32, 0.0 }
0x1b72   : > { %8474 = vmatprep.subr.bf16.mxu0 %v9419_v5 }
0x1b73   : > { %4926 = vadd.xlane.f32.xlu1 %v4925_v15 }
0x1b74   : > { %4923 = vadd.xlane.f32.xlu0 %v4922_v33  ;;  %8452 = vmatmul.mubr.msk.f32.vlgmr.msra.gmra.mrb[54].mxu0 %vm1372_vm5, %v9290_v29 }
0x1b75   : > { %8490 = vmatprep.mubr.msk.bf16.mxu0 %vm9421_vm0, %v9419_v5 }
0x1b77   : > { %4308 = vadd.xlane.f32.xlu1 %v4307_v2 }
0x1b78   : > { %4305 = vadd.xlane.f32.xlu0 %v4304_v38 }
0x1b93   : > { %v4502_v34 = vpop.xlane.xlu1 %4501 }
0x1b94   : > { %9293 = vrcp.f32 %v4502_v34  ;;  %v4505_v48 = vpop.xlane.xlu0 %4504 }
0x1b95   : > { %9295 = vrcp.f32 %v4505_v48  ;;  %v9060_v48 = vld [vmem:[%s9504_s12 + $0x80] ss:$8 sps:$4 sm:$0xff]  }
0x1b9e   : > { %v9294_v35 = vpop.eup %9293 }
0x1b9f   : > { %v9296_v37 = vpop.eup %9295  ;;  %v4597_v40 = vmul.f32 %v9294_v35, %v10186_v39  ;;  %v9062_v35 = vld [vmem:[%s9504_s12 + $0x84] ss:$8 sps:$4 sm:$0xff]  }
0x1ba0   : > { %v4598_v41 = vmul.f32 %v9296_v37, %v10184_v36  ;;  %v9065_v37 = vld [vmem:[%s9504_s12 + $0x94] ss:$8 sps:$4 sm:$0xff]  }
0x1ba1   : > { %4601 = vrot.lane.b32.xlu0 %v4597_v40, %s10628_s15  ;;  %v9069_v40 = vld [vmem:[%s9494_s30 + $0x40] sm:$0xff]  }
0x1ba2   : > { %4603 = vrot.lane.b32.xlu1 %v4598_v41, %s10628_s15  ;;  %v9068_v41 = vld [vmem:[%s9504_s12 + $0xa4] ss:$8 sps:$4 sm:$0xff]   ;;  %8475 = vmatpush3.bf16.msra.mxu0 %v9069_v40 }
0x1ba3   : > { %8476 = vmatprep.subr.bf16.mxu0 %v9419_v5 }
0x1bfc   : > { %v4717_v36 = vpop.xlane.xlu1 %4716 }
0x1bfd   : > { %v4714_v39 = vpop.xlane.xlu0 %4713 }
0x1c00   : > { %v4927_v45 = vpop.xlane.xlu1 %4926 }
0x1c01   : > { %v4924_v46 = vpop.xlane.xlu0 %4923 }
0x1c04   : > { %v4309_v60 = vpop.xlane.xlu1 %4308 }
0x1c05   : > { %9297 = vrcp.f32 %v4309_v60  ;;  %v4306_v47 = vpop.xlane.xlu0 %4305 }
0x1c06   : > { %9299 = vrcp.f32 %v4306_v47 }
0x1c07   : > { %9301 = vrcp.f32 %v4717_v36 }
0x1c08   : > { %9303 = vrcp.f32 %v4714_v39 }
0x1c09   : > { %9305 = vrcp.f32 %v4927_v45 }
0x1c0a   : > { %9307 = vrcp.f32 %v4924_v46 }
0x1c0f   : > { %v9298_v51 = vpop.eup %9297 }
0x1c10   : > { %v9300_v53 = vpop.eup %9299  ;;  %v4394_v62 = vmul.f32 %v9298_v51, %v10150_v22  ;;  %v9057_v22 = vld [vmem:[%s9474_s8 + $0x68] sm:$0xff]  }
0x1c11   : > { %v4393_v6 = vmul.f32 %v9300_v53, %v10152_v12  ;;  %8465 = vmatpush3.bf16.msra.mxu1 %v9057_v22  ;;  %v9058_v12 = vld [vmem:[%s9474_s8 + $0x70] sm:$0xff]   ;;  %v9302_v28 = vpop.eup %9301  ;;  %v9076_v51 = vld [vmem:[%s9504_s12 + $0xc4] ss:$8 sps:$4 sm:$0xff]   ;;  %v9081_v22 = vld [vmem:[%s9494_s30 + $0x58] sm:$0xff]  }
0x1c12   : > { %4396 = vst.msk [vmem:[#allocation2 + $0x8] sm:$0xff] %vm1284_vm1, %v4394_v62  ;;  %8466 = vmatprep.subr.bf16.mxu1 %v9419_v5  ;;  %v9304_v43 = vpop.eup %9303  ;;  %v9073_v53 = vld [vmem:[%s9494_s30 + $0x48] sm:$0xff]  }
0x1c13   : > { %4395 = vst.msk [vmem:[#allocation2] sm:$0xff] %vm1284_vm1, %v4393_v6  ;;  %v4602_v26 = vpop.permute.xlu0 %4601  ;;  %v9306_v11 = vpop.eup %9305  ;;  %v9074_v62 = vld [vmem:[%s9504_s12 + $0xc0] ss:$8 sps:$4 sm:$0xff]   ;;  %8477 = vmatpush3.bf16.msra.mxu0 %v9073_v53  ;;  %v9080_v6 = vld [vmem:[%s9504_s12 + $0xd4] ss:$8 sps:$4 sm:$0xff]  }
0x1c14   : > { %4607 = vst.msk [vmem:[#allocation2] sm:$0xff] %vm1688_vm6, %v4602_v26  ;;  %v4604_v8 = vpop.permute.xlu1 %4603  ;;  %v9308_v14 = vpop.eup %9307  ;;  %8478 = vmatprep.subr.bf16.mxu0 %v9419_v5  ;;  %v9077_v26 = vld [vmem:[%s9494_s30 + $0x50] sm:$0xff]  }
0x1c15   : > { %4608 = vst.msk [vmem:[#allocation2 + $0x8] sm:$0xff] %vm1688_vm6, %v4604_v8  ;;  %8467 = vmatpush3.bf16.msra.mxu1 %v9058_v12  ;;  %v9078_v8 = vld [vmem:[%s9504_s12 + $0xd0] ss:$8 sps:$4 sm:$0xff]   ;;  %v9082_v12 = vld [vmem:[%s9504_s12 + $0xe0] ss:$8 sps:$4 sm:$0xff]  }
0x1c16   : > { %8468 = vmatprep.subr.bf16.mxu1 %v9419_v5 }
0x1c17   : > { %8479 = vmatpush3.bf16.msra.mxu0 %v9077_v26 }
0x1c18   : > { %8480 = vmatprep.subr.bf16.mxu0 %v9419_v5 }
0x1c19   : > { %8469 = vmatpush3.bf16.msra.mxu1 %v9059_v63  ;;  %v9090_v63 = vld [vmem:[%s9494_s30 + $0x70] sm:$0xff]  }
0x1c1a   : > { %5415 = vmatprep.subr.bf16.mxu1 %v9062_v35 }
0x1c1b   : > { %8481 = vmatpush3.bf16.msra.mxu0 %v9081_v22 }
0x1c1c   : > { %8482 = vmatprep.subr.bf16.mxu0 %v9419_v5 }
0x1c43   : > { %v8439_v7 = vpop.f32.mrb[52].mxu0 }
0x1c44   : > { %v4808_v10 = vmul.f32 %v9302_v28, %v8439_v7  ;;  %v4796_v54 = vpop.f32.mrb[53].mxu0  ;;  %v9088_v28 = vld [vmem:[%s9504_s12 + $0xf4] ss:$8 sps:$4 sm:$0xff]   ;;  %v9085_v7 = vld [vmem:[%s9494_s30 + $0x60] sm:$0xff]  }
0x1c45   : > { %v4807_v19 = vmul.f32 %v9304_v43, %v4796_v54  ;;  %8483 = vmatpush3.bf16.msra.mxu0 %v9085_v7  ;;  %v9089_v54 = vld [vmem:[%s9494_s30 + $0x68] sm:$0xff]   ;;  %v9091_v43 = vld [vmem:[%s9494_s30 + $0x78] sm:$0xff]  }
0x1c46   : > { %4813 = vrot.lane.b32.xlu1 %v4808_v10, %s10629_s3  ;;  %v9086_v10 = vld [vmem:[%s9504_s12 + $0xf0] ss:$8 sps:$4 sm:$0xff]   ;;  %8484 = vmatprep.subr.bf16.mxu0 %v9419_v5 }
0x1c47   : > { %v8453_v13 = vpop.f32.mrb[54].mxu0 }
0x1c48   : > { %v5018_v20 = vmul.f32 %v9306_v11, %v8453_v13  ;;  %v5006_v1 = vpop.f32.mrb[55].mxu0 }
0x1c49   : > { %v5017_v50 = vmul.f32 %v9308_v14, %v5006_v1  ;;  %8485 = vmatpush3.bf16.msra.mxu0 %v9089_v54 }
0x1c4a   : > { %4811 = vrot.lane.b32.xlu1 %v4807_v19, %s10629_s3  ;;  %8486 = vmatprep.subr.bf16.mxu0 %v9419_v5 }
0x1c4b   : > { %5021 = vrot.lane.b32.xlu0 %v5017_v50, %s9424_s16 }
0x1c4d   : > { %8487 = vmatpush3.bf16.msra.mxu0 %v9090_v63 }
0x1c4e   : > { %5023 = vrot.lane.b32.xlu1 %v5018_v20, %s9424_s16  ;;  %8488 = vmatprep.subr.bf16.mxu0 %v9419_v5 }
0x1c51   : > { %8489 = vmatpush3.bf16.msra.mxu0 %v9091_v43 }
0x1cb8   : > { %v4814_v9 = vpop.permute.xlu1 %4813 }
0x1cb9   : > { %4818 = vst.msk [vmem:[#allocation2 + $0x8] sm:$0xff] %vm1899_vm7, %v4814_v9  ;;  %v7699_v9 = vld [vmem:[%s9484_s19 + $0x1] ss:$0 sm:$0xff] }
0x1cbc   : > { %v4812_v52 = vpop.permute.xlu1 %4811 }
0x1cbd   : > { %4817 = vst.msk [vmem:[#allocation2] sm:$0xff] %vm1899_vm7, %v4812_v52  ;;  %v5022_v0 = vpop.permute.xlu0 %5021 }
0x1cbe   : > { %5027 = vst.msk [vmem:[#allocation2] sm:$0xff] %vm2110_vm8, %v5022_v0 }
0x1cc0   : > { %v5024_v21 = vpop.permute.xlu1 %5023 }
0x1cc1   : > { %5028 = vst.msk [vmem:[#allocation2 + $0x8] sm:$0xff] %vm2110_vm8, %v5024_v21 }
0x1cc5   : > { %v5029_v17 = vld [vmem:[#allocation2] sm:$0xff] }
0x1cc8   : > { %v5030_v23 = vld [vmem:[#allocation2 + $0x8] sm:$0xff] }
0x1cc9   : > { %v5050_v25 = vpack.c.bf16 %v5030_v23, %v5029_v17  ;;  %v7700_v17 = vld [vmem:[%s9489_s24 + $0x1] ss:$0 sm:$0xff] }
0x1ccb   : > { %8471 = vmatmul.mubr.bf16.vlgmr.msra.gmra.mrb[32].mxu1 %v5050_v25 }
0x1ccc   : > { %5447 = vmatprep.mubr.bf16.mxu1 %v9420_v31  ;;  %5416 = vmatpush1.bf16.msra.mxu1 %v9060_v48 }
0x1ccd   : > { %5417 = vmatprep.subr.bf16.mxu1 %v9065_v37 }
0x1d9e   : > { %v5139_v29 = vpop.f32.mrb[32].mxu1 }
0x1d9f   : > { %v5140_v30 = vadd.f32 %v7688_v49, %v5139_v29  ;;  %v8472_v32 = vpop.f32.mrb[33].mxu1 }
0x1da0   : > { %v5142_v15 = vpop.f32.mrb[34].mxu1 }
0x1da1   : > { %v10253_v33 = vadd.f32 %v5140_v30, %v10070_v18  ;;  %v5143_v2 = vadd.f32 %v7688_v49, %v5142_v15  ;;  %v8473_v38 = vpop.f32.mrb[35].mxu1  ;;  %v9063_v18 = vld [vmem:[%s9504_s12 + $0x90] ss:$8 sps:$4 sm:$0xff]   ;;  %v7743_v30 = vld [vmem:[%s9509_s20 + $0x2] sm:$0x3] }
0x1da2   : > { %5418 = vmatpush1.bf16.msra.mxu1 %v9063_v18  ;;  %v5328_v32 = vrot.slane %v7743_v30, %v9655_v56  ;;  %v5332_v15 = vrot.slane %v7743_v30, %v9662_v59 }
0x1da3   : > { %v10256_v34 = vadd.f32 %v5143_v2, %v10074_v42  ;;  %5152 = vadd.xlane.f32.xlu0 %v10253_v33  ;;  %v9066_v42 = vld [vmem:[%s9504_s12 + $0xa0] ss:$8 sps:$4 sm:$0xff]   ;;  %5419 = vmatprep.subr.bf16.mxu1 %v9068_v41 }
0x1da5   : > { %5154 = vadd.xlane.f32.xlu1 %v10256_v34 }
0x1da6   : > { %5420 = vmatpush1.bf16.msra.mxu1 %v9066_v42 }
0x1da7   : > { %5421 = vmatprep.subr.bf16.mxu1 %v9072_v4 }
0x1daa   : > { %5422 = vmatpush1.bf16.msra.mxu1 %v9070_v3 }
0x1dab   : > { %5423 = vmatprep.subr.bf16.mxu1 %v9076_v51 }
0x1dae   : > { %5424 = vmatpush1.bf16.msra.mxu1 %v9074_v62 }
0x1daf   : > { %5425 = vmatprep.subr.bf16.mxu1 %v9080_v6  ;;  %v10309_v6 = vld [vmem:[%s9893_s26] ss:$0 sm:$0xff]  ;;  %s7937_s26 = sshll.u32 %s10634_s10, 4 }
0x1db2   : > { %5426 = vmatpush1.bf16.msra.mxu1 %v9078_v8 }
0x1db3   : > { %5427 = vmatprep.subr.bf16.mxu1 %v9084_v27 }
0x1db6   : > { %5428 = vmatpush1.bf16.msra.mxu1 %v9082_v12 }
0x1db7   : > { %5429 = vmatprep.subr.bf16.mxu1 %v9088_v28 }
0x1dba   : > { %5430 = vmatpush1.bf16.msra.mxu1 %v9086_v10 }
0x1dbd   : > { %5448 = vmatmul.mubr.bf16.vlgmr.msra.gmra.mrb[36].mxu1 %v9865_v61 }
0x1e30   : > { %v5153_v44 = vpop.xlane.xlu0 %5152 }
0x1e31   : > { %v5156_v57 = vmul.f32 0.0078125, %v5153_v44 }
0x1e32   : > { %v5155_v36 = vpop.xlane.xlu1 %5154 }
0x1e33   : > { %v5158_v39 = vsub.f32 %v10253_v33, %v5156_v57  ;;  %v5157_v45 = vmul.f32 0.0078125, %v5155_v36  ;;  %v7718_v57 = vld [vmem:[%s9499_s6 + $0x1] ss:$0 sm:$0xff] }
0x1e35   : > { %v5159_v46 = vsub.f32 %v10256_v34, %v5157_v45  ;;  %v5160_v60 = vmul.f32 %v5158_v39, %v5158_v39 }
0x1e37   : > { %5162 = vadd.xlane.f32.xlu0 %v5160_v60  ;;  %v5161_v47 = vmul.f32 %v5159_v46, %v5159_v46 }
0x1e3b   : > { %5164 = vadd.xlane.f32.xlu0 %v5161_v47 }
0x1e90   : > { %v5449_v2 = vpop.f32.mrb[36].mxu1 }
0x1e91   : > { %v5450_v38 = vadd.f32 %v5449_v2, %v5328_v32  ;;  %v5451_v48 = vpop.f32.mrb[37].mxu1 }
0x1e92   : > { %v5453_v35 = vpop.f32.mrb[38].mxu1  ;;  %v5452_v37 = vadd.f32 %v5451_v48, %v5332_v15 }
0x1e93   : > { %v5454_v40 = vadd.f32 %v5453_v35, %v5328_v32  ;;  %v5455_v18 = vpop.f32.mrb[39].mxu1 }
0x1e94   : > { %v5456_v41 = vadd.f32 %v5455_v18, %v5332_v15 }
0x1e95   : > { %v8690_v42 = vpack.c.bf16 %v5454_v40, %v5450_v38  ;;  %v8868_v3 = vpack.i.bf16 %v5454_v40, %v5450_v38 }
0x1e96   : > { %v8696_v4 = vpack.c.bf16 %v5456_v41, %v5452_v37  ;;  %v10303_v44 = vpack.i.bf16 %v5456_v41, %v5452_v37 }
0x1e97   : > { %8692 = vmatprep.subr.msk.bf16.mxu0 %vm9673_vm2, %v8690_v42 }
0x1ec4   : > { %v5163_v11 = vpop.xlane.xlu0 %5162 }
0x1ec5   : > { %v5166_v13 = vmul.f32 0.0078125, %v5163_v11 }
0x1ec7   : > { %v5168_v14 = vadd.f32 1e-05, %v5166_v13 }
0x1ec8   : > { %v5165_v19 = vpop.xlane.xlu0 %5164 }
0x1ec9   : > { %9309 = vrsqrt.f32 %v5168_v14  ;;  %v5167_v20 = vmul.f32 0.0078125, %v5165_v19 }
0x1ecb   : > { %v5169_v1 = vadd.f32 1e-05, %v5167_v20 }
0x1ecd   : > { %9311 = vrsqrt.f32 %v5169_v1 }
0x1ed3   : > { %v9310_v61 = vpop.eup %9309 }
0x1ed4   : > { %v5172_v50 = vmul.f32 %v9310_v61, %v5158_v39 }
0x1ed6   : > { %v5180_v21 = vmul.f32 %v7699_v9, %v5172_v50 }
0x1ed7   : > { %v9312_v52 = vpop.eup %9311 }
0x1ed8   : > { %v5173_v0 = vmul.f32 %v9312_v52, %v5159_v46  ;;  %v5188_v25 = vadd.f32 %v7700_v17, %v5180_v21 }
0x1eda   : > { %v5181_v23 = vmul.f32 %v7699_v9, %v5173_v0 }
0x1edc   : > { %v5189_v49 = vadd.f32 %v7700_v17, %v5181_v23 }
0x1ede   : > { %v5209_v29 = vpack.c.bf16 %v5189_v49, %v5188_v25 }
0x1ee0   : > { %8491 = vmatmul.mubr.bf16.vlgmr.msra.gmra.mrb[56].mxu0 %v5209_v29 }
0x1ee1   : > { %8695 = vmatpush3.bf16.xpose.msk.msra.mxu0 %vm9673_vm2, %v8690_v42 }
0x1ee2   : > { %8697 = vmatprep.subr.bf16.mxu0 %v8696_v4 }
0x1fb3   : > { %v5298_v36 = vpop.f32.mrb[56].mxu0 }
0x1fb4   : > { %v5299_v39 = vadd.f32 %v7718_v57, %v5298_v36  ;;  %v8492_v45 = vpop.f32.mrb[57].mxu0 }
0x1fb5   : > { %v5301_v46 = vpop.f32.mrb[58].mxu0 }
0x1fb6   : > { %v5458_v60 = vmul.f32 0.17677669, %v5299_v39  ;;  %v5302_v47 = vadd.f32 %v7718_v57, %v5301_v46  ;;  %v8493_v51 = vpop.f32.mrb[59].mxu0 }
0x1fb8   : > { %v5459_v53 = vmul.f32 0.17677669, %v5302_v47  ;;  %8498 = vmatprep.mubr.msk.f32.mxu0 %vm1284_vm1, %v5458_v60 }
0x1fba   : > { %8499 = vmatmul.mubr.msk.f32.vlgmr.msra.gmra.mrb[60].mxu0 %vm1284_vm1, %v5459_v53 }
0x1fbb   : > { %8699 = vmatpush3.bf16.msra.mxu0 %v8696_v4 }
0x208d   : > { %v8500_v62 = vpop.f32.mrb[60].mxu0 }
0x208e   : > { %v5544_v26 = vadd.f32 %v10309_v6, %v8500_v62  ;;  %v5538_v8 = vpop.f32.mrb[61].mxu0 }
0x208f   : > { %v5539_v27 = vadd.f32 %v10309_v6, %v5538_v8 }
0x2090   : > { %v5550_v22 = vsel %vm1372_vm5, %v5544_v26, -inf }
0x2091   : > { %5551 = vmax.xlane.f32.xlu1 %v5550_v22  ;;  %v5547_v12 = vsel %vm1372_vm5, %v5539_v27, -inf }
0x2092   : > { %5548 = vmax.xlane.f32.xlu0 %v5547_v12 }
0x20a2   : > { %5652 = vrot.lane.b32.xlu1 %v5458_v60, %s9424_s16 }
0x20a6   : > { %5654 = vrot.lane.b32.xlu1 %v5459_v53, %s9424_s16 }
0x20a8   : > { %8869 = vrot.lane.b32.xlu0 %v8868_v3, %s9424_s16 }
0x20aa   : > { %8879 = vrot.lane.b32.xlu1 %v8868_v3, %s10629_s3 }
0x211e   : > { %v5552_v28 = vpop.xlane.xlu1 %5551 }
0x211f   : > { %v5554_v7 = vsub.f32 %v5544_v26, %v5552_v28  ;;  %v5549_v10 = vpop.xlane.xlu0 %5548 }
0x2120   : > { %v5553_v54 = vsub.f32 %v5539_v27, %v5549_v10 }
0x2121   : > { %v5557_v63 = vmul.f32 1.442695, %v5554_v7 }
0x2122   : > { %v5555_v43 = vmul.f32 1.442695, %v5553_v54  ;;  %v5653_v61 = vpop.permute.xlu1 %5652 }
0x2123   : > { %v8870_v11 = vpop.permute.xlu0 %8869 }
0x2124   : > { %9313 = vpow2.f32 %v5555_v43  ;;  %v8872_v13 = vunpack.i.h.bf16 %v8870_v11  ;;  %v8871_v14 = vunpack.i.l.bf16 %v8870_v11 }
0x2125   : > { %9315 = vpow2.f32 %v5557_v63 }
0x2126   : > { %v8700_v19 = vpack.c.bf16 %v8872_v13, %v8871_v14  ;;  %v5655_v50 = vpop.permute.xlu1 %5654 }
0x2128   : > { %8702 = vmatprep.subr.msk.bf16.mxu0 %vm9673_vm2, %v8700_v19 }
0x212a   : > { %v8880_v29 = vpop.permute.xlu1 %8879 }
0x212b   : > { %v8882_v37 = vunpack.i.h.bf16 %v8880_v29  ;;  %v8881_v40 = vunpack.i.l.bf16 %v8880_v29 }
0x212d   : > { %v8710_v45 = vpack.c.bf16 %v8882_v37, %v8881_v40 }
0x212e   : > { %v10321_v20 = vpop.eup %9313 }
0x212f   : > { %v10323_v1 = vpop.eup %9315  ;;  %8505 = vmatprep.mubr.msk.f32.mxu0 %vm1372_vm5, %v10321_v20 }
0x2130   : > { %8506 = vmatmul.mubr.msk.f32.vlgmr.msra.gmra.mrb[62].mxu0 %vm1372_vm5, %v10323_v1 }
0x2131   : > { %8705 = vmatpush3.bf16.xpose.msk.msra.mxu0 %vm9673_vm2, %v8700_v19  ;;  %8512 = vmatprep.mubr.msk.f32.mxu0 %vm1284_vm1, %v5653_v61 }
0x2138   : > { %8513 = vmatmul.mubr.msk.f32.vlgmr.msra.gmra.mrb[64].mxu0 %vm1284_vm1, %v5655_v50 }
0x2203   : > { %v10333_v9 = vpop.f32.mrb[62].mxu0 }
0x2204   : > { %v10335_v52 = vpop.f32.mrb[63].mxu0 }
0x220b   : > { %v8514_v0 = vpop.f32.mrb[64].mxu0 }
0x220c   : > { %v5740_v21 = vadd.f32 %v10309_v6, %v8514_v0  ;;  %v5734_v17 = vpop.f32.mrb[65].mxu0 }
0x220d   : > { %v5735_v23 = vadd.f32 %v10309_v6, %v5734_v17 }
0x220e   : > { %v5746_v25 = vsel %vm1372_vm5, %v5740_v21, -inf }
0x220f   : > { %5747 = vmax.xlane.f32.xlu0 %v5746_v25  ;;  %v5743_v49 = vsel %vm1372_vm5, %v5735_v23, -inf }
0x2210   : > { %5744 = vmax.xlane.f32.xlu1 %v5743_v49 }
0x2221   : > { %8884 = vrot.lane.b32.xlu1 %v8868_v3, %s10628_s15 }
0x2225   : > { %8874 = vrot.lane.b32.xlu0 %v10303_v44, %s9424_s16  ;;  %5866 = vrot.lane.b32.xlu1 %v5459_v53, %s10629_s3 }
0x2229   : > { %5864 = vrot.lane.b32.xlu0 %v5458_v60, %s10629_s3  ;;  %6076 = vrot.lane.b32.xlu1 %v5459_v53, %s10628_s15 }
0x222d   : > { %6074 = vrot.lane.b32.xlu0 %v5458_v60, %s10628_s15 }
0x229c   : > { %v5748_v30 = vpop.xlane.xlu0 %5747 }
0x229d   : > { %v5750_v32 = vsub.f32 %v5740_v21, %v5748_v30  ;;  %v5745_v15 = vpop.xlane.xlu1 %5744 }
0x229e   : > { %v5749_v2 = vsub.f32 %v5735_v23, %v5745_v15 }
0x229f   : > { %v5753_v38 = vmul.f32 1.442695, %v5750_v32 }
0x22a0   : > { %v5751_v48 = vmul.f32 1.442695, %v5749_v2  ;;  %v8875_v35 = vpop.permute.xlu0 %8874 }
0x22a1   : > { %v8877_v18 = vunpack.i.h.bf16 %v8875_v35  ;;  %v8876_v41 = vunpack.i.l.bf16 %v8875_v35  ;;  %v8885_v42 = vpop.permute.xlu1 %8884 }
0x22a2   : > { %9317 = vpow2.f32 %v5751_v48  ;;  %v8887_v4 = vunpack.i.h.bf16 %v8885_v42  ;;  %v8886_v3 = vunpack.i.l.bf16 %v8885_v42 }
0x22a3   : > { %9319 = vpow2.f32 %v5753_v38  ;;  %v8706_v57 = vpack.c.bf16 %v8877_v18, %v8876_v41 }
0x22a4   : > { %v8720_v36 = vpack.c.bf16 %v8887_v4, %v8886_v3  ;;  %v5865_v39 = vpop.permute.xlu0 %5864 }
0x22a5   : > { %8707 = vmatprep.subr.bf16.mxu0 %v8706_v57  ;;  %v5867_v46 = vpop.permute.xlu1 %5866 }
0x22a6   : > { %8709 = vmatpush3.bf16.msra.mxu0 %v8706_v57  ;;  %8722 = vmatprep.subr.msk.bf16.mxu1 %vm9673_vm2, %v8720_v36 }
0x22a7   : > { %8712 = vmatprep.subr.msk.bf16.mxu0 %vm9673_vm2, %v8710_v45  ;;  %8725 = vmatpush3.bf16.xpose.msk.msra.mxu1 %vm9673_vm2, %v8720_v36 }
0x22a8   : > { %v6075_v60 = vpop.permute.xlu0 %6074  ;;  %8550 = vmatprep.subr.bf16.mxu1 %v9419_v5 }
0x22a9   : > { %8540 = vmatprep.mubr.msk.f32.mxu1 %vm1284_vm1, %v6075_v60  ;;  %v6077_v53 = vpop.permute.xlu1 %6076 }
0x22ac   : > { %v9318_v47 = vpop.eup %9317 }
0x22ad   : > { %v9320_v51 = vpop.eup %9319  ;;  %8519 = vmatprep.mubr.msk.f32.mxu0 %vm1372_vm5, %v9318_v47  ;;  %v5755_v13 = vsel %vm1372_vm5, %v9318_v47, 0.0 }
0x22ae   : > { %8520 = vmatmul.mubr.msk.f32.vlgmr.msra.gmra.mrb[66].mxu0 %vm1372_vm5, %v9320_v51  ;;  %8541 = vmatmul.mubr.msk.f32.vlgmr.msra.gmra.mrb[40].mxu1 %vm1284_vm1, %v6077_v53  ;;  %v5758_v14 = vsel %vm1372_vm5, %v9320_v51, 0.0 }
0x22af   : > { %8715 = vmatpush3.bf16.xpose.msk.msra.mxu0 %vm9673_vm2, %v8710_v45  ;;  %8526 = vmatprep.mubr.msk.f32.mxu0 %vm1284_vm1, %v5865_v39  ;;  %v5562_v39 = vsel %vm1372_vm5, %v10323_v1, 0.0  ;;  %v5559_v45 = vsel %vm1372_vm5, %v10321_v20, 0.0  ;;  %v9092_v1 = vld [vmem:[%s10620_s28 + $0x40] sm:$0xff]   ;;  %v9093_v20 = vld [vmem:[%s10620_s28 + $0x48] sm:$0xff]  }
0x22b0   : > { %8566 = vmatprep.mubr.msk.bf16.mxu1 %vm9421_vm0, %v9419_v5  ;;  %8551 = vmatpush3.bf16.msra.mxu1 %v9092_v1 }
0x22b1   : > { %8552 = vmatprep.subr.bf16.mxu1 %v9419_v5 }
0x22b4   : > { %8553 = vmatpush3.bf16.msra.mxu1 %v9093_v20 }
0x22b5   : > { %8554 = vmatprep.subr.bf16.mxu1 %v9419_v5 }
0x22b6   : > { %8527 = vmatmul.mubr.msk.f32.vlgmr.msra.gmra.mrb[68].mxu0 %vm1284_vm1, %v5867_v46 }
0x2381   : > { %v10365_v62 = vpop.f32.mrb[66].mxu0  ;;  %v8542_v26 = vpop.f32.mrb[40].mxu1 }
0x2382   : > { %v10367_v8 = vpop.f32.mrb[67].mxu0  ;;  %v6156_v27 = vpop.f32.mrb[41].mxu1  ;;  %v6162_v12 = vadd.f32 %v10309_v6, %v8542_v26 }
0x2383   : > { %v6157_v22 = vadd.f32 %v10309_v6, %v6156_v27  ;;  %v9094_v27 = vld [vmem:[%s10620_s28 + $0x50] sm:$0xff]  }
0x2384   : > { %v6168_v7 = vsel %vm1372_vm5, %v6162_v12, -inf  ;;  %8555 = vmatpush3.bf16.msra.mxu1 %v9094_v27 }
0x2385   : > { %v6165_v16 = vsel %vm1372_vm5, %v6157_v22, -inf  ;;  %8556 = vmatprep.subr.bf16.mxu1 %v9419_v5 }
0x2386   : > { %6166 = vmax.xlane.f32.xlu0 %v6165_v16 }
0x2389   : > { %v8528_v28 = vpop.f32.mrb[68].mxu0 }
0x238a   : > { %v5952_v10 = vadd.f32 %v10309_v6, %v8528_v28  ;;  %v5946_v54 = vpop.f32.mrb[69].mxu0  ;;  %6169 = vmax.xlane.f32.xlu0 %v6168_v7 }
0x238b   : > { %v5947_v63 = vadd.f32 %v10309_v6, %v5946_v54 }
0x238c   : > { %v5958_v43 = vsel %vm1372_vm5, %v5952_v10, -inf }
0x238d   : > { %5959 = vmax.xlane.f32.xlu1 %v5958_v43  ;;  %v5955_v11 = vsel %vm1372_vm5, %v5947_v63, -inf }
0x238e   : > { %5956 = vmax.xlane.f32.xlu0 %v5955_v11 }
0x239e   : > { %8894 = vrot.lane.b32.xlu1 %v10303_v44, %s10628_s15 }
0x23a4   : > { %8889 = vrot.lane.b32.xlu0 %v10303_v44, %s10629_s3 }
0x23c2   : > { %5756 = vadd.xlane.f32.xlu1 %v5755_v13 }
0x23c3   : > { %5759 = vadd.xlane.f32.xlu0 %v5758_v14  ;;  %v9096_v14 = vld [vmem:[%s10620_s28 + $0x60] sm:$0xff]  }
0x2413   : > { %v6167_v19 = vpop.xlane.xlu0 %6166 }
0x2414   : > { %v6171_v50 = vsub.f32 %v6157_v22, %v6167_v19  ;;  %v9095_v22 = vld [vmem:[%s10620_s28 + $0x58] sm:$0xff]  }
0x2415   : > { %8557 = vmatpush3.bf16.msra.mxu1 %v9095_v22  ;;  %v9108_v22 = vld [vmem:[%s10622_s2 + $0xa4] ss:$8 sps:$4 sm:$0xff]  }
0x2416   : > { %v6173_v29 = vmul.f32 1.442695, %v6171_v50  ;;  %8558 = vmatprep.subr.bf16.mxu1 %v9419_v5 }
0x2417   : > { %v6170_v6 = vpop.xlane.xlu0 %6169 }
0x2418   : > { %v6172_v61 = vsub.f32 %v6162_v12, %v6170_v6 }
0x2419   : > { %8559 = vmatpush3.bf16.msra.mxu1 %v9096_v14 }
0x241a   : > { %v5960_v0 = vpop.xlane.xlu1 %5959  ;;  %v6175_v25 = vmul.f32 1.442695, %v6172_v61  ;;  %8560 = vmatprep.subr.bf16.mxu1 %v9419_v5 }
0x241b   : > { %v5962_v21 = vsub.f32 %v5952_v10, %v5960_v0  ;;  %v5957_v17 = vpop.xlane.xlu0 %5956  ;;  %v9099_v0 = vld [vmem:[%s10620_s28 + $0x78] sm:$0xff]  }
0x241c   : > { %v5961_v23 = vsub.f32 %v5947_v63, %v5957_v17 }
0x241d   : > { %v5965_v49 = vmul.f32 1.442695, %v5962_v21 }
0x241e   : > { %v5963_v30 = vmul.f32 1.442695, %v5961_v23  ;;  %v8895_v32 = vpop.permute.xlu1 %8894 }
0x241f   : > { %9321 = vpow2.f32 %v5965_v49  ;;  %v8897_v44 = vunpack.i.h.bf16 %v8895_v32  ;;  %v8890_v15 = vpop.permute.xlu0 %8889  ;;  %v8896_v2 = vunpack.i.l.bf16 %v8895_v32 }
0x2420   : > { %9323 = vpow2.f32 %v5963_v30  ;;  %v8892_v38 = vunpack.i.h.bf16 %v8890_v15  ;;  %v8891_v48 = vunpack.i.l.bf16 %v8890_v15 }
0x2421   : > { %9325 = vpow2.f32 %v6175_v25  ;;  %v8726_v37 = vpack.c.bf16 %v8897_v44, %v8896_v2 }
0x2422   : > { %9327 = vpow2.f32 %v6173_v29  ;;  %v8716_v35 = vpack.c.bf16 %v8892_v38, %v8891_v48 }
0x2424   : > { %8717 = vmatprep.subr.bf16.mxu0 %v8716_v35 }
0x2425   : > { %8719 = vmatpush3.bf16.msra.mxu0 %v8716_v35 }
0x2426   : > { %8727 = vmatprep.subr.bf16.mxu0 %v8726_v37 }
0x2429   : > { %v9322_v40 = vpop.eup %9321 }
0x242a   : > { %v9324_v18 = vpop.eup %9323  ;;  %v5970_v41 = vsel %vm1372_vm5, %v9322_v40, 0.0 }
0x242b   : > { %v9326_v42 = vpop.eup %9325  ;;  %5971 = vadd.xlane.f32.xlu1 %v5970_v41  ;;  %8533 = vmatprep.mubr.msk.f32.mxu0 %vm1372_vm5, %v9324_v18  ;;  %v5967_v4 = vsel %vm1372_vm5, %v9324_v18, 0.0 }
0x242c   : > { %v9328_v3 = vpop.eup %9327  ;;  %5968 = vadd.xlane.f32.xlu0 %v5967_v4  ;;  %8534 = vmatmul.mubr.msk.f32.vlgmr.msra.gmra.mrb[70].mxu0 %vm1372_vm5, %v9322_v40  ;;  %v6180_v57 = vsel %vm1372_vm5, %v9326_v42, 0.0  ;;  %v7801_v40 = vld [vmem:[%s10621_s1 + $0x1] ss:$0 sm:$0xff] }
0x242d   : > { %8729 = vmatpush3.bf16.msra.mxu0 %v8726_v37  ;;  %8547 = vmatprep.mubr.msk.f32.mxu0 %vm1372_vm5, %v9328_v3  ;;  %v6177_v36 = vsel %vm1372_vm5, %v9328_v3, 0.0 }
0x242f   : > { %6181 = vadd.xlane.f32.xlu1 %v6180_v57 }
0x2430   : > { %6178 = vadd.xlane.f32.xlu0 %v6177_v36  ;;  %8548 = vmatmul.mubr.msk.f32.vlgmr.msra.gmra.mrb[72].mxu0 %vm1372_vm5, %v9326_v42 }
0x2431   : > { %6623 = vmatprep.mubr.bf16.mxu0 %v9420_v31 }
0x2433   : > { %5563 = vadd.xlane.f32.xlu1 %v5562_v39 }
0x2434   : > { %5560 = vadd.xlane.f32.xlu0 %v5559_v45  ;;  %v9100_v45 = vld [vmem:[%s10622_s2 + $0x80] ss:$8 sps:$4 sm:$0xff]  }
0x244f   : > { %v5757_v46 = vpop.xlane.xlu1 %5756 }
0x2450   : > { %9329 = vrcp.f32 %v5757_v46  ;;  %v5760_v60 = vpop.xlane.xlu0 %5759  ;;  %v9102_v46 = vld [vmem:[%s10622_s2 + $0x84] ss:$8 sps:$4 sm:$0xff]  }
0x2451   : > { %9331 = vrcp.f32 %v5760_v60  ;;  %v9105_v60 = vld [vmem:[%s10622_s2 + $0x94] ss:$8 sps:$4 sm:$0xff]   ;;  %6591 = vmatprep.subr.bf16.mxu0 %v9102_v46 }
0x2452   : > { %6592 = vmatpush1.bf16.msra.mxu0 %v9100_v45  ;;  %v9138_v45 = vld [vmem:[%s10625_s22 + $0xf8] sm:$0xff]  }
0x2453   : > { %6593 = vmatprep.subr.bf16.mxu0 %v9105_v60  ;;  %v9139_v46 = vld [vmem:[%s10625_s22 + $0xb8] sm:$0xff]   ;;  %v7830_v60 = vld [vmem:[%s10626_s23 + $0x2] sm:$0x3] }
0x245a   : > { %v9330_v47 = vpop.eup %9329 }
0x245b   : > { %v9332_v51 = vpop.eup %9331  ;;  %v5852_v53 = vmul.f32 %v9330_v47, %v10367_v8  ;;  %v9103_v47 = vld [vmem:[%s10622_s2 + $0x90] ss:$8 sps:$4 sm:$0xff]  }
0x245c   : > { %v5853_v26 = vmul.f32 %v9332_v51, %v10365_v62  ;;  %6594 = vmatpush1.bf16.msra.mxu0 %v9103_v47  ;;  %v6504_v47 = vrot.slane %v7830_v60, %v9655_v56 }
0x245d   : > { %5856 = vrot.lane.b32.xlu0 %v5852_v53, %s10628_s15  ;;  %6595 = vmatprep.subr.bf16.mxu0 %v9108_v22 }
0x245e   : > { %5858 = vrot.lane.b32.xlu1 %v5853_v26, %s10628_s15  ;;  %s10631_s15 = sld [smem:[#allocation15_spill]] }
0x24b8   : > { %v5972_v62 = vpop.xlane.xlu1 %5971 }
0x24b9   : > { %v5969_v8 = vpop.xlane.xlu0 %5968 }
0x24bc   : > { %v6182_v12 = vpop.xlane.xlu1 %6181 }
0x24bd   : > { %v6179_v16 = vpop.xlane.xlu0 %6178 }
0x24c0   : > { %v5564_v28 = vpop.xlane.xlu1 %5563 }
0x24c1   : > { %9333 = vrcp.f32 %v5564_v28  ;;  %v5561_v7 = vpop.xlane.xlu0 %5560  ;;  %v9112_v28 = vld [vmem:[%s10622_s2 + $0xc0] ss:$8 sps:$4 sm:$0xff]  }
0x24c2   : > { %9335 = vrcp.f32 %v5561_v7  ;;  %v9117_v7 = vld [vmem:[%s10622_s2 + $0xd4] ss:$8 sps:$4 sm:$0xff]  }
0x24c3   : > { %9337 = vrcp.f32 %v5972_v62  ;;  %v9106_v62 = vld [vmem:[%s10622_s2 + $0xa0] ss:$8 sps:$4 sm:$0xff]  }
0x24c4   : > { %9339 = vrcp.f32 %v5969_v8  ;;  %6596 = vmatpush1.bf16.msra.mxu0 %v9106_v62  ;;  %v9111_v8 = vld [vmem:[%s10622_s2 + $0xb4] ss:$8 sps:$4 sm:$0xff]  }
0x24c5   : > { %9341 = vrcp.f32 %v6182_v12  ;;  %v9109_v12 = vld [vmem:[%s10622_s2 + $0xb0] ss:$8 sps:$4 sm:$0xff]   ;;  %6597 = vmatprep.subr.bf16.mxu0 %v9111_v8 }
0x24c6   : > { %9343 = vrcp.f32 %v6179_v16  ;;  %v9114_v16 = vld [vmem:[%s10622_s2 + $0xc4] ss:$8 sps:$4 sm:$0xff]  }
0x24c8   : > { %6598 = vmatpush1.bf16.msra.mxu0 %v9109_v12 }
0x24c9   : > { %6599 = vmatprep.subr.bf16.mxu0 %v9114_v16 }
0x24cb   : > { %v9334_v10 = vpop.eup %9333 }
0x24cc   : > { %v9336_v54 = vpop.eup %9335  ;;  %v5649_v63 = vmul.f32 %v9334_v10, %v10333_v9  ;;  %v9097_v9 = vld [vmem:[%s10620_s28 + $0x68] sm:$0xff]   ;;  %6600 = vmatpush1.bf16.msra.mxu0 %v9112_v28  ;;  %v9115_v10 = vld [vmem:[%s10622_s2 + $0xd0] ss:$8 sps:$4 sm:$0xff]  }
0x24cd   : > { %v5648_v43 = vmul.f32 %v9336_v54, %v10335_v52  ;;  %8561 = vmatpush3.bf16.msra.mxu1 %v9097_v9  ;;  %v9098_v52 = vld [vmem:[%s10620_s28 + $0x70] sm:$0xff]   ;;  %v9338_v19 = vpop.eup %9337  ;;  %6601 = vmatprep.subr.bf16.mxu0 %v9117_v7  ;;  %v9120_v54 = vld [vmem:[%s10622_s2 + $0xe4] ss:$8 sps:$4 sm:$0xff]  }
0x24ce   : > { %5651 = vst.msk [vmem:[#allocation2 + $0x8] sm:$0xff] %vm1284_vm1, %v5649_v63  ;;  %8562 = vmatprep.subr.bf16.mxu1 %v9419_v5  ;;  %v9340_v21 = vpop.eup %9339  ;;  %v9118_v63 = vld [vmem:[%s10622_s2 + $0xe0] ss:$8 sps:$4 sm:$0xff]  }
0x24cf   : > { %5650 = vst.msk [vmem:[#allocation2] sm:$0xff] %vm1284_vm1, %v5648_v43  ;;  %v5857_v11 = vpop.permute.xlu0 %5856  ;;  %v9342_v17 = vpop.eup %9341  ;;  %v9123_v43 = vld [vmem:[%s10622_s2 + $0xf4] ss:$8 sps:$4 sm:$0xff]  }
0x24d0   : > { %5862 = vst.msk [vmem:[#allocation2] sm:$0xff] %vm1688_vm6, %v5857_v11  ;;  %v5859_v13 = vpop.permute.xlu1 %5858  ;;  %v9344_v25 = vpop.eup %9343  ;;  %6602 = vmatpush1.bf16.msra.mxu0 %v9115_v10  ;;  %v9121_v11 = vld [vmem:[%s10622_s2 + $0xf0] ss:$8 sps:$4 sm:$0xff]  }
0x24d1   : > { %5863 = vst.msk [vmem:[#allocation2 + $0x8] sm:$0xff] %vm1688_vm6, %v5859_v13  ;;  %8563 = vmatpush3.bf16.msra.mxu1 %v9098_v52  ;;  %6603 = vmatprep.subr.bf16.mxu0 %v9120_v54 }
0x24d2   : > { %8564 = vmatprep.subr.bf16.mxu1 %v9419_v5 }
0x24d4   : > { %6604 = vmatpush1.bf16.msra.mxu0 %v9118_v63 }
0x24d5   : > { %8565 = vmatpush3.bf16.msra.mxu1 %v9099_v0  ;;  %6605 = vmatprep.subr.bf16.mxu0 %v9123_v43  ;;  %v7812_v0 = vld [vmem:[%s10623_s0 + $0x1] ss:$0 sm:$0xff] }
0x24d8   : > { %6606 = vmatpush1.bf16.msra.mxu0 %v9121_v11 }
0x24ff   : > { %v8535_v6 = vpop.f32.mrb[70].mxu0 }
0x2500   : > { %v6063_v61 = vmul.f32 %v9338_v19, %v8535_v6  ;;  %v6051_v50 = vpop.f32.mrb[71].mxu0 }
0x2501   : > { %v6062_v49 = vmul.f32 %v9340_v21, %v6051_v50 }
0x2502   : > { %6068 = vrot.lane.b32.xlu1 %v6063_v61, %s10629_s3 }
0x2503   : > { %v8549_v23 = vpop.f32.mrb[72].mxu0 }
0x2504   : > { %v6273_v29 = vmul.f32 %v9342_v17, %v8549_v23  ;;  %v6261_v30 = vpop.f32.mrb[73].mxu0 }
0x2505   : > { %v6272_v32 = vmul.f32 %v9344_v25, %v6261_v30  ;;  %v7813_v25 = vld [vmem:[%s10624_s11 + $0x1] ss:$0 sm:$0xff] }
0x2506   : > { %6066 = vrot.lane.b32.xlu1 %v6062_v49, %s10629_s3  ;;  %s10630_s3 = sld [smem:[#allocation14_spill]] }
0x2507   : > { %6276 = vrot.lane.b32.xlu0 %v6272_v32, %s9424_s16 }
0x250a   : > { %6278 = vrot.lane.b32.xlu1 %v6273_v29, %s9424_s16  ;;  %s10632_s16 = sld [smem:[#allocation4_spill]] }
0x2574   : > { %v6069_v44 = vpop.permute.xlu1 %6068 }
0x2575   : > { %6073 = vst.msk [vmem:[#allocation2 + $0x8] sm:$0xff] %vm1899_vm7, %v6069_v44  ;;  %v9124_v44 = vld [vmem:[%s10625_s22 + $0xc0] sm:$0xff]  }
0x2576   : > { %8164 = vmatprep.subr.bf16.mxu1 %v9124_v44 }
0x2578   : > { %v6067_v15 = vpop.permute.xlu1 %6066 }
0x2579   : > { %6072 = vst.msk [vmem:[#allocation2] sm:$0xff] %vm1899_vm7, %v6067_v15  ;;  %v6277_v2 = vpop.permute.xlu0 %6276  ;;  %v9125_v15 = vld [vmem:[%s10625_s22 + $0x80] sm:$0xff]  }
0x257a   : > { %6282 = vst.msk [vmem:[#allocation2] sm:$0xff] %vm2110_vm8, %v6277_v2  ;;  %v9126_v2 = vld [vmem:[%s10625_s22 + $0xc8] sm:$0xff]  }
0x257c   : > { %v6279_v38 = vpop.permute.xlu1 %6278 }
0x257d   : > { %6283 = vst.msk [vmem:[#allocation2 + $0x8] sm:$0xff] %vm2110_vm8, %v6279_v38  ;;  %v9127_v38 = vld [vmem:[%s10625_s22 + $0x88] sm:$0xff]  }
0x2581   : > { %v6284_v48 = vld [vmem:[#allocation2] sm:$0xff] }
0x2584   : > { %v6285_v35 = vld [vmem:[#allocation2 + $0x8] sm:$0xff] }
0x2585   : > { %v6305_v37 = vpack.c.bf16 %v6285_v35, %v6284_v48  ;;  %v9128_v48 = vld [vmem:[%s10625_s22 + $0xd0] sm:$0xff]  }
0x2586   : > { %v9129_v35 = vld [vmem:[%s10625_s22 + $0x90] sm:$0xff]  }
0x2587   : > { %8567 = vmatmul.mubr.bf16.vlgmr.msra.gmra.mrb[44].mxu1 %v6305_v37  ;;  %v9130_v37 = vld [vmem:[%s10625_s22 + $0xd8] sm:$0xff]  }
0x2588   : > { %8165 = vmatpush3.bf16.msra.mxu1 %v9125_v15 }
0x2589   : > { %8166 = vmatprep.subr.bf16.mxu1 %v9126_v2 }
0x258c   : > { %8167 = vmatpush3.bf16.msra.mxu1 %v9127_v38 }
0x258d   : > { %8168 = vmatprep.subr.bf16.mxu1 %v9128_v48 }
0x2590   : > { %8169 = vmatpush3.bf16.msra.mxu1 %v9129_v35 }
0x2591   : > { %8170 = vmatprep.subr.bf16.mxu1 %v9130_v37 }
0x265a   : > { %v6394_v18 = vpop.f32.mrb[44].mxu1 }
0x265b   : > { %v6395_v41 = vadd.f32 %v7801_v40, %v6394_v18  ;;  %v8568_v42 = vpop.f32.mrb[45].mxu1  ;;  %v9132_v18 = vld [vmem:[%s10625_s22 + $0xe0] sm:$0xff]  }
0x265c   : > { %v6397_v4 = vpop.f32.mrb[46].mxu1  ;;  %v9134_v42 = vld [vmem:[%s10625_s22 + $0xe8] sm:$0xff]  }
0x265d   : > { %v10431_v3 = vadd.f32 %v6395_v41, %v10253_v33  ;;  %v6398_v57 = vadd.f32 %v7801_v40, %v6397_v4  ;;  %v8569_v36 = vpop.f32.mrb[47].mxu1  ;;  %v9131_v40 = vld [vmem:[%s10625_s22 + $0x98] sm:$0xff]   ;;  %v9133_v41 = vld [vmem:[%s10625_s22 + $0xa0] sm:$0xff]   ;;  %v9135_v4 = vld [vmem:[%s10625_s22 + $0xa8] sm:$0xff]  }
0x265e   : > { %8171 = vmatpush3.bf16.msra.mxu1 %v9131_v40  ;;  %v9137_v36 = vld [vmem:[%s10625_s22 + $0xb0] sm:$0xff]  }
0x265f   : > { %v10434_v39 = vadd.f32 %v6398_v57, %v10256_v34  ;;  %6407 = vadd.xlane.f32.xlu0 %v10431_v3  ;;  %8172 = vmatprep.subr.bf16.mxu1 %v9132_v18  ;;  %v9136_v57 = vld [vmem:[%s10625_s22 + $0xf0] sm:$0xff]  }
0x2661   : > { %6409 = vadd.xlane.f32.xlu1 %v10434_v39 }
0x2662   : > { %8173 = vmatpush3.bf16.msra.mxu1 %v9133_v41 }
0x2663   : > { %8174 = vmatprep.subr.bf16.mxu1 %v9134_v42 }
0x2666   : > { %8175 = vmatpush3.bf16.msra.mxu1 %v9135_v4  ;;  %v7880_v4 = vld [vmem:[%s10627_s18 + $0x1] ss:$0 sm:$0xff] }
0x2667   : > { %8176 = vmatprep.subr.bf16.mxu1 %v9136_v57 }
0x266a   : > { %8177 = vmatpush3.bf16.msra.mxu1 %v9137_v36 }
0x266b   : > { %8178 = vmatprep.subr.bf16.mxu1 %v9138_v45 }
0x266e   : > { %8179 = vmatpush3.bf16.msra.mxu1 %v9139_v46 }
0x26ec   : > { %v6408_v33 = vpop.xlane.xlu0 %6407 }
0x26ed   : > { %v6411_v51 = vmul.f32 0.0078125, %v6408_v33  ;;  %v6508_v33 = vrot.slane %v7830_v60, %v9662_v59 }
0x26ee   : > { %v6410_v34 = vpop.xlane.xlu1 %6409 }
0x26ef   : > { %v6413_v53 = vsub.f32 %v10431_v3, %v6411_v51  ;;  %v6412_v26 = vmul.f32 0.0078125, %v6410_v34 }
0x26f1   : > { %v6414_v1 = vsub.f32 %v10434_v39, %v6412_v26  ;;  %v6415_v20 = vmul.f32 %v6413_v53, %v6413_v53 }
0x26f3   : > { %6417 = vadd.xlane.f32.xlu0 %v6415_v20  ;;  %v6416_v27 = vmul.f32 %v6414_v1, %v6414_v1 }
0x26f7   : > { %6419 = vadd.xlane.f32.xlu0 %v6416_v27 }
0x2780   : > { %v6418_v13 = vpop.xlane.xlu0 %6417 }
0x2781   : > { %v6421_v14 = vmul.f32 0.0078125, %v6418_v13 }
0x2783   : > { %v6423_v9 = vadd.f32 1e-05, %v6421_v14 }
0x2784   : > { %v6420_v52 = vpop.xlane.xlu0 %6419 }
0x2785   : > { %9345 = vrsqrt.f32 %v6423_v9  ;;  %v6422_v19 = vmul.f32 0.0078125, %v6420_v52 }
0x2787   : > { %v6424_v6 = vadd.f32 1e-05, %v6422_v19 }
0x2789   : > { %9347 = vrsqrt.f32 %v6424_v6 }
0x278f   : > { %v9346_v61 = vpop.eup %9345 }
0x2790   : > { %v6427_v50 = vmul.f32 %v9346_v61, %v6413_v53 }
0x2792   : > { %v6435_v23 = vmul.f32 %v7812_v0, %v6427_v50 }
0x2793   : > { %v9348_v21 = vpop.eup %9347 }
0x2794   : > { %v6428_v17 = vmul.f32 %v9348_v21, %v6414_v1  ;;  %v6443_v29 = vadd.f32 %v7813_v25, %v6435_v23 }
0x2796   : > { %v6436_v49 = vmul.f32 %v7812_v0, %v6428_v17 }
0x2798   : > { %v6444_v30 = vadd.f32 %v7813_v25, %v6436_v49 }
0x279a   : > { %v6499_v32 = vpack.c.bf16 %v6444_v30, %v6443_v29 }
0x279c   : > { %6624 = vmatmul.mubr.bf16.vlgmr.msra.gmra.mrb[76].mxu0 %v6499_v32 }
0x279d   : > { %7104 = vmatprep.mubr.bf16.mxu0 %v9420_v31 }
0x286f   : > { %v6625_v51 = vpop.f32.mrb[76].mxu0 }
0x2870   : > { %v6626_v34 = vadd.f32 %v6625_v51, %v6504_v47  ;;  %v6627_v53 = vpop.f32.mrb[77].mxu0 }
0x2871   : > { %v6628_v26 = vadd.f32 %v6627_v53, %v6508_v33  ;;  %v6629_v1 = vpop.f32.mrb[78].mxu0  ;;  %v9142_v53 = vld [vmem:[%s9564_s17 + $0x4] ss:$16 sps:$4 sm:$0xff]  }
0x2872   : > { %v6634_v20 = vmul.f32 %v6626_v34, %v6626_v34  ;;  %v6630_v27 = vadd.f32 %v6629_v1, %v6504_v47  ;;  %v6631_v22 = vpop.f32.mrb[79].mxu0  ;;  %v9145_v1 = vld [vmem:[%s9564_s17 + $0xc] ss:$16 sps:$4 sm:$0xff]   ;;  %7072 = vmatprep.subr.bf16.mxu0 %v9142_v53 }
0x2873   : > { %v6635_v62 = vmul.f32 %v6628_v26, %v6628_v26  ;;  %v6632_v8 = vadd.f32 %v6631_v22, %v6508_v33  ;;  %7115 = vmatprep.subr.bf16.mxu1 %v9145_v1  ;;  %v9146_v22 = vld [vmem:[%s9564_s17 + $0x20] ss:$16 sps:$4 sm:$0xff]  }
0x2874   : > { %v6638_v12 = vmul.f32 %v6634_v20, %v6626_v34  ;;  %v6636_v16 = vmul.f32 %v6630_v27, %v6630_v27  ;;  %v9148_v20 = vld [vmem:[%s9564_s17 + $0x24] ss:$16 sps:$4 sm:$0xff]  }
0x2875   : > { %v6639_v28 = vmul.f32 %v6635_v62, %v6628_v26  ;;  %v6637_v7 = vmul.f32 %v6632_v8, %v6632_v8 }
0x2876   : > { %v6642_v10 = vmul.f32 0.044715, %v6638_v12  ;;  %v6640_v54 = vmul.f32 %v6636_v16, %v6630_v27 }
0x2877   : > { %v6643_v63 = vmul.f32 0.044715, %v6639_v28  ;;  %v6641_v43 = vmul.f32 %v6637_v7, %v6632_v8 }
0x2878   : > { %v6646_v11 = vadd.f32 %v6642_v10, %v6626_v34  ;;  %v6644_v13 = vmul.f32 0.044715, %v6640_v54  ;;  %v9154_v54 = vld [vmem:[%s9564_s17 + $0x44] ss:$16 sps:$4 sm:$0xff]  }
0x2879   : > { %v6647_v14 = vadd.f32 %v6643_v63, %v6628_v26  ;;  %v6645_v9 = vmul.f32 0.044715, %v6641_v43  ;;  %v9157_v63 = vld [vmem:[%s9564_s17 + $0x4c] ss:$16 sps:$4 sm:$0xff]   ;;  %v9152_v43 = vld [vmem:[%s9564_s17 + $0x40] ss:$16 sps:$4 sm:$0xff]  }
0x287a   : > { %v6650_v52 = vmul.f32 0.7978846, %v6646_v11  ;;  %v6648_v19 = vadd.f32 %v6644_v13, %v6630_v27  ;;  %v9155_v11 = vld [vmem:[%s9564_s17 + $0x48] ss:$16 sps:$4 sm:$0xff]   ;;  %v9160_v13 = vld [vmem:[%s9564_s17 + $0x64] ss:$16 sps:$4 sm:$0xff]  }
0x287b   : > { %v6651_v6 = vmul.f32 0.7978846, %v6647_v14  ;;  %v6649_v61 = vadd.f32 %v6645_v9, %v6632_v8  ;;  %v9163_v14 = vld [vmem:[%s9564_s17 + $0x6c] ss:$16 sps:$4 sm:$0xff]   ;;  %v9158_v9 = vld [vmem:[%s9564_s17 + $0x60] ss:$16 sps:$4 sm:$0xff]  }
0x287c   : > { %9349 = vtanh.f32 %v6650_v52  ;;  %v6652_v50 = vmul.f32 0.7978846, %v6648_v19  ;;  %v9161_v52 = vld [vmem:[%s9564_s17 + $0x68] ss:$16 sps:$4 sm:$0xff]   ;;  %v9166_v19 = vld [vmem:[%s9564_s17 + $0x84] ss:$16 sps:$4 sm:$0xff]  }
0x287d   : > { %9351 = vtanh.f32 %v6651_v6  ;;  %v6653_v0 = vmul.f32 0.7978846, %v6649_v61  ;;  %v9169_v6 = vld [vmem:[%s9564_s17 + $0x8c] ss:$16 sps:$4 sm:$0xff]   ;;  %v9164_v61 = vld [vmem:[%s9564_s17 + $0x80] ss:$16 sps:$4 sm:$0xff]  }
0x287e   : > { %9353 = vtanh.f32 %v6652_v50  ;;  %v9167_v50 = vld [vmem:[%s9564_s17 + $0x88] ss:$16 sps:$4 sm:$0xff]  }
0x287f   : > { %9355 = vtanh.f32 %v6653_v0  ;;  %v9172_v0 = vld [vmem:[%s9564_s17 + $0xa4] ss:$16 sps:$4 sm:$0xff]  }
0x2886   : > { %v9350_v21 = vpop.eup %9349 }
0x2887   : > { %v9352_v17 = vpop.eup %9351  ;;  %v6658_v23 = vadd.f32 1.0, %v9350_v21  ;;  %v9175_v21 = vld [vmem:[%s9564_s17 + $0xac] ss:$16 sps:$4 sm:$0xff]  }
0x2888   : > { %v9354_v25 = vpop.eup %9353  ;;  %v6659_v49 = vadd.f32 1.0, %v9352_v17  ;;  %v9170_v17 = vld [vmem:[%s9564_s17 + $0xa0] ss:$16 sps:$4 sm:$0xff]  }
0x2889   : > { %v9356_v29 = vpop.eup %9355  ;;  %v6662_v30 = vmul.f32 0.5, %v6658_v23  ;;  %v6660_v32 = vadd.f32 1.0, %v9354_v25  ;;  %v9173_v23 = vld [vmem:[%s9564_s17 + $0xa8] ss:$16 sps:$4 sm:$0xff]   ;;  %v9178_v25 = vld [vmem:[%s9564_s17 + $0xc4] ss:$16 sps:$4 sm:$0xff]  }
0x288a   : > { %v6661_v44 = vadd.f32 1.0, %v9356_v29  ;;  %v6663_v15 = vmul.f32 0.5, %v6659_v49  ;;  %v9181_v49 = vld [vmem:[%s9564_s17 + $0xcc] ss:$16 sps:$4 sm:$0xff]   ;;  %v9176_v29 = vld [vmem:[%s9564_s17 + $0xc0] ss:$16 sps:$4 sm:$0xff]  }
0x288b   : > { %v6664_v2 = vmul.f32 0.5, %v6660_v32  ;;  %v6666_v48 = vmul.f32 %v6662_v30, %v6626_v34  ;;  %v9140_v34 = vld [vmem:[%s9564_s17] ss:$16 sps:$4 sm:$0xff]   ;;  %v9179_v30 = vld [vmem:[%s9564_s17 + $0xc8] ss:$16 sps:$4 sm:$0xff]  }
0x288c   : > { %v6665_v38 = vmul.f32 0.5, %v6661_v44  ;;  %v6667_v37 = vmul.f32 %v6663_v15, %v6628_v26  ;;  %v9143_v26 = vld [vmem:[%s9564_s17 + $0x8] ss:$16 sps:$4 sm:$0xff]   ;;  %7073 = vmatpush1.bf16.msra.mxu0 %v9140_v34  ;;  %v9184_v32 = vld [vmem:[%s9564_s17 + $0xe4] ss:$16 sps:$4 sm:$0xff]   ;;  %v6906_v34 = vsub.s32 3, %v9652_v55 }
0x288d   : > { %v6668_v35 = vmul.f32 %v6664_v2, %v6630_v27  ;;  %v9151_v27 = vld [vmem:[%s9564_s17 + $0x2c] ss:$16 sps:$4 sm:$0xff]   ;;  %7074 = vmatprep.subr.bf16.mxu0 %v9148_v20  ;;  %v9182_v15 = vld [vmem:[%s9564_s17 + $0xe0] ss:$16 sps:$4 sm:$0xff]   ;;  %v9185_v2 = vld [vmem:[%s9564_s17 + $0xe8] ss:$16 sps:$4 sm:$0xff]  }
0x288e   : > { %v6669_v40 = vmul.f32 %v6665_v38, %v6632_v8  ;;  %v9187_v44 = vld [vmem:[%s9564_s17 + $0xec] ss:$16 sps:$4 sm:$0xff]  }
0x288f   : > { %v6670_v18 = vpack.c.bf16 %v6668_v35, %v6666_v48 }
0x2890   : > { %v6671_v41 = vpack.c.bf16 %v6669_v40, %v6667_v37  ;;  %7075 = vmatpush1.bf16.msra.mxu0 %v9146_v22 }
0x2891   : > { %7076 = vmatprep.subr.bf16.mxu0 %v9154_v54 }
0x2892   : > { %6806 = vmatprep.mubr.bf16.mxu1 %v6671_v41 }
0x2893   : > { %6807 = vmatmul.mubr.bf16.vlgmr.msra.gmra.mrb[48].mxu1 %v6670_v18 }
0x2894   : > { %7147 = vmatprep.mubr.bf16.mxu1 %v9420_v31  ;;  %7116 = vmatpush1.bf16.msra.mxu1 %v9143_v26 }
0x2895   : > { %7117 = vmatprep.subr.bf16.mxu1 %v9151_v27  ;;  %7077 = vmatpush1.bf16.msra.mxu0 %v9152_v43 }
0x2896   : > { %7078 = vmatprep.subr.bf16.mxu0 %v9160_v13 }
0x2899   : > { %7079 = vmatpush1.bf16.msra.mxu0 %v9158_v9 }
0x289a   : > { %7080 = vmatprep.subr.bf16.mxu0 %v9166_v19 }
0x289d   : > { %7081 = vmatpush1.bf16.msra.mxu0 %v9164_v61 }
0x289e   : > { %7082 = vmatprep.subr.bf16.mxu0 %v9172_v0 }
0x28a1   : > { %7083 = vmatpush1.bf16.msra.mxu0 %v9170_v17 }
0x28a2   : > { %7084 = vmatprep.subr.bf16.mxu0 %v9178_v25 }
0x28a5   : > { %7085 = vmatpush1.bf16.msra.mxu0 %v9176_v29 }
0x28a6   : > { %7086 = vmatprep.subr.bf16.mxu0 %v9184_v32 }
0x28a9   : > { %7087 = vmatpush1.bf16.msra.mxu0 %v9182_v15 }
0x2966   : > { %v8180_v42 = vpop.f32.mrb[48].mxu1 }
0x2967   : > { %v8181_v57 = vpop.f32.mrb[49].mxu1 }
0x2968   : > { %v8182_v36 = vadd.f32 %v8181_v57, %v8180_v42  ;;  %v8183_v45 = vpop.f32.mrb[50].mxu1  ;;  %v7897_v42 = vld [vmem:[%s10630_s3] ss:$0 sm:$0xff]  ;;  %s955_s3 = scalar_lea.vmem %s10632_s16, %s7937_s26  ;;  %s961_s26 = scalar_lea.vmem %s9579_s4, %s10634_s10 }
0x2969   : > { %v8184_v46 = vpop.f32.mrb[51].mxu1  ;;  %v10548_v19 = vld [vmem:[%s955_s3] sm:$0xff] }
0x296a   : > { %v6809_v60 = vadd.f32 %v8182_v36, %v7880_v4  ;;  %v8185_v47 = vadd.f32 %v8184_v46, %v8183_v45  ;;  %v7898_v46 = vld [vmem:[%s10631_s15] ss:$0 sm:$0xff]  ;;  %vm7245_vm1 = vcmp.ne.s32.totalorder %v10548_v19, 4294967196  ;;  %s958_s15 = scalar_lea.vmem %s9574_s27, %s10634_s10 }
0x296c   : > { %v6812_v33 = vadd.f32 %v8185_v47, %v7880_v4  ;;  %v6815_v51 = vadd.f32 %v6809_v60, %v10431_v3  ;;  %v9149_v3 = vld [vmem:[%s9564_s17 + $0x28] ss:$16 sps:$4 sm:$0xff]  }
0x296d   : > { %7118 = vmatpush1.bf16.msra.mxu1 %v9149_v3 }
0x296e   : > { %6819 = vadd.xlane.f32.xlu0 %v6815_v51  ;;  %v6816_v31 = vadd.f32 %v6812_v33, %v10434_v39  ;;  %7119 = vmatprep.subr.bf16.mxu1 %v9157_v63 }
0x2970   : > { %6821 = vadd.xlane.f32.xlu1 %v6816_v31 }
0x2971   : > { %7120 = vmatpush1.bf16.msra.mxu1 %v9155_v11 }
0x2972   : > { %7121 = vmatprep.subr.bf16.mxu1 %v9163_v14 }
0x2975   : > { %7122 = vmatpush1.bf16.msra.mxu1 %v9161_v52  ;;  %v10545_v52 = vld [vmem:[%s955_s3 + $0x8] sm:$0xff] }
0x2976   : > { %7123 = vmatprep.subr.bf16.mxu1 %v9169_v6  ;;  %vm7246_vm2 = vcmp.ne.s32.totalorder %v10545_v52, 4294967196 }
0x2979   : > { %7124 = vmatpush1.bf16.msra.mxu1 %v9167_v50 }
0x297a   : > { %7125 = vmatprep.subr.bf16.mxu1 %v9175_v21 }
0x297d   : > { %7126 = vmatpush1.bf16.msra.mxu1 %v9173_v23 }
0x297e   : > { %7127 = vmatprep.subr.bf16.mxu1 %v9181_v49 }
0x2981   : > { %7128 = vmatpush1.bf16.msra.mxu1 %v9179_v30 }
0x2982   : > { %7129 = vmatprep.subr.bf16.mxu1 %v9187_v44 }
0x2985   : > { %7130 = vmatpush1.bf16.msra.mxu1 %v9185_v2 }
0x29fb   : > { %v6820_v39 = vpop.xlane.xlu0 %6819 }
0x29fc   : > { %v6823_v62 = vmul.f32 0.0078125, %v6820_v39 }
0x29fd   : > { %v6822_v8 = vpop.xlane.xlu1 %6821 }
0x29fe   : > { %v10490_v12 = vsub.f32 %v6815_v51, %v6823_v62  ;;  %v6824_v16 = vmul.f32 0.0078125, %v6822_v8 }
0x2a00   : > { %v10492_v28 = vsub.f32 %v6816_v31, %v6824_v16  ;;  %v6827_v7 = vmul.f32 %v10490_v12, %v10490_v12  ;;  %v6890_v31 = vld [vmem:[%s9569_s13] sm:$0xf] }
0x2a01   : > { %v6895_v53 = vrot.slane %v6890_v31, %v9655_v56  ;;  %v6903_v26 = vrot.slane %v6890_v31, %v9659_v58  ;;  %v6899_v1 = vrot.slane %v6890_v31, %v9662_v59  ;;  %v6907_v20 = vrot.slane %v6890_v31, %v6906_v34 }
0x2a02   : > { %6829 = vadd.xlane.f32.xlu0 %v6827_v7  ;;  %v6828_v10 = vmul.f32 %v10492_v28, %v10492_v28  ;;  %v7212_v34 = vadd.s32 384, %v9690_v24 }
0x2a04   : > { %6831 = vadd.xlane.f32.xlu1 %v6828_v10 }
0x2a8f   : > { %v6830_v38 = vpop.xlane.xlu0 %6829 }
0x2a90   : > { %v6833_v48 = vmul.f32 0.0078125, %v6830_v38 }
0x2a91   : > { %v6832_v35 = vpop.xlane.xlu1 %6831 }
0x2a92   : > { %v6835_v37 = vadd.f32 1e-05, %v6833_v48  ;;  %v6834_v40 = vmul.f32 0.0078125, %v6832_v35 }
0x2a94   : > { %9357 = vrsqrt.f32 %v6835_v37  ;;  %v6836_v18 = vadd.f32 1e-05, %v6834_v40  ;;  %v7210_v37 = vadd.s32 128, %v9690_v24 }
0x2a96   : > { %9359 = vrsqrt.f32 %v6836_v18 }
0x2a9e   : > { %v9358_v41 = vpop.eup %9357 }
0x2a9f   : > { %v6839_v4 = vmul.f32 %v9358_v41, %v10490_v12 }
0x2aa0   : > { %v9360_v57 = vpop.eup %9359 }
0x2aa1   : > { %v6840_v36 = vmul.f32 %v9360_v57, %v10492_v28  ;;  %v6847_v45 = vmul.f32 %v7897_v42, %v6839_v4  ;;  %v7211_v57 = vadd.s32 256, %v9690_v24 }
0x2aa3   : > { %v6848_v60 = vmul.f32 %v7897_v42, %v6840_v36  ;;  %v6855_v47 = vadd.f32 %v7898_v46, %v6847_v45 }
0x2aa5   : > { %v6856_v33 = vadd.f32 %v7898_v46, %v6848_v60 }
0x2aa7   : > { %v6857_v51 = vpack.c.bf16 %v6856_v33, %v6855_v47 }
0x2aa9   : > { %7105 = vmatmul.mubr.bf16.vlgmr.msra.gmra.mrb[80].mxu0 %v6857_v51  ;;  %7148 = vmatmul.mubr.bf16.vlgmr.msra.gmra.mrb[52].mxu1 %v6857_v51 }
0x2b7c   : > { %v7106_v27 = vpop.f32.mrb[80].mxu0  ;;  %v7149_v22 = vpop.f32.mrb[52].mxu1 }
0x2b7d   : > { %v7107_v3 = vadd.f32 %v7106_v27, %v6895_v53  ;;  %v10531_v39 = vadd.f32 %v7149_v22, %v6903_v26  ;;  %v7108_v62 = vpop.f32.mrb[81].mxu0  ;;  %v7151_v8 = vpop.f32.mrb[53].mxu1 }
0x2b7e   : > { %v7109_v12 = vadd.f32 %v7108_v62, %v6899_v1  ;;  %v10533_v16 = vadd.f32 %v7151_v8, %v6907_v20  ;;  %v7110_v28 = vpop.f32.mrb[82].mxu0  ;;  %v7153_v55 = vpop.f32.mrb[54].mxu1 }
0x2b7f   : > { %v7160_v56 = vmax.f32 %v7107_v3, %v10531_v39  ;;  %v7111_v58 = vadd.f32 %v7110_v28, %v6895_v53  ;;  %v10536_v7 = vadd.f32 %v7153_v55, %v6903_v26  ;;  %v7112_v59 = vpop.f32.mrb[83].mxu0  ;;  %v7155_v10 = vpop.f32.mrb[55].mxu1 }
0x2b80   : > { %v7161_v54 = vmax.f32 %v7109_v12, %v10533_v16  ;;  %v7113_v63 = vadd.f32 %v7112_v59, %v6899_v1  ;;  %v10539_v43 = vadd.f32 %v7155_v10, %v6907_v20 }
0x2b81   : > { %v7165_v11 = vmax.f32 %v7111_v58, %v10536_v7 }
0x2b82   : > { %v7166_v13 = vmax.f32 %v7113_v63, %v10539_v43  ;;  %v7162_v14 = vmax.f32 %v7160_v56, %v7161_v54 }
0x2b84   : > { %7163 = vmax.xlane.f32.xlu0 %v7162_v14  ;;  %v7167_v9 = vmax.f32 %v7165_v11, %v7166_v13 }
0x2b86   : > { %7168 = vmax.xlane.f32.xlu1 %v7167_v9 }
0x2b97   : > { %7217 = vperm.xlu1 %8899, %v10545_v52  }
0x2b9a   : > { %7214 = vperm.xlu0 %8898, %v10548_v19  }
0x2c11   : > { %v10551_v6 = vpop.xlane.xlu0 %7163 }
0x2c12   : > { %v7170_v61 = vsub.f32 %v7107_v3, %v10551_v6  ;;  %v7171_v50 = vsub.f32 %v7109_v12, %v10551_v6  ;;  %v7172_v0 = vsub.f32 %v10531_v39, %v10551_v6  ;;  %v7173_v21 = vsub.f32 %v10533_v16, %v10551_v6 }
0x2c13   : > { %v10559_v17 = vpop.xlane.xlu1 %7168 }
0x2c14   : > { %v7178_v23 = vmul.f32 1.442695, %v7170_v61  ;;  %v7180_v25 = vmul.f32 1.442695, %v7171_v50  ;;  %v7182_v49 = vmul.f32 1.442695, %v7172_v0  ;;  %v7174_v29 = vsub.f32 %v7111_v58, %v10559_v17 }
0x2c15   : > { %v7184_v30 = vmul.f32 1.442695, %v7173_v21  ;;  %v7175_v32 = vsub.f32 %v7113_v63, %v10559_v17  ;;  %v7176_v44 = vsub.f32 %v10536_v7, %v10559_v17  ;;  %v7177_v2 = vsub.f32 %v10539_v43, %v10559_v17 }
0x2c16   : > { %9361 = vpow2.f32 %v7178_v23  ;;  %v7186_v15 = vmul.f32 1.442695, %v7174_v29  ;;  %v7932_v50 = vsel %vm7246_vm2, 1.0, %v9419_v5 }
0x2c17   : > { %9363 = vpow2.f32 %v7180_v25  ;;  %v7188_v38 = vmul.f32 1.442695, %v7175_v32  ;;  %v7190_v48 = vmul.f32 1.442695, %v7176_v44  ;;  %v7192_v40 = vmul.f32 1.442695, %v7177_v2  ;;  %v7218_v18 = vpop.permute.xlu1 %7217 }
0x2c18   : > { %9365 = vpow2.f32 %v7182_v49  ;;  %vm7223_vm11 = vcmp.eq.s32.totalorder %v9690_v24, %v7218_v18  ;;  %vm7224_vm12 = vcmp.eq.s32.totalorder %v7210_v37, %v7218_v18  ;;  %vm7225_vm14 = vcmp.eq.s32.totalorder %v7211_v57, %v7218_v18 }
0x2c19   : > { %9367 = vpow2.f32 %v7184_v30  ;;  %v7215_v35 = vpop.permute.xlu0 %7214  ;;  %v7231_v45 = vsel %vm7223_vm11, %v7111_v58, 0.0  ;;  %v7232_v60 = vsel %vm7224_vm12, %v7113_v63, 0.0  ;;  %v7233_v28 = vsel %vm7225_vm14, %v10536_v7, 0.0 }
0x2c1a   : > { %9369 = vpow2.f32 %v7186_v15  ;;  %vm7219_vm9 = vcmp.eq.s32.totalorder %v9690_v24, %v7215_v35  ;;  %vm7220_vm10 = vcmp.eq.s32.totalorder %v7210_v37, %v7215_v35  ;;  %vm7221_vm13 = vcmp.eq.s32.totalorder %v7211_v57, %v7215_v35 }
0x2c1b   : > { %9371 = vpow2.f32 %v7188_v38  ;;  %v7227_v41 = vsel %vm7219_vm9, %v7107_v3, 0.0  ;;  %v7228_v42 = vsel %vm7220_vm10, %v7109_v12, 0.0  ;;  %v7240_v1 = vadd.f32 %v7232_v60, %v7231_v45 }
0x2c1c   : > { %9373 = vpow2.f32 %v7190_v48  ;;  %v7235_v47 = vadd.f32 %v7228_v42, %v7227_v41  ;;  %v7229_v20 = vsel %vm7221_vm13, %v10531_v39, 0.0  ;;  %vm7222_vm15 = vcmp.eq.s32.totalorder %v7212_v34, %v7215_v35 }
0x2c1d   : > { %9375 = vpow2.f32 %v7192_v40  ;;  %v7230_v55 = vsel %vm7222_vm15, %v10533_v16, 0.0  ;;  %vm7226_vm0 = vcmp.eq.s32.totalorder %v7212_v34, %v7218_v18  ;;  %v7241_v58 = vadd.f32 %v7240_v1, %v7233_v28 }
0x2c1e   : > { %v7236_v3 = vadd.f32 %v7235_v47, %v7229_v20  ;;  %v7234_v39 = vsel %vm7226_vm0, %v10539_v43, 0.0  ;;  %v7931_v43 = vsel %vm7245_vm1, 1.0, %v9419_v5  ;;  %v7272_v29 = vsel %vm7255_vm3, %v7932_v50, 0.0 }
0x2c1f   : > { %v7242_v59 = vadd.f32 %v7241_v58, %v7234_v39  ;;  %v7271_v49 = vsel %vm7255_vm3, %v7931_v43, 0.0 }
0x2c20   : > { %v9362_v4 = vpop.eup %9361  ;;  %v7237_v56 = vadd.f32 %v7236_v3, %v7230_v55  ;;  %v7273_v32 = vadd.f32 %v7272_v29, %v7271_v49 }
0x2c21   : > { %v9364_v36 = vpop.eup %9363 }
0x2c22   : > { %v9366_v46 = vpop.eup %9365  ;;  %v7194_v33 = vadd.f32 %v9364_v36, %v9362_v4 }
0x2c23   : > { %v9368_v51 = vpop.eup %9367 }
0x2c24   : > { %v9370_v31 = vpop.eup %9369  ;;  %v7195_v53 = vadd.f32 %v9366_v46, %v7194_v33 }
0x2c25   : > { %v9372_v26 = vpop.eup %9371 }
0x2c26   : > { %v7196_v27 = vadd.f32 %v9368_v51, %v7195_v53  ;;  %v7199_v22 = vadd.f32 %v9372_v26, %v9370_v31  ;;  %v9374_v62 = vpop.eup %9373 }
0x2c27   : > { %v9376_v12 = vpop.eup %9375 }
0x2c28   : > { %7197 = vadd.xlane.f32.xlu1 %v7196_v27  ;;  %v7200_v8 = vadd.f32 %v9374_v62, %v7199_v22 }
0x2c2a   : > { %v7201_v24 = vadd.f32 %v9376_v12, %v7200_v8 }
0x2c2c   : > { %7202 = vadd.xlane.f32.xlu0 %v7201_v24  ;;  %7238 = vadd.xlane.f32.xlu1 %v7237_v56 }
0x2c30   : > { %7243 = vadd.xlane.f32.xlu1 %v7242_v59 }
0x2cb5   : > { %v7198_v10 = vpop.xlane.xlu1 %7197 }
0x2cb6   : > { %9377 = vlog2.f32 %v7198_v10 }
0x2cb9   : > { %v7203_v54 = vpop.xlane.xlu0 %7202  ;;  %v7239_v13 = vpop.xlane.xlu1 %7238 }
0x2cba   : > { %9379 = vlog2.f32 %v7203_v54 }
0x2cbd   : > { %v7244_v0 = vpop.xlane.xlu1 %7243 }
0x2cc0   : > { %v9378_v63 = vpop.eup %9377 }
0x2cc1   : > { %v7205_v11 = vmul.f32 0.6931472, %v9378_v63 }
0x2cc3   : > { %v7208_v7 = vadd.f32 %v7205_v11, %v10551_v6 }
0x2cc4   : > { %v9380_v16 = vpop.eup %9379 }
0x2cc5   : > { %v7207_v14 = vmul.f32 0.6931472, %v9380_v16  ;;  %v7251_v9 = vsub.f32 %v7208_v7, %v7239_v13 }
0x2cc7   : > { %v7209_v61 = vadd.f32 %v7207_v14, %v10559_v17  ;;  %v7253_v21 = vmul.f32 %v7931_v43, %v7251_v9 }
0x2cc9   : > { %v7252_v23 = vsub.f32 %v7209_v61, %v7244_v0  ;;  %v7256_v6 = vsel %vm7255_vm3, %v7253_v21, 0.0 }
0x2ccb   : > { %v7254_v25 = vmul.f32 %v7932_v50, %v7252_v23 }
0x2ccd   : > { %v7257_v19 = vsel %vm7255_vm3, %v7254_v25, 0.0 }
0x2cce   : > { %v7258_v30 = vadd.f32 %v7257_v19, %v7256_v6 }
0x2cd0   : > { %7259 = vadd.xlane.f32.xlu1 %v7258_v30 }
0x2cd4   : > { %7274 = vadd.xlane.f32.xlu1 %v7273_v32 }
0x2d5d   : > { %v7260_v52 = vpop.xlane.xlu1 %7259 }
0x2d5e   : > { %v7261_v44 = vrot.slane %v7260_v52, 4 }
0x2d60   : > { %v7262_v17 = vadd.f32 %v7261_v44, %v7260_v52 }
0x2d61   : > { %v7275_v15 = vpop.xlane.xlu1 %7274 }
0x2d62   : > { %v7263_v5 = vrot.slane %v7262_v17, 2  ;;  %v7276_v2 = vrot.slane %v7275_v15, 4 }
0x2d64   : > { %v7277_v38 = vadd.f32 %v7276_v2, %v7275_v15  ;;  %v7264_v48 = vadd.f32 %v7263_v5, %v7262_v17 }
0x2d66   : > { %v7278_v35 = vrot.slane %v7277_v38, 2  ;;  %v7265_v37 = vrot.slane %v7264_v48, 1 }
0x2d68   : > { %v7279_v40 = vadd.f32 %v7278_v35, %v7277_v38  ;;  %v7266_v18 = vadd.f32 %v7265_v37, %v7264_v48 }
0x2d6a   : > { %8730 = vpush %v7266_v18  ;;  %v7280_v41 = vrot.slane %v7279_v40, 1 }
0x2d6c   : > { %v7281_v42 = vadd.f32 %v7280_v41, %v7279_v40 }
0x2d6e   : > { %8732 = vpush %v7281_v42 }
0x2d9b   : > { %s8731_s16 = spop %8730 }
0x2d9c   : > { %v7268_v4 = vstv %s8731_s16 }
0x2d9d   : > { %7270 = vst.msk [vmem:[%s958_s15] sm:$0x1] %vm7269_vm4, %v7268_v4 }
0x2d9f   : > { %s8733_s3 = spop %8732 }
0x2da0   : > { %v7283_v57 = vstv %s8733_s3 }
0x2da1   : > { %7284 = vst.msk [vmem:[%s961_s26] sm:$0x1] %vm7269_vm4, %v7283_v57 }
0x2da2 PF: > { %s70_s7 = sadd.s32 1, %s9388_s7  }
0x2da3   : > { %p67_p4 = scmp.ge.s32.totalorder %s70_s7, 4  }
0x2da5   :  { %69 = sbr.rel (!%p67_p4) target bundleno = 50 (0x32), region = 232 }

</bundles_post_ra>
